<compile_context>
chip_gen: v6e
topology: v6e:2x2x1
jax: 0.10.0
libtpu: 0.0.40
codegen_flags: <defaults>
</compile_context>

<pallas_src>
import jax
import jax.numpy as jnp
from jax.experimental import pallas as pl
from jax.experimental.pallas import tpu as pltpu


def _round_up(x: int, m: int) -> int:
    return (x + m - 1) // m * m


def _generator_kernel(x_ref,
                      w1_ref, b1_ref,
                      w2_ref, b2_ref,
                      w3_ref, b3_ref,
                      w4_ref, b4_ref,
                      o_ref):
    """Fused 4-layer MLP forward for one batch tile.

    Weights are bf16 MXU operands with f32 accumulation; bias add,
    leaky_relu and tanh are computed in f32.
    """
    slope = jnp.float32(0.2)

    def leaky_relu(h):
        return jnp.where(h >= 0, h, slope * h)

    x = x_ref[...].astype(jnp.bfloat16)
    h = jnp.dot(x, w1_ref[...], preferred_element_type=jnp.float32) + b1_ref[...]
    h = leaky_relu(h)

    h = jnp.dot(h.astype(jnp.bfloat16), w2_ref[...],
                preferred_element_type=jnp.float32) + b2_ref[...]
    h = leaky_relu(h)

    h = jnp.dot(h.astype(jnp.bfloat16), w3_ref[...],
                preferred_element_type=jnp.float32) + b3_ref[...]
    h = leaky_relu(h)

    h = jnp.dot(h.astype(jnp.bfloat16), w4_ref[...],
                preferred_element_type=jnp.float32) + b4_ref[...]
    o_ref[...] = jnp.tanh(h).astype(o_ref.dtype)


def generator_forward(x, params, *, batch_tile=256):
    """x: [B, g_input_dim] float32.

    params: dict of (w, b) per layer with w already transposed to [in, out]
    (any float dtype; cast to bf16 here) and b shaped [1, out].
    """
    (w1, b1), (w2, b2), (w3, b3), (w4, b4) = (
        params["fc1"], params["fc2"], params["fc3"], params["fc4"])

    B, in_dim = x.shape
    out_dim = w4.shape[1]

    # ---- lane-dense padding of the first matmul's K and the output N ------
    in_pad = _round_up(in_dim, 128)
    out_pad = _round_up(out_dim, 128)

    bf16 = jnp.bfloat16
    w1p = jnp.pad(w1.astype(bf16), ((0, in_pad - in_dim), (0, 0)))
    w2p = w2.astype(bf16)
    w3p = w3.astype(bf16)
    w4p = jnp.pad(w4.astype(bf16), ((0, 0), (0, out_pad - out_dim)))
    b1p = b1.astype(jnp.float32)
    b2p = b2.astype(jnp.float32)
    b3p = b3.astype(jnp.float32)
    b4p = jnp.pad(b4.astype(jnp.float32), ((0, 0), (0, out_pad - out_dim)))

    # ---- batch tiling: pad instead of asserting divisibility --------------
    b_rounded = _round_up(B, 8)
    n_tiles = pl.cdiv(b_rounded, batch_tile)
    if n_tiles == 1 and b_rounded >= 256:
        # Big enough batch but only one tile -> split in two so v7x's
        # 2 TensorCores both get work (harmless on v5e/v6e).
        n_tiles = 2
    tile = _round_up(pl.cdiv(b_rounded, n_tiles), 8)
    B_pad = tile * n_tiles

    xp = jnp.pad(x.astype(jnp.float32), ((0, B_pad - B), (0, in_pad - in_dim)))

    def build(weight_pipeline_mode):
        def const_spec(shape):
            # Whole array in VMEM, same block every grid step.
            kwargs = {}
            if weight_pipeline_mode is not None:
                kwargs["pipeline_mode"] = weight_pipeline_mode
            return pl.BlockSpec(shape, lambda i: (0,) * len(shape), **kwargs)

        return pl.pallas_call(
            _generator_kernel,
            out_shape=jax.ShapeDtypeStruct((B_pad, out_pad), jnp.float32),
            grid_spec=pltpu.PrefetchScalarGridSpec(
                num_scalar_prefetch=0,
                grid=(B_pad // tile,),
                in_specs=[
                    pl.BlockSpec((tile, in_pad), lambda i: (i, 0)),
                    const_spec(w1p.shape), const_spec(b1p.shape),
                    const_spec(w2p.shape), const_spec(b2p.shape),
                    const_spec(w3p.shape), const_spec(b3p.shape),
                    const_spec(w4p.shape), const_spec(b4p.shape),
                ],
                out_specs=pl.BlockSpec((tile, out_pad), lambda i: (i, 0)),
            ),
            compiler_params=pltpu.CompilerParams(
                dimension_semantics=("parallel",),
                # Explicit scoped-VMEM budget; keeps headroom on v7x (64 MiB).
                vmem_limit_bytes=48 << 20,
            ),
        )

    args = (xp, w1p, b1p, w2p, b2p, w3p, b3p, w4p, b4p)
    try:
        # Constant-index weight/bias blocks never change between grid steps,
        # so a single buffer suffices and frees VMEM for bigger batch tiles.
        out = build(pl.Buffered(1))(*args)
    except Exception:  # fallback: default (double) buffering still correct
        out = build(None)(*args)

    return out[:B, :out_dim]


def init_generator_params(key, g_input_dim, g_output_dim):
    """nn.Linear-style init: U(-1/sqrt(fan_in), 1/sqrt(fan_in)).
    Weights stored as [in, out] (transposed vs. PyTorch's [out, in])."""
    dims = [(g_input_dim, 256), (256, 512), (512, 1024), (1024, g_output_dim)]
    names = ["fc1", "fc2", "fc3", "fc4"]
    params = {}
    for name, (fan_in, fan_out) in zip(names, dims):
        key, kw, kb = jax.random.split(key, 3)
        bound = 1.0 / jnp.sqrt(jnp.float32(fan_in))
        w = jax.random.uniform(kw, (fan_in, fan_out), jnp.float32, -bound, bound)
        b = jax.random.uniform(kb, (1, fan_out), jnp.float32, -bound, bound)
        params[name] = (w, b)
    return params


def generator_reference(x, params):
    """Pure-JAX reference, matching the kernel's bf16-operand / f32-acc dots."""
    def lrelu(h):
        return jnp.where(h >= 0, h, 0.2 * h)

    def mm(a, w):
        return jnp.dot(a.astype(jnp.bfloat16), w.astype(jnp.bfloat16),
                       preferred_element_type=jnp.float32)

    (w1, b1), (w2, b2), (w3, b3), (w4, b4) = (
        params["fc1"], params["fc2"], params["fc3"], params["fc4"])
    h = lrelu(mm(x, w1) + b1)
    h = lrelu(mm(h, w2) + b2)
    h = lrelu(mm(h, w3) + b3)
    return jnp.tanh(mm(h, w4) + b4)


if __name__ == "__main__":
    # Module-consistent small shapes: MNIST-GAN dims (latent 100 -> 784),
    # batch 16. 784 is deliberately NOT a multiple of 128 to exercise the
    # lane-dense padding path; 16 exercises the batch padding/tiling path.
    g_input_dim = 100
    g_output_dim = 784
    batch = 16

    key = jax.random.PRNGKey(0)
    key, kx = jax.random.split(key)
    x = jax.random.normal(kx, (batch, g_input_dim), dtype=jnp.float32)

    params = init_generator_params(key, g_input_dim, g_output_dim)

    out = generator_forward(x, params)
    out = jax.block_until_ready(out)

    ref = generator_reference(x, params)
    assert out.shape == (batch, g_output_dim)
    assert bool(jnp.all(jnp.isfinite(out)))
    max_err = float(jnp.max(jnp.abs(out - ref)))
    assert jnp.allclose(out, ref, atol=2e-2, rtol=2e-2), f"mismatch: {max_err}"

    print("KERNEL_OK")
</pallas_src>

<mosaic_0001>
module attributes {stable_mosaic.version = 11 : i64} {
  func.func @_generator_kernel(%arg0: i32, %arg1: memref<16x128xf32, #tpu.memory_space<vmem>>, %arg2: memref<128x256xbf16, #tpu.memory_space<vmem>>, %arg3: memref<1x256xf32, #tpu.memory_space<vmem>>, %arg4: memref<256x512xbf16, #tpu.memory_space<vmem>>, %arg5: memref<1x512xf32, #tpu.memory_space<vmem>>, %arg6: memref<512x1024xbf16, #tpu.memory_space<vmem>>, %arg7: memref<1x1024xf32, #tpu.memory_space<vmem>>, %arg8: memref<1024x896xbf16, #tpu.memory_space<vmem>>, %arg9: memref<1x896xf32, #tpu.memory_space<vmem>>, %arg10: memref<16x896xf32, #tpu.memory_space<vmem>>) attributes {dimension_semantics = [#tpu.dimension_semantics<parallel>], iteration_bounds = array<i64: 1>, scalar_prefetch = 0 : i64, scratch_operands = 0 : i64, tpu.core_type = #tpu.core_type<tc>, window_params = [{transform_indices = @transform_0, window_bounds = array<i64: 16, 128>}, {pipeline_mode = #tpu.pipeline_mode<synchronous>, transform_indices = @transform_1, window_bounds = array<i64: 128, 256>}, {pipeline_mode = #tpu.pipeline_mode<synchronous>, transform_indices = @transform_2, window_bounds = array<i64: 1, 256>}, {pipeline_mode = #tpu.pipeline_mode<synchronous>, transform_indices = @transform_3, window_bounds = array<i64: 256, 512>}, {pipeline_mode = #tpu.pipeline_mode<synchronous>, transform_indices = @transform_4, window_bounds = array<i64: 1, 512>}, {pipeline_mode = #tpu.pipeline_mode<synchronous>, transform_indices = @transform_5, window_bounds = array<i64: 512, 1024>}, {pipeline_mode = #tpu.pipeline_mode<synchronous>, transform_indices = @transform_6, window_bounds = array<i64: 1, 1024>}, {pipeline_mode = #tpu.pipeline_mode<synchronous>, transform_indices = @transform_7, window_bounds = array<i64: 1024, 896>}, {pipeline_mode = #tpu.pipeline_mode<synchronous>, transform_indices = @transform_8, window_bounds = array<i64: 1, 896>}, {transform_indices = @transform_9, window_bounds = array<i64: 16, 896>}]} {
    %c0 = arith.constant 0 : index
    %c0_0 = arith.constant 0 : index
    %0 = vector.load %arg1[%c0, %c0_0] : memref<16x128xf32, #tpu.memory_space<vmem>>, vector<16x128xf32>
    %1 = arith.truncf %0 : vector<16x128xf32> to vector<16x128xbf16>
    %c0_1 = arith.constant 0 : index
    %c0_2 = arith.constant 0 : index
    %2 = vector.load %arg2[%c0_1, %c0_2] : memref<128x256xbf16, #tpu.memory_space<vmem>>, vector<128x256xbf16>
    %cst = arith.constant dense<0.000000e+00> : vector<16x256xf32>
    %3 = tpu.matmul %1, %2, %cst {dimension_numbers = #tpu.dot_dimension_numbers<[1], [0], [0], [1], [0, 0, 1, 1], [], []>} : vector<16x128xbf16>, vector<128x256xbf16>, vector<16x256xf32> -> vector<16x256xf32>
    %c0_3 = arith.constant 0 : index
    %c0_4 = arith.constant 0 : index
    %4 = vector.load %arg3[%c0_3, %c0_4] : memref<1x256xf32, #tpu.memory_space<vmem>>, vector<1x256xf32>
    %5 = vector.broadcast %4 : vector<1x256xf32> to vector<16x256xf32>
    %6 = arith.addf %3, %5 : vector<16x256xf32>
    %cst_5 = arith.constant 0.000000e+00 : f32
    %7 = vector.broadcast %cst_5 : f32 to vector<16x256xf32>
    %8 = arith.cmpf oge, %6, %7 : vector<16x256xf32>
    %cst_6 = arith.constant 2.000000e-01 : f32
    %9 = vector.broadcast %cst_6 : f32 to vector<16x256xf32>
    %10 = arith.mulf %9, %6 : vector<16x256xf32>
    %11 = arith.select %8, %6, %10 : vector<16x256xi1>, vector<16x256xf32>
    %12 = arith.truncf %11 : vector<16x256xf32> to vector<16x256xbf16>
    %c0_7 = arith.constant 0 : index
    %c0_8 = arith.constant 0 : index
    %13 = vector.load %arg4[%c0_7, %c0_8] : memref<256x512xbf16, #tpu.memory_space<vmem>>, vector<256x512xbf16>
    %cst_9 = arith.constant dense<0.000000e+00> : vector<16x512xf32>
    %14 = tpu.matmul %12, %13, %cst_9 {dimension_numbers = #tpu.dot_dimension_numbers<[1], [0], [0], [1], [0, 0, 1, 1], [], []>} : vector<16x256xbf16>, vector<256x512xbf16>, vector<16x512xf32> -> vector<16x512xf32>
    %c0_10 = arith.constant 0 : index
    %c0_11 = arith.constant 0 : index
    %15 = vector.load %arg5[%c0_10, %c0_11] : memref<1x512xf32, #tpu.memory_space<vmem>>, vector<1x512xf32>
    %16 = vector.broadcast %15 : vector<1x512xf32> to vector<16x512xf32>
    %17 = arith.addf %14, %16 : vector<16x512xf32>
    %cst_12 = arith.constant 0.000000e+00 : f32
    %18 = vector.broadcast %cst_12 : f32 to vector<16x512xf32>
    %19 = arith.cmpf oge, %17, %18 : vector<16x512xf32>
    %cst_13 = arith.constant 2.000000e-01 : f32
    %20 = vector.broadcast %cst_13 : f32 to vector<16x512xf32>
    %21 = arith.mulf %20, %17 : vector<16x512xf32>
    %22 = arith.select %19, %17, %21 : vector<16x512xi1>, vector<16x512xf32>
    %23 = arith.truncf %22 : vector<16x512xf32> to vector<16x512xbf16>
    %c0_14 = arith.constant 0 : index
    %c0_15 = arith.constant 0 : index
    %24 = vector.load %arg6[%c0_14, %c0_15] : memref<512x1024xbf16, #tpu.memory_space<vmem>>, vector<512x1024xbf16>
    %cst_16 = arith.constant dense<0.000000e+00> : vector<16x1024xf32>
    %25 = tpu.matmul %23, %24, %cst_16 {dimension_numbers = #tpu.dot_dimension_numbers<[1], [0], [0], [1], [0, 0, 1, 1], [], []>} : vector<16x512xbf16>, vector<512x1024xbf16>, vector<16x1024xf32> -> vector<16x1024xf32>
    %c0_17 = arith.constant 0 : index
    %c0_18 = arith.constant 0 : index
    %26 = vector.load %arg7[%c0_17, %c0_18] : memref<1x1024xf32, #tpu.memory_space<vmem>>, vector<1x1024xf32>
    %27 = vector.broadcast %26 : vector<1x1024xf32> to vector<16x1024xf32>
    %28 = arith.addf %25, %27 : vector<16x1024xf32>
    %cst_19 = arith.constant 0.000000e+00 : f32
    %29 = vector.broadcast %cst_19 : f32 to vector<16x1024xf32>
    %30 = arith.cmpf oge, %28, %29 : vector<16x1024xf32>
    %cst_20 = arith.constant 2.000000e-01 : f32
    %31 = vector.broadcast %cst_20 : f32 to vector<16x1024xf32>
    %32 = arith.mulf %31, %28 : vector<16x1024xf32>
    %33 = arith.select %30, %28, %32 : vector<16x1024xi1>, vector<16x1024xf32>
    %34 = arith.truncf %33 : vector<16x1024xf32> to vector<16x1024xbf16>
    %c0_21 = arith.constant 0 : index
    %c0_22 = arith.constant 0 : index
    %35 = vector.load %arg8[%c0_21, %c0_22] : memref<1024x896xbf16, #tpu.memory_space<vmem>>, vector<1024x896xbf16>
    %cst_23 = arith.constant dense<0.000000e+00> : vector<16x896xf32>
    %36 = tpu.matmul %34, %35, %cst_23 {dimension_numbers = #tpu.dot_dimension_numbers<[1], [0], [0], [1], [0, 0, 1, 1], [], []>} : vector<16x1024xbf16>, vector<1024x896xbf16>, vector<16x896xf32> -> vector<16x896xf32>
    %c0_24 = arith.constant 0 : index
    %c0_25 = arith.constant 0 : index
    %37 = vector.load %arg9[%c0_24, %c0_25] : memref<1x896xf32, #tpu.memory_space<vmem>>, vector<1x896xf32>
    %38 = vector.broadcast %37 : vector<1x896xf32> to vector<16x896xf32>
    %39 = arith.addf %36, %38 : vector<16x896xf32>
    %40 = math.tanh %39 : vector<16x896xf32>
    %c0_26 = arith.constant 0 : index
    %c0_27 = arith.constant 0 : index
    %41 = vector.load %arg10[%c0_26, %c0_27] : memref<16x896xf32, #tpu.memory_space<vmem>>, vector<16x896xf32>
    tpu.vector_store %arg10[%c0_26, %c0_27], %40 {strides = array<i32>} : memref<16x896xf32, #tpu.memory_space<vmem>>, vector<16x896xf32>,
    return
  }
  func.func @transform_0(%arg0: i32) -> (i32, i32) {
    %c0_i32 = arith.constant 0 : i32
    %c0_i32_0 = arith.constant 0 : i32
    return %arg0, %c0_i32 : i32, i32
  }
  func.func @transform_1(%arg0: i32) -> (i32, i32) {
    %c0_i32 = arith.constant 0 : i32
    %c0_i32_0 = arith.constant 0 : i32
    %c0_i32_1 = arith.constant 0 : i32
    return %c0_i32, %c0_i32_0 : i32, i32
  }
  func.func @transform_2(%arg0: i32) -> (i32, i32) {
    %c0_i32 = arith.constant 0 : i32
    %c0_i32_0 = arith.constant 0 : i32
    %c0_i32_1 = arith.constant 0 : i32
    return %c0_i32, %c0_i32_0 : i32, i32
  }
  func.func @transform_3(%arg0: i32) -> (i32, i32) {
    %c0_i32 = arith.constant 0 : i32
    %c0_i32_0 = arith.constant 0 : i32
    %c0_i32_1 = arith.constant 0 : i32
    return %c0_i32, %c0_i32_0 : i32, i32
  }
  func.func @transform_4(%arg0: i32) -> (i32, i32) {
    %c0_i32 = arith.constant 0 : i32
    %c0_i32_0 = arith.constant 0 : i32
    %c0_i32_1 = arith.constant 0 : i32
    return %c0_i32, %c0_i32_0 : i32, i32
  }
  func.func @transform_5(%arg0: i32) -> (i32, i32) {
    %c0_i32 = arith.constant 0 : i32
    %c0_i32_0 = arith.constant 0 : i32
    %c0_i32_1 = arith.constant 0 : i32
    return %c0_i32, %c0_i32_0 : i32, i32
  }
  func.func @transform_6(%arg0: i32) -> (i32, i32) {
    %c0_i32 = arith.constant 0 : i32
    %c0_i32_0 = arith.constant 0 : i32
    %c0_i32_1 = arith.constant 0 : i32
    return %c0_i32, %c0_i32_0 : i32, i32
  }
  func.func @transform_7(%arg0: i32) -> (i32, i32) {
    %c0_i32 = arith.constant 0 : i32
    %c0_i32_0 = arith.constant 0 : i32
    %c0_i32_1 = arith.constant 0 : i32
    return %c0_i32, %c0_i32_0 : i32, i32
  }
  func.func @transform_8(%arg0: i32) -> (i32, i32) {
    %c0_i32 = arith.constant 0 : i32
    %c0_i32_0 = arith.constant 0 : i32
    %c0_i32_1 = arith.constant 0 : i32
    return %c0_i32, %c0_i32_0 : i32, i32
  }
  func.func @transform_9(%arg0: i32) -> (i32, i32) {
    %c0_i32 = arith.constant 0 : i32
    %c0_i32_0 = arith.constant 0 : i32
    return %arg0, %c0_i32 : i32, i32
  }
}

module attributes {stable_mosaic.version = 11 : i64} {
  func.func @_generator_kernel(%arg0: i32, %arg1: memref<16x128xf32, #tpu.memory_space<vmem>>, %arg2: memref<128x256xbf16, #tpu.memory_space<vmem>>, %arg3: memref<1x256xf32, #tpu.memory_space<vmem>>, %arg4: memref<256x512xbf16, #tpu.memory_space<vmem>>, %arg5: memref<1x512xf32, #tpu.memory_space<vmem>>, %arg6: memref<512x1024xbf16, #tpu.memory_space<vmem>>, %arg7: memref<1x1024xf32, #tpu.memory_space<vmem>>, %arg8: memref<1024x896xbf16, #tpu.memory_space<vmem>>, %arg9: memref<1x896xf32, #tpu.memory_space<vmem>>, %arg10: memref<16x896xf32, #tpu.memory_space<vmem>>) attributes {dimension_semantics = [#tpu.dimension_semantics<parallel>], iteration_bounds = array<i64: 1>, scalar_prefetch = 0 : i64, scratch_operands = 0 : i64, tpu.core_type = #tpu.core_type<tc>, window_params = [{transform_indices = @transform_0, window_bounds = array<i64: 16, 128>}, {pipeline_mode = #tpu.pipeline_mode<synchronous>, transform_indices = @transform_1, window_bounds = array<i64: 128, 256>}, {pipeline_mode = #tpu.pipeline_mode<synchronous>, transform_indices = @transform_2, window_bounds = array<i64: 1, 256>}, {pipeline_mode = #tpu.pipeline_mode<synchronous>, transform_indices = @transform_3, window_bounds = array<i64: 256, 512>}, {pipeline_mode = #tpu.pipeline_mode<synchronous>, transform_indices = @transform_4, window_bounds = array<i64: 1, 512>}, {pipeline_mode = #tpu.pipeline_mode<synchronous>, transform_indices = @transform_5, window_bounds = array<i64: 512, 1024>}, {pipeline_mode = #tpu.pipeline_mode<synchronous>, transform_indices = @transform_6, window_bounds = array<i64: 1, 1024>}, {pipeline_mode = #tpu.pipeline_mode<synchronous>, transform_indices = @transform_7, window_bounds = array<i64: 1024, 896>}, {pipeline_mode = #tpu.pipeline_mode<synchronous>, transform_indices = @transform_8, window_bounds = array<i64: 1, 896>}, {transform_indices = @transform_9, window_bounds = array<i64: 16, 896>}]} {
    %c0 = arith.constant 0 : index
    %c0_0 = arith.constant 0 : index
    %0 = vector.load %arg1[%c0, %c0_0] : memref<16x128xf32, #tpu.memory_space<vmem>>, vector<16x128xf32>
    %1 = arith.truncf %0 : vector<16x128xf32> to vector<16x128xbf16>
    %c0_1 = arith.constant 0 : index
    %c0_2 = arith.constant 0 : index
    %2 = vector.load %arg2[%c0_1, %c0_2] : memref<128x256xbf16, #tpu.memory_space<vmem>>, vector<128x256xbf16>
    %cst = arith.constant dense<0.000000e+00> : vector<16x256xf32>
    %3 = tpu.matmul %1, %2, %cst {dimension_numbers = #tpu.dot_dimension_numbers<[1], [0], [0], [1], [0, 0, 1, 1], [], []>} : vector<16x128xbf16>, vector<128x256xbf16>, vector<16x256xf32> -> vector<16x256xf32>
    %c0_3 = arith.constant 0 : index
    %c0_4 = arith.constant 0 : index
    %4 = vector.load %arg3[%c0_3, %c0_4] : memref<1x256xf32, #tpu.memory_space<vmem>>, vector<1x256xf32>
    %5 = vector.broadcast %4 : vector<1x256xf32> to vector<16x256xf32>
    %6 = arith.addf %3, %5 : vector<16x256xf32>
    %cst_5 = arith.constant 0.000000e+00 : f32
    %7 = vector.broadcast %cst_5 : f32 to vector<16x256xf32>
    %8 = arith.cmpf oge, %6, %7 : vector<16x256xf32>
    %cst_6 = arith.constant 2.000000e-01 : f32
    %9 = vector.broadcast %cst_6 : f32 to vector<16x256xf32>
    %10 = arith.mulf %9, %6 : vector<16x256xf32>
    %11 = arith.select %8, %6, %10 : vector<16x256xi1>, vector<16x256xf32>
    %12 = arith.truncf %11 : vector<16x256xf32> to vector<16x256xbf16>
    %c0_7 = arith.constant 0 : index
    %c0_8 = arith.constant 0 : index
    %13 = vector.load %arg4[%c0_7, %c0_8] : memref<256x512xbf16, #tpu.memory_space<vmem>>, vector<256x512xbf16>
    %cst_9 = arith.constant dense<0.000000e+00> : vector<16x512xf32>
    %14 = tpu.matmul %12, %13, %cst_9 {dimension_numbers = #tpu.dot_dimension_numbers<[1], [0], [0], [1], [0, 0, 1, 1], [], []>} : vector<16x256xbf16>, vector<256x512xbf16>, vector<16x512xf32> -> vector<16x512xf32>
    %c0_10 = arith.constant 0 : index
    %c0_11 = arith.constant 0 : index
    %15 = vector.load %arg5[%c0_10, %c0_11] : memref<1x512xf32, #tpu.memory_space<vmem>>, vector<1x512xf32>
    %16 = vector.broadcast %15 : vector<1x512xf32> to vector<16x512xf32>
    %17 = arith.addf %14, %16 : vector<16x512xf32>
    %cst_12 = arith.constant 0.000000e+00 : f32
    %18 = vector.broadcast %cst_12 : f32 to vector<16x512xf32>
    %19 = arith.cmpf oge, %17, %18 : vector<16x512xf32>
    %cst_13 = arith.constant 2.000000e-01 : f32
    %20 = vector.broadcast %cst_13 : f32 to vector<16x512xf32>
    %21 = arith.mulf %20, %17 : vector<16x512xf32>
    %22 = arith.select %19, %17, %21 : vector<16x512xi1>, vector<16x512xf32>
    %23 = arith.truncf %22 : vector<16x512xf32> to vector<16x512xbf16>
    %c0_14 = arith.constant 0 : index
    %c0_15 = arith.constant 0 : index
    %24 = vector.load %arg6[%c0_14, %c0_15] : memref<512x1024xbf16, #tpu.memory_space<vmem>>, vector<512x1024xbf16>
    %cst_16 = arith.constant dense<0.000000e+00> : vector<16x1024xf32>
    %25 = tpu.matmul %23, %24, %cst_16 {dimension_numbers = #tpu.dot_dimension_numbers<[1], [0], [0], [1], [0, 0, 1, 1], [], []>} : vector<16x512xbf16>, vector<512x1024xbf16>, vector<16x1024xf32> -> vector<16x1024xf32>
    %c0_17 = arith.constant 0 : index
    %c0_18 = arith.constant 0 : index
    %26 = vector.load %arg7[%c0_17, %c0_18] : memref<1x1024xf32, #tpu.memory_space<vmem>>, vector<1x1024xf32>
    %27 = vector.broadcast %26 : vector<1x1024xf32> to vector<16x1024xf32>
    %28 = arith.addf %25, %27 : vector<16x1024xf32>
    %cst_19 = arith.constant 0.000000e+00 : f32
    %29 = vector.broadcast %cst_19 : f32 to vector<16x1024xf32>
    %30 = arith.cmpf oge, %28, %29 : vector<16x1024xf32>
    %cst_20 = arith.constant 2.000000e-01 : f32
    %31 = vector.broadcast %cst_20 : f32 to vector<16x1024xf32>
    %32 = arith.mulf %31, %28 : vector<16x1024xf32>
    %33 = arith.select %30, %28, %32 : vector<16x1024xi1>, vector<16x1024xf32>
    %34 = arith.truncf %33 : vector<16x1024xf32> to vector<16x1024xbf16>
    %c0_21 = arith.constant 0 : index
    %c0_22 = arith.constant 0 : index
    %35 = vector.load %arg8[%c0_21, %c0_22] : memref<1024x896xbf16, #tpu.memory_space<vmem>>, vector<1024x896xbf16>
    %cst_23 = arith.constant dense<0.000000e+00> : vector<16x896xf32>
    %36 = tpu.matmul %34, %35, %cst_23 {dimension_numbers = #tpu.dot_dimension_numbers<[1], [0], [0], [1], [0, 0, 1, 1], [], []>} : vector<16x1024xbf16>, vector<1024x896xbf16>, vector<16x896xf32> -> vector<16x896xf32>
    %c0_24 = arith.constant 0 : index
    %c0_25 = arith.constant 0 : index
    %37 = vector.load %arg9[%c0_24, %c0_25] : memref<1x896xf32, #tpu.memory_space<vmem>>, vector<1x896xf32>
    %38 = vector.broadcast %37 : vector<1x896xf32> to vector<16x896xf32>
    %39 = arith.addf %36, %38 : vector<16x896xf32>
    %40 = math.tanh %39 : vector<16x896xf32>
    %c0_26 = arith.constant 0 : index
    %c0_27 = arith.constant 0 : index
    %41 = vector.load %arg10[%c0_26, %c0_27] : memref<16x896xf32, #tpu.memory_space<vmem>>, vector<16x896xf32>
    tpu.vector_store %arg10[%c0_26, %c0_27], %40 {strides = array<i32>} : memref<16x896xf32, #tpu.memory_space<vmem>>, vector<16x896xf32>,
    return
  }
  func.func @transform_0(%arg0: i32) -> (i32, i32) {
    %c0_i32 = arith.constant 0 : i32
    %c0_i32_0 = arith.constant 0 : i32
    return %arg0, %c0_i32 : i32, i32
  }
  func.func @transform_1(%arg0: i32) -> (i32, i32) {
    %c0_i32 = arith.constant 0 : i32
    %c0_i32_0 = arith.constant 0 : i32
    %c0_i32_1 = arith.constant 0 : i32
    return %c0_i32, %c0_i32_0 : i32, i32
  }
  func.func @transform_2(%arg0: i32) -> (i32, i32) {
    %c0_i32 = arith.constant 0 : i32
    %c0_i32_0 = arith.constant 0 : i32
    %c0_i32_1 = arith.constant 0 : i32
    return %c0_i32, %c0_i32_0 : i32, i32
  }
  func.func @transform_3(%arg0: i32) -> (i32, i32) {
    %c0_i32 = arith.constant 0 : i32
    %c0_i32_0 = arith.constant 0 : i32
    %c0_i32_1 = arith.constant 0 : i32
    return %c0_i32, %c0_i32_0 : i32, i32
  }
  func.func @transform_4(%arg0: i32) -> (i32, i32) {
    %c0_i32 = arith.constant 0 : i32
    %c0_i32_0 = arith.constant 0 : i32
    %c0_i32_1 = arith.constant 0 : i32
    return %c0_i32, %c0_i32_0 : i32, i32
  }
  func.func @transform_5(%arg0: i32) -> (i32, i32) {
    %c0_i32 = arith.constant 0 : i32
    %c0_i32_0 = arith.constant 0 : i32
    %c0_i32_1 = arith.constant 0 : i32
    return %c0_i32, %c0_i32_0 : i32, i32
  }
  func.func @transform_6(%arg0: i32) -> (i32, i32) {
    %c0_i32 = arith.constant 0 : i32
    %c0_i32_0 = arith.constant 0 : i32
    %c0_i32_1 = arith.constant 0 : i32
    return %c0_i32, %c0_i32_0 : i32, i32
  }
  func.func @transform_7(%arg0: i32) -> (i32, i32) {
    %c0_i32 = arith.constant 0 : i32
    %c0_i32_0 = arith.constant 0 : i32
    %c0_i32_1 = arith.constant 0 : i32
    return %c0_i32, %c0_i32_0 : i32, i32
  }
  func.func @transform_8(%arg0: i32) -> (i32, i32) {
    %c0_i32 = arith.constant 0 : i32
    %c0_i32_0 = arith.constant 0 : i32
    %c0_i32_1 = arith.constant 0 : i32
    return %c0_i32, %c0_i32_0 : i32, i32
  }
  func.func @transform_9(%arg0: i32) -> (i32, i32) {
    %c0_i32 = arith.constant 0 : i32
    %c0_i32_0 = arith.constant 0 : i32
    return %arg0, %c0_i32 : i32, i32
  }
}

</mosaic_0001>

<bundles_post_ra>
// kernel: tpu_custom_call.1
= control target key start
LH: loop header
LB: loop body
LE: loop exit
PB: predicated region body
PF: predicated region fallthrough
CT: control target
= control target key end

     0   :  { %14 = vsyncpa [#allocation3], 0  ;;  %s8566_s0 = inlined_call_operand.hbm [shape: f32[16,128], index: 0, kind: input, shape index: {}]   ;;  %s8567_s1 = inlined_call_operand.hbm [shape: bf16[128,256], index: 1, kind: input, shape index: {}]   ;;  %s8568_s2 = inlined_call_operand.hbm [shape: f32[1,256], index: 2, kind: input, shape index: {}]   ;;  %s8569_s3 = inlined_call_operand.hbm [shape: bf16[256,512], index: 3, kind: input, shape index: {}]   ;;  %s8570_s4 = inlined_call_operand.hbm [shape: f32[1,512], index: 4, kind: input, shape index: {}]   ;;  %s8571_s5 = inlined_call_operand.hbm [shape: bf16[512,1024], index: 5, kind: input, shape index: {}]   ;;  %s8572_s6 = inlined_call_operand.hbm [shape: f32[1,1024], index: 6, kind: input, shape index: {}]   ;;  %s8573_s7 = inlined_call_operand.hbm [shape: bf16[1024,896], index: 7, kind: input, shape index: {}]   ;;  %s8574_s8 = inlined_call_operand.hbm [shape: f32[1,896], index: 8, kind: input, shape index: {}]   ;;  %s8575_s9 = inlined_call_operand.hbm [shape: f32[16,896], index: 9, kind: output, shape index: {}]  }
   0x1   :  { %15 = vsyncpa [#allocation6], 0 }
   0x2   :  { %16 = vsyncpa [#allocation9], 0 }
   0x3   :  { %17 = vsyncpa [#allocation12], 0 }
   0x4   :  { %18 = vsyncpa [#allocation15], 0 }
   0x5   :  { %19 = vsyncpa [#allocation4], 0  ;;  %s8289_s30 = smov [#allocation5]   ;;  %s8290_s11 = smov [#allocation8]  }
   0x6   :  { %s37_s10 = sshll.u32 %s8289_s30, 4  ;;  %s59_s12 = sshll.u32 %s8290_s11, 4  ;;  %s38_s10 = int_to_ptr.vmem [resolvable:$true] %s37_s10  ;;  %s60_s12 = int_to_ptr.vmem [resolvable:$true] %s59_s12 }
   0x7   :  { %s8085_s13 = scalar_lea.vmem %s38_s10, 2048  ;;  %p8090_p1 = scmp.lt.s32.totalorder %s38_s10, %s38_s10 }
   0x8   :  { %p8086_p0 = scmp.ne.s32.totalorder %s38_s10, %s8085_s13  ;;  %p8091_p2 = scmp.lt.s32.totalorder %s8085_s13, %s8085_s13 }
   0xa   :  { %p8092_p3 = por %p8091_p2, %p8090_p1 }
   0xc   :  { %p8093_p4 = pnand %p8092_p3, %p8086_p0 }
   0xe   :  { %8096 = shalt.err (!%p8093_p4)
}
   0xf   :  { %s8291_s14 = smov 128   ;;  %s8292_s15 = smov 8  }
  0x10   :  { %43 = dma.hbm_to_vmem [thread:$0]  %s8567_s1, 2048, %s38_s10, [#allocation6], %s8291_s14, %s8291_s14, %s8292_s15  }
  0x11   :  { %s8105_s18 = scalar_lea.vmem %s60_s12, 8192  ;;  %p8110_p6 = scmp.lt.s32.totalorder %s60_s12, %s60_s12 }
  0x12   :  { %p8106_p5 = scmp.ne.s32.totalorder %s60_s12, %s8105_s18  ;;  %p8111_p7 = scmp.lt.s32.totalorder %s8105_s18, %s8105_s18 }
  0x14   :  { %p8112_p8 = por %p8111_p7, %p8110_p6 }
  0x16   :  { %p8113_p9 = pnand %p8112_p8, %p8106_p5 }
  0x18   :  { %8116 = shalt.err (!%p8113_p9)
}
  0x19   :  { %s8293_s19 = smov 256   ;;  %s8294_s20 = smov 16  }
  0x1a   :  { %65 = dma.hbm_to_vmem [thread:$0]  %s8569_s3, 8192, %s60_s12, [#allocation9], %s8293_s19, %s8293_s19, %s8294_s20  }
  0x1b   :  { %s8295_s23 = smov [#allocation11]  }
  0x1c   :  { %s81_s24 = sshll.u32 %s8295_s23, 4  ;;  %s82_s24 = int_to_ptr.vmem [resolvable:$true] %s81_s24 }
  0x1d   :  { %s8125_s25 = scalar_lea.vmem %s82_s24, 32768  ;;  %p8130_p11 = scmp.lt.s32.totalorder %s82_s24, %s82_s24 }
  0x1e   :  { %p8126_p10 = scmp.ne.s32.totalorder %s82_s24, %s8125_s25  ;;  %p8131_p12 = scmp.lt.s32.totalorder %s8125_s25, %s8125_s25 }
  0x20   :  { %p8132_p13 = por %p8131_p12, %p8130_p11 }
  0x22   :  { %p8133_p0 = pnand %p8132_p13, %p8126_p10 }
  0x24   :  { %8136 = shalt.err (!%p8133_p0)
}
  0x25   :  { %s8296_s1 = smov 512   ;;  %s8297_s26 = smov 32  }
  0x26   :  { %87 = dma.hbm_to_vmem [thread:$0]  %s8571_s5, 32768, %s82_s24, [#allocation12], %s8296_s1, %s8296_s1, %s8297_s26  }
  0x27   :  { %s8298_s29 = smov [#allocation14]  }
  0x28   :  { %s103_s30 = sshll.u32 %s8298_s29, 4  ;;  %s104_s30 = int_to_ptr.vmem [resolvable:$true] %s103_s30 }
  0x29   :  { %s8145_s3 = scalar_lea.vmem %s104_s30, 57344  ;;  %p8150_p2 = scmp.lt.s32.totalorder %s104_s30, %s104_s30 }
  0x2a   :  { %p8146_p1 = scmp.ne.s32.totalorder %s104_s30, %s8145_s3  ;;  %p8151_p3 = scmp.lt.s32.totalorder %s8145_s3, %s8145_s3 }
  0x2c   :  { %p8152_p4 = por %p8151_p3, %p8150_p2 }
  0x2e   :  { %p8153_p5 = pnand %p8152_p4, %p8146_p1 }
  0x30   :  { %8156 = shalt.err (!%p8153_p5)
}
  0x31   :  { %s8299_s10 = smov 448   ;;  %s8300_s11 = smov 28  }
  0x32   :  { %109 = dma.hbm_to_vmem [thread:$0]  %s8573_s7, 57344, %s104_s30, [#allocation15], %s8299_s10, %s8299_s10, %s8300_s11  }
  0x33   :  { %s8301_s16 = smov [#allocation2]   ;;  %s8302_s18 = smov [#allocation7]  }
  0x34   :  { %s25_s17 = sshll.u32 %s8301_s16, 4  ;;  %s50_s5 = sshll.u32 %s8302_s18, 4  ;;  %s26_s17 = int_to_ptr.vmem [resolvable:$true] %s25_s17  ;;  %s51_s5 = int_to_ptr.vmem [resolvable:$true] %s50_s5 }
  0x35   :  { %s8165_s19 = scalar_lea.vmem %s26_s17, 256  ;;  %p8170_p7 = scmp.lt.s32.totalorder %s26_s17, %s26_s17 }
  0x36   :  { %p8166_p6 = scmp.ne.s32.totalorder %s26_s17, %s8165_s19  ;;  %p8171_p8 = scmp.lt.s32.totalorder %s8165_s19, %s8165_s19 }
  0x38   :  { %p8172_p9 = por %p8171_p8, %p8170_p7 }
  0x3a   :  { %p8173_p10 = pnand %p8172_p9, %p8166_p6 }
  0x3c   :  { %8176 = shalt.err (!%p8173_p10)
}
  0x3d   :  { %31 = dma.hbm_to_vmem [thread:$0]  %s8566_s0, 256, %s26_s17, [#allocation3], %s8291_s14, %s8291_s14, %s8292_s15  }
  0x3e   :  { %s8185_s7 = scalar_lea.vmem %s51_s5, 32  ;;  %p8190_p12 = scmp.lt.s32.totalorder %s51_s5, %s51_s5 }
  0x3f   :  { %p8186_p11 = scmp.ne.s32.totalorder %s51_s5, %s8185_s7  ;;  %p8191_p13 = scmp.lt.s32.totalorder %s8185_s7, %s8185_s7 }
  0x41   :  { %p8192_p0 = por %p8191_p13, %p8190_p12 }
  0x43   :  { %p8193_p1 = pnand %p8192_p0, %p8186_p11 }
  0x45   :  { %8196 = shalt.err (!%p8193_p1)
}
  0x46   :  { %53 = dma.hbm_to_vmem [thread:$0]  %s8568_s2, 32, %s51_s5, [#allocation6]  }
  0x47   :  { %s8303_s24 = smov [#allocation10]   ;;  %s8304_s1 = smov [#allocation13]  }
  0x48   :  { %s72_s25 = sshll.u32 %s8303_s24, 4  ;;  %s94_s26 = sshll.u32 %s8304_s1, 4  ;;  %s73_s25 = int_to_ptr.vmem [resolvable:$true] %s72_s25  ;;  %s95_s26 = int_to_ptr.vmem [resolvable:$true] %s94_s26 }
  0x49   :  { %s8205_s27 = scalar_lea.vmem %s73_s25, 64  ;;  %p8210_p3 = scmp.lt.s32.totalorder %s73_s25, %s73_s25 }
  0x4a   :  { %p8206_p2 = scmp.ne.s32.totalorder %s73_s25, %s8205_s27  ;;  %p8211_p4 = scmp.lt.s32.totalorder %s8205_s27, %s8205_s27 }
  0x4c   :  { %p8212_p5 = por %p8211_p4, %p8210_p3 }
  0x4e   :  { %p8213_p6 = pnand %p8212_p5, %p8206_p2 }
  0x50   :  { %8216 = shalt.err (!%p8213_p6)
}
  0x51   :  { %75 = dma.hbm_to_vmem [thread:$0]  %s8570_s4, 64, %s73_s25, [#allocation9]  }
  0x52   :  { %s8225_s15 = scalar_lea.vmem %s95_s26, 128  ;;  %p8230_p8 = scmp.lt.s32.totalorder %s95_s26, %s95_s26 }
  0x53   :  { %p8226_p7 = scmp.ne.s32.totalorder %s95_s26, %s8225_s15  ;;  %p8231_p9 = scmp.lt.s32.totalorder %s8225_s15, %s8225_s15 }
  0x55   :  { %p8232_p10 = por %p8231_p9, %p8230_p8 }
  0x57   :  { %p8233_p11 = pnand %p8232_p10, %p8226_p7 }
  0x59   :  { %8236 = shalt.err (!%p8233_p11)
}
  0x5a   :  { %97 = dma.hbm_to_vmem [thread:$0]  %s8572_s6, 128, %s95_s26, [#allocation12]  }
  0x5b   :  { %s8305_s29 = smov [#allocation16]  }
  0x5c   :  { %s116_s30 = sshll.u32 %s8305_s29, 4  ;;  %s117_s30 = int_to_ptr.vmem [resolvable:$true] %s116_s30 }
  0x5d   :  { %s8245_s3 = scalar_lea.vmem %s117_s30, 112  ;;  %s8249_s10 = scalar_lea.vmem %s117_s30, 128 }
  0x5e   :  { %p8246_p12 = scmp.ne.s32.totalorder %s117_s30, %s8245_s3  ;;  %p8250_p13 = scmp.lt.s32.totalorder %s117_s30, %s117_s30 }
  0x5f   :  { %p8251_p0 = scmp.lt.s32.totalorder %s8249_s10, %s8245_s3 }
  0x61   :  { %p8252_p1 = por %p8251_p0, %p8250_p13 }
  0x63   :  { %p8253_p2 = pnand %p8252_p1, %p8246_p12 }
  0x65   :  { %8256 = shalt.err (!%p8253_p2)
}
  0x66   :  { %119 = dma.hbm_to_vmem [thread:$0]  %s8574_s8, 112, %s117_s30, [#allocation15]  }
  0x67   :  { %8277 = dma.done.wait [#allocation3], 256  }
  0x68   :  { %8278 = vsyncadd [#allocation3], 4294967040 }
  0x69   :  { %8279 = dma.done.wait [#allocation6], 2080  }
  0x6a   :  { %8280 = vsyncadd [#allocation6], 4294965216 }
  0x6b   :  { %8281 = dma.done.wait [#allocation9], 8256  }
  0x6c   :  { %8282 = vsyncadd [#allocation9], 4294959040 }
  0x6d   :  { %8283 = dma.done.wait [#allocation12], 32896  }
  0x6e   :  { %8284 = vsyncadd [#allocation12], 4294934400 }
  0x6f   :  { %8285 = dma.done.wait [#allocation15], 57456  }
  0x70   :  { %8286 = vsyncadd [#allocation15], 4294909840  ;;  %v8306_v0 = vmov 0   ;;  %v7289_v1 = vld [vmem:[#allocation5 + $0x74] ss:$8 sps:$4 sm:$0xff]   ;;  %s8307_s6 = smov [#allocation17]  }
  0x71   :  { %291 = vmatprep.mubr.bf16.mxu0 %v8306_v0  ;;  %v7291_v2 = vld [vmem:[#allocation5 + $0x70] ss:$8 sps:$4 sm:$0xff]   ;;  %259 = vmatprep.subr.bf16.mxu0 %v7289_v1  ;;  %v7292_v3 = vld [vmem:[#allocation5 + $0x64] ss:$8 sps:$4 sm:$0xff]   ;;  %v7294_v4 = vld [vmem:[#allocation5 + $0x60] ss:$8 sps:$4 sm:$0xff]  }
  0x72   :  { %260 = vmatpush1.bf16.msra.mxu0 %v7291_v2  ;;  %v7295_v5 = vld [vmem:[#allocation5 + $0x54] ss:$8 sps:$4 sm:$0xff]   ;;  %v7297_v6 = vld [vmem:[#allocation5 + $0x50] ss:$8 sps:$4 sm:$0xff]   ;;  %v7298_v7 = vld [vmem:[#allocation5 + $0x44] ss:$8 sps:$4 sm:$0xff]  }
  0x73   :  { %261 = vmatprep.subr.bf16.mxu0 %v7292_v3  ;;  %v7300_v8 = vld [vmem:[#allocation5 + $0x40] ss:$8 sps:$4 sm:$0xff]   ;;  %v7301_v9 = vld [vmem:[#allocation5 + $0x34] ss:$8 sps:$4 sm:$0xff]   ;;  %v7303_v13 = vld [vmem:[#allocation5 + $0x30] ss:$8 sps:$4 sm:$0xff]  }
  0x74   :  { %v7313_v10 = vld [vmem:[#allocation8 + $0xe4] ss:$16 sps:$4 sm:$0xff]   ;;  %v7318_v11 = vld [vmem:[#allocation8 + $0xe0] ss:$16 sps:$4 sm:$0xff]   ;;  %v7317_v28 = vld [vmem:[#allocation8 + $0xec] ss:$16 sps:$4 sm:$0xff]  }
  0x75   :  { %722 = vmatprep.subr.bf16.mxu1 %v7313_v10  ;;  %v7319_v12 = vld [vmem:[#allocation8 + $0xc4] ss:$16 sps:$4 sm:$0xff]   ;;  %v7324_v15 = vld [vmem:[#allocation8 + $0xc0] ss:$16 sps:$4 sm:$0xff]   ;;  %v7315_v32 = vld [vmem:[#allocation8 + $0xe8] ss:$16 sps:$4 sm:$0xff]  }
  0x76   :  { %262 = vmatpush1.bf16.msra.mxu0 %v7294_v4  ;;  %723 = vmatpush1.bf16.msra.mxu1 %v7318_v11  ;;  %v7304_v14 = vld [vmem:[#allocation5 + $0x24] ss:$8 sps:$4 sm:$0xff]   ;;  %v7306_v17 = vld [vmem:[#allocation5 + $0x20] ss:$8 sps:$4 sm:$0xff]   ;;  %v7307_v18 = vld [vmem:[#allocation5 + $0x14] ss:$8 sps:$4 sm:$0xff]  }
  0x77   :  { %263 = vmatprep.subr.bf16.mxu0 %v7295_v5  ;;  %724 = vmatprep.subr.bf16.mxu1 %v7319_v12  ;;  %v7325_v16 = vld [vmem:[#allocation8 + $0xa4] ss:$16 sps:$4 sm:$0xff]   ;;  %v7330_v19 = vld [vmem:[#allocation8 + $0xa0] ss:$16 sps:$4 sm:$0xff]   ;;  %v7323_v34 = vld [vmem:[#allocation8 + $0xcc] ss:$16 sps:$4 sm:$0xff]  }
  0x78   :  { %v7331_v20 = vld [vmem:[#allocation8 + $0x84] ss:$16 sps:$4 sm:$0xff]   ;;  %v7336_v22 = vld [vmem:[#allocation8 + $0x80] ss:$16 sps:$4 sm:$0xff]   ;;  %v7321_v36 = vld [vmem:[#allocation8 + $0xc8] ss:$16 sps:$4 sm:$0xff]  }
  0x79   :  { %v7309_v21 = vld [vmem:[#allocation5 + $0x10] ss:$8 sps:$4 sm:$0xff]   ;;  %v7310_v23 = vld [vmem:[#allocation5 + $0x4] ss:$8 sps:$4 sm:$0xff]   ;;  %v7312_v25 = vld [vmem:[#allocation5] ss:$8 sps:$4 sm:$0xff]  }
  0x7a   :  { %264 = vmatpush1.bf16.msra.mxu0 %v7297_v6  ;;  %725 = vmatpush1.bf16.msra.mxu1 %v7324_v15  ;;  %v7337_v24 = vld [vmem:[#allocation8 + $0x64] ss:$16 sps:$4 sm:$0xff]   ;;  %v7342_v29 = vld [vmem:[#allocation8 + $0x60] ss:$16 sps:$4 sm:$0xff]   ;;  %v7329_v37 = vld [vmem:[#allocation8 + $0xac] ss:$16 sps:$4 sm:$0xff]  }
  0x7b   :  { %265 = vmatprep.subr.bf16.mxu0 %v7298_v7  ;;  %726 = vmatprep.subr.bf16.mxu1 %v7325_v16  ;;  %v148_v26 = vld [vmem:[#allocation2] sm:$0xff]  ;;  %v149_v27 = vld [vmem:[#allocation2 + $0x8] sm:$0xff]  ;;  %s6380_s8 = sshll.u32 %s8307_s6, 4  ;;  %s6381_s8 = int_to_ptr.vmem [resolvable:$true] %s6380_s8 }
  0x7c   :  { %v7343_v30 = vld [vmem:[#allocation8 + $0x44] ss:$16 sps:$4 sm:$0xff]   ;;  %v150_v31 = vpack.c.bf16 %v149_v27, %v148_v26  ;;  %v7348_v33 = vld [vmem:[#allocation8 + $0x40] ss:$16 sps:$4 sm:$0xff]   ;;  %v7327_v40 = vld [vmem:[#allocation8 + $0xa8] ss:$16 sps:$4 sm:$0xff]   ;;  %p8262_p4 = scmp.lt.s32.totalorder %s6381_s8, %s6381_s8 }
  0x7d   :  { %v7349_v35 = vld [vmem:[#allocation8 + $0x24] ss:$16 sps:$4 sm:$0xff]   ;;  %v7354_v38 = vld [vmem:[#allocation8 + $0x20] ss:$16 sps:$4 sm:$0xff]   ;;  %v7335_v42 = vld [vmem:[#allocation8 + $0x8c] ss:$16 sps:$4 sm:$0xff]  }
  0x7e   :  { %266 = vmatpush1.bf16.msra.mxu0 %v7300_v8  ;;  %727 = vmatpush1.bf16.msra.mxu1 %v7330_v19  ;;  %v7355_v39 = vld [vmem:[#allocation8 + $0x4] ss:$16 sps:$4 sm:$0xff]   ;;  %v7360_v41 = vld [vmem:[#allocation8] ss:$16 sps:$4 sm:$0xff]   ;;  %v7333_v44 = vld [vmem:[#allocation8 + $0x88] ss:$16 sps:$4 sm:$0xff]  }
  0x7f   :  { %267 = vmatprep.subr.bf16.mxu0 %v7301_v9  ;;  %728 = vmatprep.subr.bf16.mxu1 %v7331_v20  ;;  %v7361_v43 = vld [vmem:[#allocation8 + $0x1e4] ss:$16 sps:$4 sm:$0xff]   ;;  %v7341_v45 = vld [vmem:[#allocation8 + $0x6c] ss:$16 sps:$4 sm:$0xff]   ;;  %v7366_v46 = vld [vmem:[#allocation8 + $0x1e0] ss:$16 sps:$4 sm:$0xff]  }
  0x80   :  { %v7367_v47 = vld [vmem:[#allocation8 + $0x1c4] ss:$16 sps:$4 sm:$0xff]   ;;  %v7339_v48 = vld [vmem:[#allocation8 + $0x68] ss:$16 sps:$4 sm:$0xff]   ;;  %v7372_v49 = vld [vmem:[#allocation8 + $0x1c0] ss:$16 sps:$4 sm:$0xff]  }
  0x81   :  { %v7347_v50 = vld [vmem:[#allocation8 + $0x4c] ss:$16 sps:$4 sm:$0xff]   ;;  %v7373_v51 = vld [vmem:[#allocation8 + $0x1a4] ss:$16 sps:$4 sm:$0xff]   ;;  %v7345_v52 = vld [vmem:[#allocation8 + $0x48] ss:$16 sps:$4 sm:$0xff]  }
  0x82   :  { %268 = vmatpush1.bf16.msra.mxu0 %v7303_v13  ;;  %729 = vmatpush1.bf16.msra.mxu1 %v7336_v22  ;;  %v7378_v53 = vld [vmem:[#allocation8 + $0x1a0] ss:$16 sps:$4 sm:$0xff]   ;;  %v7353_v54 = vld [vmem:[#allocation8 + $0x2c] ss:$16 sps:$4 sm:$0xff]   ;;  %v7379_v55 = vld [vmem:[#allocation8 + $0x184] ss:$16 sps:$4 sm:$0xff]  }
  0x83   :  { %269 = vmatprep.subr.bf16.mxu0 %v7304_v14  ;;  %730 = vmatprep.subr.bf16.mxu1 %v7337_v24  ;;  %v7351_v56 = vld [vmem:[#allocation8 + $0x28] ss:$16 sps:$4 sm:$0xff]   ;;  %v7384_v57 = vld [vmem:[#allocation8 + $0x180] ss:$16 sps:$4 sm:$0xff]   ;;  %v7359_v58 = vld [vmem:[#allocation8 + $0xc] ss:$16 sps:$4 sm:$0xff]  }
  0x84   :  { %v7385_v59 = vld [vmem:[#allocation8 + $0x164] ss:$16 sps:$4 sm:$0xff]   ;;  %v7357_v60 = vld [vmem:[#allocation8 + $0x8] ss:$16 sps:$4 sm:$0xff]   ;;  %v7365_v61 = vld [vmem:[#allocation8 + $0x1ec] ss:$16 sps:$4 sm:$0xff]  }
  0x85   :  { %v7363_v62 = vld [vmem:[#allocation8 + $0x1e8] ss:$16 sps:$4 sm:$0xff]   ;;  %v7371_v63 = vld [vmem:[#allocation8 + $0x1cc] ss:$16 sps:$4 sm:$0xff]   ;;  %v7390_v7 = vld [vmem:[#allocation8 + $0x160] ss:$16 sps:$4 sm:$0xff]  }
  0x86   :  { %270 = vmatpush1.bf16.msra.mxu0 %v7306_v17  ;;  %731 = vmatpush1.bf16.msra.mxu1 %v7342_v29  ;;  %v7369_v0 = vld [vmem:[#allocation8 + $0x1c8] ss:$16 sps:$4 sm:$0xff]   ;;  %v7377_v1 = vld [vmem:[#allocation8 + $0x1ac] ss:$16 sps:$4 sm:$0xff]   ;;  %v7391_v8 = vld [vmem:[#allocation8 + $0x144] ss:$16 sps:$4 sm:$0xff]  }
  0x87   :  { %271 = vmatprep.subr.bf16.mxu0 %v7307_v18  ;;  %732 = vmatprep.subr.bf16.mxu1 %v7343_v30  ;;  %v7375_v2 = vld [vmem:[#allocation8 + $0x1a8] ss:$16 sps:$4 sm:$0xff]   ;;  %v7383_v3 = vld [vmem:[#allocation8 + $0x18c] ss:$16 sps:$4 sm:$0xff]   ;;  %v7396_v11 = vld [vmem:[#allocation8 + $0x140] ss:$16 sps:$4 sm:$0xff]  }
  0x88   :  { %v7381_v4 = vld [vmem:[#allocation8 + $0x188] ss:$16 sps:$4 sm:$0xff]   ;;  %v7389_v5 = vld [vmem:[#allocation8 + $0x16c] ss:$16 sps:$4 sm:$0xff]   ;;  %v7397_v12 = vld [vmem:[#allocation8 + $0x124] ss:$16 sps:$4 sm:$0xff]  }
  0x89   :  { %v7387_v6 = vld [vmem:[#allocation8 + $0x168] ss:$16 sps:$4 sm:$0xff]   ;;  %v7395_v9 = vld [vmem:[#allocation8 + $0x14c] ss:$16 sps:$4 sm:$0xff]   ;;  %v7402_v15 = vld [vmem:[#allocation8 + $0x120] ss:$16 sps:$4 sm:$0xff]  }
  0x8a   :  { %272 = vmatpush1.bf16.msra.mxu0 %v7309_v21  ;;  %733 = vmatpush1.bf16.msra.mxu1 %v7348_v33  ;;  %v7393_v10 = vld [vmem:[#allocation8 + $0x148] ss:$16 sps:$4 sm:$0xff]   ;;  %v7401_v13 = vld [vmem:[#allocation8 + $0x12c] ss:$16 sps:$4 sm:$0xff]   ;;  %v7403_v16 = vld [vmem:[#allocation8 + $0x104] ss:$16 sps:$4 sm:$0xff]  }
  0x8b   :  { %273 = vmatprep.subr.bf16.mxu0 %v7310_v23  ;;  %734 = vmatprep.subr.bf16.mxu1 %v7349_v35  ;;  %v7399_v14 = vld [vmem:[#allocation8 + $0x128] ss:$16 sps:$4 sm:$0xff]   ;;  %v7407_v18 = vld [vmem:[#allocation8 + $0x10c] ss:$16 sps:$4 sm:$0xff]   ;;  %v7408_v19 = vld [vmem:[#allocation8 + $0x100] ss:$16 sps:$4 sm:$0xff]  }
  0x8c   :  { %v7405_v17 = vld [vmem:[#allocation8 + $0x108] ss:$16 sps:$4 sm:$0xff]   ;;  %v167_v30 = vld [vmem:[#allocation7] sm:$0x3]  ;;  %s8257_s12 = scalar_lea.vmem %s6381_s8, 1792 }
  0x8d   :  { %v892_v20 = vld [vmem:[#allocation11 + $0x1c0] sm:$0xff]  ;;  %p8258_p3 = scmp.ne.s32.totalorder %s6381_s8, %s8257_s12  ;;  %p8263_p5 = scmp.lt.s32.totalorder %s8257_s12, %s8257_s12 }
  0x8e   :  { %274 = vmatpush1.bf16.msra.mxu0 %v7312_v25  ;;  %735 = vmatpush1.bf16.msra.mxu1 %v7354_v38  ;;  %v896_v21 = vld [vmem:[#allocation11 + $0x1e0] sm:$0xff] }
  0x8f   :  { %765 = vmatprep.subr.bf16.mxu0 %v7317_v28  ;;  %736 = vmatprep.subr.bf16.mxu1 %v7355_v39  ;;  %v1020_v22 = vld [vmem:[#allocation11 + $0x5c0] sm:$0xff]  ;;  %v6532_v23 = vcombine.low %v892_v20, %v896_v21  ;;  %v6533_v24 = vcombine.high %v892_v20, %v896_v21  ;;  %v169_v28 = vlaneseq  ;;  %p8264_p6 = por %p8263_p5, %p8262_p4 }
  0x90   :  { %v1024_v25 = vld [vmem:[#allocation11 + $0x5e0] sm:$0xff] }
  0x91   :  { %292 = vmatmul.mubr.bf16.vlgmr.msra.gmra.mxu0 %v150_v31  ;;  %v6660_v26 = vcombine.low %v1020_v22, %v1024_v25  ;;  %v6661_v27 = vcombine.high %v1020_v22, %v1024_v25  ;;  %v8393_v29 = vshrl.u32 %v169_v28, 7  ;;  %v856_v20 = vld [vmem:[#allocation11 + $0xa0] sm:$0xff]  ;;  %p8265_p7 = pnand %p8264_p6, %p8258_p3 }
  0x92   :  { %766 = vmatpush1.bf16.msra.mxu0 %v7315_v32  ;;  %737 = vmatpush1.bf16.msra.mxu1 %v7360_v41  ;;  %v980_v21 = vld [vmem:[#allocation11 + $0x480] sm:$0xff] }
  0x93   :  { %767 = vmatprep.subr.bf16.mxu0 %v7323_v34  ;;  %738 = vmatprep.subr.bf16.mxu1 %v7361_v43  ;;  %v8396_v31 = vsub.s32 0, %v8393_v29  ;;  %v8399_v32 = vsub.s32 1, %v8393_v29  ;;  %v984_v22 = vld [vmem:[#allocation11 + $0x4a0] sm:$0xff] }
  0x94   :  { %v848_v28 = vld [vmem:[#allocation11 + $0x60] sm:$0xff] }
  0x95   :  { %v172_v33 = vrot.slane %v167_v30, %v8396_v31  ;;  %v176_v34 = vrot.slane %v167_v30, %v8399_v32  ;;  %v972_v30 = vld [vmem:[#allocation11 + $0x440] sm:$0xff] }
  0x96   :  { %768 = vmatpush1.bf16.msra.mxu0 %v7321_v36  ;;  %739 = vmatpush2.bf16.msra.mxu1 %v7366_v46  ;;  %v884_v46 = vld [vmem:[#allocation11 + $0x180] sm:$0xff] }
  0x97   :  { %769 = vmatprep.subr.bf16.mxu0 %v7329_v37  ;;  %740 = vmatprep.subr.bf16.mxu1 %v7367_v47  ;;  %v888_v47 = vld [vmem:[#allocation11 + $0x1a0] sm:$0xff] }
  0x9a   :  { %770 = vmatpush1.bf16.msra.mxu0 %v7327_v40  ;;  %741 = vmatpush2.bf16.msra.mxu1 %v7372_v49  ;;  %v1016_v49 = vld [vmem:[#allocation11 + $0x5a0] sm:$0xff] }
  0x9b   :  { %771 = vmatprep.subr.bf16.mxu0 %v7335_v42  ;;  %742 = vmatprep.subr.bf16.mxu1 %v7373_v51 }
  0x9e   :  { %772 = vmatpush1.bf16.msra.mxu0 %v7333_v44  ;;  %743 = vmatpush2.bf16.msra.mxu1 %v7378_v53 }
  0x9f   :  { %773 = vmatprep.subr.bf16.mxu0 %v7341_v45  ;;  %744 = vmatprep.subr.bf16.mxu1 %v7379_v55 }
  0xa2   :  { %774 = vmatpush1.bf16.msra.mxu0 %v7339_v48  ;;  %745 = vmatpush2.bf16.msra.mxu1 %v7384_v57  ;;  %v1012_v48 = vld [vmem:[#allocation11 + $0x580] sm:$0xff] }
  0xa3   :  { %775 = vmatprep.subr.bf16.mxu0 %v7347_v50  ;;  %746 = vmatprep.subr.bf16.mxu1 %v7385_v59  ;;  %v880_v57 = vld [vmem:[#allocation11 + $0x160] sm:$0xff] }
  0xa4   :  { %v1008_v59 = vld [vmem:[#allocation11 + $0x560] sm:$0xff] }
  0xa6   :  { %776 = vmatpush1.bf16.msra.mxu0 %v7345_v52  ;;  %747 = vmatpush2.bf16.msra.mxu1 %v7390_v7 }
  0xa7   :  { %777 = vmatprep.subr.bf16.mxu0 %v7353_v54  ;;  %748 = vmatprep.subr.bf16.mxu1 %v7391_v8 }
  0xaa   :  { %778 = vmatpush1.bf16.msra.mxu0 %v7351_v56  ;;  %749 = vmatpush2.bf16.msra.mxu1 %v7396_v11  ;;  %v876_v56 = vld [vmem:[#allocation11 + $0x140] sm:$0xff] }
  0xab   :  { %779 = vmatprep.subr.bf16.mxu0 %v7359_v58  ;;  %750 = vmatprep.subr.bf16.mxu1 %v7397_v12  ;;  %v1004_v58 = vld [vmem:[#allocation11 + $0x540] sm:$0xff]  ;;  %v6516_v7 = vcombine.low %v876_v56, %v880_v57 }
  0xac   :  { %v6644_v8 = vcombine.low %v1004_v58, %v1008_v59  ;;  %v860_v11 = vld [vmem:[#allocation11 + $0xc0] sm:$0xff] }
  0xad   :  { %v864_v12 = vld [vmem:[#allocation11 + $0xe0] sm:$0xff] }
  0xae   :  { %780 = vmatpush1.bf16.msra.mxu0 %v7357_v60  ;;  %751 = vmatpush2.bf16.msra.mxu1 %v7402_v15 }
  0xaf   :  { %781 = vmatprep.subr.bf16.mxu0 %v7365_v61  ;;  %752 = vmatprep.subr.bf16.mxu1 %v7403_v16  ;;  %v6525_v61 = vcombine.high %v884_v46, %v888_v47 }
  0xb2   :  { %782 = vmatpush2.bf16.msra.mxu0 %v7363_v62  ;;  %753 = vmatpush2.bf16.msra.mxu1 %v7408_v19  ;;  %v6653_v62 = vcombine.high %v1012_v48, %v1016_v49  ;;  %v852_v19 = vld [vmem:[#allocation11 + $0x80] sm:$0xff] }
  0xb3   :  { %783 = vmatprep.subr.bf16.mxu0 %v7371_v63  ;;  %2414 = vmatprep.subr.bf16.mxu1 %v6533_v24  ;;  %v6524_v63 = vcombine.low %v884_v46, %v888_v47  ;;  %v6493_v25 = vcombine.high %v852_v19, %v856_v20  ;;  %v956_v46 = vld [vmem:[#allocation11 + $0x3c0] sm:$0xff] }
  0xb4   :  { %v960_v47 = vld [vmem:[#allocation11 + $0x3e0] sm:$0xff] }
  0xb6   :  { %784 = vmatpush2.bf16.msra.mxu0 %v7369_v0  ;;  %v6652_v0 = vcombine.low %v1012_v48, %v1016_v49  ;;  %v1084_v48 = vld [vmem:[#allocation11 + $0x7c0] sm:$0xff] }
  0xb7   :  { %785 = vmatprep.subr.bf16.mxu0 %v7377_v1  ;;  %v868_v1 = vld [vmem:[#allocation11 + $0x100] sm:$0xff] }
  0xb8   :  { %v1088_v49 = vld [vmem:[#allocation11 + $0x7e0] sm:$0xff] }
  0xba   :  { %786 = vmatpush2.bf16.msra.mxu0 %v7375_v2  ;;  %v872_v2 = vld [vmem:[#allocation11 + $0x120] sm:$0xff] }
  0xbb   :  { %787 = vmatprep.subr.bf16.mxu0 %v7383_v3  ;;  %v996_v3 = vld [vmem:[#allocation11 + $0x500] sm:$0xff]  ;;  %v6508_v15 = vcombine.low %v868_v1, %v872_v2 }
  0xbe   :  { %788 = vmatpush2.bf16.msra.mxu0 %v7381_v4  ;;  %v1000_v4 = vld [vmem:[#allocation11 + $0x520] sm:$0xff] }
  0xbf   :  { %789 = vmatprep.subr.bf16.mxu0 %v7389_v5  ;;  %v6517_v5 = vcombine.high %v876_v56, %v880_v57  ;;  %v6636_v16 = vcombine.low %v996_v3, %v1000_v4  ;;  %v1076_v56 = vld [vmem:[#allocation11 + $0x780] sm:$0xff] }
  0xc0   :  { %v1080_v57 = vld [vmem:[#allocation11 + $0x7a0] sm:$0xff] }
  0xc2   :  { %790 = vmatpush2.bf16.msra.mxu0 %v7387_v6  ;;  %v6645_v6 = vcombine.high %v1004_v58, %v1008_v59  ;;  %v6596_v58 = vcombine.low %v956_v46, %v960_v47  ;;  %v6724_v59 = vcombine.low %v1084_v48, %v1088_v49 }
  0xc3   :  { %791 = vmatprep.subr.bf16.mxu0 %v7395_v9  ;;  %v6509_v9 = vcombine.high %v868_v1, %v872_v2  ;;  %v1072_v1 = vld [vmem:[#allocation11 + $0x760] sm:$0xff] }
  0xc6   :  { %792 = vmatpush2.bf16.msra.mxu0 %v7393_v10  ;;  %v6637_v10 = vcombine.high %v996_v3, %v1000_v4  ;;  %v6716_v3 = vcombine.low %v1076_v56, %v1080_v57 }
  0xc7   :  { %793 = vmatprep.subr.bf16.mxu0 %v7401_v13  ;;  %v988_v13 = vld [vmem:[#allocation11 + $0x4c0] sm:$0xff] }
  0xca   :  { %794 = vmatpush2.bf16.msra.mxu0 %v7399_v14  ;;  %v992_v14 = vld [vmem:[#allocation11 + $0x4e0] sm:$0xff] }
  0xcb   :  { %795 = vmatprep.subr.bf16.mxu0 %v7407_v18  ;;  %v6629_v18 = vcombine.high %v988_v13, %v992_v14  ;;  %v6628_v24 = vcombine.low %v988_v13, %v992_v14  ;;  %v924_v14 = vld [vmem:[#allocation11 + $0x2c0] sm:$0xff] }
  0xce   :  { %796 = vmatpush2.bf16.msra.mxu0 %v7405_v17  ;;  %v6501_v17 = vcombine.high %v860_v11, %v864_v12 }
  0xcf   :  { %2457 = vmatprep.subr.bf16.mxu0 %v6661_v27  ;;  %v844_v27 = vld [vmem:[#allocation11 + $0x40] sm:$0xff] }
 0x151   :  { %v293_v35 = vpop.f32.mrf.mxu0 }
 0x152   :  { %v294_v36 = vadd.f32 %v293_v35, %v172_v33  ;;  %v6620_v35 = vcombine.low %v980_v21, %v984_v22 }
 0x153   :  { %v295_v37 = vpop.f32.mrf.mxu0 }
 0x154   :  { %v296_v38 = vadd.f32 %v295_v37, %v176_v34  ;;  %v306_v40 = vmul.f32 0.2, %v294_v36  ;;  %vm302_vm2 = vcmp.ge.f32.partialorder %v294_v36, 0.0 }
 0x155   :  { %v297_v39 = vpop.f32.mrf.mxu0 }
 0x156   :  { %v307_v41 = vmul.f32 0.2, %v296_v38  ;;  %v298_v42 = vadd.f32 %v297_v39, %v172_v33  ;;  %vm303_vm1 = vcmp.ge.f32.partialorder %v296_v38, 0.0  ;;  %v310_v55 = vsel %vm302_vm2, %v294_v36, %v306_v40  ;;  %v976_v33 = vld [vmem:[#allocation11 + $0x460] sm:$0xff] }
 0x157   :  { %v299_v43 = vpop.f32.mrf.mxu0  ;;  %v6485_v36 = vcombine.high %v844_v27, %v848_v28  ;;  %v6613_v37 = vcombine.high %v972_v30, %v976_v33  ;;  %v840_v39 = vld [vmem:[#allocation11 + $0x20] sm:$0xff] }
 0x158   :  { %vm304_vm0 = vcmp.ge.f32.partialorder %v298_v42, 0.0  ;;  %v308_v44 = vmul.f32 0.2, %v298_v42  ;;  %v300_v45 = vadd.f32 %v299_v43, %v176_v34  ;;  %v311_v52 = vsel %vm303_vm1, %v296_v38, %v307_v41  ;;  %v836_v38 = vld [vmem:[#allocation11] sm:$0xff] }
 0x159   :  { %v6492_v34 = vcombine.low %v852_v19, %v856_v20  ;;  %v964_v40 = vld [vmem:[#allocation11 + $0x400] sm:$0xff]  ;;  %v6612_v43 = vcombine.low %v972_v30, %v976_v33 }
 0x15a   :  { %v309_v50 = vmul.f32 0.2, %v300_v45  ;;  %vm305_vm3 = vcmp.ge.f32.partialorder %v300_v45, 0.0  ;;  %v312_v51 = vsel %vm304_vm0, %v298_v42, %v308_v44  ;;  %v968_v41 = vld [vmem:[#allocation11 + $0x420] sm:$0xff]  ;;  %v6484_v42 = vcombine.low %v844_v27, %v848_v28 }
 0x15b   :  { %v314_v60 = vpack.c.bf16 %v312_v51, %v310_v55  ;;  %v6477_v44 = vcombine.high %v836_v38, %v840_v39  ;;  %v6604_v51 = vcombine.low %v964_v40, %v968_v41  ;;  %v952_v55 = vld [vmem:[#allocation11 + $0x3a0] sm:$0xff] }
 0x15c   :  { %v313_v53 = vsel %vm305_vm3, %v300_v45, %v309_v50  ;;  %v6605_v45 = vcombine.high %v964_v40, %v968_v41  ;;  %v6476_v50 = vcombine.low %v836_v38, %v840_v39  ;;  %v1048_v28 = vld [vmem:[#allocation11 + $0x6a0] sm:$0xff] }
 0x15d   :  { %v315_v54 = vpack.c.bf16 %v313_v53, %v311_v52  ;;  %v6597_v52 = vcombine.high %v956_v46, %v960_v47  ;;  %v6725_v53 = vcombine.high %v1084_v48, %v1088_v49  ;;  %v1040_v39 = vld [vmem:[#allocation11 + $0x660] sm:$0xff] }
 0x15e   :  { %v1032_v47 = vld [vmem:[#allocation11 + $0x620] sm:$0xff] }
 0x15f   :  { %754 = vmatprep.mubr.bf16.mxu1 %v315_v54  ;;  %797 = vmatprep.mubr.bf16.mxu0 %v315_v54  ;;  %v948_v54 = vld [vmem:[#allocation11 + $0x380] sm:$0xff] }
 0x160   :  { %755 = vmatmul.mubr.bf16.vlgmr.msra.gmra.mxu1 %v314_v60  ;;  %798 = vmatmul.mubr.bf16.vlgmr.msra.gmra.mxu0 %v314_v60  ;;  %v6589_v60 = vcombine.high %v948_v54, %v952_v55  ;;  %v6588_v2 = vcombine.low %v948_v54, %v952_v55  ;;  %v8411_v55 = vld [vmem:[#allocation11 + $0x5e8] sm:$0xff] }
 0x161   :  { %2415 = vmatpush1.bf16.msra.mxu1 %v6532_v23  ;;  %2458 = vmatpush1.bf16.msra.mxu0 %v6660_v26  ;;  %v6500_v23 = vcombine.low %v860_v11, %v864_v12  ;;  %v6621_v26 = vcombine.high %v980_v21, %v984_v22 }
 0x162   :  { %2416 = vmatprep.subr.bf16.mxu1 %v6525_v61  ;;  %2459 = vmatprep.subr.bf16.mxu0 %v6653_v62  ;;  %v6717_v61 = vcombine.high %v1076_v56, %v1080_v57  ;;  %v940_v62 = vld [vmem:[#allocation11 + $0x340] sm:$0xff] }
 0x165   :  { %2417 = vmatpush1.bf16.msra.mxu1 %v6524_v63  ;;  %2460 = vmatpush1.bf16.msra.mxu0 %v6652_v0  ;;  %v944_v63 = vld [vmem:[#allocation11 + $0x360] sm:$0xff] }
 0x166   :  { %2418 = vmatprep.subr.bf16.mxu1 %v6517_v5  ;;  %2461 = vmatprep.subr.bf16.mxu0 %v6645_v6  ;;  %v1068_v0 = vld [vmem:[#allocation11 + $0x740] sm:$0xff]  ;;  %v6581_v4 = vcombine.high %v940_v62, %v944_v63 }
 0x167   :  { %v6709_v5 = vcombine.high %v1068_v0, %v1072_v1  ;;  %v932_v6 = vld [vmem:[#allocation11 + $0x300] sm:$0xff]  ;;  %v6708_v11 = vcombine.low %v1068_v0, %v1072_v1 }
 0x169   :  { %2419 = vmatpush1.bf16.msra.mxu1 %v6516_v7  ;;  %2462 = vmatpush1.bf16.msra.mxu0 %v6644_v8  ;;  %v936_v7 = vld [vmem:[#allocation11 + $0x320] sm:$0xff] }
 0x16a   :  { %2420 = vmatprep.subr.bf16.mxu1 %v6509_v9  ;;  %2463 = vmatprep.subr.bf16.mxu0 %v6637_v10  ;;  %v1060_v8 = vld [vmem:[#allocation11 + $0x700] sm:$0xff]  ;;  %v6580_v10 = vcombine.low %v940_v62, %v944_v63  ;;  %v6573_v12 = vcombine.high %v932_v6, %v936_v7 }
 0x16b   :  { %v1064_v9 = vld [vmem:[#allocation11 + $0x720] sm:$0xff] }
 0x16c   :  { %v6701_v13 = vcombine.high %v1060_v8, %v1064_v9  ;;  %v6700_v19 = vcombine.low %v1060_v8, %v1064_v9 }
 0x16d   :  { %2421 = vmatpush1.bf16.msra.mxu1 %v6508_v15  ;;  %2464 = vmatpush1.bf16.msra.mxu0 %v6636_v16  ;;  %v928_v15 = vld [vmem:[#allocation11 + $0x2e0] sm:$0xff] }
 0x16e   :  { %2422 = vmatprep.subr.bf16.mxu1 %v6501_v17  ;;  %2465 = vmatprep.subr.bf16.mxu0 %v6629_v18  ;;  %v1052_v16 = vld [vmem:[#allocation11 + $0x6c0] sm:$0xff]  ;;  %v6572_v18 = vcombine.low %v932_v6, %v936_v7  ;;  %v6565_v20 = vcombine.high %v924_v14, %v928_v15  ;;  %v6564_v22 = vcombine.low %v924_v14, %v928_v15 }
 0x16f   :  { %v1056_v17 = vld [vmem:[#allocation11 + $0x6e0] sm:$0xff] }
 0x170   :  { %v6693_v21 = vcombine.high %v1052_v16, %v1056_v17 }
 0x171   :  { %2423 = vmatpush1.bf16.msra.mxu1 %v6500_v23  ;;  %2466 = vmatpush1.bf16.msra.mxu0 %v6628_v24  ;;  %v6692_v23 = vcombine.low %v1052_v16, %v1056_v17  ;;  %v916_v24 = vld [vmem:[#allocation11 + $0x280] sm:$0xff] }
 0x172   :  { %2424 = vmatprep.subr.bf16.mxu1 %v6493_v25  ;;  %2467 = vmatprep.subr.bf16.mxu0 %v6621_v26  ;;  %v920_v25 = vld [vmem:[#allocation11 + $0x2a0] sm:$0xff] }
 0x173   :  { %v1044_v26 = vld [vmem:[#allocation11 + $0x680] sm:$0xff]  ;;  %v6557_v27 = vcombine.high %v916_v24, %v920_v25  ;;  %v6556_v30 = vcombine.low %v916_v24, %v920_v25 }
 0x174   :  { %v6684_v33 = vcombine.low %v1044_v26, %v1048_v28 }
 0x175   :  { %2425 = vmatpush1.bf16.msra.mxu1 %v6492_v34  ;;  %2468 = vmatpush1.bf16.msra.mxu0 %v6620_v35  ;;  %v6685_v34 = vcombine.high %v1044_v26, %v1048_v28  ;;  %v908_v35 = vld [vmem:[#allocation11 + $0x240] sm:$0xff] }
 0x176   :  { %2426 = vmatprep.subr.bf16.mxu1 %v6485_v36  ;;  %2469 = vmatprep.subr.bf16.mxu0 %v6613_v37  ;;  %v912_v36 = vld [vmem:[#allocation11 + $0x260] sm:$0xff] }
 0x177   :  { %v1036_v37 = vld [vmem:[#allocation11 + $0x640] sm:$0xff]  ;;  %v6549_v38 = vcombine.high %v908_v35, %v912_v36  ;;  %v6548_v40 = vcombine.low %v908_v35, %v912_v36 }
 0x178   :  { %v6676_v41 = vcombine.low %v1036_v37, %v1040_v39 }
 0x179   :  { %2427 = vmatpush1.bf16.msra.mxu1 %v6484_v42  ;;  %2470 = vmatpush1.bf16.msra.mxu0 %v6612_v43  ;;  %v6677_v42 = vcombine.high %v1036_v37, %v1040_v39  ;;  %v900_v43 = vld [vmem:[#allocation11 + $0x200] sm:$0xff]  ;;  %v1013_v39 = vld [vmem:[#allocation11 + $0x588] sm:$0xff] }
 0x17a   :  { %2428 = vmatprep.subr.bf16.mxu1 %v6477_v44  ;;  %2471 = vmatprep.subr.bf16.mxu0 %v6605_v45  ;;  %v904_v44 = vld [vmem:[#allocation11 + $0x220] sm:$0xff] }
 0x17b   :  { %v1028_v45 = vld [vmem:[#allocation11 + $0x600] sm:$0xff]  ;;  %v6541_v46 = vcombine.high %v900_v43, %v904_v44  ;;  %v6540_v48 = vcombine.low %v900_v43, %v904_v44 }
 0x17c   :  { %v6668_v49 = vcombine.low %v1028_v45, %v1032_v47 }
 0x17d   :  { %2429 = vmatpush1.bf16.msra.mxu1 %v6476_v50  ;;  %2472 = vmatpush1.bf16.msra.mxu0 %v6604_v51  ;;  %v6669_v50 = vcombine.high %v1028_v45, %v1032_v47  ;;  %v8403_v51 = vld [vmem:[#allocation11 + $0x1c8] sm:$0xff] }
 0x17e   :  { %2430 = vmatprep.subr.bf16.mxu1 %v6597_v52  ;;  %2473 = vmatprep.subr.bf16.mxu0 %v6725_v53  ;;  %v8405_v52 = vld [vmem:[#allocation11 + $0x1e8] sm:$0xff] }
 0x17f   :  { %v8407_v53 = vld [vmem:[#allocation11 + $0x5c8] sm:$0xff]  ;;  %v6535_v54 = vcombine.high %v8403_v51, %v8405_v52  ;;  %v6534_v56 = vcombine.low %v8403_v51, %v8405_v52 }
 0x180   :  { %v6662_v57 = vcombine.low %v8407_v53, %v8411_v55  ;;  %v881_v47 = vld [vmem:[#allocation11 + $0x168] sm:$0xff] }
 0x181   :  { %2431 = vmatpush2.bf16.msra.mxu1 %v6596_v58  ;;  %2474 = vmatpush2.bf16.msra.mxu0 %v6724_v59  ;;  %v6663_v58 = vcombine.high %v8407_v53, %v8411_v55  ;;  %v380_v59 = vld [vmem:[#allocation10] sm:$0xf] }
 0x182   :  { %2432 = vmatprep.subr.bf16.mxu1 %v6589_v60  ;;  %2475 = vmatprep.subr.bf16.mxu0 %v6717_v61  ;;  %v8420_v60 = vsub.s32 3, %v8393_v29  ;;  %v8423_v61 = vsub.s32 2, %v8393_v29  ;;  %v385_v62 = vrot.slane %v380_v59, %v8396_v31  ;;  %v389_v1 = vrot.slane %v380_v59, %v8399_v32 }
 0x185   :  { %2433 = vmatpush2.bf16.msra.mxu1 %v6588_v2  ;;  %2476 = vmatpush2.bf16.msra.mxu0 %v6716_v3  ;;  %v397_v2 = vrot.slane %v380_v59, %v8420_v60  ;;  %v393_v3 = vrot.slane %v380_v59, %v8423_v61 }
 0x186   :  { %2434 = vmatprep.subr.bf16.mxu1 %v6581_v4  ;;  %2477 = vmatprep.subr.bf16.mxu0 %v6709_v5 }
 0x189   :  { %2435 = vmatpush2.bf16.msra.mxu1 %v6580_v10  ;;  %2478 = vmatpush2.bf16.msra.mxu0 %v6708_v11 }
 0x18a   :  { %2436 = vmatprep.subr.bf16.mxu1 %v6573_v12  ;;  %2479 = vmatprep.subr.bf16.mxu0 %v6701_v13 }
 0x18d   :  { %2437 = vmatpush2.bf16.msra.mxu1 %v6572_v18  ;;  %2480 = vmatpush2.bf16.msra.mxu0 %v6700_v19 }
 0x18e   :  { %2438 = vmatprep.subr.bf16.mxu1 %v6565_v20  ;;  %2481 = vmatprep.subr.bf16.mxu0 %v6693_v21 }
 0x191   :  { %2439 = vmatpush2.bf16.msra.mxu1 %v6564_v22  ;;  %2482 = vmatpush2.bf16.msra.mxu0 %v6692_v23 }
 0x192   :  { %2440 = vmatprep.subr.bf16.mxu1 %v6557_v27  ;;  %2483 = vmatprep.subr.bf16.mxu0 %v6685_v34  ;;  %v889_v34 = vld [vmem:[#allocation11 + $0x1a8] sm:$0xff] }
 0x195   :  { %2441 = vmatpush2.bf16.msra.mxu1 %v6556_v30  ;;  %2484 = vmatpush2.bf16.msra.mxu0 %v6684_v33  ;;  %v885_v33 = vld [vmem:[#allocation11 + $0x188] sm:$0xff] }
 0x196   :  { %2442 = vmatprep.subr.bf16.mxu1 %v6549_v38  ;;  %2485 = vmatprep.subr.bf16.mxu0 %v6677_v42  ;;  %v6527_v45 = vcombine.high %v885_v33, %v889_v34 }
 0x199   :  { %2443 = vmatpush2.bf16.msra.mxu1 %v6548_v40  ;;  %2486 = vmatpush2.bf16.msra.mxu0 %v6676_v41  ;;  %v1017_v40 = vld [vmem:[#allocation11 + $0x5a8] sm:$0xff] }
 0x19a   :  { %2444 = vmatprep.subr.bf16.mxu1 %v6541_v46  ;;  %2487 = vmatprep.subr.bf16.mxu0 %v6669_v50  ;;  %v877_v46 = vld [vmem:[#allocation11 + $0x148] sm:$0xff] }
 0x19b   :  { %v1009_v50 = vld [vmem:[#allocation11 + $0x568] sm:$0xff]  ;;  %v6519_v59 = vcombine.high %v877_v46, %v881_v47  ;;  %v6518_v51 = vcombine.low %v877_v46, %v881_v47 }
 0x19d   :  { %2445 = vmatpush2.bf16.msra.mxu1 %v6540_v48  ;;  %2488 = vmatpush2.bf16.msra.mxu0 %v6668_v49  ;;  %v6655_v48 = vcombine.high %v1013_v39, %v1017_v40  ;;  %v1005_v49 = vld [vmem:[#allocation11 + $0x548] sm:$0xff] }
 0x19e   :  { %2500 = vmatprep.subr.bf16.mxu1 %v6535_v54  ;;  %2543 = vmatprep.subr.bf16.mxu0 %v6663_v58  ;;  %v6526_v54 = vcombine.low %v885_v33, %v889_v34  ;;  %v6654_v58 = vcombine.low %v1013_v39, %v1017_v40  ;;  %v6646_v52 = vcombine.low %v1005_v49, %v1009_v50  ;;  %v1085_v39 = vld [vmem:[#allocation11 + $0x7c8] sm:$0xff] }
 0x19f   :  { %v1089_v40 = vld [vmem:[#allocation11 + $0x7e8] sm:$0xff] }
 0x1a0   :  { %v6727_v47 = vcombine.high %v1085_v39, %v1089_v40 }
 0x220   :  { %v756_v63 = vpop.f32.mrf.mxu1  ;;  %v799_v0 = vpop.f32.mrf.mxu0 }
 0x221   :  { %v757_v6 = vadd.f32 %v756_v63, %v385_v62  ;;  %v800_v13 = vadd.f32 %v799_v0, %v393_v3  ;;  %v869_v63 = vld [vmem:[#allocation11 + $0x108] sm:$0xff] }
 0x222   :  { %v758_v4 = vpop.f32.mrf.mxu1  ;;  %v801_v5 = vpop.f32.mrf.mxu0  ;;  %v873_v0 = vld [vmem:[#allocation11 + $0x128] sm:$0xff] }
 0x223   :  { %v759_v7 = vadd.f32 %v758_v4, %v389_v1  ;;  %v802_v10 = vadd.f32 %v801_v5, %v397_v2  ;;  %vm808_vm4 = vcmp.ge.f32.partialorder %v757_v6, 0.0  ;;  %v816_v21 = vmul.f32 0.2, %v757_v6  ;;  %v993_v4 = vld [vmem:[#allocation11 + $0x4e8] sm:$0xff] }
 0x224   :  { %v760_v8 = vpop.f32.mrf.mxu1  ;;  %v803_v9 = vpop.f32.mrf.mxu0  ;;  %v818_v23 = vmul.f32 0.2, %v800_v13  ;;  %vm810_vm10 = vcmp.ge.f32.partialorder %v800_v13, 0.0  ;;  %v6511_v53 = vcombine.high %v869_v63, %v873_v0  ;;  %v6510_v5 = vcombine.low %v869_v63, %v873_v0  ;;  %v941_v0 = vld [vmem:[#allocation11 + $0x348] sm:$0xff] }
 0x225   :  { %v761_v11 = vadd.f32 %v760_v8, %v385_v62  ;;  %v804_v12 = vadd.f32 %v803_v9, %v393_v3  ;;  %v817_v16 = vmul.f32 0.2, %v759_v7  ;;  %vm809_vm6 = vcmp.ge.f32.partialorder %v759_v7, 0.0  ;;  %v989_v3 = vld [vmem:[#allocation11 + $0x4c8] sm:$0xff] }
 0x226   :  { %v762_v14 = vpop.f32.mrf.mxu1  ;;  %v805_v15 = vpop.f32.mrf.mxu0  ;;  %v819_v22 = vmul.f32 0.2, %v802_v10  ;;  %vm811_vm8 = vcmp.ge.f32.partialorder %v802_v10, 0.0  ;;  %v824_v35 = vsel %vm808_vm4, %v757_v6, %v816_v21  ;;  %v826_v41 = vsel %vm810_vm10, %v800_v13, %v818_v23  ;;  %v853_v9 = vld [vmem:[#allocation11 + $0x88] sm:$0xff] }
 0x227   :  { %v820_v17 = vmul.f32 0.2, %v761_v11  ;;  %vm812_vm5 = vcmp.ge.f32.partialorder %v761_v11, 0.0  ;;  %v822_v18 = vmul.f32 0.2, %v804_v12  ;;  %v763_v19 = vadd.f32 %v762_v14, %v389_v1  ;;  %v997_v1 = vld [vmem:[#allocation11 + $0x508] sm:$0xff] }
 0x228   :  { %v806_v20 = vadd.f32 %v805_v15, %v397_v2  ;;  %vm814_vm7 = vcmp.ge.f32.partialorder %v804_v12, 0.0  ;;  %v825_v27 = vsel %vm809_vm6, %v759_v7, %v817_v16  ;;  %v827_v36 = vsel %vm811_vm8, %v802_v10, %v819_v22  ;;  %v1001_v2 = vld [vmem:[#allocation11 + $0x528] sm:$0xff] }
 0x229   :  { %vm813_vm9 = vcmp.ge.f32.partialorder %v763_v19, 0.0  ;;  %v821_v24 = vmul.f32 0.2, %v763_v19  ;;  %v828_v25 = vsel %vm812_vm5, %v761_v11, %v820_v17  ;;  %v830_v28 = vsel %vm814_vm7, %v804_v12, %v822_v18  ;;  %v857_v10 = vld [vmem:[#allocation11 + $0xa8] sm:$0xff] }
 0x22a   :  { %vm815_vm11 = vcmp.ge.f32.partialorder %v806_v20, 0.0  ;;  %v823_v26 = vmul.f32 0.2, %v806_v20  ;;  %v8432_v42 = vpack.c.bf16 %v828_v25, %v824_v35  ;;  %v8436_v44 = vpack.c.bf16 %v830_v28, %v826_v41  ;;  %v981_v11 = vld [vmem:[#allocation11 + $0x488] sm:$0xff] }
 0x22b   :  { %v829_v30 = vsel %vm813_vm9, %v763_v19, %v821_v24  ;;  %v6647_v62 = vcombine.high %v1005_v49, %v1009_v50  ;;  %v6639_v55 = vcombine.high %v997_v1, %v1001_v2  ;;  %v6638_v6 = vcombine.low %v997_v1, %v1001_v2  ;;  %v985_v12 = vld [vmem:[#allocation11 + $0x4a8] sm:$0xff] }
 0x22c   :  { %v8430_v37 = vpack.c.bf16 %v829_v30, %v825_v27  ;;  %v831_v38 = vsel %vm815_vm11, %v806_v20, %v823_v26  ;;  %v6631_v8 = vcombine.high %v989_v3, %v993_v4  ;;  %v6630_v14 = vcombine.low %v989_v3, %v993_v4  ;;  %v845_v17 = vld [vmem:[#allocation11 + $0x48] sm:$0xff] }
 0x22d   :  { %v8434_v43 = vpack.c.bf16 %v831_v38, %v827_v36  ;;  %v6495_v15 = vcombine.high %v853_v9, %v857_v10  ;;  %v6623_v16 = vcombine.high %v981_v11, %v985_v12  ;;  %v849_v18 = vld [vmem:[#allocation11 + $0x68] sm:$0xff]  ;;  %v6494_v21 = vcombine.low %v853_v9, %v857_v10 }
 0x22e   :  { %2446 = vmatprep.mubr.bf16.mxu1 %v8430_v37  ;;  %v973_v19 = vld [vmem:[#allocation11 + $0x448] sm:$0xff]  ;;  %v6622_v22 = vcombine.low %v981_v11, %v985_v12  ;;  %v6487_v23 = vcombine.high %v845_v17, %v849_v18  ;;  %v6486_v30 = vcombine.low %v845_v17, %v849_v18 }
 0x22f   :  { %2489 = vmatprep.mubr.bf16.mxu0 %v8434_v43  ;;  %2447 = vmatmul.mubr.bf16.vlgmr.msra.gmra.mxu1 %v8432_v42  ;;  %v977_v20 = vld [vmem:[#allocation11 + $0x468] sm:$0xff] }
 0x230   :  { %2490 = vmatmul.mubr.bf16.vlgmr.msra.gmra.mxu0 %v8436_v44  ;;  %2501 = vmatpush1.bf16.msra.mxu1 %v6534_v56  ;;  %v861_v56 = vld [vmem:[#allocation11 + $0xc8] sm:$0xff]  ;;  %v6615_v24 = vcombine.high %v973_v19, %v977_v20  ;;  %v6614_v33 = vcombine.low %v973_v19, %v977_v20 }
 0x231   :  { %2544 = vmatpush1.bf16.msra.mxu0 %v6662_v57  ;;  %2532 = vmatprep.mubr.bf16.mxu1 %v8430_v37  ;;  %v865_v57 = vld [vmem:[#allocation11 + $0xe8] sm:$0xff] }
 0x232   :  { %2575 = vmatprep.mubr.bf16.mxu0 %v8434_v43  ;;  %2502 = vmatprep.subr.bf16.mxu1 %v6527_v45  ;;  %v6503_v7 = vcombine.high %v861_v56, %v865_v57  ;;  %v6502_v13 = vcombine.low %v861_v56, %v865_v57  ;;  %v837_v25 = vld [vmem:[#allocation11 + $0x8] sm:$0xff] }
 0x233   :  { %2545 = vmatprep.subr.bf16.mxu0 %v6655_v48  ;;  %v841_v26 = vld [vmem:[#allocation11 + $0x28] sm:$0xff] }
 0x234   :  { %2503 = vmatpush1.bf16.msra.mxu1 %v6526_v54  ;;  %v965_v27 = vld [vmem:[#allocation11 + $0x408] sm:$0xff]  ;;  %v6479_v34 = vcombine.high %v837_v25, %v841_v26  ;;  %v6478_v41 = vcombine.low %v837_v25, %v841_v26 }
 0x235   :  { %2546 = vmatpush1.bf16.msra.mxu0 %v6654_v58  ;;  %2504 = vmatprep.subr.bf16.mxu1 %v6519_v59  ;;  %v969_v28 = vld [vmem:[#allocation11 + $0x428] sm:$0xff]  ;;  %v6726_v59 = vcombine.low %v1085_v39, %v1089_v40 }
 0x236   :  { %2547 = vmatprep.subr.bf16.mxu0 %v6647_v62  ;;  %v6607_v35 = vcombine.high %v965_v27, %v969_v28  ;;  %v957_v36 = vld [vmem:[#allocation11 + $0x3c8] sm:$0xff]  ;;  %v6606_v45 = vcombine.low %v965_v27, %v969_v28 }
 0x237   :  { %v961_v38 = vld [vmem:[#allocation11 + $0x3e8] sm:$0xff] }
 0x238   :  { %2505 = vmatpush1.bf16.msra.mxu1 %v6518_v51  ;;  %v6599_v46 = vcombine.high %v957_v36, %v961_v38  ;;  %v949_v48 = vld [vmem:[#allocation11 + $0x388] sm:$0xff]  ;;  %v6598_v58 = vcombine.low %v957_v36, %v961_v38 }
 0x239   :  { %2548 = vmatpush1.bf16.msra.mxu0 %v6646_v52  ;;  %2506 = vmatprep.subr.bf16.mxu1 %v6511_v53  ;;  %v953_v49 = vld [vmem:[#allocation11 + $0x3a8] sm:$0xff] }
 0x23a   :  { %2549 = vmatprep.subr.bf16.mxu0 %v6639_v55  ;;  %v1077_v50 = vld [vmem:[#allocation11 + $0x788] sm:$0xff]  ;;  %v6591_v62 = vcombine.high %v949_v48, %v953_v49  ;;  %v6590_v52 = vcombine.low %v949_v48, %v953_v49  ;;  %v894_v49 = vld [vmem:[#allocation11 + $0x1d0] sm:$0xff] }
 0x23b   :  { %v1081_v54 = vld [vmem:[#allocation11 + $0x7a8] sm:$0xff] }
 0x23c   :  { %2507 = vmatpush1.bf16.msra.mxu1 %v6510_v5  ;;  %v6719_v63 = vcombine.high %v1077_v50, %v1081_v54  ;;  %v945_v1 = vld [vmem:[#allocation11 + $0x368] sm:$0xff]  ;;  %v6718_v53 = vcombine.low %v1077_v50, %v1081_v54  ;;  %v898_v50 = vld [vmem:[#allocation11 + $0x1f0] sm:$0xff] }
 0x23d   :  { %2550 = vmatpush1.bf16.msra.mxu0 %v6638_v6  ;;  %2508 = vmatprep.subr.bf16.mxu1 %v6503_v7  ;;  %v1069_v2 = vld [vmem:[#allocation11 + $0x748] sm:$0xff]  ;;  %v6583_v55 = vcombine.high %v941_v0, %v945_v1  ;;  %v6582_v6 = vcombine.low %v941_v0, %v945_v1  ;;  %v1022_v54 = vld [vmem:[#allocation11 + $0x5d0] sm:$0xff] }
 0x23e   :  { %2551 = vmatprep.subr.bf16.mxu0 %v6631_v8  ;;  %v1073_v51 = vld [vmem:[#allocation11 + $0x768] sm:$0xff]  ;;  %v886_v1 = vld [vmem:[#allocation11 + $0x190] sm:$0xff] }
 0x23f   :  { %v6711_v56 = vcombine.high %v1069_v2, %v1073_v51  ;;  %v933_v57 = vld [vmem:[#allocation11 + $0x308] sm:$0xff]  ;;  %v6710_v7 = vcombine.low %v1069_v2, %v1073_v51  ;;  %v890_v2 = vld [vmem:[#allocation11 + $0x1b0] sm:$0xff]  ;;  %v6536_v51 = vcombine.low %v894_v49, %v898_v50 }
 0x240   :  { %2509 = vmatpush1.bf16.msra.mxu1 %v6502_v13  ;;  %v937_v3 = vld [vmem:[#allocation11 + $0x328] sm:$0xff] }
 0x241   :  { %2552 = vmatpush1.bf16.msra.mxu0 %v6630_v14  ;;  %2510 = vmatprep.subr.bf16.mxu1 %v6495_v15  ;;  %v1061_v4 = vld [vmem:[#allocation11 + $0x708] sm:$0xff]  ;;  %v6575_v8 = vcombine.high %v933_v57, %v937_v3  ;;  %v6574_v14 = vcombine.low %v933_v57, %v937_v3  ;;  %v878_v57 = vld [vmem:[#allocation11 + $0x150] sm:$0xff] }
 0x242   :  { %2553 = vmatprep.subr.bf16.mxu0 %v6623_v16  ;;  %v1065_v5 = vld [vmem:[#allocation11 + $0x728] sm:$0xff]  ;;  %v882_v3 = vld [vmem:[#allocation11 + $0x170] sm:$0xff] }
 0x243   :  { %v6703_v9 = vcombine.high %v1061_v4, %v1065_v5  ;;  %v925_v10 = vld [vmem:[#allocation11 + $0x2c8] sm:$0xff]  ;;  %v6702_v15 = vcombine.low %v1061_v4, %v1065_v5  ;;  %v1006_v5 = vld [vmem:[#allocation11 + $0x550] sm:$0xff] }
 0x244   :  { %2511 = vmatpush1.bf16.msra.mxu1 %v6494_v21  ;;  %v929_v11 = vld [vmem:[#allocation11 + $0x2e8] sm:$0xff] }
 0x245   :  { %2554 = vmatpush1.bf16.msra.mxu0 %v6622_v22  ;;  %2512 = vmatprep.subr.bf16.mxu1 %v6487_v23  ;;  %v1053_v12 = vld [vmem:[#allocation11 + $0x6c8] sm:$0xff]  ;;  %v6567_v16 = vcombine.high %v925_v10, %v929_v11  ;;  %v6566_v22 = vcombine.low %v925_v10, %v929_v11  ;;  %v870_v11 = vld [vmem:[#allocation11 + $0x110] sm:$0xff] }
 0x246   :  { %2555 = vmatprep.subr.bf16.mxu0 %v6615_v24  ;;  %v1057_v13 = vld [vmem:[#allocation11 + $0x6e8] sm:$0xff] }
 0x247   :  { %v6695_v17 = vcombine.high %v1053_v12, %v1057_v13  ;;  %v917_v18 = vld [vmem:[#allocation11 + $0x288] sm:$0xff]  ;;  %v6694_v23 = vcombine.low %v1053_v12, %v1057_v13  ;;  %v874_v12 = vld [vmem:[#allocation11 + $0x130] sm:$0xff] }
 0x248   :  { %2513 = vmatpush1.bf16.msra.mxu1 %v6486_v30  ;;  %v921_v19 = vld [vmem:[#allocation11 + $0x2a8] sm:$0xff]  ;;  %v998_v13 = vld [vmem:[#allocation11 + $0x510] sm:$0xff] }
 0x249   :  { %2556 = vmatpush1.bf16.msra.mxu0 %v6614_v33  ;;  %2514 = vmatprep.subr.bf16.mxu1 %v6479_v34  ;;  %v1045_v20 = vld [vmem:[#allocation11 + $0x688] sm:$0xff]  ;;  %v6559_v24 = vcombine.high %v917_v18, %v921_v19  ;;  %v6558_v33 = vcombine.low %v917_v18, %v921_v19  ;;  %v862_v19 = vld [vmem:[#allocation11 + $0xd0] sm:$0xff] }
 0x24a   :  { %2557 = vmatprep.subr.bf16.mxu0 %v6607_v35  ;;  %v1049_v21 = vld [vmem:[#allocation11 + $0x6a8] sm:$0xff] }
 0x24b   :  { %v6687_v25 = vcombine.high %v1045_v20, %v1049_v21  ;;  %v909_v26 = vld [vmem:[#allocation11 + $0x248] sm:$0xff]  ;;  %v6686_v34 = vcombine.low %v1045_v20, %v1049_v21  ;;  %v866_v20 = vld [vmem:[#allocation11 + $0xf0] sm:$0xff] }
 0x24c   :  { %2515 = vmatpush1.bf16.msra.mxu1 %v6478_v41  ;;  %v913_v27 = vld [vmem:[#allocation11 + $0x268] sm:$0xff]  ;;  %v990_v21 = vld [vmem:[#allocation11 + $0x4d0] sm:$0xff] }
 0x24d   :  { %2558 = vmatpush1.bf16.msra.mxu0 %v6606_v45  ;;  %2516 = vmatprep.subr.bf16.mxu1 %v6599_v46  ;;  %v1037_v28 = vld [vmem:[#allocation11 + $0x648] sm:$0xff]  ;;  %v6551_v35 = vcombine.high %v909_v26, %v913_v27  ;;  %v6550_v45 = vcombine.low %v909_v26, %v913_v27  ;;  %v854_v27 = vld [vmem:[#allocation11 + $0x90] sm:$0xff] }
 0x24e   :  { %2559 = vmatprep.subr.bf16.mxu0 %v6727_v47  ;;  %v1041_v30 = vld [vmem:[#allocation11 + $0x668] sm:$0xff] }
 0x24f   :  { %v6679_v36 = vcombine.high %v1037_v28, %v1041_v30  ;;  %v901_v38 = vld [vmem:[#allocation11 + $0x208] sm:$0xff]  ;;  %v6678_v46 = vcombine.low %v1037_v28, %v1041_v30  ;;  %v858_v28 = vld [vmem:[#allocation11 + $0xb0] sm:$0xff] }
 0x250   :  { %2517 = vmatpush2.bf16.msra.mxu1 %v6598_v58  ;;  %v905_v39 = vld [vmem:[#allocation11 + $0x228] sm:$0xff]  ;;  %v1026_v58 = vld [vmem:[#allocation11 + $0x5f0] sm:$0xff] }
 0x251   :  { %2560 = vmatpush2.bf16.msra.mxu0 %v6726_v59  ;;  %2518 = vmatprep.subr.bf16.mxu1 %v6591_v62  ;;  %v1029_v40 = vld [vmem:[#allocation11 + $0x608] sm:$0xff]  ;;  %v6543_v47 = vcombine.high %v901_v38, %v905_v39  ;;  %v6542_v59 = vcombine.low %v901_v38, %v905_v39  ;;  %v6665_v0 = vcombine.high %v1022_v54, %v1026_v58  ;;  %v982_v30 = vld [vmem:[#allocation11 + $0x490] sm:$0xff] }
 0x252   :  { %2561 = vmatprep.subr.bf16.mxu0 %v6719_v63  ;;  %v1033_v41 = vld [vmem:[#allocation11 + $0x628] sm:$0xff]  ;;  %v6537_v63 = vcombine.high %v894_v49, %v898_v50  ;;  %v846_v39 = vld [vmem:[#allocation11 + $0x50] sm:$0xff] }
 0x253   :  { %v6671_v48 = vcombine.high %v1029_v40, %v1033_v41  ;;  %v6670_v62 = vcombine.low %v1029_v40, %v1033_v41  ;;  %v850_v40 = vld [vmem:[#allocation11 + $0x70] sm:$0xff] }
 0x254   :  { %2519 = vmatpush2.bf16.msra.mxu1 %v6590_v52  ;;  %v1014_v52 = vld [vmem:[#allocation11 + $0x590] sm:$0xff] }
 0x255   :  { %2562 = vmatpush2.bf16.msra.mxu0 %v6718_v53  ;;  %2520 = vmatprep.subr.bf16.mxu1 %v6583_v55  ;;  %v1018_v53 = vld [vmem:[#allocation11 + $0x5b0] sm:$0xff]  ;;  %v6664_v55 = vcombine.low %v1022_v54, %v1026_v58 }
 0x256   :  { %2563 = vmatprep.subr.bf16.mxu0 %v6711_v56  ;;  %v6529_v56 = vcombine.high %v886_v1, %v890_v2  ;;  %v6657_v4 = vcombine.high %v1014_v52, %v1018_v53  ;;  %v974_v41 = vld [vmem:[#allocation11 + $0x450] sm:$0xff] }
 0x257   :  { %v838_v50 = vld [vmem:[#allocation11 + $0x10] sm:$0xff] }
 0x258   :  { %2521 = vmatpush2.bf16.msra.mxu1 %v6582_v6  ;;  %v1010_v6 = vld [vmem:[#allocation11 + $0x570] sm:$0xff] }
 0x259   :  { %2564 = vmatpush2.bf16.msra.mxu0 %v6710_v7  ;;  %2522 = vmatprep.subr.bf16.mxu1 %v6575_v8  ;;  %v6528_v7 = vcombine.low %v886_v1, %v890_v2  ;;  %v6656_v8 = vcombine.low %v1014_v52, %v1018_v53  ;;  %v6649_v10 = vcombine.high %v1006_v5, %v1010_v6  ;;  %v842_v54 = vld [vmem:[#allocation11 + $0x30] sm:$0xff] }
 0x25a   :  { %2565 = vmatprep.subr.bf16.mxu0 %v6703_v9  ;;  %v6521_v9 = vcombine.high %v878_v57, %v882_v3  ;;  %v966_v58 = vld [vmem:[#allocation11 + $0x410] sm:$0xff] }
 0x25b   :  { %v958_v2 = vld [vmem:[#allocation11 + $0x3d0] sm:$0xff] }
 0x25c   :  { %2523 = vmatpush2.bf16.msra.mxu1 %v6574_v14  ;;  %v1002_v14 = vld [vmem:[#allocation11 + $0x530] sm:$0xff] }
 0x25d   :  { %2566 = vmatpush2.bf16.msra.mxu0 %v6702_v15  ;;  %2524 = vmatprep.subr.bf16.mxu1 %v6567_v16  ;;  %v6520_v15 = vcombine.low %v878_v57, %v882_v3  ;;  %v6648_v16 = vcombine.low %v1006_v5, %v1010_v6  ;;  %v6641_v18 = vcombine.high %v998_v13, %v1002_v14  ;;  %v1086_v52 = vld [vmem:[#allocation11 + $0x7d0] sm:$0xff] }
 0x25e   :  { %2567 = vmatprep.subr.bf16.mxu0 %v6695_v17  ;;  %v6513_v17 = vcombine.high %v870_v11, %v874_v12  ;;  %v1090_v53 = vld [vmem:[#allocation11 + $0x7f0] sm:$0xff] }
 0x25f   :  { %v6729_v3 = vcombine.high %v1086_v52, %v1090_v53  ;;  %v954_v5 = vld [vmem:[#allocation11 + $0x3b0] sm:$0xff] }
 0x260   :  { %2525 = vmatpush2.bf16.msra.mxu1 %v6566_v22  ;;  %v994_v22 = vld [vmem:[#allocation11 + $0x4f0] sm:$0xff] }
 0x261   :  { %2568 = vmatpush2.bf16.msra.mxu0 %v6694_v23  ;;  %2526 = vmatprep.subr.bf16.mxu1 %v6559_v24  ;;  %v6512_v23 = vcombine.low %v870_v11, %v874_v12  ;;  %v6640_v24 = vcombine.low %v998_v13, %v1002_v14  ;;  %v6633_v26 = vcombine.high %v990_v21, %v994_v22  ;;  %v1078_v6 = vld [vmem:[#allocation11 + $0x790] sm:$0xff] }
 0x262   :  { %2569 = vmatprep.subr.bf16.mxu0 %v6687_v25  ;;  %v6505_v25 = vcombine.high %v862_v19, %v866_v20  ;;  %v942_v12 = vld [vmem:[#allocation11 + $0x350] sm:$0xff] }
 0x263   :  { %v946_v13 = vld [vmem:[#allocation11 + $0x370] sm:$0xff] }
 0x264   :  { %2527 = vmatpush2.bf16.msra.mxu1 %v6558_v33  ;;  %v986_v33 = vld [vmem:[#allocation11 + $0x4b0] sm:$0xff] }
 0x265   :  { %2570 = vmatpush2.bf16.msra.mxu0 %v6686_v34  ;;  %2528 = vmatprep.subr.bf16.mxu1 %v6551_v35  ;;  %v6504_v34 = vcombine.low %v862_v19, %v866_v20  ;;  %v6632_v35 = vcombine.low %v990_v21, %v994_v22  ;;  %v6625_v38 = vcombine.high %v982_v30, %v986_v33  ;;  %v1070_v14 = vld [vmem:[#allocation11 + $0x750] sm:$0xff] }
 0x266   :  { %2571 = vmatprep.subr.bf16.mxu0 %v6679_v36  ;;  %v6497_v36 = vcombine.high %v854_v27, %v858_v28  ;;  %v934_v20 = vld [vmem:[#allocation11 + $0x310] sm:$0xff] }
 0x267   :  { %v938_v21 = vld [vmem:[#allocation11 + $0x330] sm:$0xff] }
 0x268   :  { %2529 = vmatpush2.bf16.msra.mxu1 %v6550_v45  ;;  %v978_v45 = vld [vmem:[#allocation11 + $0x470] sm:$0xff] }
 0x269   :  { %2572 = vmatpush2.bf16.msra.mxu0 %v6678_v46  ;;  %2530 = vmatprep.subr.bf16.mxu1 %v6543_v47  ;;  %v6496_v46 = vcombine.low %v854_v27, %v858_v28  ;;  %v6624_v47 = vcombine.low %v982_v30, %v986_v33  ;;  %v6617_v49 = vcombine.high %v974_v41, %v978_v45  ;;  %v1062_v22 = vld [vmem:[#allocation11 + $0x710] sm:$0xff] }
 0x26a   :  { %2573 = vmatprep.subr.bf16.mxu0 %v6671_v48  ;;  %v6489_v48 = vcombine.high %v846_v39, %v850_v40  ;;  %v926_v28 = vld [vmem:[#allocation11 + $0x2d0] sm:$0xff] }
 0x26b   :  { %v930_v30 = vld [vmem:[#allocation11 + $0x2f0] sm:$0xff] }
 0x26c   :  { %2531 = vmatpush2.bf16.msra.mxu1 %v6542_v59  ;;  %v970_v59 = vld [vmem:[#allocation11 + $0x430] sm:$0xff] }
 0x26d   :  { %2574 = vmatpush2.bf16.msra.mxu0 %v6670_v62  ;;  %2586 = vmatprep.subr.bf16.mxu1 %v6537_v63  ;;  %v6488_v62 = vcombine.low %v846_v39, %v850_v40  ;;  %v6616_v63 = vcombine.low %v974_v41, %v978_v45  ;;  %v6609_v1 = vcombine.high %v966_v58, %v970_v59  ;;  %v1054_v33 = vld [vmem:[#allocation11 + $0x6d0] sm:$0xff] }
 0x26e   :  { %2629 = vmatprep.subr.bf16.mxu0 %v6665_v0  ;;  %v6481_v0 = vcombine.high %v838_v50, %v842_v54  ;;  %v918_v40 = vld [vmem:[#allocation11 + $0x290] sm:$0xff] }
 0x26f   :  { %2533 = vmatmul.mubr.bf16.vlgmr.msra.gmra.mxu1 %v8432_v42  ;;  %v922_v41 = vld [vmem:[#allocation11 + $0x2b0] sm:$0xff] }
 0x270   :  { %2576 = vmatmul.mubr.bf16.vlgmr.msra.gmra.mxu0 %v8436_v44  ;;  %2587 = vmatpush1.bf16.msra.mxu1 %v6536_v51  ;;  %v962_v51 = vld [vmem:[#allocation11 + $0x3f0] sm:$0xff] }
 0x271   :  { %2618 = vmatprep.mubr.bf16.mxu1 %v8430_v37  ;;  %2630 = vmatpush1.bf16.msra.mxu0 %v6664_v55  ;;  %v6480_v55 = vcombine.low %v838_v50, %v842_v54  ;;  %v6601_v57 = vcombine.high %v958_v2, %v962_v51  ;;  %v1046_v45 = vld [vmem:[#allocation11 + $0x690] sm:$0xff] }
 0x272   :  { %2661 = vmatprep.mubr.bf16.mxu0 %v8434_v43  ;;  %2588 = vmatprep.subr.bf16.mxu1 %v6529_v56  ;;  %v6608_v56 = vcombine.low %v966_v58, %v970_v59  ;;  %v910_v54 = vld [vmem:[#allocation11 + $0x250] sm:$0xff] }
 0x273   :  { %2631 = vmatprep.subr.bf16.mxu0 %v6657_v4  ;;  %v950_v4 = vld [vmem:[#allocation11 + $0x390] sm:$0xff] }
 0x274   :  { %2589 = vmatpush1.bf16.msra.mxu1 %v6528_v7  ;;  %v1082_v7 = vld [vmem:[#allocation11 + $0x7b0] sm:$0xff] }
 0x275   :  { %2632 = vmatpush1.bf16.msra.mxu0 %v6656_v8  ;;  %2590 = vmatprep.subr.bf16.mxu1 %v6521_v9  ;;  %v6600_v8 = vcombine.low %v958_v2, %v962_v51  ;;  %v6728_v9 = vcombine.low %v1086_v52, %v1090_v53  ;;  %v6721_v11 = vcombine.high %v1078_v6, %v1082_v7  ;;  %v914_v58 = vld [vmem:[#allocation11 + $0x270] sm:$0xff] }
 0x276   :  { %2633 = vmatprep.subr.bf16.mxu0 %v6649_v10  ;;  %v6593_v10 = vcombine.high %v950_v4, %v954_v5  ;;  %v1038_v59 = vld [vmem:[#allocation11 + $0x650] sm:$0xff] }
 0x277   :  { %v902_v51 = vld [vmem:[#allocation11 + $0x210] sm:$0xff] }
 0x278   :  { %2591 = vmatpush1.bf16.msra.mxu1 %v6520_v15  ;;  %v1074_v15 = vld [vmem:[#allocation11 + $0x770] sm:$0xff] }
 0x279   :  { %2634 = vmatpush1.bf16.msra.mxu0 %v6648_v16  ;;  %2592 = vmatprep.subr.bf16.mxu1 %v6513_v17  ;;  %v6592_v16 = vcombine.low %v950_v4, %v954_v5  ;;  %v6720_v17 = vcombine.low %v1078_v6, %v1082_v7  ;;  %v6713_v19 = vcombine.high %v1070_v14, %v1074_v15  ;;  %v906_v52 = vld [vmem:[#allocation11 + $0x230] sm:$0xff]  ;;  %v895_v5 = vld [vmem:[#allocation11 + $0x1d8] sm:$0xff] }
 0x27a   :  { %2635 = vmatprep.subr.bf16.mxu0 %v6641_v18  ;;  %v6585_v18 = vcombine.high %v942_v12, %v946_v13  ;;  %v1030_v53 = vld [vmem:[#allocation11 + $0x610] sm:$0xff]  ;;  %v899_v6 = vld [vmem:[#allocation11 + $0x1f8] sm:$0xff] }
 0x27b   :  { %v1023_v7 = vld [vmem:[#allocation11 + $0x5d8] sm:$0xff] }
 0x27c   :  { %2593 = vmatpush1.bf16.msra.mxu1 %v6512_v23  ;;  %v1066_v23 = vld [vmem:[#allocation11 + $0x730] sm:$0xff] }
 0x27d   :  { %2636 = vmatpush1.bf16.msra.mxu0 %v6640_v24  ;;  %2594 = vmatprep.subr.bf16.mxu1 %v6505_v25  ;;  %v6584_v24 = vcombine.low %v942_v12, %v946_v13  ;;  %v6712_v25 = vcombine.low %v1070_v14, %v1074_v15  ;;  %v6705_v27 = vcombine.high %v1062_v22, %v1066_v23  ;;  %v887_v13 = vld [vmem:[#allocation11 + $0x198] sm:$0xff] }
 0x27e   :  { %2637 = vmatprep.subr.bf16.mxu0 %v6633_v26  ;;  %v6577_v26 = vcombine.high %v934_v20, %v938_v21  ;;  %v891_v14 = vld [vmem:[#allocation11 + $0x1b8] sm:$0xff]  ;;  %v6538_v15 = vcombine.low %v895_v5, %v899_v6 }
 0x280   :  { %2595 = vmatpush1.bf16.msra.mxu1 %v6504_v34  ;;  %v1058_v34 = vld [vmem:[#allocation11 + $0x6f0] sm:$0xff] }
 0x281   :  { %2638 = vmatpush1.bf16.msra.mxu0 %v6632_v35  ;;  %2596 = vmatprep.subr.bf16.mxu1 %v6497_v36  ;;  %v6576_v35 = vcombine.low %v934_v20, %v938_v21  ;;  %v6704_v36 = vcombine.low %v1062_v22, %v1066_v23  ;;  %v6697_v39 = vcombine.high %v1054_v33, %v1058_v34  ;;  %v879_v20 = vld [vmem:[#allocation11 + $0x158] sm:$0xff] }
 0x282   :  { %2639 = vmatprep.subr.bf16.mxu0 %v6625_v38  ;;  %v6569_v38 = vcombine.high %v926_v28, %v930_v30  ;;  %v883_v21 = vld [vmem:[#allocation11 + $0x178] sm:$0xff] }
 0x283   :  { %v1007_v23 = vld [vmem:[#allocation11 + $0x558] sm:$0xff] }
 0x284   :  { %2597 = vmatpush1.bf16.msra.mxu1 %v6496_v46  ;;  %v1050_v46 = vld [vmem:[#allocation11 + $0x6b0] sm:$0xff] }
 0x285   :  { %2640 = vmatpush1.bf16.msra.mxu0 %v6624_v47  ;;  %2598 = vmatprep.subr.bf16.mxu1 %v6489_v48  ;;  %v6568_v47 = vcombine.low %v926_v28, %v930_v30  ;;  %v6696_v48 = vcombine.low %v1054_v33, %v1058_v34  ;;  %v6689_v50 = vcombine.high %v1046_v45, %v1050_v46  ;;  %v871_v30 = vld [vmem:[#allocation11 + $0x118] sm:$0xff] }
 0x286   :  { %2641 = vmatprep.subr.bf16.mxu0 %v6617_v49  ;;  %v6561_v49 = vcombine.high %v918_v40, %v922_v41  ;;  %v875_v33 = vld [vmem:[#allocation11 + $0x138] sm:$0xff] }
 0x287   :  { %v999_v34 = vld [vmem:[#allocation11 + $0x518] sm:$0xff] }
 0x288   :  { %2599 = vmatpush1.bf16.msra.mxu1 %v6488_v62  ;;  %v1042_v62 = vld [vmem:[#allocation11 + $0x670] sm:$0xff] }
 0x289   :  { %2642 = vmatpush1.bf16.msra.mxu0 %v6616_v63  ;;  %2600 = vmatprep.subr.bf16.mxu1 %v6481_v0  ;;  %v6560_v63 = vcombine.low %v918_v40, %v922_v41  ;;  %v6688_v0 = vcombine.low %v1046_v45, %v1050_v46  ;;  %v6681_v2 = vcombine.high %v1038_v59, %v1042_v62  ;;  %v863_v40 = vld [vmem:[#allocation11 + $0xd8] sm:$0xff] }
 0x28a   :  { %2643 = vmatprep.subr.bf16.mxu0 %v6609_v1  ;;  %v6553_v1 = vcombine.high %v910_v54, %v914_v58  ;;  %v867_v41 = vld [vmem:[#allocation11 + $0xf8] sm:$0xff] }
 0x28b   :  { %v991_v45 = vld [vmem:[#allocation11 + $0x4d8] sm:$0xff] }
 0x28c   :  { %2601 = vmatpush1.bf16.msra.mxu1 %v6480_v55  ;;  %v1034_v55 = vld [vmem:[#allocation11 + $0x630] sm:$0xff]  ;;  %v995_v46 = vld [vmem:[#allocation11 + $0x4f8] sm:$0xff] }
 0x28d   :  { %2644 = vmatpush1.bf16.msra.mxu0 %v6608_v56  ;;  %2602 = vmatprep.subr.bf16.mxu1 %v6601_v57  ;;  %v6552_v56 = vcombine.low %v910_v54, %v914_v58  ;;  %v6680_v57 = vcombine.low %v1038_v59, %v1042_v62  ;;  %v6673_v4 = vcombine.high %v1030_v53, %v1034_v55  ;;  %v859_v54 = vld [vmem:[#allocation11 + $0xb8] sm:$0xff] }
 0x28e   :  { %2645 = vmatprep.subr.bf16.mxu0 %v6729_v3  ;;  %v6545_v3 = vcombine.high %v902_v51, %v906_v52  ;;  %v983_v58 = vld [vmem:[#allocation11 + $0x498] sm:$0xff]  ;;  %v6506_v62 = vcombine.low %v863_v40, %v867_v41 }
 0x28f   :  { %v987_v59 = vld [vmem:[#allocation11 + $0x4b8] sm:$0xff] }
 0x290   :  { %2603 = vmatpush2.bf16.msra.mxu1 %v6600_v8  ;;  %v1027_v8 = vld [vmem:[#allocation11 + $0x5f8] sm:$0xff] }
 0x291   :  { %2646 = vmatpush2.bf16.msra.mxu0 %v6728_v9  ;;  %2604 = vmatprep.subr.bf16.mxu1 %v6593_v10  ;;  %v6544_v9 = vcombine.low %v902_v51, %v906_v52  ;;  %v6672_v10 = vcombine.low %v1030_v53, %v1034_v55  ;;  %v6667_v12 = vcombine.high %v1023_v7, %v1027_v8  ;;  %v851_v51 = vld [vmem:[#allocation11 + $0x78] sm:$0xff] }
 0x292   :  { %2647 = vmatprep.subr.bf16.mxu0 %v6721_v11  ;;  %v6539_v11 = vcombine.high %v895_v5, %v899_v6  ;;  %v975_v52 = vld [vmem:[#allocation11 + $0x458] sm:$0xff] }
 0x293   :  { %v979_v53 = vld [vmem:[#allocation11 + $0x478] sm:$0xff] }
 0x294   :  { %2605 = vmatpush2.bf16.msra.mxu1 %v6592_v16  ;;  %v1015_v16 = vld [vmem:[#allocation11 + $0x598] sm:$0xff] }
 0x295   :  { %2648 = vmatpush2.bf16.msra.mxu0 %v6720_v17  ;;  %2606 = vmatprep.subr.bf16.mxu1 %v6585_v18  ;;  %v1019_v17 = vld [vmem:[#allocation11 + $0x5b8] sm:$0xff]  ;;  %v6666_v18 = vcombine.low %v1023_v7, %v1027_v8 }
 0x296   :  { %2649 = vmatprep.subr.bf16.mxu0 %v6713_v19  ;;  %v6531_v19 = vcombine.high %v887_v13, %v891_v14  ;;  %v6659_v22 = vcombine.high %v1015_v16, %v1019_v17  ;;  %v843_v5 = vld [vmem:[#allocation11 + $0x38] sm:$0xff] }
 0x297   :  { %v967_v6 = vld [vmem:[#allocation11 + $0x418] sm:$0xff] }
 0x298   :  { %2607 = vmatpush2.bf16.msra.mxu1 %v6584_v24  ;;  %v1011_v24 = vld [vmem:[#allocation11 + $0x578] sm:$0xff] }
 0x299   :  { %2650 = vmatpush2.bf16.msra.mxu0 %v6712_v25  ;;  %2608 = vmatprep.subr.bf16.mxu1 %v6577_v26  ;;  %v6530_v25 = vcombine.low %v887_v13, %v891_v14  ;;  %v6658_v26 = vcombine.low %v1015_v16, %v1019_v17  ;;  %v6651_v28 = vcombine.high %v1007_v23, %v1011_v24  ;;  %v971_v7 = vld [vmem:[#allocation11 + $0x438] sm:$0xff] }
 0x29a   :  { %2651 = vmatprep.subr.bf16.mxu0 %v6705_v27  ;;  %v6523_v27 = vcombine.high %v879_v20, %v883_v21  ;;  %v963_v13 = vld [vmem:[#allocation11 + $0x3f8] sm:$0xff]  ;;  %v6610_v17 = vcombine.low %v967_v6, %v971_v7 }
 0x29b   :  { %v1087_v14 = vld [vmem:[#allocation11 + $0x7d8] sm:$0xff] }
 0x29c   :  { %2609 = vmatpush2.bf16.msra.mxu1 %v6576_v35  ;;  %v1003_v35 = vld [vmem:[#allocation11 + $0x538] sm:$0xff] }
 0x29d   :  { %2652 = vmatpush2.bf16.msra.mxu0 %v6704_v36  ;;  %2610 = vmatprep.subr.bf16.mxu1 %v6569_v38  ;;  %v6522_v36 = vcombine.low %v879_v20, %v883_v21  ;;  %v6650_v38 = vcombine.low %v1007_v23, %v1011_v24  ;;  %v951_v20 = vld [vmem:[#allocation11 + $0x398] sm:$0xff] }
 0x29e   :  { %2653 = vmatprep.subr.bf16.mxu0 %v6697_v39  ;;  %v6515_v39 = vcombine.high %v871_v30, %v875_v33  ;;  %v955_v21 = vld [vmem:[#allocation11 + $0x3b8] sm:$0xff] }
 0x29f   :  { %v1083_v23 = vld [vmem:[#allocation11 + $0x7b8] sm:$0xff] }
 0x2a0   :  { %2611 = vmatpush2.bf16.msra.mxu1 %v6568_v47  ;;  %v6642_v47 = vcombine.low %v999_v34, %v1003_v35 }
 0x2a1   :  { %2654 = vmatpush2.bf16.msra.mxu0 %v6696_v48  ;;  %2612 = vmatprep.subr.bf16.mxu1 %v6561_v49  ;;  %v6507_v48 = vcombine.high %v863_v40, %v867_v41  ;;  %v6635_v49 = vcombine.high %v991_v45, %v995_v46  ;;  %v939_v40 = vld [vmem:[#allocation11 + $0x338] sm:$0xff] }
 0x2a2   :  { %2655 = vmatprep.subr.bf16.mxu0 %v6689_v50  ;;  %v855_v50 = vld [vmem:[#allocation11 + $0x98] sm:$0xff] }
 0x2a3   :  { %v6498_v55 = vcombine.low %v855_v50, %v859_v54  ;;  %v1063_v41 = vld [vmem:[#allocation11 + $0x718] sm:$0xff] }
 0x2a4   :  { %2613 = vmatpush2.bf16.msra.mxu1 %v6560_v63  ;;  %v6634_v63 = vcombine.low %v991_v45, %v995_v46  ;;  %v1067_v45 = vld [vmem:[#allocation11 + $0x738] sm:$0xff] }
 0x2a5   :  { %2656 = vmatpush2.bf16.msra.mxu0 %v6688_v0  ;;  %2614 = vmatprep.subr.bf16.mxu1 %v6553_v1  ;;  %v6499_v0 = vcombine.high %v855_v50, %v859_v54  ;;  %v6627_v1 = vcombine.high %v983_v58, %v987_v59  ;;  %v931_v50 = vld [vmem:[#allocation11 + $0x2f8] sm:$0xff] }
 0x2a6   :  { %2657 = vmatprep.subr.bf16.mxu0 %v6681_v2  ;;  %v847_v2 = vld [vmem:[#allocation11 + $0x58] sm:$0xff] }
 0x2a7   :  { %v6490_v8 = vcombine.low %v847_v2, %v851_v51  ;;  %v1055_v54 = vld [vmem:[#allocation11 + $0x6d8] sm:$0xff] }
 0x2a8   :  { %2615 = vmatpush2.bf16.msra.mxu1 %v6552_v56  ;;  %v6626_v56 = vcombine.low %v983_v58, %v987_v59  ;;  %v1059_v58 = vld [vmem:[#allocation11 + $0x6f8] sm:$0xff] }
 0x2a9   :  { %2658 = vmatpush2.bf16.msra.mxu0 %v6680_v57  ;;  %2616 = vmatprep.subr.bf16.mxu1 %v6545_v3  ;;  %v6491_v57 = vcombine.high %v847_v2, %v851_v51  ;;  %v6619_v3 = vcombine.high %v975_v52, %v979_v53  ;;  %v923_v2 = vld [vmem:[#allocation11 + $0x2b8] sm:$0xff] }
 0x2aa   :  { %2659 = vmatprep.subr.bf16.mxu0 %v6673_v4  ;;  %v839_v4 = vld [vmem:[#allocation11 + $0x18] sm:$0xff] }
 0x2ab   :  { %v6482_v16 = vcombine.low %v839_v4, %v843_v5  ;;  %v1047_v51 = vld [vmem:[#allocation11 + $0x698] sm:$0xff] }
 0x2ac   :  { %2617 = vmatpush2.bf16.msra.mxu1 %v6544_v9  ;;  %v6618_v9 = vcombine.low %v975_v52, %v979_v53  ;;  %v1051_v52 = vld [vmem:[#allocation11 + $0x6b8] sm:$0xff] }
 0x2ad   :  { %2660 = vmatpush2.bf16.msra.mxu0 %v6672_v10  ;;  %2672 = vmatprep.subr.bf16.mxu1 %v6539_v11  ;;  %v6483_v10 = vcombine.high %v839_v4, %v843_v5  ;;  %v6611_v11 = vcombine.high %v967_v6, %v971_v7  ;;  %v915_v4 = vld [vmem:[#allocation11 + $0x278] sm:$0xff] }
 0x2ae   :  { %2715 = vmatprep.subr.bf16.mxu0 %v6667_v12  ;;  %v959_v12 = vld [vmem:[#allocation11 + $0x3d8] sm:$0xff] }
 0x2af   :  { %2619 = vmatmul.mubr.bf16.vlgmr.msra.gmra.mxu1 %v8432_v42  ;;  %v6602_v24 = vcombine.low %v959_v12, %v963_v13  ;;  %v1039_v5 = vld [vmem:[#allocation11 + $0x658] sm:$0xff] }
 0x2b0   :  { %2662 = vmatmul.mubr.bf16.vlgmr.msra.gmra.mxu0 %v8436_v44  ;;  %2673 = vmatpush1.bf16.msra.mxu1 %v6538_v15  ;;  %v1091_v15 = vld [vmem:[#allocation11 + $0x7f8] sm:$0xff] }
 0x2b1   :  { %2704 = vmatprep.mubr.bf16.mxu1 %v8430_v37  ;;  %2716 = vmatpush1.bf16.msra.mxu0 %v6666_v18  ;;  %v6643_v37 = vcombine.high %v999_v34, %v1003_v35  ;;  %v6603_v18 = vcombine.high %v959_v12, %v963_v13  ;;  %v1075_v34 = vld [vmem:[#allocation11 + $0x778] sm:$0xff]  ;;  %v6594_v35 = vcombine.low %v951_v20, %v955_v21 }
 0x2b2   :  { %2747 = vmatprep.mubr.bf16.mxu0 %v8434_v43  ;;  %2674 = vmatprep.subr.bf16.mxu1 %v6531_v19  ;;  %v6514_v43 = vcombine.low %v871_v30, %v875_v33  ;;  %v6731_v19 = vcombine.high %v1087_v14, %v1091_v15  ;;  %v947_v30 = vld [vmem:[#allocation11 + $0x378] sm:$0xff] }
 0x2b3   :  { %2717 = vmatprep.subr.bf16.mxu0 %v6659_v22  ;;  %v1079_v22 = vld [vmem:[#allocation11 + $0x798] sm:$0xff] }
 0x2b4   :  { %2675 = vmatpush1.bf16.msra.mxu1 %v6530_v25  ;;  %v6730_v25 = vcombine.low %v1087_v14, %v1091_v15  ;;  %v1071_v33 = vld [vmem:[#allocation11 + $0x758] sm:$0xff] }
 0x2b5   :  { %2718 = vmatpush1.bf16.msra.mxu0 %v6658_v26  ;;  %2676 = vmatprep.subr.bf16.mxu1 %v6523_v27  ;;  %v6595_v26 = vcombine.high %v951_v20, %v955_v21  ;;  %v6723_v27 = vcombine.high %v1079_v22, %v1083_v23  ;;  %v1043_v6 = vld [vmem:[#allocation11 + $0x678] sm:$0xff]  ;;  %v7411_v21 = vld [vmem:[#allocation14 + $0x18c] ss:$28 sps:$4 sm:$0xff]  }
 0x2b6   :  { %2719 = vmatprep.subr.bf16.mxu0 %v6651_v28  ;;  %v943_v28 = vld [vmem:[#allocation11 + $0x358] sm:$0xff] }
 0x2b7   :  { %v6586_v46 = vcombine.low %v943_v28, %v947_v30  ;;  %v907_v12 = vld [vmem:[#allocation11 + $0x238] sm:$0xff] }
 0x2b8   :  { %2677 = vmatpush1.bf16.msra.mxu1 %v6522_v36  ;;  %v6722_v36 = vcombine.low %v1079_v22, %v1083_v23  ;;  %v1031_v13 = vld [vmem:[#allocation11 + $0x618] sm:$0xff]  ;;  %v7426_v22 = vld [vmem:[#allocation14 + $0x50c] ss:$28 sps:$4 sm:$0xff]  }
 0x2b9   :  { %2720 = vmatpush1.bf16.msra.mxu0 %v6650_v38  ;;  %2678 = vmatprep.subr.bf16.mxu1 %v6515_v39  ;;  %v6587_v38 = vcombine.high %v943_v28, %v947_v30  ;;  %v6715_v39 = vcombine.high %v1071_v33, %v1075_v34  ;;  %v1035_v14 = vld [vmem:[#allocation11 + $0x638] sm:$0xff]  ;;  %v7409_v23 = vld [vmem:[#allocation14 + $0x188] ss:$28 sps:$4 sm:$0xff]  }
 0x2ba   :  { %2721 = vmatprep.subr.bf16.mxu0 %v6643_v37  ;;  %v935_v37 = vld [vmem:[#allocation11 + $0x318] sm:$0xff]  ;;  %v6674_v20 = vcombine.low %v1031_v13, %v1035_v14 }
 0x2bb   :  { %v6578_v59 = vcombine.low %v935_v37, %v939_v40  ;;  %v7432_v28 = vld [vmem:[#allocation14 + $0x4d4] ss:$28 sps:$4 sm:$0xff]  }
 0x2bc   :  { %2679 = vmatpush1.bf16.msra.mxu1 %v6514_v43  ;;  %v6714_v43 = vcombine.low %v1071_v33, %v1075_v34  ;;  %v7412_v34 = vld [vmem:[#allocation14 + $0x150] ss:$28 sps:$4 sm:$0xff]  }
 0x2bd   :  { %2722 = vmatpush1.bf16.msra.mxu0 %v6642_v47  ;;  %2680 = vmatprep.subr.bf16.mxu1 %v6507_v48  ;;  %v6579_v47 = vcombine.high %v935_v37, %v939_v40  ;;  %v6707_v48 = vcombine.high %v1063_v41, %v1067_v45  ;;  %v7438_v40 = vld [vmem:[#allocation14 + $0x49c] ss:$28 sps:$4 sm:$0xff]  }
 0x2be   :  { %2723 = vmatprep.subr.bf16.mxu0 %v6635_v49  ;;  %v927_v49 = vld [vmem:[#allocation11 + $0x2d8] sm:$0xff] }
 0x2bf   :  { %v6570_v53 = vcombine.low %v927_v49, %v931_v50 }
 0x2c0   :  { %2681 = vmatpush1.bf16.msra.mxu1 %v6506_v62  ;;  %v6706_v62 = vcombine.low %v1063_v41, %v1067_v45  ;;  %v7415_v45 = vld [vmem:[#allocation14 + $0x118] ss:$28 sps:$4 sm:$0xff]  }
 0x2c1   :  { %2724 = vmatpush1.bf16.msra.mxu0 %v6634_v63  ;;  %2682 = vmatprep.subr.bf16.mxu1 %v6499_v0  ;;  %v6571_v63 = vcombine.high %v927_v49, %v931_v50  ;;  %v6699_v0 = vcombine.high %v1055_v54, %v1059_v58 }
 0x2c2   :  { %2725 = vmatprep.subr.bf16.mxu0 %v6627_v1  ;;  %v919_v1 = vld [vmem:[#allocation11 + $0x298] sm:$0xff] }
 0x2c3   :  { %v6562_v7 = vcombine.low %v919_v1, %v923_v2 }
 0x2c4   :  { %2683 = vmatpush1.bf16.msra.mxu1 %v6498_v55  ;;  %v6698_v55 = vcombine.low %v1055_v54, %v1059_v58  ;;  %v7418_v54 = vld [vmem:[#allocation14 + $0xe0] ss:$28 sps:$4 sm:$0xff]  }
 0x2c5   :  { %2726 = vmatpush1.bf16.msra.mxu0 %v6626_v56  ;;  %2684 = vmatprep.subr.bf16.mxu1 %v6491_v57  ;;  %v6563_v56 = vcombine.high %v919_v1, %v923_v2  ;;  %v6691_v57 = vcombine.high %v1047_v51, %v1051_v52  ;;  %v7421_v2 = vld [vmem:[#allocation14 + $0xa8] ss:$28 sps:$4 sm:$0xff]  }
 0x2c6   :  { %2727 = vmatprep.subr.bf16.mxu0 %v6619_v3  ;;  %v911_v3 = vld [vmem:[#allocation11 + $0x258] sm:$0xff] }
 0x2c7   :  { %v6554_v15 = vcombine.low %v911_v3, %v915_v4 }
 0x2c8   :  { %2685 = vmatpush1.bf16.msra.mxu1 %v6490_v8  ;;  %v6690_v8 = vcombine.low %v1047_v51, %v1051_v52 }
 0x2c9   :  { %2728 = vmatpush1.bf16.msra.mxu0 %v6618_v9  ;;  %2686 = vmatprep.subr.bf16.mxu1 %v6483_v10  ;;  %v6555_v9 = vcombine.high %v911_v3, %v915_v4  ;;  %v6683_v10 = vcombine.high %v1039_v5, %v1043_v6  ;;  %v7427_v3 = vld [vmem:[#allocation14 + $0x70] ss:$28 sps:$4 sm:$0xff]   ;;  %v7435_v4 = vld [vmem:[#allocation14 + $0x3c] ss:$28 sps:$4 sm:$0xff]  }
 0x2ca   :  { %2729 = vmatprep.subr.bf16.mxu0 %v6611_v11  ;;  %v903_v11 = vld [vmem:[#allocation11 + $0x218] sm:$0xff] }
 0x2cc   :  { %2687 = vmatpush1.bf16.msra.mxu1 %v6482_v16  ;;  %v6682_v16 = vcombine.low %v1039_v5, %v1043_v6  ;;  %v7454_v5 = vld [vmem:[#allocation14 + $0x3f0] ss:$28 sps:$4 sm:$0xff]   ;;  %v7462_v6 = vld [vmem:[#allocation14 + $0x3bc] ss:$28 sps:$4 sm:$0xff]  }
 0x2cd   :  { %2730 = vmatpush1.bf16.msra.mxu0 %v6610_v17  ;;  %2688 = vmatprep.subr.bf16.mxu1 %v6603_v18  ;;  %v6547_v17 = vcombine.high %v903_v11, %v907_v12  ;;  %v6675_v18 = vcombine.high %v1031_v13, %v1035_v14  ;;  %v7466_v13 = vld [vmem:[#allocation14 + $0x380] ss:$28 sps:$4 sm:$0xff]   ;;  %v7474_v14 = vld [vmem:[#allocation14 + $0x6cc] ss:$28 sps:$4 sm:$0xff]  }
 0x2ce   :  { %2731 = vmatprep.subr.bf16.mxu0 %v6731_v19  ;;  %v6546_v19 = vcombine.low %v903_v11, %v907_v12  ;;  %v7439_v11 = vld [vmem:[#allocation14] ss:$28 sps:$4 sm:$0xff]   ;;  %v7447_v12 = vld [vmem:[#allocation14 + $0x34c] ss:$28 sps:$4 sm:$0xff]  }
 0x2d0   :  { %2689 = vmatpush2.bf16.msra.mxu1 %v6602_v24  ;;  %v8458_v24 = vld [vmem:[#allocation13] sm:$0xff] }
 0x2d1   :  { %2732 = vmatpush2.bf16.msra.mxu0 %v6730_v25  ;;  %2690 = vmatprep.subr.bf16.mxu1 %v6595_v26  ;;  %v7414_v25 = vld [vmem:[#allocation14 + $0x154] ss:$28 sps:$4 sm:$0xff]   ;;  %v7424_v26 = vld [vmem:[#allocation14 + $0x508] ss:$28 sps:$4 sm:$0xff]  }
 0x2d2   :  { %2733 = vmatprep.subr.bf16.mxu0 %v6723_v27  ;;  %v1101_v27 = vrot.slane %v8458_v24, %v8399_v32 }
 0x2d4   :  { %2691 = vmatpush2.bf16.msra.mxu1 %v6594_v35 }
 0x2d5   :  { %2734 = vmatpush2.bf16.msra.mxu0 %v6722_v36  ;;  %2692 = vmatprep.subr.bf16.mxu1 %v6587_v38  ;;  %v7417_v36 = vld [vmem:[#allocation14 + $0x11c] ss:$28 sps:$4 sm:$0xff]   ;;  %v7430_v38 = vld [vmem:[#allocation14 + $0x4d0] ss:$28 sps:$4 sm:$0xff]  }
 0x2d6   :  { %2735 = vmatprep.subr.bf16.mxu0 %v6715_v39 }
 0x2d8   :  { %2693 = vmatpush2.bf16.msra.mxu1 %v6586_v46 }
 0x2d9   :  { %2736 = vmatpush2.bf16.msra.mxu0 %v6714_v43  ;;  %2694 = vmatprep.subr.bf16.mxu1 %v6579_v47  ;;  %v7420_v43 = vld [vmem:[#allocation14 + $0xe4] ss:$28 sps:$4 sm:$0xff]   ;;  %v7436_v47 = vld [vmem:[#allocation14 + $0x498] ss:$28 sps:$4 sm:$0xff]  }
 0x2da   :  { %2737 = vmatprep.subr.bf16.mxu0 %v6707_v48  ;;  %v7444_v48 = vld [vmem:[#allocation14 + $0x464] ss:$28 sps:$4 sm:$0xff]  }
 0x2dc   :  { %2695 = vmatpush2.bf16.msra.mxu1 %v6578_v59 }
 0x2dd   :  { %2738 = vmatpush2.bf16.msra.mxu0 %v6706_v62  ;;  %2696 = vmatprep.subr.bf16.mxu1 %v6571_v63  ;;  %v7423_v62 = vld [vmem:[#allocation14 + $0xac] ss:$28 sps:$4 sm:$0xff]   ;;  %v7442_v63 = vld [vmem:[#allocation14 + $0x460] ss:$28 sps:$4 sm:$0xff]  }
 0x2de   :  { %2739 = vmatprep.subr.bf16.mxu0 %v6699_v0  ;;  %v7450_v0 = vld [vmem:[#allocation14 + $0x42c] ss:$28 sps:$4 sm:$0xff]  }
 0x2e0   :  { %2697 = vmatpush2.bf16.msra.mxu1 %v6570_v53  ;;  %v7429_v53 = vld [vmem:[#allocation14 + $0x74] ss:$28 sps:$4 sm:$0xff]  }
 0x2e1   :  { %2740 = vmatpush2.bf16.msra.mxu0 %v6698_v55  ;;  %2698 = vmatprep.subr.bf16.mxu1 %v6563_v56  ;;  %v7448_v55 = vld [vmem:[#allocation14 + $0x428] ss:$28 sps:$4 sm:$0xff]  }
 0x2e2   :  { %2741 = vmatprep.subr.bf16.mxu0 %v6691_v57  ;;  %v7456_v57 = vld [vmem:[#allocation14 + $0x3f4] ss:$28 sps:$4 sm:$0xff]  }
 0x2e4   :  { %2699 = vmatpush2.bf16.msra.mxu1 %v6562_v7  ;;  %v7433_v7 = vld [vmem:[#allocation14 + $0x38] ss:$28 sps:$4 sm:$0xff]  }
 0x2e5   :  { %2742 = vmatpush2.bf16.msra.mxu0 %v6690_v8  ;;  %2700 = vmatprep.subr.bf16.mxu1 %v6555_v9  ;;  %v7441_v8 = vld [vmem:[#allocation14 + $0x4] ss:$28 sps:$4 sm:$0xff]   ;;  %v7460_v9 = vld [vmem:[#allocation14 + $0x3b8] ss:$28 sps:$4 sm:$0xff]  }
 0x2e6   :  { %2743 = vmatprep.subr.bf16.mxu0 %v6683_v10  ;;  %v7468_v10 = vld [vmem:[#allocation14 + $0x384] ss:$28 sps:$4 sm:$0xff]  }
 0x2e8   :  { %2701 = vmatpush2.bf16.msra.mxu1 %v6554_v15  ;;  %v7445_v15 = vld [vmem:[#allocation14 + $0x348] ss:$28 sps:$4 sm:$0xff]  }
 0x2e9   :  { %2744 = vmatpush2.bf16.msra.mxu0 %v6682_v16  ;;  %2702 = vmatprep.subr.bf16.mxu1 %v6547_v17  ;;  %v7453_v16 = vld [vmem:[#allocation14 + $0x314] ss:$28 sps:$4 sm:$0xff]   ;;  %v7472_v17 = vld [vmem:[#allocation14 + $0x6c8] ss:$28 sps:$4 sm:$0xff]  }
 0x2ea   :  { %2745 = vmatprep.subr.bf16.mxu0 %v6675_v18  ;;  %v7480_v18 = vld [vmem:[#allocation14 + $0x694] ss:$28 sps:$4 sm:$0xff]  }
 0x2ec   :  { %2703 = vmatpush2.bf16.msra.mxu1 %v6546_v19  ;;  %v7451_v19 = vld [vmem:[#allocation14 + $0x310] ss:$28 sps:$4 sm:$0xff]  }
 0x2ed   :  { %2746 = vmatpush2.bf16.msra.mxu0 %v6674_v20  ;;  %5667 = vmatprep.subr.bf16.mxu1 %v7411_v21  ;;  %v7459_v20 = vld [vmem:[#allocation14 + $0x2dc] ss:$28 sps:$4 sm:$0xff]   ;;  %v7478_v21 = vld [vmem:[#allocation14 + $0x690] ss:$28 sps:$4 sm:$0xff]  }
 0x2ee   :  { %5710 = vmatprep.subr.bf16.mxu0 %v7426_v22  ;;  %v7486_v22 = vld [vmem:[#allocation14 + $0x65c] ss:$28 sps:$4 sm:$0xff]  }
 0x2ef   :  { %2705 = vmatmul.mubr.bf16.vlgmr.msra.gmra.mxu1 %v8432_v42  ;;  %v8463_v30 = vpop.f32.mrf.mxu1 }
 0x2f0   :  { %2748 = vmatmul.mubr.bf16.vlgmr.msra.gmra.mxu0 %v8436_v44  ;;  %v8466_v33 = vpop.f32.mrf.mxu0  ;;  %5668 = vmatpush1.bf16.msra.mxu1 %v7409_v23  ;;  %v7457_v23 = vld [vmem:[#allocation14 + $0x2d8] ss:$28 sps:$4 sm:$0xff]  }
 0x2f1   :  { %v2450_v35 = vpop.f32.mrf.mxu1  ;;  %5669 = vmatprep.subr.bf16.mxu1 %v7414_v25  ;;  %5711 = vmatpush1.bf16.msra.mxu0 %v7424_v26  ;;  %v7465_v25 = vld [vmem:[#allocation14 + $0x2a4] ss:$28 sps:$4 sm:$0xff]   ;;  %v7484_v26 = vld [vmem:[#allocation14 + $0x658] ss:$28 sps:$4 sm:$0xff]  }
 0x2f2   :  { %v2451_v39 = vadd.f32 %v2450_v35, %v1101_v27  ;;  %v2493_v37 = vpop.f32.mrf.mxu0  ;;  %5712 = vmatprep.subr.bf16.mxu0 %v7432_v28  ;;  %v7463_v28 = vld [vmem:[#allocation14 + $0x2a0] ss:$28 sps:$4 sm:$0xff]  }
 0x2f3   :  { %v8468_v41 = vpop.f32.mrf.mxu1  ;;  %v7490_v35 = vld [vmem:[#allocation14 + $0x620] ss:$28 sps:$4 sm:$0xff]  }
 0x2f4   :  { %v8470_v42 = vpop.f32.mrf.mxu0  ;;  %5670 = vmatpush1.bf16.msra.mxu1 %v7412_v34  ;;  %v2494_v44 = vadd.f32 %v2493_v37, %v2451_v39  ;;  %v7471_v34 = vld [vmem:[#allocation14 + $0x26c] ss:$28 sps:$4 sm:$0xff]   ;;  %v7477_v37 = vld [vmem:[#allocation14 + $0x234] ss:$28 sps:$4 sm:$0xff]  }
 0x2f5   :  { %v2454_v46 = vpop.f32.mrf.mxu1  ;;  %5671 = vmatprep.subr.bf16.mxu1 %v7417_v36  ;;  %5713 = vmatpush1.bf16.msra.mxu0 %v7430_v38  ;;  %v7495_v36 = vld [vmem:[#allocation14 + $0x5ec] ss:$28 sps:$4 sm:$0xff]   ;;  %v1097_v38 = vrot.slane %v8458_v24, %v8396_v31 }
 0x2f6   :  { %5714 = vmatprep.subr.bf16.mxu0 %v7438_v40  ;;  %v2455_v49 = vadd.f32 %v2454_v46, %v1101_v27  ;;  %v2497_v50 = vpop.f32.mrf.mxu0  ;;  %v2775_v58 = vmul.f32 0.2, %v2494_v44  ;;  %vm2759_vm12 = vcmp.ge.f32.partialorder %v2494_v44, 0.0  ;;  %v7492_v27 = vld [vmem:[#allocation14 + $0x624] ss:$28 sps:$4 sm:$0xff]  }
 0x2f7   :  { %v7469_v39 = vld [vmem:[#allocation14 + $0x268] ss:$28 sps:$4 sm:$0xff]   ;;  %v2449_v46 = vadd.f32 %v8463_v30, %v1097_v38 }
 0x2f8   :  { %5672 = vmatpush1.bf16.msra.mxu1 %v7415_v45  ;;  %v2498_v59 = vadd.f32 %v2497_v50, %v2455_v49  ;;  %v2791_v51 = vsel %vm2759_vm12, %v2494_v44, %v2775_v58  ;;  %v7493_v40 = vld [vmem:[#allocation14 + $0x5e8] ss:$28 sps:$4 sm:$0xff]   ;;  %v2453_v45 = vadd.f32 %v8468_v41, %v1097_v38  ;;  %v7498_v44 = vld [vmem:[#allocation14 + $0x5b4] ss:$28 sps:$4 sm:$0xff]   ;;  %v7501_v50 = vld [vmem:[#allocation14 + $0x57c] ss:$28 sps:$4 sm:$0xff]  }
 0x2f9   :  { %5673 = vmatprep.subr.bf16.mxu1 %v7420_v43  ;;  %5715 = vmatpush1.bf16.msra.mxu0 %v7436_v47  ;;  %v7475_v43 = vld [vmem:[#allocation14 + $0x230] ss:$28 sps:$4 sm:$0xff]   ;;  %v7483_v47 = vld [vmem:[#allocation14 + $0x1fc] ss:$28 sps:$4 sm:$0xff]   ;;  %v7489_v41 = vld [vmem:[#allocation14 + $0x1c4] ss:$28 sps:$4 sm:$0xff]  }
 0x2fa   :  { %5716 = vmatprep.subr.bf16.mxu0 %v7444_v48  ;;  %vm2767_vm13 = vcmp.ge.f32.partialorder %v2498_v59, 0.0  ;;  %v2783_v1 = vmul.f32 0.2, %v2498_v59  ;;  %v7496_v48 = vld [vmem:[#allocation14 + $0x5b0] ss:$28 sps:$4 sm:$0xff]   ;;  %v2496_v49 = vadd.f32 %v8470_v42, %v2453_v45 }
 0x2fb   :  { %v7481_v58 = vld [vmem:[#allocation14 + $0x1f8] ss:$28 sps:$4 sm:$0xff]   ;;  %v7504_v30 = vld [vmem:[#allocation14 + $0x544] ss:$28 sps:$4 sm:$0xff]  }
 0x2fc   :  { %5674 = vmatpush1.bf16.msra.mxu1 %v7418_v54  ;;  %v2799_v52 = vsel %vm2767_vm13, %v2498_v59, %v2783_v1  ;;  %v2492_v54 = vadd.f32 %v8466_v33, %v2449_v46  ;;  %v7499_v59 = vld [vmem:[#allocation14 + $0x578] ss:$28 sps:$4 sm:$0xff]   ;;  %vm2766_vm14 = vcmp.ge.f32.partialorder %v2496_v49, 0.0  ;;  %v7502_v42 = vld [vmem:[#allocation14 + $0x540] ss:$28 sps:$4 sm:$0xff]  }
 0x2fd   :  { %5675 = vmatprep.subr.bf16.mxu1 %v7423_v62  ;;  %5717 = vmatpush1.bf16.msra.mxu0 %v7442_v63  ;;  %v8472_v56 = vpack.c.bf16 %v2799_v52, %v2791_v51  ;;  %v2782_v62 = vmul.f32 0.2, %v2496_v49  ;;  %v7507_v1 = vld [vmem:[#allocation14 + $0x88c] ss:$28 sps:$4 sm:$0xff]  }
 0x2fe   :  { %5718 = vmatprep.subr.bf16.mxu0 %v7450_v0  ;;  %v2774_v63 = vmul.f32 0.2, %v2492_v54  ;;  %v7487_v0 = vld [vmem:[#allocation14 + $0x1c0] ss:$28 sps:$4 sm:$0xff]   ;;  %vm2758_vm15 = vcmp.ge.f32.partialorder %v2492_v54, 0.0 }
 0x2ff   :  { %5699 = vmatprep.mubr.bf16.mxu1 %v8472_v56  ;;  %v7555_v33 = vld [vmem:[#allocation14 + $0xc0c] ss:$28 sps:$4 sm:$0xff]  }
 0x300   :  { %5676 = vmatpush1.bf16.msra.mxu1 %v7421_v2  ;;  %v2798_v2 = vsel %vm2766_vm14, %v2496_v49, %v2782_v62  ;;  %v2790_v51 = vsel %vm2758_vm15, %v2492_v54, %v2774_v63  ;;  %v7505_v52 = vld [vmem:[#allocation14 + $0x888] ss:$28 sps:$4 sm:$0xff]   ;;  %v7525_v49 = vld [vmem:[#allocation14 + $0x73c] ss:$28 sps:$4 sm:$0xff]  }
 0x301   :  { %5677 = vmatprep.subr.bf16.mxu1 %v7429_v53  ;;  %5719 = vmatpush1.bf16.msra.mxu0 %v7448_v55  ;;  %v8481_v53 = vpack.c.bf16 %v2798_v2, %v2790_v51  ;;  %v7510_v55 = vld [vmem:[#allocation14 + $0x854] ss:$28 sps:$4 sm:$0xff]   ;;  %v7517_v38 = vld [vmem:[#allocation14 + $0x7a8] ss:$28 sps:$4 sm:$0xff]   ;;  %v7567_v54 = vld [vmem:[#allocation14 + $0xb9c] ss:$28 sps:$4 sm:$0xff]  }
 0x302   :  { %5720 = vmatprep.subr.bf16.mxu0 %v7456_v57  ;;  %v1105_v57 = vrot.slane %v8458_v24, %v8423_v61  ;;  %v7553_v46 = vld [vmem:[#allocation14 + $0xc08] ss:$28 sps:$4 sm:$0xff]   ;;  %v7534_v2 = vld [vmem:[#allocation14 + $0xa14] ss:$28 sps:$4 sm:$0xff]  }
 0x303   :  { %v7573_v62 = vld [vmem:[#allocation14 + $0xb64] ss:$28 sps:$4 sm:$0xff]   ;;  %v7531_v63 = vld [vmem:[#allocation14 + $0xa4c] ss:$28 sps:$4 sm:$0xff]   ;;  %v7585_v51 = vld [vmem:[#allocation14 + $0xaf4] ss:$28 sps:$4 sm:$0xff]  }
 0x304   :  { %5678 = vmatpush1.bf16.msra.mxu1 %v7427_v3  ;;  %v1109_v3 = vrot.slane %v8458_v24, %v8420_v60 }
 0x305   :  { %5679 = vmatprep.subr.bf16.mxu1 %v7435_v4  ;;  %5721 = vmatpush1.bf16.msra.mxu0 %v7454_v5 }
 0x306   :  { %5722 = vmatprep.subr.bf16.mxu0 %v7462_v6  ;;  %v7508_v6 = vld [vmem:[#allocation14 + $0x850] ss:$28 sps:$4 sm:$0xff]  }
 0x308   :  { %5680 = vmatpush1.bf16.msra.mxu1 %v7433_v7 }
 0x309   :  { %5681 = vmatprep.subr.bf16.mxu1 %v7441_v8  ;;  %5723 = vmatpush1.bf16.msra.mxu0 %v7460_v9  ;;  %v7513_v8 = vld [vmem:[#allocation14 + $0x81c] ss:$28 sps:$4 sm:$0xff]  }
 0x30a   :  { %5724 = vmatprep.subr.bf16.mxu0 %v7468_v10 }
 0x30c   :  { %5682 = vmatpush1.bf16.msra.mxu1 %v7439_v11 }
 0x30d   :  { %5683 = vmatprep.subr.bf16.mxu1 %v7447_v12  ;;  %5725 = vmatpush1.bf16.msra.mxu0 %v7466_v13 }
 0x30e   :  { %5726 = vmatprep.subr.bf16.mxu0 %v7474_v14 }
 0x310   :  { %5684 = vmatpush2.bf16.msra.mxu1 %v7445_v15  ;;  %v7511_v15 = vld [vmem:[#allocation14 + $0x818] ss:$28 sps:$4 sm:$0xff]  }
 0x311   :  { %5685 = vmatprep.subr.bf16.mxu1 %v7453_v16  ;;  %5727 = vmatpush2.bf16.msra.mxu0 %v7472_v17 }
 0x312   :  { %5728 = vmatprep.subr.bf16.mxu0 %v7480_v18  ;;  %v7516_v18 = vld [vmem:[#allocation14 + $0x7e4] ss:$28 sps:$4 sm:$0xff]  }
 0x314   :  { %5686 = vmatpush2.bf16.msra.mxu1 %v7451_v19 }
 0x315   :  { %5687 = vmatprep.subr.bf16.mxu1 %v7459_v20  ;;  %5729 = vmatpush2.bf16.msra.mxu0 %v7478_v21 }
 0x316   :  { %5730 = vmatprep.subr.bf16.mxu0 %v7486_v22 }
 0x318   :  { %5688 = vmatpush2.bf16.msra.mxu1 %v7457_v23 }
 0x319   :  { %5689 = vmatprep.subr.bf16.mxu1 %v7465_v25  ;;  %5731 = vmatpush2.bf16.msra.mxu0 %v7484_v26  ;;  %v7514_v25 = vld [vmem:[#allocation14 + $0x7e0] ss:$28 sps:$4 sm:$0xff]  }
 0x31a   :  { %5732 = vmatprep.subr.bf16.mxu0 %v7492_v27 }
 0x31c   :  { %5690 = vmatpush2.bf16.msra.mxu1 %v7463_v28  ;;  %v7519_v28 = vld [vmem:[#allocation14 + $0x7ac] ss:$28 sps:$4 sm:$0xff]  }
 0x31d   :  { %5691 = vmatprep.subr.bf16.mxu1 %v7471_v34  ;;  %5733 = vmatpush2.bf16.msra.mxu0 %v7490_v35 }
 0x31e   :  { %5734 = vmatprep.subr.bf16.mxu0 %v7495_v36 }
 0x320   :  { %5692 = vmatpush2.bf16.msra.mxu1 %v7469_v39 }
 0x321   :  { %5693 = vmatprep.subr.bf16.mxu1 %v7477_v37  ;;  %5735 = vmatpush2.bf16.msra.mxu0 %v7493_v40  ;;  %v7522_v40 = vld [vmem:[#allocation14 + $0x774] ss:$28 sps:$4 sm:$0xff]  }
 0x322   :  { %5736 = vmatprep.subr.bf16.mxu0 %v7498_v44 }
 0x324   :  { %5694 = vmatpush2.bf16.msra.mxu1 %v7475_v43 }
 0x325   :  { %5695 = vmatprep.subr.bf16.mxu1 %v7483_v47  ;;  %5737 = vmatpush2.bf16.msra.mxu0 %v7496_v48  ;;  %v7561_v47 = vld [vmem:[#allocation14 + $0xbd4] ss:$28 sps:$4 sm:$0xff]  }
 0x326   :  { %5738 = vmatprep.subr.bf16.mxu0 %v7501_v50  ;;  %v7520_v48 = vld [vmem:[#allocation14 + $0x770] ss:$28 sps:$4 sm:$0xff]  }
 0x327   :  { %v7559_v50 = vld [vmem:[#allocation14 + $0xbd0] ss:$28 sps:$4 sm:$0xff]  }
 0x328   :  { %5696 = vmatpush2.bf16.msra.mxu1 %v7481_v58  ;;  %v7523_v58 = vld [vmem:[#allocation14 + $0x738] ss:$28 sps:$4 sm:$0xff]  }
 0x329   :  { %5697 = vmatprep.subr.bf16.mxu1 %v7489_v41  ;;  %5739 = vmatpush2.bf16.msra.mxu0 %v7499_v59  ;;  %v7528_v41 = vld [vmem:[#allocation14 + $0x704] ss:$28 sps:$4 sm:$0xff]   ;;  %v7565_v59 = vld [vmem:[#allocation14 + $0xb98] ss:$28 sps:$4 sm:$0xff]  }
 0x32a   :  { %5740 = vmatprep.subr.bf16.mxu0 %v7504_v30  ;;  %v7526_v30 = vld [vmem:[#allocation14 + $0x700] ss:$28 sps:$4 sm:$0xff]  }
 0x32c   :  { %5698 = vmatpush2.bf16.msra.mxu1 %v7487_v0  ;;  %v7571_v0 = vld [vmem:[#allocation14 + $0xb60] ss:$28 sps:$4 sm:$0xff]  }
 0x32d   :  { %5741 = vmatpush2.bf16.msra.mxu0 %v7502_v42  ;;  %5753 = vmatprep.subr.bf16.mxu1 %v7507_v1  ;;  %v7579_v42 = vld [vmem:[#allocation14 + $0xb2c] ss:$28 sps:$4 sm:$0xff]  }
 0x32e   :  { %5796 = vmatprep.subr.bf16.mxu0 %v7555_v33  ;;  %v7529_v1 = vld [vmem:[#allocation14 + $0xa48] ss:$28 sps:$4 sm:$0xff]  }
 0x32f   :  { %v2534_v4 = vpop.f32.mrf.mxu1  ;;  %5700 = vmatmul.mubr.bf16.vlgmr.msra.gmra.mxu1 %v8481_v53  ;;  %v7577_v33 = vld [vmem:[#allocation14 + $0xb28] ss:$28 sps:$4 sm:$0xff]  }
 0x330   :  { %v2577_v5 = vpop.f32.mrf.mxu0  ;;  %5754 = vmatpush1.bf16.msra.mxu1 %v7505_v52  ;;  %v2535_v9 = vadd.f32 %v2534_v4, %v1105_v57  ;;  %v7532_v52 = vld [vmem:[#allocation14 + $0xa10] ss:$28 sps:$4 sm:$0xff]   ;;  %v7535_v4 = vld [vmem:[#allocation14 + $0x9d8] ss:$28 sps:$4 sm:$0xff]  }
 0x331   :  { %v2536_v7 = vpop.f32.mrf.mxu1  ;;  %5755 = vmatprep.subr.bf16.mxu1 %v7510_v55  ;;  %v7537_v55 = vld [vmem:[#allocation14 + $0x9dc] ss:$28 sps:$4 sm:$0xff]  }
 0x332   :  { %v2537_v10 = vadd.f32 %v2536_v7, %v1109_v3  ;;  %v2579_v11 = vpop.f32.mrf.mxu0  ;;  %v2578_v19 = vadd.f32 %v2577_v5, %v2535_v9  ;;  %v7540_v5 = vld [vmem:[#allocation14 + $0x9a4] ss:$28 sps:$4 sm:$0xff]   ;;  %v7543_v9 = vld [vmem:[#allocation14 + $0x96c] ss:$28 sps:$4 sm:$0xff]  }
 0x333   :  { %v2538_v12 = vpop.f32.mrf.mxu1  ;;  %v7597_v7 = vld [vmem:[#allocation14 + $0xa84] ss:$28 sps:$4 sm:$0xff]  }
 0x334   :  { %v2539_v13 = vadd.f32 %v2538_v12, %v1105_v57  ;;  %v2581_v14 = vpop.f32.mrf.mxu0  ;;  %5756 = vmatpush1.bf16.msra.mxu1 %v7508_v6  ;;  %v2580_v16 = vadd.f32 %v2579_v11, %v2537_v10  ;;  %v2776_v34 = vmul.f32 0.2, %v2578_v19  ;;  %vm2760_vm2 = vcmp.ge.f32.partialorder %v2578_v19, 0.0  ;;  %v7583_v57 = vld [vmem:[#allocation14 + $0xaf0] ss:$28 sps:$4 sm:$0xff]  }
 0x335   :  { %v2540_v17 = vpop.f32.mrf.mxu1  ;;  %5757 = vmatprep.subr.bf16.mxu1 %v7513_v8  ;;  %v7589_v6 = vld [vmem:[#allocation14 + $0xab8] ss:$28 sps:$4 sm:$0xff]   ;;  %v7538_v8 = vld [vmem:[#allocation14 + $0x9a0] ss:$28 sps:$4 sm:$0xff]   ;;  %v7603_v11 = vld [vmem:[#allocation14 + $0xdcc] ss:$28 sps:$4 sm:$0xff]  }
 0x336   :  { %v2582_v20 = vadd.f32 %v2581_v14, %v2539_v13  ;;  %v2541_v21 = vadd.f32 %v2540_v17, %v1109_v3  ;;  %v2583_v23 = vpop.f32.mrf.mxu0  ;;  %v2777_v26 = vmul.f32 0.2, %v2580_v16  ;;  %vm2761_vm1 = vcmp.ge.f32.partialorder %v2580_v16, 0.0  ;;  %v7591_v3 = vld [vmem:[#allocation14 + $0xabc] ss:$28 sps:$4 sm:$0xff]  }
 0x337   :  { %v2792_v45 = vsel %vm2760_vm2, %v2578_v19, %v2776_v34  ;;  %v7595_v10 = vld [vmem:[#allocation14 + $0xa80] ss:$28 sps:$4 sm:$0xff]   ;;  %v7541_v12 = vld [vmem:[#allocation14 + $0x968] ss:$28 sps:$4 sm:$0xff]   ;;  %v7546_v13 = vld [vmem:[#allocation14 + $0x934] ss:$28 sps:$4 sm:$0xff]  }
 0x338   :  { %v2784_v22 = vmul.f32 0.2, %v2582_v20  ;;  %5758 = vmatpush1.bf16.msra.mxu1 %v7511_v15  ;;  %vm2768_vm0 = vcmp.ge.f32.partialorder %v2582_v20, 0.0  ;;  %v2584_v27 = vadd.f32 %v2583_v23, %v2541_v21  ;;  %v2793_v39 = vsel %vm2761_vm1, %v2580_v16, %v2777_v26  ;;  %v7601_v14 = vld [vmem:[#allocation14 + $0xdc8] ss:$28 sps:$4 sm:$0xff]  }
 0x339   :  { %5759 = vmatprep.subr.bf16.mxu1 %v7516_v18  ;;  %v7609_v15 = vld [vmem:[#allocation14 + $0xd94] ss:$28 sps:$4 sm:$0xff]   ;;  %v7549_v17 = vld [vmem:[#allocation14 + $0x8fc] ss:$28 sps:$4 sm:$0xff]   ;;  %v7552_v21 = vld [vmem:[#allocation14 + $0x8c4] ss:$28 sps:$4 sm:$0xff]  }
 0x33a   :  { %vm2769_vm3 = vcmp.ge.f32.partialorder %v2584_v27, 0.0  ;;  %v2785_v35 = vmul.f32 0.2, %v2584_v27  ;;  %v2800_v36 = vsel %vm2768_vm0, %v2582_v20, %v2784_v22  ;;  %v7544_v16 = vld [vmem:[#allocation14 + $0x930] ss:$28 sps:$4 sm:$0xff]  }
 0x33b   :  { %v8490_v43 = vpack.c.bf16 %v2800_v36, %v2792_v45  ;;  %v7607_v18 = vld [vmem:[#allocation14 + $0xd90] ss:$28 sps:$4 sm:$0xff]   ;;  %v7615_v19 = vld [vmem:[#allocation14 + $0xd5c] ss:$28 sps:$4 sm:$0xff]   ;;  %v7621_v23 = vld [vmem:[#allocation14 + $0xd24] ss:$28 sps:$4 sm:$0xff]  }
 0x33c   :  { %5760 = vmatpush1.bf16.msra.mxu1 %v7514_v25  ;;  %v2801_v37 = vsel %vm2769_vm3, %v2584_v27, %v2785_v35  ;;  %v7547_v20 = vld [vmem:[#allocation14 + $0x8f8] ss:$28 sps:$4 sm:$0xff]   ;;  %v7550_v25 = vld [vmem:[#allocation14 + $0x8c0] ss:$28 sps:$4 sm:$0xff]   ;;  %v1112_v27 = vsub.s32 4, %v8393_v29 }
 0x33d   :  { %5761 = vmatprep.subr.bf16.mxu1 %v7519_v28  ;;  %v8488_v44 = vpack.c.bf16 %v2801_v37, %v2793_v39  ;;  %v7613_v22 = vld [vmem:[#allocation14 + $0xd58] ss:$28 sps:$4 sm:$0xff]   ;;  %v1116_v28 = vsub.s32 5, %v8393_v29  ;;  %v7619_v34 = vld [vmem:[#allocation14 + $0xd20] ss:$28 sps:$4 sm:$0xff]  }
 0x33e   :  { %v7558_v26 = vld [vmem:[#allocation14 + $0x194] ss:$28 sps:$4 sm:$0xff]   ;;  %v7627_v35 = vld [vmem:[#allocation14 + $0xcec] ss:$28 sps:$4 sm:$0xff]   ;;  %v1113_v36 = vrot.slane %v8458_v24, %v1112_v27 }
 0x33f   :  { %5742 = vmatprep.mubr.bf16.mxu0 %v8488_v44  ;;  %v7625_v39 = vld [vmem:[#allocation14 + $0xce8] ss:$28 sps:$4 sm:$0xff]  }
 0x340   :  { %5762 = vmatpush1.bf16.msra.mxu1 %v7517_v38  ;;  %5743 = vmatmul.mubr.bf16.vlgmr.msra.gmra.mxu0 %v8490_v43  ;;  %v1117_v38 = vrot.slane %v8458_v24, %v1116_v28 }
 0x341   :  { %5763 = vmatprep.subr.bf16.mxu1 %v7522_v40  ;;  %5797 = vmatpush1.bf16.msra.mxu0 %v7553_v46  ;;  %v7633_v40 = vld [vmem:[#allocation14 + $0xcb4] ss:$28 sps:$4 sm:$0xff]  }
 0x342   :  { %5798 = vmatprep.subr.bf16.mxu0 %v7561_v47 }
 0x344   :  { %5764 = vmatpush1.bf16.msra.mxu1 %v7520_v48 }
 0x345   :  { %5765 = vmatprep.subr.bf16.mxu1 %v7525_v49  ;;  %5799 = vmatpush1.bf16.msra.mxu0 %v7559_v50  ;;  %v7631_v50 = vld [vmem:[#allocation14 + $0xcb0] ss:$28 sps:$4 sm:$0xff]  }
 0x346   :  { %5800 = vmatprep.subr.bf16.mxu0 %v7567_v54 }
 0x348   :  { %5766 = vmatpush1.bf16.msra.mxu1 %v7523_v58  ;;  %v7639_v58 = vld [vmem:[#allocation14 + $0xc7c] ss:$28 sps:$4 sm:$0xff]  }
 0x349   :  { %5767 = vmatprep.subr.bf16.mxu1 %v7528_v41  ;;  %5801 = vmatpush1.bf16.msra.mxu0 %v7565_v59 }
 0x34a   :  { %5802 = vmatprep.subr.bf16.mxu0 %v7573_v62 }
 0x34c   :  { %5768 = vmatpush1.bf16.msra.mxu1 %v7526_v30 }
 0x34d   :  { %5769 = vmatprep.subr.bf16.mxu1 %v7531_v63  ;;  %5803 = vmatpush1.bf16.msra.mxu0 %v7571_v0 }
 0x34e   :  { %5804 = vmatprep.subr.bf16.mxu0 %v7579_v42  ;;  %v7637_v42 = vld [vmem:[#allocation14 + $0xc78] ss:$28 sps:$4 sm:$0xff]  }
 0x350   :  { %5770 = vmatpush2.bf16.msra.mxu1 %v7529_v1 }
 0x351   :  { %5771 = vmatprep.subr.bf16.mxu1 %v7534_v2  ;;  %5805 = vmatpush1.bf16.msra.mxu0 %v7577_v33  ;;  %v7645_v2 = vld [vmem:[#allocation14 + $0xc44] ss:$28 sps:$4 sm:$0xff]  }
 0x352   :  { %5806 = vmatprep.subr.bf16.mxu0 %v7585_v51 }
 0x354   :  { %5772 = vmatpush2.bf16.msra.mxu1 %v7532_v52 }
 0x355   :  { %5773 = vmatprep.subr.bf16.mxu1 %v7537_v55  ;;  %5807 = vmatpush1.bf16.msra.mxu0 %v7583_v57 }
 0x356   :  { %5808 = vmatprep.subr.bf16.mxu0 %v7591_v3  ;;  %v7643_v3 = vld [vmem:[#allocation14 + $0xc40] ss:$28 sps:$4 sm:$0xff]  }
 0x358   :  { %5774 = vmatpush2.bf16.msra.mxu1 %v7535_v4 }
 0x359   :  { %5775 = vmatprep.subr.bf16.mxu1 %v7540_v5  ;;  %5809 = vmatpush1.bf16.msra.mxu0 %v7589_v6  ;;  %v7651_v5 = vld [vmem:[#allocation14 + $0x514] ss:$28 sps:$4 sm:$0xff]  }
 0x35a   :  { %5810 = vmatprep.subr.bf16.mxu0 %v7597_v7 }
 0x35c   :  { %5776 = vmatpush2.bf16.msra.mxu1 %v7538_v8 }
 0x35d   :  { %5777 = vmatprep.subr.bf16.mxu1 %v7543_v9  ;;  %5811 = vmatpush1.bf16.msra.mxu0 %v7595_v10 }
 0x35e   :  { %5812 = vmatprep.subr.bf16.mxu0 %v7603_v11  ;;  %v7556_v11 = vld [vmem:[#allocation14 + $0x190] ss:$28 sps:$4 sm:$0xff]  }
 0x360   :  { %5778 = vmatpush2.bf16.msra.mxu1 %v7541_v12 }
 0x361   :  { %5779 = vmatprep.subr.bf16.mxu1 %v7546_v13  ;;  %5813 = vmatpush2.bf16.msra.mxu0 %v7601_v14  ;;  %v7564_v13 = vld [vmem:[#allocation14 + $0x15c] ss:$28 sps:$4 sm:$0xff]  }
 0x362   :  { %5814 = vmatprep.subr.bf16.mxu0 %v7609_v15  ;;  %v7562_v14 = vld [vmem:[#allocation14 + $0x158] ss:$28 sps:$4 sm:$0xff]   ;;  %v7570_v15 = vld [vmem:[#allocation14 + $0x124] ss:$28 sps:$4 sm:$0xff]  }
 0x364   :  { %5780 = vmatpush2.bf16.msra.mxu1 %v7544_v16  ;;  %v7568_v16 = vld [vmem:[#allocation14 + $0x120] ss:$28 sps:$4 sm:$0xff]  }
 0x365   :  { %5781 = vmatprep.subr.bf16.mxu1 %v7549_v17  ;;  %5815 = vmatpush2.bf16.msra.mxu0 %v7607_v18  ;;  %v7576_v17 = vld [vmem:[#allocation14 + $0xec] ss:$28 sps:$4 sm:$0xff]  }
 0x366   :  { %5816 = vmatprep.subr.bf16.mxu0 %v7615_v19  ;;  %v7574_v18 = vld [vmem:[#allocation14 + $0xe8] ss:$28 sps:$4 sm:$0xff]   ;;  %v7582_v19 = vld [vmem:[#allocation14 + $0xb4] ss:$28 sps:$4 sm:$0xff]  }
 0x368   :  { %5782 = vmatpush2.bf16.msra.mxu1 %v7547_v20  ;;  %v7580_v20 = vld [vmem:[#allocation14 + $0xb0] ss:$28 sps:$4 sm:$0xff]  }
 0x369   :  { %5783 = vmatprep.subr.bf16.mxu1 %v7552_v21  ;;  %5817 = vmatpush2.bf16.msra.mxu0 %v7613_v22  ;;  %v7588_v21 = vld [vmem:[#allocation14 + $0x7c] ss:$28 sps:$4 sm:$0xff]  }
 0x36a   :  { %5818 = vmatprep.subr.bf16.mxu0 %v7621_v23  ;;  %v7586_v22 = vld [vmem:[#allocation14 + $0x78] ss:$28 sps:$4 sm:$0xff]   ;;  %v7594_v23 = vld [vmem:[#allocation14 + $0x44] ss:$28 sps:$4 sm:$0xff]  }
 0x36c   :  { %5784 = vmatpush2.bf16.msra.mxu1 %v7550_v25  ;;  %v7592_v25 = vld [vmem:[#allocation14 + $0x40] ss:$28 sps:$4 sm:$0xff]  }
 0x36d   :  { %5839 = vmatprep.subr.bf16.mxu1 %v7558_v26  ;;  %5819 = vmatpush2.bf16.msra.mxu0 %v7619_v34  ;;  %v7600_v26 = vld [vmem:[#allocation14 + $0xc] ss:$28 sps:$4 sm:$0xff]  }
 0x36e   :  { %5820 = vmatprep.subr.bf16.mxu0 %v7627_v35  ;;  %v7598_v34 = vld [vmem:[#allocation14 + $0x8] ss:$28 sps:$4 sm:$0xff]   ;;  %v7606_v35 = vld [vmem:[#allocation14 + $0x354] ss:$28 sps:$4 sm:$0xff]  }
 0x36f   :  { %v2620_v37 = vpop.f32.mrf.mxu1 }
 0x370   :  { %v2663_v45 = vpop.f32.mrf.mxu0  ;;  %v2621_v47 = vadd.f32 %v2620_v37, %v1113_v36  ;;  %v7618_v37 = vld [vmem:[#allocation14 + $0x2e4] ss:$28 sps:$4 sm:$0xff]  }
 0x371   :  { %v2622_v46 = vpop.f32.mrf.mxu1  ;;  %5821 = vmatpush2.bf16.msra.mxu0 %v7625_v39  ;;  %v7610_v39 = vld [vmem:[#allocation14 + $0x318] ss:$28 sps:$4 sm:$0xff]  }
 0x372   :  { %v2623_v48 = vadd.f32 %v2622_v46, %v1117_v38  ;;  %v2665_v49 = vpop.f32.mrf.mxu0  ;;  %5822 = vmatprep.subr.bf16.mxu0 %v7633_v40  ;;  %v2664_v63 = vadd.f32 %v2663_v45, %v2621_v47  ;;  %v7616_v40 = vld [vmem:[#allocation14 + $0x2e0] ss:$28 sps:$4 sm:$0xff]   ;;  %v7624_v45 = vld [vmem:[#allocation14 + $0x2ac] ss:$28 sps:$4 sm:$0xff]   ;;  %v1120_v47 = vsub.s32 6, %v8393_v29 }
 0x373   :  { %v2624_v54 = vpop.f32.mrf.mxu1  ;;  %v7622_v46 = vld [vmem:[#allocation14 + $0x2a8] ss:$28 sps:$4 sm:$0xff]  }
 0x374   :  { %v2625_v41 = vadd.f32 %v2624_v54, %v1113_v36  ;;  %v2667_v59 = vpop.f32.mrf.mxu0  ;;  %v2666_v62 = vadd.f32 %v2665_v49, %v2623_v48  ;;  %v2778_v57 = vmul.f32 0.2, %v2664_v63  ;;  %vm2762_vm6 = vcmp.ge.f32.partialorder %v2664_v63, 0.0  ;;  %v7604_v36 = vld [vmem:[#allocation14 + $0x350] ss:$28 sps:$4 sm:$0xff]  }
 0x375   :  { %v2626_v30 = vpop.f32.mrf.mxu1  ;;  %5823 = vmatpush2.bf16.msra.mxu0 %v7631_v50  ;;  %v1124_v48 = vsub.s32 7, %v8393_v29  ;;  %v7630_v49 = vld [vmem:[#allocation14 + $0x274] ss:$28 sps:$4 sm:$0xff]   ;;  %v1121_v50 = vrot.slane %v8458_v24, %v1120_v47 }
 0x376   :  { %v2668_v0 = vadd.f32 %v2667_v59, %v2625_v41  ;;  %v2627_v1 = vadd.f32 %v2626_v30, %v1117_v38  ;;  %5824 = vmatprep.subr.bf16.mxu0 %v7639_v58  ;;  %v2669_v51 = vpop.f32.mrf.mxu0  ;;  %v2779_v52 = vmul.f32 0.2, %v2666_v62  ;;  %vm2763_vm5 = vcmp.ge.f32.partialorder %v2666_v62, 0.0  ;;  %v7612_v38 = vld [vmem:[#allocation14 + $0x31c] ss:$28 sps:$4 sm:$0xff]  }
 0x377   :  { %v2794_v9 = vsel %vm2762_vm6, %v2664_v63, %v2778_v57  ;;  %v7628_v54 = vld [vmem:[#allocation14 + $0x270] ss:$28 sps:$4 sm:$0xff]   ;;  %v1125_v58 = vrot.slane %v8458_v24, %v1124_v48  ;;  %v7636_v59 = vld [vmem:[#allocation14 + $0x23c] ss:$28 sps:$4 sm:$0xff]   ;;  %v7667_v48 = vld [vmem:[#allocation14 + $0x468] ss:$28 sps:$4 sm:$0xff]  }
 0x378   :  { %v2786_v33 = vmul.f32 0.2, %v2668_v0  ;;  %vm2770_vm4 = vcmp.ge.f32.partialorder %v2668_v0, 0.0  ;;  %v2670_v55 = vadd.f32 %v2669_v51, %v2627_v1  ;;  %v2795_v7 = vsel %vm2763_vm5, %v2666_v62, %v2779_v52  ;;  %v7634_v1 = vld [vmem:[#allocation14 + $0x238] ss:$28 sps:$4 sm:$0xff]  }
 0x379   :  { %5825 = vmatpush2.bf16.msra.mxu0 %v7637_v42  ;;  %v7640_v24 = vld [vmem:[#allocation14 + $0x200] ss:$28 sps:$4 sm:$0xff]  }
 0x37a   :  { %vm2771_vm7 = vcmp.ge.f32.partialorder %v2670_v55, 0.0  ;;  %v2787_v4 = vmul.f32 0.2, %v2670_v55  ;;  %5826 = vmatprep.subr.bf16.mxu0 %v7645_v2  ;;  %v2802_v6 = vsel %vm2770_vm4, %v2668_v0, %v2786_v33  ;;  %v7642_v33 = vld [vmem:[#allocation14 + $0x204] ss:$28 sps:$4 sm:$0xff]  }
 0x37b   :  { %v8504_v12 = vpack.c.bf16 %v2802_v6, %v2794_v9  ;;  %v7648_v6 = vld [vmem:[#allocation14 + $0x1cc] ss:$28 sps:$4 sm:$0xff]  }
 0x37c   :  { %v2803_v8 = vsel %vm2771_vm7, %v2670_v55, %v2787_v4 }
 0x37d   :  { %v8502_v10 = vpack.c.bf16 %v2803_v8, %v2795_v7  ;;  %5827 = vmatpush2.bf16.msra.mxu0 %v7643_v3 }
 0x37e   :  { %5882 = vmatprep.subr.bf16.mxu0 %v7651_v5 }
 0x37f   :  { %5785 = vmatprep.mubr.bf16.mxu1 %v8502_v10 }
 0x380   :  { %5786 = vmatmul.mubr.bf16.vlgmr.msra.gmra.mxu1 %v8504_v12 }
 0x381   :  { %5840 = vmatpush1.bf16.msra.mxu1 %v7556_v11  ;;  %5871 = vmatprep.mubr.bf16.mxu1 %v8472_v56 }
 0x382   :  { %5841 = vmatprep.subr.bf16.mxu1 %v7564_v13 }
 0x385   :  { %5842 = vmatpush1.bf16.msra.mxu1 %v7562_v14  ;;  %v7646_v14 = vld [vmem:[#allocation14 + $0x1c8] ss:$28 sps:$4 sm:$0xff]  }
 0x386   :  { %5843 = vmatprep.subr.bf16.mxu1 %v7570_v15 }
 0x389   :  { %5844 = vmatpush1.bf16.msra.mxu1 %v7568_v16  ;;  %v7654_v16 = vld [vmem:[#allocation14 + $0x894] ss:$28 sps:$4 sm:$0xff]  }
 0x38a   :  { %5845 = vmatprep.subr.bf16.mxu1 %v7576_v17 }
 0x38d   :  { %5846 = vmatpush1.bf16.msra.mxu1 %v7574_v18 }
 0x38e   :  { %5847 = vmatprep.subr.bf16.mxu1 %v7582_v19 }
 0x391   :  { %5848 = vmatpush1.bf16.msra.mxu1 %v7580_v20 }
 0x392   :  { %5849 = vmatprep.subr.bf16.mxu1 %v7588_v21 }
 0x395   :  { %5850 = vmatpush1.bf16.msra.mxu1 %v7586_v22  ;;  %v7649_v22 = vld [vmem:[#allocation14 + $0x510] ss:$28 sps:$4 sm:$0xff]  }
 0x396   :  { %5851 = vmatprep.subr.bf16.mxu1 %v7594_v23  ;;  %v7652_v23 = vld [vmem:[#allocation14 + $0x890] ss:$28 sps:$4 sm:$0xff]  }
 0x399   :  { %5852 = vmatpush1.bf16.msra.mxu1 %v7592_v25 }
 0x39a   :  { %5853 = vmatprep.subr.bf16.mxu1 %v7600_v26  ;;  %v7657_v26 = vld [vmem:[#allocation14 + $0x4dc] ss:$28 sps:$4 sm:$0xff]  }
 0x39d   :  { %5854 = vmatpush1.bf16.msra.mxu1 %v7598_v34  ;;  %v7660_v34 = vld [vmem:[#allocation14 + $0x85c] ss:$28 sps:$4 sm:$0xff]  }
 0x39e   :  { %5855 = vmatprep.subr.bf16.mxu1 %v7606_v35  ;;  %v7655_v35 = vld [vmem:[#allocation14 + $0x4d8] ss:$28 sps:$4 sm:$0xff]  }
 0x3a1   :  { %5856 = vmatpush2.bf16.msra.mxu1 %v7604_v36  ;;  %v7658_v36 = vld [vmem:[#allocation14 + $0x858] ss:$28 sps:$4 sm:$0xff]  }
 0x3a2   :  { %5857 = vmatprep.subr.bf16.mxu1 %v7612_v38  ;;  %v7663_v38 = vld [vmem:[#allocation14 + $0x4a4] ss:$28 sps:$4 sm:$0xff]  }
 0x3a5   :  { %5858 = vmatpush2.bf16.msra.mxu1 %v7610_v39  ;;  %v7666_v39 = vld [vmem:[#allocation14 + $0x824] ss:$28 sps:$4 sm:$0xff]  }
 0x3a6   :  { %5859 = vmatprep.subr.bf16.mxu1 %v7618_v37  ;;  %v7661_v37 = vld [vmem:[#allocation14 + $0x4a0] ss:$28 sps:$4 sm:$0xff]  }
 0x3a9   :  { %5860 = vmatpush2.bf16.msra.mxu1 %v7616_v40  ;;  %v7664_v40 = vld [vmem:[#allocation14 + $0x820] ss:$28 sps:$4 sm:$0xff]  }
 0x3aa   :  { %5861 = vmatprep.subr.bf16.mxu1 %v7624_v45  ;;  %v7669_v45 = vld [vmem:[#allocation14 + $0x46c] ss:$28 sps:$4 sm:$0xff]  }
 0x3ad   :  { %5862 = vmatpush2.bf16.msra.mxu1 %v7622_v46  ;;  %v7672_v46 = vld [vmem:[#allocation14 + $0x7ec] ss:$28 sps:$4 sm:$0xff]  }
 0x3ae   :  { %5863 = vmatprep.subr.bf16.mxu1 %v7630_v49  ;;  %v7670_v49 = vld [vmem:[#allocation14 + $0x7e8] ss:$28 sps:$4 sm:$0xff]  }
 0x3af   :  { %v2706_v41 = vpop.f32.mrf.mxu1 }
 0x3b0   :  { %v2749_v62 = vpop.f32.mrf.mxu0  ;;  %v2707_v63 = vadd.f32 %v2706_v41, %v1121_v50  ;;  %v7676_v41 = vld [vmem:[#allocation14 + $0x7b0] ss:$28 sps:$4 sm:$0xff]  }
 0x3b1   :  { %v2708_v30 = vpop.f32.mrf.mxu1  ;;  %5864 = vmatpush2.bf16.msra.mxu1 %v7628_v54  ;;  %v7678_v54 = vld [vmem:[#allocation14 + $0x7b4] ss:$28 sps:$4 sm:$0xff]  }
 0x3b2   :  { %v2709_v0 = vadd.f32 %v2708_v30, %v1125_v58  ;;  %v2751_v42 = vpop.f32.mrf.mxu0  ;;  %5865 = vmatprep.subr.bf16.mxu1 %v7636_v59  ;;  %v2750_v3 = vadd.f32 %v2749_v62, %v2707_v63  ;;  %v7681_v59 = vld [vmem:[#allocation14 + $0x3fc] ss:$28 sps:$4 sm:$0xff]  }
 0x3b3   :  { %v2710_v2 = vpop.f32.mrf.mxu1  ;;  %v7684_v62 = vld [vmem:[#allocation14 + $0x77c] ss:$28 sps:$4 sm:$0xff]  }
 0x3b4   :  { %v2711_v51 = vadd.f32 %v2710_v2, %v1121_v50  ;;  %v2753_v52 = vpop.f32.mrf.mxu0  ;;  %v2752_v55 = vadd.f32 %v2751_v42, %v2709_v0  ;;  %v2780_v13 = vmul.f32 0.2, %v2750_v3  ;;  %vm2764_vm10 = vcmp.ge.f32.partialorder %v2750_v3, 0.0  ;;  %v7675_v50 = vld [vmem:[#allocation14 + $0x434] ss:$28 sps:$4 sm:$0xff]  }
 0x3b5   :  { %v2712_v57 = vpop.f32.mrf.mxu1  ;;  %5866 = vmatpush2.bf16.msra.mxu1 %v7634_v1  ;;  %v7679_v30 = vld [vmem:[#allocation14 + $0x3f8] ss:$28 sps:$4 sm:$0xff]   ;;  %v7687_v0 = vld [vmem:[#allocation14 + $0x3c4] ss:$28 sps:$4 sm:$0xff]  }
 0x3b6   :  { %v2754_v4 = vadd.f32 %v2753_v52, %v2711_v51  ;;  %v2713_v5 = vadd.f32 %v2712_v57, %v1125_v58  ;;  %5867 = vmatprep.subr.bf16.mxu1 %v7642_v33  ;;  %v2755_v8 = vpop.f32.mrf.mxu0  ;;  %v2781_v9 = vmul.f32 0.2, %v2752_v55  ;;  %vm2765_vm9 = vcmp.ge.f32.partialorder %v2752_v55, 0.0  ;;  %v7673_v58 = vld [vmem:[#allocation14 + $0x430] ss:$28 sps:$4 sm:$0xff]  }
 0x3b7   :  { %v2796_v20 = vsel %vm2764_vm10, %v2750_v3, %v2780_v13  ;;  %v7682_v63 = vld [vmem:[#allocation14 + $0x778] ss:$28 sps:$4 sm:$0xff]   ;;  %v7690_v42 = vld [vmem:[#allocation14 + $0x744] ss:$28 sps:$4 sm:$0xff]   ;;  %v7693_v33 = vld [vmem:[#allocation14 + $0x38c] ss:$28 sps:$4 sm:$0xff]  }
 0x3b8   :  { %v2788_v7 = vmul.f32 0.2, %v2754_v4  ;;  %vm2772_vm8 = vcmp.ge.f32.partialorder %v2754_v4, 0.0  ;;  %v2756_v11 = vadd.f32 %v2755_v8, %v2713_v5  ;;  %v2797_v18 = vsel %vm2765_vm9, %v2752_v55, %v2781_v9  ;;  %v7685_v1 = vld [vmem:[#allocation14 + $0x3c0] ss:$28 sps:$4 sm:$0xff]  }
 0x3b9   :  { %5868 = vmatpush2.bf16.msra.mxu1 %v7640_v24  ;;  %v7688_v2 = vld [vmem:[#allocation14 + $0x740] ss:$28 sps:$4 sm:$0xff]   ;;  %v7696_v51 = vld [vmem:[#allocation14 + $0x70c] ss:$28 sps:$4 sm:$0xff]   ;;  %v7699_v57 = vld [vmem:[#allocation14 + $0x6d4] ss:$28 sps:$4 sm:$0xff]  }
 0x3ba   :  { %vm2773_vm11 = vcmp.ge.f32.partialorder %v2756_v11, 0.0  ;;  %v2789_v15 = vmul.f32 0.2, %v2756_v11  ;;  %5869 = vmatprep.subr.bf16.mxu1 %v7648_v6  ;;  %v2804_v17 = vsel %vm2772_vm8, %v2754_v4, %v2788_v7  ;;  %v7691_v52 = vld [vmem:[#allocation14 + $0x388] ss:$28 sps:$4 sm:$0xff]  }
 0x3bb   :  { %v8517_v25 = vpack.c.bf16 %v2804_v17, %v2796_v20  ;;  %v7694_v55 = vld [vmem:[#allocation14 + $0x708] ss:$28 sps:$4 sm:$0xff]   ;;  %v7702_v3 = vld [vmem:[#allocation14 + $0xa54] ss:$28 sps:$4 sm:$0xff]   ;;  %v7705_v5 = vld [vmem:[#allocation14 + $0x69c] ss:$28 sps:$4 sm:$0xff]  }
 0x3bc   :  { %v2805_v19 = vsel %vm2773_vm11, %v2756_v11, %v2789_v15  ;;  %v7697_v4 = vld [vmem:[#allocation14 + $0x6d0] ss:$28 sps:$4 sm:$0xff]   ;;  %v7708_v6 = vld [vmem:[#allocation14 + $0xa1c] ss:$28 sps:$4 sm:$0xff]   ;;  %v7711_v9 = vld [vmem:[#allocation14 + $0x664] ss:$28 sps:$4 sm:$0xff]  }
 0x3bd   :  { %v8515_v21 = vpack.c.bf16 %v2805_v19, %v2797_v18  ;;  %5870 = vmatpush2.bf16.msra.mxu1 %v7646_v14  ;;  %v7700_v24 = vld [vmem:[#allocation14 + $0xa50] ss:$28 sps:$4 sm:$0xff]   ;;  %v7703_v7 = vld [vmem:[#allocation14 + $0x698] ss:$28 sps:$4 sm:$0xff]   ;;  %v7714_v11 = vld [vmem:[#allocation14 + $0x9e4] ss:$28 sps:$4 sm:$0xff]  }
 0x3be   :  { %5925 = vmatprep.subr.bf16.mxu1 %v7654_v16  ;;  %v7706_v8 = vld [vmem:[#allocation14 + $0xa18] ss:$28 sps:$4 sm:$0xff]   ;;  %v7709_v13 = vld [vmem:[#allocation14 + $0x660] ss:$28 sps:$4 sm:$0xff]   ;;  %v7717_v15 = vld [vmem:[#allocation14 + $0x62c] ss:$28 sps:$4 sm:$0xff]  }
 0x3bf   :  { %5828 = vmatprep.mubr.bf16.mxu0 %v8515_v21  ;;  %v7712_v14 = vld [vmem:[#allocation14 + $0x9e0] ss:$28 sps:$4 sm:$0xff]   ;;  %v7720_v16 = vld [vmem:[#allocation14 + $0x9ac] ss:$28 sps:$4 sm:$0xff]   ;;  %v7723_v19 = vld [vmem:[#allocation14 + $0x5f4] ss:$28 sps:$4 sm:$0xff]  }
 0x3c0   :  { %5872 = vmatmul.mubr.bf16.vlgmr.msra.gmra.mxu1 %v8481_v53  ;;  %5829 = vmatmul.mubr.bf16.vlgmr.msra.gmra.mxu0 %v8517_v25  ;;  %v7715_v17 = vld [vmem:[#allocation14 + $0x628] ss:$28 sps:$4 sm:$0xff]   ;;  %v7726_v20 = vld [vmem:[#allocation14 + $0x974] ss:$28 sps:$4 sm:$0xff]  }
 0x3c1   :  { %5883 = vmatpush1.bf16.msra.mxu0 %v7649_v22  ;;  %5926 = vmatpush1.bf16.msra.mxu1 %v7652_v23  ;;  %v7718_v18 = vld [vmem:[#allocation14 + $0x9a8] ss:$28 sps:$4 sm:$0xff]   ;;  %v7721_v22 = vld [vmem:[#allocation14 + $0x5f0] ss:$28 sps:$4 sm:$0xff]  }
 0x3c2   :  { %5957 = vmatprep.mubr.bf16.mxu1 %v8502_v10  ;;  %5914 = vmatprep.mubr.bf16.mxu0 %v8488_v44  ;;  %v7724_v23 = vld [vmem:[#allocation14 + $0x970] ss:$28 sps:$4 sm:$0xff]  }
 0x3c3   :  { %5884 = vmatprep.subr.bf16.mxu0 %v7657_v26  ;;  %5927 = vmatprep.subr.bf16.mxu1 %v7660_v34  ;;  %v7729_v26 = vld [vmem:[#allocation14 + $0x5bc] ss:$28 sps:$4 sm:$0xff]  }
 0x3c4   :  { %v7732_v34 = vld [vmem:[#allocation14 + $0x93c] ss:$28 sps:$4 sm:$0xff]  }
 0x3c5   :  { %5885 = vmatpush1.bf16.msra.mxu0 %v7655_v35  ;;  %5928 = vmatpush1.bf16.msra.mxu1 %v7658_v36  ;;  %v7727_v35 = vld [vmem:[#allocation14 + $0x5b8] ss:$28 sps:$4 sm:$0xff]  }
 0x3c6   :  { %5886 = vmatprep.subr.bf16.mxu0 %v7663_v38  ;;  %5929 = vmatprep.subr.bf16.mxu1 %v7666_v39  ;;  %v7730_v36 = vld [vmem:[#allocation14 + $0x938] ss:$28 sps:$4 sm:$0xff]   ;;  %v7735_v38 = vld [vmem:[#allocation14 + $0x584] ss:$28 sps:$4 sm:$0xff]  }
 0x3c7   :  { %v7738_v39 = vld [vmem:[#allocation14 + $0x904] ss:$28 sps:$4 sm:$0xff]  }
 0x3c9   :  { %5887 = vmatpush1.bf16.msra.mxu0 %v7661_v37  ;;  %5930 = vmatpush1.bf16.msra.mxu1 %v7664_v40  ;;  %v7733_v37 = vld [vmem:[#allocation14 + $0x580] ss:$28 sps:$4 sm:$0xff]  }
 0x3ca   :  { %5888 = vmatprep.subr.bf16.mxu0 %v7669_v45  ;;  %5931 = vmatprep.subr.bf16.mxu1 %v7672_v46  ;;  %v7736_v40 = vld [vmem:[#allocation14 + $0x900] ss:$28 sps:$4 sm:$0xff]   ;;  %v7741_v45 = vld [vmem:[#allocation14 + $0x54c] ss:$28 sps:$4 sm:$0xff]  }
 0x3cb   :  { %v7744_v46 = vld [vmem:[#allocation14 + $0x8cc] ss:$28 sps:$4 sm:$0xff]  }
 0x3cd   :  { %5889 = vmatpush1.bf16.msra.mxu0 %v7667_v48  ;;  %5932 = vmatpush1.bf16.msra.mxu1 %v7670_v49  ;;  %v7739_v48 = vld [vmem:[#allocation14 + $0x548] ss:$28 sps:$4 sm:$0xff]  }
 0x3ce   :  { %5890 = vmatprep.subr.bf16.mxu0 %v7675_v50  ;;  %5933 = vmatprep.subr.bf16.mxu1 %v7678_v54  ;;  %v7742_v49 = vld [vmem:[#allocation14 + $0x8c8] ss:$28 sps:$4 sm:$0xff]   ;;  %v7747_v50 = vld [vmem:[#allocation14 + $0xc14] ss:$28 sps:$4 sm:$0xff]   ;;  %v7750_v54 = vld [vmem:[#allocation14 + $0x19c] ss:$28 sps:$4 sm:$0xff]  }
 0x3d1   :  { %5891 = vmatpush1.bf16.msra.mxu0 %v7673_v58  ;;  %5934 = vmatpush1.bf16.msra.mxu1 %v7676_v41  ;;  %v7745_v58 = vld [vmem:[#allocation14 + $0xc10] ss:$28 sps:$4 sm:$0xff]   ;;  %v7748_v41 = vld [vmem:[#allocation14 + $0x198] ss:$28 sps:$4 sm:$0xff]  }
 0x3d2   :  { %5892 = vmatprep.subr.bf16.mxu0 %v7681_v59  ;;  %5935 = vmatprep.subr.bf16.mxu1 %v7684_v62  ;;  %v7753_v59 = vld [vmem:[#allocation14 + $0xbdc] ss:$28 sps:$4 sm:$0xff]   ;;  %v7756_v62 = vld [vmem:[#allocation14 + $0x164] ss:$28 sps:$4 sm:$0xff]  }
 0x3d5   :  { %5893 = vmatpush1.bf16.msra.mxu0 %v7679_v30  ;;  %5936 = vmatpush1.bf16.msra.mxu1 %v7682_v63  ;;  %v7751_v30 = vld [vmem:[#allocation14 + $0xbd8] ss:$28 sps:$4 sm:$0xff]   ;;  %v7754_v63 = vld [vmem:[#allocation14 + $0x160] ss:$28 sps:$4 sm:$0xff]  }
 0x3d6   :  { %5894 = vmatprep.subr.bf16.mxu0 %v7687_v0  ;;  %5937 = vmatprep.subr.bf16.mxu1 %v7690_v42  ;;  %v7759_v0 = vld [vmem:[#allocation14 + $0xba4] ss:$28 sps:$4 sm:$0xff]   ;;  %v7762_v42 = vld [vmem:[#allocation14 + $0x12c] ss:$28 sps:$4 sm:$0xff]  }
 0x3d9   :  { %5895 = vmatpush1.bf16.msra.mxu0 %v7685_v1  ;;  %5938 = vmatpush1.bf16.msra.mxu1 %v7688_v2  ;;  %v7757_v1 = vld [vmem:[#allocation14 + $0xba0] ss:$28 sps:$4 sm:$0xff]   ;;  %v7760_v2 = vld [vmem:[#allocation14 + $0x128] ss:$28 sps:$4 sm:$0xff]  }
 0x3da   :  { %5896 = vmatprep.subr.bf16.mxu0 %v7693_v33  ;;  %5939 = vmatprep.subr.bf16.mxu1 %v7696_v51  ;;  %v7765_v33 = vld [vmem:[#allocation14 + $0xb6c] ss:$28 sps:$4 sm:$0xff]   ;;  %v7768_v51 = vld [vmem:[#allocation14 + $0xf4] ss:$28 sps:$4 sm:$0xff]  }
 0x3dd   :  { %5897 = vmatpush1.bf16.msra.mxu0 %v7691_v52  ;;  %5940 = vmatpush1.bf16.msra.mxu1 %v7694_v55  ;;  %v7763_v52 = vld [vmem:[#allocation14 + $0xb68] ss:$28 sps:$4 sm:$0xff]   ;;  %v7766_v55 = vld [vmem:[#allocation14 + $0xf0] ss:$28 sps:$4 sm:$0xff]  }
 0x3de   :  { %5898 = vmatprep.subr.bf16.mxu0 %v7699_v57  ;;  %5941 = vmatprep.subr.bf16.mxu1 %v7702_v3  ;;  %v7771_v57 = vld [vmem:[#allocation14 + $0xb34] ss:$28 sps:$4 sm:$0xff]   ;;  %v7774_v3 = vld [vmem:[#allocation14 + $0xbc] ss:$28 sps:$4 sm:$0xff]  }
 0x3e1   :  { %5899 = vmatpush2.bf16.msra.mxu0 %v7697_v4  ;;  %5942 = vmatpush2.bf16.msra.mxu1 %v7700_v24  ;;  %v7769_v4 = vld [vmem:[#allocation14 + $0xb30] ss:$28 sps:$4 sm:$0xff]   ;;  %v7772_v24 = vld [vmem:[#allocation14 + $0xb8] ss:$28 sps:$4 sm:$0xff]  }
 0x3e2   :  { %5900 = vmatprep.subr.bf16.mxu0 %v7705_v5  ;;  %5943 = vmatprep.subr.bf16.mxu1 %v7708_v6  ;;  %v7777_v5 = vld [vmem:[#allocation14 + $0xafc] ss:$28 sps:$4 sm:$0xff]   ;;  %v7780_v6 = vld [vmem:[#allocation14 + $0x84] ss:$28 sps:$4 sm:$0xff]  }
 0x3e5   :  { %5901 = vmatpush2.bf16.msra.mxu0 %v7703_v7  ;;  %5944 = vmatpush2.bf16.msra.mxu1 %v7706_v8  ;;  %v7775_v7 = vld [vmem:[#allocation14 + $0xaf8] ss:$28 sps:$4 sm:$0xff]   ;;  %v7778_v8 = vld [vmem:[#allocation14 + $0x80] ss:$28 sps:$4 sm:$0xff]  }
 0x3e6   :  { %5902 = vmatprep.subr.bf16.mxu0 %v7711_v9  ;;  %5945 = vmatprep.subr.bf16.mxu1 %v7714_v11  ;;  %v7783_v9 = vld [vmem:[#allocation14 + $0xac4] ss:$28 sps:$4 sm:$0xff]   ;;  %v7786_v11 = vld [vmem:[#allocation14 + $0x4c] ss:$28 sps:$4 sm:$0xff]  }
 0x3e9   :  { %5903 = vmatpush2.bf16.msra.mxu0 %v7709_v13  ;;  %5946 = vmatpush2.bf16.msra.mxu1 %v7712_v14  ;;  %v7781_v13 = vld [vmem:[#allocation14 + $0xac0] ss:$28 sps:$4 sm:$0xff]   ;;  %v7784_v14 = vld [vmem:[#allocation14 + $0x48] ss:$28 sps:$4 sm:$0xff]  }
 0x3ea   :  { %5904 = vmatprep.subr.bf16.mxu0 %v7717_v15  ;;  %5947 = vmatprep.subr.bf16.mxu1 %v7720_v16  ;;  %v7789_v15 = vld [vmem:[#allocation14 + $0xa8c] ss:$28 sps:$4 sm:$0xff]   ;;  %v7792_v16 = vld [vmem:[#allocation14 + $0x14] ss:$28 sps:$4 sm:$0xff]  }
 0x3ed   :  { %5905 = vmatpush2.bf16.msra.mxu0 %v7715_v17  ;;  %5948 = vmatpush2.bf16.msra.mxu1 %v7718_v18  ;;  %v7787_v17 = vld [vmem:[#allocation14 + $0xa88] ss:$28 sps:$4 sm:$0xff]   ;;  %v7790_v18 = vld [vmem:[#allocation14 + $0x10] ss:$28 sps:$4 sm:$0xff]  }
 0x3ee   :  { %5906 = vmatprep.subr.bf16.mxu0 %v7723_v19  ;;  %5949 = vmatprep.subr.bf16.mxu1 %v7726_v20  ;;  %v7795_v19 = vld [vmem:[#allocation14 + $0xdd4] ss:$28 sps:$4 sm:$0xff]   ;;  %v7798_v20 = vld [vmem:[#allocation14 + $0x35c] ss:$28 sps:$4 sm:$0xff]  }
 0x3f1   :  { %5907 = vmatpush2.bf16.msra.mxu0 %v7721_v22  ;;  %5950 = vmatpush2.bf16.msra.mxu1 %v7724_v23  ;;  %v7793_v22 = vld [vmem:[#allocation14 + $0xdd0] ss:$28 sps:$4 sm:$0xff]   ;;  %v7796_v23 = vld [vmem:[#allocation14 + $0x358] ss:$28 sps:$4 sm:$0xff]  }
 0x3f2   :  { %5908 = vmatprep.subr.bf16.mxu0 %v7729_v26  ;;  %5951 = vmatprep.subr.bf16.mxu1 %v7732_v34  ;;  %v7801_v26 = vld [vmem:[#allocation14 + $0xd9c] ss:$28 sps:$4 sm:$0xff]   ;;  %v7804_v34 = vld [vmem:[#allocation14 + $0x324] ss:$28 sps:$4 sm:$0xff]  }
 0x3f5   :  { %5909 = vmatpush2.bf16.msra.mxu0 %v7727_v35  ;;  %5952 = vmatpush2.bf16.msra.mxu1 %v7730_v36  ;;  %v7799_v35 = vld [vmem:[#allocation14 + $0xd98] ss:$28 sps:$4 sm:$0xff]   ;;  %v7802_v36 = vld [vmem:[#allocation14 + $0x320] ss:$28 sps:$4 sm:$0xff]  }
 0x3f6   :  { %5910 = vmatprep.subr.bf16.mxu0 %v7735_v38  ;;  %5953 = vmatprep.subr.bf16.mxu1 %v7738_v39  ;;  %v7807_v38 = vld [vmem:[#allocation14 + $0xd64] ss:$28 sps:$4 sm:$0xff]   ;;  %v7810_v39 = vld [vmem:[#allocation14 + $0x2ec] ss:$28 sps:$4 sm:$0xff]  }
 0x3f9   :  { %5911 = vmatpush2.bf16.msra.mxu0 %v7733_v37  ;;  %5954 = vmatpush2.bf16.msra.mxu1 %v7736_v40  ;;  %v7805_v37 = vld [vmem:[#allocation14 + $0xd60] ss:$28 sps:$4 sm:$0xff]   ;;  %v7808_v40 = vld [vmem:[#allocation14 + $0x2e8] ss:$28 sps:$4 sm:$0xff]  }
 0x3fa   :  { %5912 = vmatprep.subr.bf16.mxu0 %v7741_v45  ;;  %5955 = vmatprep.subr.bf16.mxu1 %v7744_v46  ;;  %v7813_v45 = vld [vmem:[#allocation14 + $0xd2c] ss:$28 sps:$4 sm:$0xff]   ;;  %v7816_v46 = vld [vmem:[#allocation14 + $0x2b4] ss:$28 sps:$4 sm:$0xff]  }
 0x3fd   :  { %5913 = vmatpush2.bf16.msra.mxu0 %v7739_v48  ;;  %5956 = vmatpush2.bf16.msra.mxu1 %v7742_v49  ;;  %v7811_v48 = vld [vmem:[#allocation14 + $0xd28] ss:$28 sps:$4 sm:$0xff]   ;;  %v7814_v49 = vld [vmem:[#allocation14 + $0x2b0] ss:$28 sps:$4 sm:$0xff]  }
 0x3fe   :  { %5968 = vmatprep.subr.bf16.mxu0 %v7747_v50  ;;  %6011 = vmatprep.subr.bf16.mxu1 %v7750_v54  ;;  %v7819_v50 = vld [vmem:[#allocation14 + $0xcf4] ss:$28 sps:$4 sm:$0xff]   ;;  %v7822_v54 = vld [vmem:[#allocation14 + $0x27c] ss:$28 sps:$4 sm:$0xff]  }
 0x400   :  { %5915 = vmatmul.mubr.bf16.vlgmr.msra.gmra.mxu0 %v8490_v43  ;;  %5958 = vmatmul.mubr.bf16.vlgmr.msra.gmra.mxu1 %v8504_v12 }
 0x401   :  { %5969 = vmatpush1.bf16.msra.mxu0 %v7745_v58  ;;  %6000 = vmatprep.mubr.bf16.mxu0 %v8515_v21  ;;  %v7817_v58 = vld [vmem:[#allocation14 + $0xcf0] ss:$28 sps:$4 sm:$0xff]  }
 0x402   :  { %6012 = vmatpush1.bf16.msra.mxu1 %v7748_v41  ;;  %6043 = vmatprep.mubr.bf16.mxu1 %v8472_v56  ;;  %v7820_v41 = vld [vmem:[#allocation14 + $0x278] ss:$28 sps:$4 sm:$0xff]  }
 0x403   :  { %5970 = vmatprep.subr.bf16.mxu0 %v7753_v59  ;;  %6013 = vmatprep.subr.bf16.mxu1 %v7756_v62  ;;  %v7825_v59 = vld [vmem:[#allocation14 + $0xcbc] ss:$28 sps:$4 sm:$0xff]   ;;  %v7828_v62 = vld [vmem:[#allocation14 + $0x244] ss:$28 sps:$4 sm:$0xff]  }
 0x405   :  { %5971 = vmatpush1.bf16.msra.mxu0 %v7751_v30  ;;  %v7823_v30 = vld [vmem:[#allocation14 + $0xcb8] ss:$28 sps:$4 sm:$0xff]  }
 0x406   :  { %6014 = vmatpush1.bf16.msra.mxu1 %v7754_v63  ;;  %5972 = vmatprep.subr.bf16.mxu0 %v7759_v0  ;;  %v7826_v63 = vld [vmem:[#allocation14 + $0x240] ss:$28 sps:$4 sm:$0xff]  }
 0x407   :  { %6015 = vmatprep.subr.bf16.mxu1 %v7762_v42  ;;  %v7831_v0 = vld [vmem:[#allocation14 + $0xc84] ss:$28 sps:$4 sm:$0xff]   ;;  %v7834_v42 = vld [vmem:[#allocation14 + $0x20c] ss:$28 sps:$4 sm:$0xff]  }
 0x409   :  { %5973 = vmatpush1.bf16.msra.mxu0 %v7757_v1  ;;  %v7829_v1 = vld [vmem:[#allocation14 + $0xc80] ss:$28 sps:$4 sm:$0xff]  }
 0x40a   :  { %6016 = vmatpush1.bf16.msra.mxu1 %v7760_v2  ;;  %5974 = vmatprep.subr.bf16.mxu0 %v7765_v33  ;;  %v7832_v2 = vld [vmem:[#allocation14 + $0x208] ss:$28 sps:$4 sm:$0xff]  }
 0x40b   :  { %6017 = vmatprep.subr.bf16.mxu1 %v7768_v51  ;;  %v7837_v33 = vld [vmem:[#allocation14 + $0xc4c] ss:$28 sps:$4 sm:$0xff]   ;;  %v7840_v51 = vld [vmem:[#allocation14 + $0x1d4] ss:$28 sps:$4 sm:$0xff]  }
 0x40d   :  { %5975 = vmatpush1.bf16.msra.mxu0 %v7763_v52  ;;  %v7835_v52 = vld [vmem:[#allocation14 + $0xc48] ss:$28 sps:$4 sm:$0xff]  }
 0x40e   :  { %6018 = vmatpush1.bf16.msra.mxu1 %v7766_v55  ;;  %5976 = vmatprep.subr.bf16.mxu0 %v7771_v57  ;;  %v7838_v55 = vld [vmem:[#allocation14 + $0x1d0] ss:$28 sps:$4 sm:$0xff]   ;;  %v7843_v57 = vld [vmem:[#allocation14 + $0x51c] ss:$28 sps:$4 sm:$0xff]  }
 0x40f   :  { %6019 = vmatprep.subr.bf16.mxu1 %v7774_v3  ;;  %v7846_v3 = vld [vmem:[#allocation14 + $0x89c] ss:$28 sps:$4 sm:$0xff]  }
 0x411   :  { %5977 = vmatpush1.bf16.msra.mxu0 %v7769_v4  ;;  %v7841_v4 = vld [vmem:[#allocation14 + $0x518] ss:$28 sps:$4 sm:$0xff]  }
 0x412   :  { %6020 = vmatpush1.bf16.msra.mxu1 %v7772_v24  ;;  %5978 = vmatprep.subr.bf16.mxu0 %v7777_v5  ;;  %v7844_v24 = vld [vmem:[#allocation14 + $0x898] ss:$28 sps:$4 sm:$0xff]   ;;  %v7849_v5 = vld [vmem:[#allocation14 + $0x4e4] ss:$28 sps:$4 sm:$0xff]  }
 0x413   :  { %6021 = vmatprep.subr.bf16.mxu1 %v7780_v6  ;;  %v7852_v6 = vld [vmem:[#allocation14 + $0x864] ss:$28 sps:$4 sm:$0xff]  }
 0x415   :  { %5979 = vmatpush1.bf16.msra.mxu0 %v7775_v7  ;;  %v7847_v7 = vld [vmem:[#allocation14 + $0x4e0] ss:$28 sps:$4 sm:$0xff]  }
 0x416   :  { %6022 = vmatpush1.bf16.msra.mxu1 %v7778_v8  ;;  %5980 = vmatprep.subr.bf16.mxu0 %v7783_v9  ;;  %v7850_v8 = vld [vmem:[#allocation14 + $0x860] ss:$28 sps:$4 sm:$0xff]   ;;  %v7855_v9 = vld [vmem:[#allocation14 + $0x4ac] ss:$28 sps:$4 sm:$0xff]  }
 0x417   :  { %6023 = vmatprep.subr.bf16.mxu1 %v7786_v11  ;;  %v7858_v11 = vld [vmem:[#allocation14 + $0x82c] ss:$28 sps:$4 sm:$0xff]  }
 0x419   :  { %5981 = vmatpush1.bf16.msra.mxu0 %v7781_v13  ;;  %v7853_v13 = vld [vmem:[#allocation14 + $0x4a8] ss:$28 sps:$4 sm:$0xff]  }
 0x41a   :  { %6024 = vmatpush1.bf16.msra.mxu1 %v7784_v14  ;;  %5982 = vmatprep.subr.bf16.mxu0 %v7789_v15  ;;  %v7856_v14 = vld [vmem:[#allocation14 + $0x828] ss:$28 sps:$4 sm:$0xff]   ;;  %v7861_v15 = vld [vmem:[#allocation14 + $0x474] ss:$28 sps:$4 sm:$0xff]  }
 0x41b   :  { %6025 = vmatprep.subr.bf16.mxu1 %v7792_v16  ;;  %v7864_v16 = vld [vmem:[#allocation14 + $0x7f4] ss:$28 sps:$4 sm:$0xff]  }
 0x41d   :  { %5983 = vmatpush1.bf16.msra.mxu0 %v7787_v17  ;;  %v7859_v17 = vld [vmem:[#allocation14 + $0x470] ss:$28 sps:$4 sm:$0xff]  }
 0x41e   :  { %6026 = vmatpush1.bf16.msra.mxu1 %v7790_v18  ;;  %5984 = vmatprep.subr.bf16.mxu0 %v7795_v19  ;;  %v7862_v18 = vld [vmem:[#allocation14 + $0x7f0] ss:$28 sps:$4 sm:$0xff]   ;;  %v7867_v19 = vld [vmem:[#allocation14 + $0x43c] ss:$28 sps:$4 sm:$0xff]  }
 0x41f   :  { %6027 = vmatprep.subr.bf16.mxu1 %v7798_v20  ;;  %v7870_v20 = vld [vmem:[#allocation14 + $0x7bc] ss:$28 sps:$4 sm:$0xff]  }
 0x421   :  { %5985 = vmatpush2.bf16.msra.mxu0 %v7793_v22  ;;  %v7865_v22 = vld [vmem:[#allocation14 + $0x438] ss:$28 sps:$4 sm:$0xff]  }
 0x422   :  { %6028 = vmatpush2.bf16.msra.mxu1 %v7796_v23  ;;  %5986 = vmatprep.subr.bf16.mxu0 %v7801_v26  ;;  %v7868_v23 = vld [vmem:[#allocation14 + $0x7b8] ss:$28 sps:$4 sm:$0xff]   ;;  %v7873_v26 = vld [vmem:[#allocation14 + $0x404] ss:$28 sps:$4 sm:$0xff]  }
 0x423   :  { %6029 = vmatprep.subr.bf16.mxu1 %v7804_v34  ;;  %v7876_v34 = vld [vmem:[#allocation14 + $0x784] ss:$28 sps:$4 sm:$0xff]  }
 0x425   :  { %5987 = vmatpush2.bf16.msra.mxu0 %v7799_v35  ;;  %v7871_v35 = vld [vmem:[#allocation14 + $0x400] ss:$28 sps:$4 sm:$0xff]  }
 0x426   :  { %6030 = vmatpush2.bf16.msra.mxu1 %v7802_v36  ;;  %5988 = vmatprep.subr.bf16.mxu0 %v7807_v38  ;;  %v7874_v36 = vld [vmem:[#allocation14 + $0x780] ss:$28 sps:$4 sm:$0xff]   ;;  %v7879_v38 = vld [vmem:[#allocation14 + $0x3cc] ss:$28 sps:$4 sm:$0xff]  }
 0x427   :  { %6031 = vmatprep.subr.bf16.mxu1 %v7810_v39  ;;  %v7882_v39 = vld [vmem:[#allocation14 + $0x74c] ss:$28 sps:$4 sm:$0xff]  }
 0x429   :  { %5989 = vmatpush2.bf16.msra.mxu0 %v7805_v37  ;;  %v7877_v37 = vld [vmem:[#allocation14 + $0x3c8] ss:$28 sps:$4 sm:$0xff]  }
 0x42a   :  { %6032 = vmatpush2.bf16.msra.mxu1 %v7808_v40  ;;  %5990 = vmatprep.subr.bf16.mxu0 %v7813_v45  ;;  %v7880_v40 = vld [vmem:[#allocation14 + $0x748] ss:$28 sps:$4 sm:$0xff]   ;;  %v7885_v45 = vld [vmem:[#allocation14 + $0x394] ss:$28 sps:$4 sm:$0xff]  }
 0x42b   :  { %6033 = vmatprep.subr.bf16.mxu1 %v7816_v46  ;;  %v7888_v46 = vld [vmem:[#allocation14 + $0x714] ss:$28 sps:$4 sm:$0xff]  }
 0x42d   :  { %5991 = vmatpush2.bf16.msra.mxu0 %v7811_v48  ;;  %v7883_v48 = vld [vmem:[#allocation14 + $0x390] ss:$28 sps:$4 sm:$0xff]  }
 0x42e   :  { %6034 = vmatpush2.bf16.msra.mxu1 %v7814_v49  ;;  %5992 = vmatprep.subr.bf16.mxu0 %v7819_v50  ;;  %v7886_v49 = vld [vmem:[#allocation14 + $0x710] ss:$28 sps:$4 sm:$0xff]   ;;  %v7891_v50 = vld [vmem:[#allocation14 + $0x6dc] ss:$28 sps:$4 sm:$0xff]  }
 0x42f   :  { %6035 = vmatprep.subr.bf16.mxu1 %v7822_v54  ;;  %v7894_v54 = vld [vmem:[#allocation14 + $0xa5c] ss:$28 sps:$4 sm:$0xff]  }
 0x431   :  { %5993 = vmatpush2.bf16.msra.mxu0 %v7817_v58  ;;  %v7889_v58 = vld [vmem:[#allocation14 + $0x6d8] ss:$28 sps:$4 sm:$0xff]  }
 0x432   :  { %6036 = vmatpush2.bf16.msra.mxu1 %v7820_v41  ;;  %5994 = vmatprep.subr.bf16.mxu0 %v7825_v59  ;;  %v7892_v41 = vld [vmem:[#allocation14 + $0xa58] ss:$28 sps:$4 sm:$0xff]   ;;  %v7897_v59 = vld [vmem:[#allocation14 + $0x6a4] ss:$28 sps:$4 sm:$0xff]  }
 0x433   :  { %6037 = vmatprep.subr.bf16.mxu1 %v7828_v62  ;;  %v7900_v62 = vld [vmem:[#allocation14 + $0xa24] ss:$28 sps:$4 sm:$0xff]  }
 0x435   :  { %5995 = vmatpush2.bf16.msra.mxu0 %v7823_v30  ;;  %v7895_v30 = vld [vmem:[#allocation14 + $0x6a0] ss:$28 sps:$4 sm:$0xff]  }
 0x436   :  { %6038 = vmatpush2.bf16.msra.mxu1 %v7826_v63  ;;  %5996 = vmatprep.subr.bf16.mxu0 %v7831_v0  ;;  %v7898_v63 = vld [vmem:[#allocation14 + $0xa20] ss:$28 sps:$4 sm:$0xff]   ;;  %v7903_v0 = vld [vmem:[#allocation14 + $0x66c] ss:$28 sps:$4 sm:$0xff]  }
 0x437   :  { %6039 = vmatprep.subr.bf16.mxu1 %v7834_v42  ;;  %v7906_v42 = vld [vmem:[#allocation14 + $0x9ec] ss:$28 sps:$4 sm:$0xff]  }
 0x439   :  { %5997 = vmatpush2.bf16.msra.mxu0 %v7829_v1  ;;  %v7901_v1 = vld [vmem:[#allocation14 + $0x668] ss:$28 sps:$4 sm:$0xff]  }
 0x43a   :  { %6040 = vmatpush2.bf16.msra.mxu1 %v7832_v2  ;;  %5998 = vmatprep.subr.bf16.mxu0 %v7837_v33  ;;  %v7904_v2 = vld [vmem:[#allocation14 + $0x9e8] ss:$28 sps:$4 sm:$0xff]   ;;  %v7909_v33 = vld [vmem:[#allocation14 + $0x634] ss:$28 sps:$4 sm:$0xff]  }
 0x43b   :  { %6041 = vmatprep.subr.bf16.mxu1 %v7840_v51  ;;  %v7912_v51 = vld [vmem:[#allocation14 + $0x9b4] ss:$28 sps:$4 sm:$0xff]  }
 0x43d   :  { %5999 = vmatpush2.bf16.msra.mxu0 %v7835_v52  ;;  %v5701_v52 = vpop.f32.mrf.mxu1 }
 0x43e   :  { %6042 = vmatpush2.bf16.msra.mxu1 %v7838_v55  ;;  %6054 = vmatprep.subr.bf16.mxu0 %v7843_v57  ;;  %v7907_v55 = vld [vmem:[#allocation14 + $0x630] ss:$28 sps:$4 sm:$0xff]  }
 0x43f   :  { %6097 = vmatprep.subr.bf16.mxu1 %v7846_v3  ;;  %v7910_v57 = vld [vmem:[#allocation14 + $0x9b0] ss:$28 sps:$4 sm:$0xff]   ;;  %v7915_v3 = vld [vmem:[#allocation14 + $0x5fc] ss:$28 sps:$4 sm:$0xff]  }
 0x440   :  { %6001 = vmatmul.mubr.bf16.vlgmr.msra.gmra.mxu0 %v8517_v25 }
 0x441   :  { %6044 = vmatmul.mubr.bf16.vlgmr.msra.gmra.mxu1 %v8481_v53  ;;  %6055 = vmatpush1.bf16.msra.mxu0 %v7841_v4  ;;  %v7918_v4 = vld [vmem:[#allocation14 + $0x97c] ss:$28 sps:$4 sm:$0xff]  }
 0x442   :  { %6086 = vmatprep.mubr.bf16.mxu0 %v8488_v44  ;;  %6098 = vmatpush1.bf16.msra.mxu1 %v7844_v24  ;;  %v5703_v24 = vpop.f32.mrf.mxu1 }
 0x443   :  { %6129 = vmatprep.mubr.bf16.mxu1 %v8502_v10  ;;  %6056 = vmatprep.subr.bf16.mxu0 %v7849_v5  ;;  %v7913_v5 = vld [vmem:[#allocation14 + $0x5f8] ss:$28 sps:$4 sm:$0xff]  }
 0x444   :  { %6099 = vmatprep.subr.bf16.mxu1 %v7852_v6  ;;  %v7916_v6 = vld [vmem:[#allocation14 + $0x978] ss:$28 sps:$4 sm:$0xff]  }
 0x445   :  { %6057 = vmatpush1.bf16.msra.mxu0 %v7847_v7  ;;  %v7921_v7 = vld [vmem:[#allocation14 + $0x5c4] ss:$28 sps:$4 sm:$0xff]  }
 0x446   :  { %6100 = vmatpush1.bf16.msra.mxu1 %v7850_v8  ;;  %6058 = vmatprep.subr.bf16.mxu0 %v7855_v9  ;;  %v7924_v8 = vld [vmem:[#allocation14 + $0x944] ss:$28 sps:$4 sm:$0xff]   ;;  %v5705_v9 = vpop.f32.mrf.mxu1 }
 0x447   :  { %6101 = vmatprep.subr.bf16.mxu1 %v7858_v11  ;;  %v7919_v11 = vld [vmem:[#allocation14 + $0x5c0] ss:$28 sps:$4 sm:$0xff]  }
 0x449   :  { %6059 = vmatpush1.bf16.msra.mxu0 %v7853_v13  ;;  %v5744_v13 = vpop.f32.mrf.mxu0 }
 0x44a   :  { %6102 = vmatpush1.bf16.msra.mxu1 %v7856_v14  ;;  %6060 = vmatprep.subr.bf16.mxu0 %v7861_v15  ;;  %v7922_v14 = vld [vmem:[#allocation14 + $0x940] ss:$28 sps:$4 sm:$0xff]   ;;  %v7927_v15 = vld [vmem:[#allocation14 + $0x58c] ss:$28 sps:$4 sm:$0xff]  }
 0x44b   :  { %6103 = vmatprep.subr.bf16.mxu1 %v7864_v16  ;;  %v7930_v16 = vld [vmem:[#allocation14 + $0x90c] ss:$28 sps:$4 sm:$0xff]  }
 0x44d   :  { %6061 = vmatpush1.bf16.msra.mxu0 %v7859_v17  ;;  %v8532_v17 = vld [vmem:[#allocation16] sm:$0xff] }
 0x44e   :  { %6104 = vmatpush1.bf16.msra.mxu1 %v7862_v18  ;;  %6062 = vmatprep.subr.bf16.mxu0 %v7867_v19  ;;  %v5707_v18 = vpop.f32.mrf.mxu1  ;;  %v7925_v19 = vld [vmem:[#allocation14 + $0x588] ss:$28 sps:$4 sm:$0xff]  }
 0x44f   :  { %6105 = vmatprep.subr.bf16.mxu1 %v7870_v20  ;;  %v5746_v20 = vpop.f32.mrf.mxu0 }
 0x451   :  { %6063 = vmatpush1.bf16.msra.mxu0 %v7865_v22  ;;  %v5787_v22 = vpop.f32.mrf.mxu1 }
 0x452   :  { %6106 = vmatpush1.bf16.msra.mxu1 %v7868_v23  ;;  %6064 = vmatprep.subr.bf16.mxu0 %v7873_v26  ;;  %v7928_v23 = vld [vmem:[#allocation14 + $0x908] ss:$28 sps:$4 sm:$0xff]   ;;  %v7933_v26 = vld [vmem:[#allocation14 + $0x554] ss:$28 sps:$4 sm:$0xff]  }
 0x453   :  { %6107 = vmatprep.subr.bf16.mxu1 %v7876_v34  ;;  %v3331_v34 = vrot.slane %v8532_v17, %v8396_v31  ;;  %v7937_v31 = vld [vmem:[#allocation14 + $0xc18] ss:$28 sps:$4 sm:$0xff]  }
 0x455   :  { %6065 = vmatpush1.bf16.msra.mxu0 %v7871_v35  ;;  %v7936_v35 = vld [vmem:[#allocation14 + $0x8d4] ss:$28 sps:$4 sm:$0xff]  }
 0x456   :  { %6108 = vmatpush1.bf16.msra.mxu1 %v7874_v36  ;;  %6066 = vmatprep.subr.bf16.mxu0 %v7879_v38  ;;  %v3335_v36 = vrot.slane %v8532_v17, %v8399_v32  ;;  %v7931_v38 = vld [vmem:[#allocation14 + $0x550] ss:$28 sps:$4 sm:$0xff]   ;;  %v7941_v32 = vld [vmem:[#allocation14 + $0x1a0] ss:$28 sps:$4 sm:$0xff]  }
 0x457   :  { %6109 = vmatprep.subr.bf16.mxu1 %v7882_v39  ;;  %v5748_v39 = vpop.f32.mrf.mxu0 }
 0x459   :  { %6067 = vmatpush1.bf16.msra.mxu0 %v7877_v37  ;;  %v5789_v37 = vpop.f32.mrf.mxu1 }
 0x45a   :  { %6110 = vmatpush1.bf16.msra.mxu1 %v7880_v40  ;;  %6068 = vmatprep.subr.bf16.mxu0 %v7885_v45  ;;  %v7934_v40 = vld [vmem:[#allocation14 + $0x8d0] ss:$28 sps:$4 sm:$0xff]   ;;  %v7939_v45 = vld [vmem:[#allocation14 + $0xc1c] ss:$28 sps:$4 sm:$0xff]  }
 0x45b   :  { %6111 = vmatprep.subr.bf16.mxu1 %v7888_v46  ;;  %v5702_v46 = vadd.f32 %v5701_v52, %v3331_v34 }
 0x45d   :  { %6069 = vmatpush1.bf16.msra.mxu0 %v7883_v48  ;;  %v7940_v48 = vld [vmem:[#allocation14 + $0x360] ss:$28 sps:$4 sm:$0xff]  }
 0x45e   :  { %6112 = vmatpush1.bf16.msra.mxu1 %v7886_v49  ;;  %6070 = vmatprep.subr.bf16.mxu0 %v7891_v50  ;;  %v5704_v49 = vadd.f32 %v5703_v24, %v3335_v36  ;;  %v5745_v50 = vadd.f32 %v5744_v13, %v5702_v46 }
 0x45f   :  { %6113 = vmatprep.subr.bf16.mxu1 %v7894_v54  ;;  %v5750_v54 = vpop.f32.mrf.mxu0 }
 0x461   :  { %6071 = vmatpush2.bf16.msra.mxu0 %v7889_v58  ;;  %v5791_v58 = vpop.f32.mrf.mxu1 }
 0x462   :  { %6114 = vmatpush2.bf16.msra.mxu1 %v7892_v41  ;;  %6072 = vmatprep.subr.bf16.mxu0 %v7897_v59  ;;  %v5706_v41 = vadd.f32 %v5705_v9, %v3331_v34  ;;  %v5747_v59 = vadd.f32 %v5746_v20, %v5704_v49  ;;  %v7959_v20 = vld [vmem:[#allocation14 + $0xb3c] ss:$28 sps:$4 sm:$0xff]   ;;  %v7964_v34 = vld [vmem:[#allocation14 + $0xb04] ss:$28 sps:$4 sm:$0xff]  }
 0x463   :  { %6115 = vmatprep.subr.bf16.mxu1 %v7900_v62  ;;  %v5788_v62 = vadd.f32 %v5787_v22, %v5745_v50  ;;  %v5793_v52 = vpop.f32.mrf.mxu1  ;;  %v7960_v22 = vld [vmem:[#allocation14 + $0x280] ss:$28 sps:$4 sm:$0xff]   ;;  %v7971_v50 = vld [vmem:[#allocation14 + $0x50] ss:$28 sps:$4 sm:$0xff]  }
 0x465   :  { %6073 = vmatpush2.bf16.msra.mxu0 %v7895_v30  ;;  %v7944_v30 = vld [vmem:[#allocation14 + $0xbe4] ss:$28 sps:$4 sm:$0xff]  }
 0x466   :  { %6116 = vmatpush2.bf16.msra.mxu1 %v7898_v63  ;;  %6074 = vmatprep.subr.bf16.mxu0 %v7903_v0  ;;  %v5708_v63 = vadd.f32 %v5707_v18, %v3335_v36  ;;  %v7955_v18 = vld [vmem:[#allocation14 + $0x2b8] ss:$28 sps:$4 sm:$0xff]  }
 0x467   :  { %6117 = vmatprep.subr.bf16.mxu1 %v7906_v42  ;;  %v7945_v42 = vld [vmem:[#allocation14 + $0x328] ss:$28 sps:$4 sm:$0xff]  }
 0x469   :  { %6075 = vmatpush2.bf16.msra.mxu0 %v7901_v1  ;;  %v5749_v1 = vadd.f32 %v5748_v39, %v5706_v41  ;;  %v7979_v41 = vld [vmem:[#allocation14 + $0xddc] ss:$28 sps:$4 sm:$0xff]  }
 0x46a   :  { %6118 = vmatpush2.bf16.msra.mxu1 %v7904_v2  ;;  %6076 = vmatprep.subr.bf16.mxu0 %v7909_v33  ;;  %v5790_v2 = vadd.f32 %v5789_v37, %v5747_v59  ;;  %v7966_v37 = vld [vmem:[#allocation14 + $0x88] ss:$28 sps:$4 sm:$0xff]   ;;  %v7980_v59 = vld [vmem:[#allocation14 + $0xa60] ss:$28 sps:$4 sm:$0xff]  }
 0x46b   :  { %6119 = vmatprep.subr.bf16.mxu1 %v7912_v51  ;;  %v7942_v51 = vld [vmem:[#allocation14 + $0xbe0] ss:$28 sps:$4 sm:$0xff]   ;;  %v5792_v24 = vadd.f32 %v5791_v58, %v5749_v1  ;;  %v7972_v58 = vld [vmem:[#allocation14 + $0xa90] ss:$28 sps:$4 sm:$0xff]   ;;  %v7986_v1 = vld [vmem:[#allocation14 + $0x868] ss:$28 sps:$4 sm:$0xff]  }
 0x46d   :  { %6077 = vmatpush2.bf16.msra.mxu0 %v7907_v55 }
 0x46e   :  { %6120 = vmatpush2.bf16.msra.mxu1 %v7910_v57  ;;  %6078 = vmatprep.subr.bf16.mxu0 %v7915_v3  ;;  %v7946_v57 = vld [vmem:[#allocation14 + $0x168] ss:$28 sps:$4 sm:$0xff]  }
 0x46f   :  { %6121 = vmatprep.subr.bf16.mxu1 %v7918_v4  ;;  %v7949_v3 = vld [vmem:[#allocation14 + $0xbac] ss:$28 sps:$4 sm:$0xff]   ;;  %v5751_v4 = vadd.f32 %v5750_v54, %v5708_v63  ;;  %v7975_v54 = vld [vmem:[#allocation14 + $0x1d8] ss:$28 sps:$4 sm:$0xff]   ;;  %v7984_v63 = vld [vmem:[#allocation14 + $0xda4] ss:$28 sps:$4 sm:$0xff]  }
 0x471   :  { %6079 = vmatpush2.bf16.msra.mxu0 %v7913_v5 }
 0x472   :  { %6122 = vmatpush2.bf16.msra.mxu1 %v7916_v6  ;;  %6080 = vmatprep.subr.bf16.mxu0 %v7921_v7  ;;  %v7950_v6 = vld [vmem:[#allocation14 + $0x2f0] ss:$28 sps:$4 sm:$0xff]  }
 0x473   :  { %6123 = vmatprep.subr.bf16.mxu1 %v7924_v8  ;;  %v5794_v8 = vadd.f32 %v5793_v52, %v5751_v4  ;;  %v7991_v52 = vld [vmem:[#allocation14 + $0x830] ss:$28 sps:$4 sm:$0xff]   ;;  %v7999_v4 = vld [vmem:[#allocation14 + $0xcfc] ss:$28 sps:$4 sm:$0xff]  }
 0x475   :  { %6081 = vmatpush2.bf16.msra.mxu0 %v7919_v11  ;;  %v7947_v11 = vld [vmem:[#allocation14 + $0xba8] ss:$28 sps:$4 sm:$0xff]  }
 0x476   :  { %6124 = vmatpush2.bf16.msra.mxu1 %v7922_v14  ;;  %6082 = vmatprep.subr.bf16.mxu0 %v7927_v15  ;;  %v7951_v14 = vld [vmem:[#allocation14 + $0x130] ss:$28 sps:$4 sm:$0xff]  }
 0x477   :  { %6125 = vmatprep.subr.bf16.mxu1 %v7930_v16  ;;  %v7954_v15 = vld [vmem:[#allocation14 + $0xb74] ss:$28 sps:$4 sm:$0xff]  }
 0x479   :  { %6083 = vmatpush2.bf16.msra.mxu0 %v7925_v19  ;;  %v7956_v19 = vld [vmem:[#allocation14 + $0xf8] ss:$28 sps:$4 sm:$0xff]  }
 0x47a   :  { %6126 = vmatpush2.bf16.msra.mxu1 %v7928_v23  ;;  %6084 = vmatprep.subr.bf16.mxu0 %v7933_v26  ;;  %v7957_v23 = vld [vmem:[#allocation14 + $0xb38] ss:$28 sps:$4 sm:$0xff]   ;;  %v7961_v26 = vld [vmem:[#allocation14 + $0xc0] ss:$28 sps:$4 sm:$0xff]  }
 0x47b   :  { %6127 = vmatprep.subr.bf16.mxu1 %v7936_v35  ;;  %v7965_v35 = vld [vmem:[#allocation14 + $0x248] ss:$28 sps:$4 sm:$0xff]  }
 0x47d   :  { %6085 = vmatpush2.bf16.msra.mxu0 %v7931_v38  ;;  %v7962_v38 = vld [vmem:[#allocation14 + $0xb00] ss:$28 sps:$4 sm:$0xff]  }
 0x47e   :  { %6128 = vmatpush2.bf16.msra.mxu1 %v7934_v40  ;;  %6140 = vmatprep.subr.bf16.mxu0 %v7939_v45  ;;  %v7969_v40 = vld [vmem:[#allocation14 + $0xacc] ss:$28 sps:$4 sm:$0xff]  }
 0x47f   :  { %7180 = vmatprep.subr.bf16.mxu1 %v7940_v48  ;;  %v7970_v45 = vld [vmem:[#allocation14 + $0x210] ss:$28 sps:$4 sm:$0xff]   ;;  %v7967_v48 = vld [vmem:[#allocation14 + $0xac8] ss:$28 sps:$4 sm:$0xff]  }
 0x480   :  { %6087 = vmatmul.mubr.bf16.vlgmr.msra.gmra.mxu0 %v8490_v43  ;;  %v5830_v0 = vpop.f32.mrf.mxu0 }
 0x481   :  { %6130 = vmatmul.mubr.bf16.vlgmr.msra.gmra.mxu1 %v8504_v12  ;;  %v5831_v33 = vadd.f32 %v5830_v0, %v5788_v62  ;;  %6141 = vmatpush1.bf16.msra.mxu0 %v7937_v31  ;;  %v7974_v31 = vld [vmem:[#allocation14 + $0xa94] ss:$28 sps:$4 sm:$0xff]   ;;  %v7985_v0 = vld [vmem:[#allocation14 + $0xa28] ss:$28 sps:$4 sm:$0xff]  }
 0x482   :  { %6172 = vmatprep.mubr.bf16.mxu0 %v8515_v21  ;;  %7181 = vmatpush3.bf16.msra.mxu1 %v7941_v32  ;;  %v5832_v55 = vpop.f32.mrf.mxu0  ;;  %v7976_v32 = vld [vmem:[#allocation14 + $0x18] ss:$28 sps:$4 sm:$0xff]  }
 0x483   :  { %8049 = vtanh.f32 %v5831_v33  ;;  %6215 = vmatprep.mubr.bf16.mxu1 %v8472_v56  ;;  %v5833_v5 = vadd.f32 %v5832_v55, %v5790_v2  ;;  %6142 = vmatprep.subr.bf16.mxu0 %v7944_v30  ;;  %v7952_v56 = vld [vmem:[#allocation14 + $0xb70] ss:$28 sps:$4 sm:$0xff]   ;;  %v7977_v62 = vld [vmem:[#allocation14 + $0xdd8] ss:$28 sps:$4 sm:$0xff]   ;;  %v7981_v30 = vld [vmem:[#allocation14 + $0x8a0] ss:$28 sps:$4 sm:$0xff]  }
 0x484   :  { %7182 = vmatprep.subr.bf16.mxu1 %v7945_v42  ;;  %v5834_v7 = vpop.f32.mrf.mxu0  ;;  %v7982_v42 = vld [vmem:[#allocation14 + $0xda0] ss:$28 sps:$4 sm:$0xff]   ;;  %v7989_v2 = vld [vmem:[#allocation14 + $0xd6c] ss:$28 sps:$4 sm:$0xff]   ;;  %v7994_v55 = vld [vmem:[#allocation14 + $0xd34] ss:$28 sps:$4 sm:$0xff]  }
 0x485   :  { %8051 = vtanh.f32 %v5833_v5  ;;  %v5835_v9 = vadd.f32 %v5834_v7, %v5792_v24  ;;  %6143 = vmatpush1.bf16.msra.mxu0 %v7942_v51  ;;  %v7990_v33 = vld [vmem:[#allocation14 + $0x9f0] ss:$28 sps:$4 sm:$0xff]   ;;  %v7987_v51 = vld [vmem:[#allocation14 + $0xd68] ss:$28 sps:$4 sm:$0xff]   ;;  %v7997_v24 = vld [vmem:[#allocation14 + $0xcf8] ss:$28 sps:$4 sm:$0xff]  }
 0x486   :  { %7183 = vmatpush3.bf16.msra.mxu1 %v7946_v57  ;;  %v5836_v13 = vpop.f32.mrf.mxu0  ;;  %6144 = vmatprep.subr.bf16.mxu0 %v7949_v3  ;;  %v7995_v57 = vld [vmem:[#allocation14 + $0x9b8] ss:$28 sps:$4 sm:$0xff]   ;;  %v8001_v5 = vld [vmem:[#allocation14 + $0x7c0] ss:$28 sps:$4 sm:$0xff]   ;;  %v8005_v7 = vld [vmem:[#allocation14 + $0x948] ss:$28 sps:$4 sm:$0xff]  }
 0x487   :  { %8053 = vtanh.f32 %v5835_v9  ;;  %v5837_v16 = vadd.f32 %v5836_v13, %v5794_v8  ;;  %7184 = vmatprep.subr.bf16.mxu1 %v7950_v6  ;;  %v7996_v3 = vld [vmem:[#allocation14 + $0x7f8] ss:$28 sps:$4 sm:$0xff]   ;;  %v8004_v6 = vld [vmem:[#allocation14 + $0xcc4] ss:$28 sps:$4 sm:$0xff]   ;;  %v8010_v13 = vld [vmem:[#allocation14 + $0x910] ss:$28 sps:$4 sm:$0xff]  }
 0x488   :  { %v8002_v8 = vld [vmem:[#allocation14 + $0xcc0] ss:$28 sps:$4 sm:$0xff]   ;;  %v8006_v9 = vld [vmem:[#allocation14 + $0x788] ss:$28 sps:$4 sm:$0xff]  }
 0x489   :  { %8055 = vtanh.f32 %v5837_v16  ;;  %6145 = vmatpush1.bf16.msra.mxu0 %v7947_v11  ;;  %v8009_v11 = vld [vmem:[#allocation14 + $0xc8c] ss:$28 sps:$4 sm:$0xff]   ;;  %v8014_v16 = vld [vmem:[#allocation14 + $0xc54] ss:$28 sps:$4 sm:$0xff]  }
 0x48a   :  { %7185 = vmatpush3.bf16.msra.mxu1 %v7951_v14  ;;  %6146 = vmatprep.subr.bf16.mxu0 %v7954_v15  ;;  %v8007_v14 = vld [vmem:[#allocation14 + $0xc88] ss:$28 sps:$4 sm:$0xff]   ;;  %v8011_v15 = vld [vmem:[#allocation14 + $0x750] ss:$28 sps:$4 sm:$0xff]  }
 0x48b   :  { %7186 = vmatprep.subr.bf16.mxu1 %v7955_v18  ;;  %v8015_v18 = vld [vmem:[#allocation14 + $0x8d8] ss:$28 sps:$4 sm:$0xff]  }
 0x48d   :  { %6147 = vmatpush1.bf16.msra.mxu0 %v7952_v56  ;;  %v8012_v56 = vld [vmem:[#allocation14 + $0xc50] ss:$28 sps:$4 sm:$0xff]  }
 0x48e   :  { %7187 = vmatpush3.bf16.msra.mxu1 %v7956_v19  ;;  %6148 = vmatprep.subr.bf16.mxu0 %v7959_v20  ;;  %v8016_v19 = vld [vmem:[#allocation14 + $0x718] ss:$28 sps:$4 sm:$0xff]   ;;  %v8017_v20 = vld [vmem:[#allocation14 + $0x6e0] ss:$28 sps:$4 sm:$0xff]  }
 0x48f   :  { %7188 = vmatprep.subr.bf16.mxu1 %v7960_v22  ;;  %v8018_v22 = vld [vmem:[#allocation14 + $0x520] ss:$28 sps:$4 sm:$0xff]  }
 0x490   :  { %v8050_v36 = vpop.eup %8049 }
 0x491   :  { %6361 = vst [vmem:[#allocation17] sm:$0xff] %v8050_v36  ;;  %6149 = vmatpush1.bf16.msra.mxu0 %v7957_v23  ;;  %v8019_v23 = vld [vmem:[#allocation14 + $0x6a8] ss:$28 sps:$4 sm:$0xff]   ;;  %v8023_v36 = vld [vmem:[#allocation14 + $0x638] ss:$28 sps:$4 sm:$0xff]  }
 0x492   :  { %v8052_v39 = vpop.eup %8051  ;;  %7189 = vmatpush3.bf16.msra.mxu1 %v7961_v26  ;;  %6150 = vmatprep.subr.bf16.mxu0 %v7964_v34  ;;  %v8020_v26 = vld [vmem:[#allocation14 + $0x4e8] ss:$28 sps:$4 sm:$0xff]   ;;  %v8021_v34 = vld [vmem:[#allocation14 + $0x670] ss:$28 sps:$4 sm:$0xff]  }
 0x493   :  { %6362 = vst [vmem:[#allocation17 + $0x8] sm:$0xff] %v8052_v39  ;;  %7190 = vmatprep.subr.bf16.mxu1 %v7965_v35  ;;  %v8022_v35 = vld [vmem:[#allocation14 + $0x4b0] ss:$28 sps:$4 sm:$0xff]   ;;  %v8025_v39 = vld [vmem:[#allocation14 + $0x600] ss:$28 sps:$4 sm:$0xff]  }
 0x494   :  { %v8054_v46 = vpop.eup %8053 }
 0x495   :  { %6368 = vst [vmem:[#allocation17 + $0x38] sm:$0xff] %v8054_v46  ;;  %6151 = vmatpush1.bf16.msra.mxu0 %v7962_v38  ;;  %v8024_v38 = vld [vmem:[#allocation14 + $0x478] ss:$28 sps:$4 sm:$0xff]  }
 0x496   :  { %v8056_v49 = vpop.eup %8055  ;;  %7191 = vmatpush3.bf16.msra.mxu1 %v7966_v37  ;;  %6152 = vmatprep.subr.bf16.mxu0 %v7969_v40  ;;  %v8026_v37 = vld [vmem:[#allocation14 + $0x440] ss:$28 sps:$4 sm:$0xff]   ;;  %v8027_v40 = vld [vmem:[#allocation14 + $0x5c8] ss:$28 sps:$4 sm:$0xff]   ;;  %v8031_v46 = vld [vmem:[#allocation14 + $0x558] ss:$28 sps:$4 sm:$0xff]  }
 0x497   :  { %6369 = vst [vmem:[#allocation17 + $0x40] sm:$0xff] %v8056_v49  ;;  %7192 = vmatprep.subr.bf16.mxu1 %v7970_v45  ;;  %v8029_v45 = vld [vmem:[#allocation14 + $0x590] ss:$28 sps:$4 sm:$0xff]   ;;  %v8033_v49 = vld [vmem:[#allocation14 + $0xde0] ss:$28 sps:$4 sm:$0xff]  }
 0x499   :  { %6153 = vmatpush1.bf16.msra.mxu0 %v7967_v48  ;;  %v8032_v48 = vld [vmem:[#allocation14 + $0x398] ss:$28 sps:$4 sm:$0xff]  }
 0x49a   :  { %7193 = vmatpush3.bf16.msra.mxu1 %v7971_v50  ;;  %6154 = vmatprep.subr.bf16.mxu0 %v7974_v31  ;;  %v8034_v50 = vld [vmem:[#allocation14 + $0xc20] ss:$28 sps:$4 sm:$0xff]   ;;  %v8035_v31 = vld [vmem:[#allocation14 + $0xda8] ss:$28 sps:$4 sm:$0xff]  }
 0x49b   :  { %7194 = vmatprep.subr.bf16.mxu1 %v7975_v54  ;;  %v8036_v54 = vld [vmem:[#allocation14 + $0xbe8] ss:$28 sps:$4 sm:$0xff]  }
 0x49d   :  { %6155 = vmatpush1.bf16.msra.mxu0 %v7972_v58  ;;  %v8037_v58 = vld [vmem:[#allocation14 + $0xd70] ss:$28 sps:$4 sm:$0xff]  }
 0x49e   :  { %7195 = vmatpush3.bf16.msra.mxu1 %v7976_v32  ;;  %6156 = vmatprep.subr.bf16.mxu0 %v7979_v41  ;;  %v8038_v32 = vld [vmem:[#allocation14 + $0xbb0] ss:$28 sps:$4 sm:$0xff]   ;;  %v8039_v41 = vld [vmem:[#allocation14 + $0xd38] ss:$28 sps:$4 sm:$0xff]  }
 0x49f   :  { %7224 = vmatprep.subr.bf16.mxu1 %v7980_v59  ;;  %v8040_v59 = vld [vmem:[#allocation14 + $0xb78] ss:$28 sps:$4 sm:$0xff]  }
 0x4a1   :  { %6216 = vmatmul.mubr.bf16.vlgmr.msra.gmra.mxu1 %v8481_v53  ;;  %6157 = vmatpush2.bf16.msra.mxu0 %v7977_v62  ;;  %v7992_v53 = vld [vmem:[#allocation14 + $0xd30] ss:$28 sps:$4 sm:$0xff]   ;;  %v5873_v62 = vpop.f32.mrf.mxu1 }
 0x4a2   :  { %7225 = vmatpush3.bf16.msra.mxu1 %v7981_v30  ;;  %6297 = vmatprep.mubr.bf16.mxu1 %v8502_v10  ;;  %v8000_v10 = vld [vmem:[#allocation14 + $0x980] ss:$28 sps:$4 sm:$0xff]  }
 0x4a3   :  { %6158 = vmatprep.subr.bf16.mxu0 %v7984_v63  ;;  %7226 = vmatprep.subr.bf16.mxu1 %v7985_v0  ;;  %v8041_v30 = vld [vmem:[#allocation14 + $0xd00] ss:$28 sps:$4 sm:$0xff]   ;;  %v5875_v0 = vpop.f32.mrf.mxu1 }
 0x4a4   :  { %v8042_v63 = vld [vmem:[#allocation14 + $0xb40] ss:$28 sps:$4 sm:$0xff]  }
 0x4a5   :  { %6159 = vmatpush2.bf16.msra.mxu0 %v7982_v42  ;;  %v8044_v42 = vld [vmem:[#allocation14 + $0xb08] ss:$28 sps:$4 sm:$0xff]  }
 0x4a6   :  { %7227 = vmatpush3.bf16.msra.mxu1 %v7986_v1  ;;  %6160 = vmatprep.subr.bf16.mxu0 %v7989_v2  ;;  %v8045_v2 = vld [vmem:[#allocation14 + $0xc90] ss:$28 sps:$4 sm:$0xff]  }
 0x4a7   :  { %7228 = vmatprep.subr.bf16.mxu1 %v7990_v33  ;;  %v3339_v33 = vrot.slane %v8532_v17, %v8423_v61 }
 0x4a9   :  { %6161 = vmatpush2.bf16.msra.mxu0 %v7987_v51  ;;  %v8046_v51 = vld [vmem:[#allocation14 + $0xad0] ss:$28 sps:$4 sm:$0xff]  }
 0x4aa   :  { %7229 = vmatpush3.bf16.msra.mxu1 %v7991_v52  ;;  %6162 = vmatprep.subr.bf16.mxu0 %v7994_v55 }
 0x4ab   :  { %7230 = vmatprep.subr.bf16.mxu1 %v7995_v57  ;;  %v8047_v57 = vld [vmem:[#allocation14 + $0xc58] ss:$28 sps:$4 sm:$0xff]  }
 0x4ad   :  { %6163 = vmatpush2.bf16.msra.mxu0 %v7992_v53  ;;  %v3343_v53 = vrot.slane %v8532_v17, %v8420_v60 }
 0x4ae   :  { %7231 = vmatpush3.bf16.msra.mxu1 %v7996_v3  ;;  %6164 = vmatprep.subr.bf16.mxu0 %v7999_v4  ;;  %v5874_v4 = vadd.f32 %v5873_v62, %v3339_v33 }
 0x4af   :  { %7232 = vmatprep.subr.bf16.mxu1 %v8000_v10  ;;  %v8048_v10 = vld [vmem:[#allocation14 + $0xa98] ss:$28 sps:$4 sm:$0xff]  }
 0x4b1   :  { %6165 = vmatpush2.bf16.msra.mxu0 %v7997_v24 }
 0x4b2   :  { %7233 = vmatpush3.bf16.msra.mxu1 %v8001_v5  ;;  %6166 = vmatprep.subr.bf16.mxu0 %v8004_v6  ;;  %v5876_v5 = vadd.f32 %v5875_v0, %v3343_v53 }
 0x4b3   :  { %7234 = vmatprep.subr.bf16.mxu1 %v8005_v7 }
 0x4b5   :  { %6167 = vmatpush2.bf16.msra.mxu0 %v8002_v8 }
 0x4b6   :  { %7235 = vmatpush3.bf16.msra.mxu1 %v8006_v9  ;;  %6168 = vmatprep.subr.bf16.mxu0 %v8009_v11 }
 0x4b7   :  { %7236 = vmatprep.subr.bf16.mxu1 %v8010_v13 }
 0x4b9   :  { %6169 = vmatpush2.bf16.msra.mxu0 %v8007_v14 }
 0x4ba   :  { %7237 = vmatpush3.bf16.msra.mxu1 %v8011_v15  ;;  %6170 = vmatprep.subr.bf16.mxu0 %v8014_v16 }
 0x4bb   :  { %7238 = vmatprep.subr.bf16.mxu1 %v8015_v18 }
 0x4bd   :  { %6171 = vmatpush2.bf16.msra.mxu0 %v8012_v56 }
 0x4be   :  { %7239 = vmatpush3.bf16.msra.mxu1 %v8016_v19  ;;  %7202 = vmatprep.subr.bf16.mxu0 %v8017_v20 }
 0x4c0   :  { %6173 = vmatmul.mubr.bf16.vlgmr.msra.gmra.mxu0 %v8517_v25  ;;  %v5916_v1 = vpop.f32.mrf.mxu0 }
 0x4c1   :  { %6298 = vmatmul.mubr.bf16.vlgmr.msra.gmra.mxu1 %v8504_v12  ;;  %7203 = vmatpush3.bf16.msra.mxu0 %v8018_v22  ;;  %v8028_v12 = vld [vmem:[#allocation14 + $0x408] ss:$28 sps:$4 sm:$0xff]   ;;  %v5917_v6 = vadd.f32 %v5916_v1, %v5874_v4 }
 0x4c2   :  { %6256 = vmatprep.mubr.bf16.mxu0 %v8488_v44  ;;  %7204 = vmatprep.subr.bf16.mxu0 %v8019_v23  ;;  %v8030_v44 = vld [vmem:[#allocation14 + $0x3d0] ss:$28 sps:$4 sm:$0xff]   ;;  %v5918_v55 = vpop.f32.mrf.mxu0 }
 0x4c3   :  { %v5919_v61 = vadd.f32 %v5918_v55, %v5876_v5 }
 0x4c4   :  { %v5920_v24 = vpop.f32.mrf.mxu0 }
 0x4c5   :  { %7205 = vmatpush3.bf16.msra.mxu0 %v8020_v26 }
 0x4c6   :  { %7206 = vmatprep.subr.bf16.mxu0 %v8021_v34  ;;  %v5922_v9 = vpop.f32.mrf.mxu0 }
 0x4c9   :  { %7207 = vmatpush3.bf16.msra.mxu0 %v8022_v35 }
 0x4ca   :  { %7208 = vmatprep.subr.bf16.mxu0 %v8023_v36 }
 0x4cd   :  { %7209 = vmatpush3.bf16.msra.mxu0 %v8024_v38 }
 0x4ce   :  { %7210 = vmatprep.subr.bf16.mxu0 %v8025_v39 }
 0x4d1   :  { %7211 = vmatpush3.bf16.msra.mxu0 %v8026_v37 }
 0x4d2   :  { %7212 = vmatprep.subr.bf16.mxu0 %v8027_v40 }
 0x4d5   :  { %7213 = vmatpush3.bf16.msra.mxu0 %v8028_v12 }
 0x4d6   :  { %7214 = vmatprep.subr.bf16.mxu0 %v8029_v45 }
 0x4d9   :  { %7215 = vmatpush3.bf16.msra.mxu0 %v8030_v44 }
 0x4da   :  { %7216 = vmatprep.subr.bf16.mxu0 %v8031_v46 }
 0x4dd   :  { %7217 = vmatpush3.bf16.msra.mxu0 %v8032_v48  ;;  %v3347_v48 = vrot.slane %v8532_v17, %v1112_v27 }
 0x4de   :  { %7246 = vmatprep.subr.bf16.mxu0 %v8033_v49 }
 0x4e0   :  { %6257 = vmatmul.mubr.bf16.vlgmr.msra.gmra.mxu0 %v8490_v43  ;;  %v8043_v43 = vld [vmem:[#allocation14 + $0xcc8] ss:$28 sps:$4 sm:$0xff]  }
 0x4e1   :  { %7247 = vmatpush3.bf16.msra.mxu0 %v8034_v50  ;;  %6338 = vmatprep.mubr.bf16.mxu0 %v8515_v21  ;;  %v5877_v21 = vpop.f32.mrf.mxu1 }
 0x4e2   :  { %7248 = vmatprep.subr.bf16.mxu0 %v8035_v31  ;;  %v5878_v8 = vadd.f32 %v5877_v21, %v3339_v33  ;;  %v3351_v31 = vrot.slane %v8532_v17, %v1116_v28 }
 0x4e3   :  { %v5879_v52 = vpop.f32.mrf.mxu1 }
 0x4e4   :  { %v5880_v11 = vadd.f32 %v5879_v52, %v3343_v53  ;;  %v5921_v14 = vadd.f32 %v5920_v24, %v5878_v8 }
 0x4e5   :  { %7249 = vmatpush3.bf16.msra.mxu0 %v8036_v54  ;;  %v5959_v3 = vpop.f32.mrf.mxu1 }
 0x4e6   :  { %7250 = vmatprep.subr.bf16.mxu0 %v8037_v58  ;;  %v5960_v13 = vadd.f32 %v5959_v3, %v5917_v6  ;;  %v5923_v18 = vadd.f32 %v5922_v9, %v5880_v11 }
 0x4e7   :  { %v5961_v7 = vpop.f32.mrf.mxu1 }
 0x4e8   :  { %v5962_v60 = vadd.f32 %v5961_v7, %v5919_v61 }
 0x4e9   :  { %7251 = vmatpush3.bf16.msra.mxu0 %v8038_v32  ;;  %v5963_v15 = vpop.f32.mrf.mxu1 }
 0x4ea   :  { %7252 = vmatprep.subr.bf16.mxu0 %v8039_v41  ;;  %v5964_v20 = vadd.f32 %v5963_v15, %v5921_v14 }
 0x4eb   :  { %v5965_v23 = vpop.f32.mrf.mxu1 }
 0x4ec   :  { %v5966_v34 = vadd.f32 %v5965_v23, %v5923_v18  ;;  %v3355_v18 = vrot.slane %v8532_v17, %v1120_v47 }
 0x4ed   :  { %7253 = vmatpush3.bf16.msra.mxu0 %v8040_v59 }
 0x4ee   :  { %7254 = vmatprep.subr.bf16.mxu0 %v8041_v30 }
 0x4f1   :  { %7255 = vmatpush3.bf16.msra.mxu0 %v8042_v63 }
 0x4f2   :  { %7256 = vmatprep.subr.bf16.mxu0 %v8043_v43 }
 0x4f5   :  { %7257 = vmatpush3.bf16.msra.mxu0 %v8044_v42 }
 0x4f6   :  { %7258 = vmatprep.subr.bf16.mxu0 %v8045_v2 }
 0x4f9   :  { %7259 = vmatpush3.bf16.msra.mxu0 %v8046_v51 }
 0x4fa   :  { %7260 = vmatprep.subr.bf16.mxu0 %v8047_v57 }
 0x4fd   :  { %7261 = vmatpush3.bf16.msra.mxu0 %v8048_v10 }
 0x500   :  { %v6002_v16 = vpop.f32.mrf.mxu0  ;;  %6339 = vmatmul.mubr.bf16.vlgmr.msra.gmra.mxu0 %v8517_v25 }
 0x501   :  { %v6003_v56 = vadd.f32 %v6002_v16, %v5960_v13  ;;  %v6045_v12 = vpop.f32.mrf.mxu1 }
 0x502   :  { %v6004_v19 = vpop.f32.mrf.mxu0  ;;  %v6046_v58 = vadd.f32 %v6045_v12, %v3347_v48 }
 0x503   :  { %8057 = vtanh.f32 %v6003_v56  ;;  %v6005_v22 = vadd.f32 %v6004_v19, %v5962_v60  ;;  %v6047_v45 = vpop.f32.mrf.mxu1 }
 0x504   :  { %v6006_v26 = vpop.f32.mrf.mxu0  ;;  %v6048_v41 = vadd.f32 %v6047_v45, %v3351_v31 }
 0x505   :  { %8059 = vtanh.f32 %v6005_v22  ;;  %v6007_v35 = vadd.f32 %v6006_v26, %v5964_v20  ;;  %v6049_v44 = vpop.f32.mrf.mxu1 }
 0x506   :  { %v6008_v36 = vpop.f32.mrf.mxu0  ;;  %v6050_v30 = vadd.f32 %v6049_v44, %v3347_v48 }
 0x507   :  { %8061 = vtanh.f32 %v6007_v35  ;;  %v6009_v38 = vadd.f32 %v6008_v36, %v5966_v34  ;;  %v6051_v49 = vpop.f32.mrf.mxu1 }
 0x508   :  { %v6052_v43 = vadd.f32 %v6051_v49, %v3351_v31 }
 0x509   :  { %8063 = vtanh.f32 %v6009_v38 }
 0x510   :  { %v8058_v39 = vpop.eup %8057 }
 0x511   :  { %6363 = vst [vmem:[#allocation17 + $0x10] sm:$0xff] %v8058_v39 }
 0x512   :  { %v8060_v37 = vpop.eup %8059 }
 0x513   :  { %6364 = vst [vmem:[#allocation17 + $0x18] sm:$0xff] %v8060_v37 }
 0x514   :  { %v8062_v25 = vpop.eup %8061 }
 0x515   :  { %6370 = vst [vmem:[#allocation17 + $0x48] sm:$0xff] %v8062_v25 }
 0x516   :  { %v8064_v40 = vpop.eup %8063 }
 0x517   :  { %6371 = vst [vmem:[#allocation17 + $0x50] sm:$0xff] %v8064_v40 }
 0x540   :  { %v6088_v46 = vpop.f32.mrf.mxu0 }
 0x541   :  { %v6131_v54 = vpop.f32.mrf.mxu1  ;;  %v6089_v59 = vadd.f32 %v6088_v46, %v6046_v58 }
 0x542   :  { %v6090_v50 = vpop.f32.mrf.mxu0 }
 0x543   :  { %v6133_v62 = vpop.f32.mrf.mxu1  ;;  %v6091_v63 = vadd.f32 %v6090_v50, %v6048_v41  ;;  %v6132_v42 = vadd.f32 %v6131_v54, %v6089_v59 }
 0x544   :  { %v6092_v32 = vpop.f32.mrf.mxu0 }
 0x545   :  { %v6093_v21 = vadd.f32 %v6092_v32, %v6050_v30  ;;  %v6135_v1 = vpop.f32.mrf.mxu1  ;;  %v6134_v2 = vadd.f32 %v6133_v62, %v6091_v63 }
 0x546   :  { %v6094_v0 = vpop.f32.mrf.mxu0 }
 0x547   :  { %v6095_v33 = vadd.f32 %v6094_v0, %v6052_v43  ;;  %v6136_v55 = vadd.f32 %v6135_v1, %v6093_v21  ;;  %v6137_v57 = vpop.f32.mrf.mxu1 }
 0x549   :  { %v6138_v3 = vadd.f32 %v6137_v57, %v6095_v33 }
 0x561   :  { %v7196_v61 = vpop.f32.mrf.mxu1 }
 0x563   :  { %v7197_v9 = vpop.f32.mrf.mxu1 }
 0x564   :  { %v7198_v56 = vadd.f32 %v7197_v9, %v7196_v61 }
 0x565   :  { %v7199_v11 = vpop.f32.mrf.mxu1 }
 0x566   :  { %v6218_v23 = vadd.f32 %v7198_v56, %v3355_v18 }
 0x567   :  { %v7200_v14 = vpop.f32.mrf.mxu1 }
 0x568   :  { %v7201_v26 = vadd.f32 %v7200_v14, %v7199_v11 }
 0x56a   :  { %v6221_v39 = vadd.f32 %v7201_v26, %v3355_v18 }
 0x580   :  { %v6174_v27 = vpop.f32.mrf.mxu0 }
 0x581   :  { %v6175_v51 = vadd.f32 %v6174_v27, %v6132_v42  ;;  %v7240_v16 = vpop.f32.mrf.mxu1 }
 0x582   :  { %v6176_v52 = vpop.f32.mrf.mxu0 }
 0x583   :  { %8065 = vtanh.f32 %v6175_v51  ;;  %v6177_v28 = vadd.f32 %v6176_v52, %v6134_v2  ;;  %v7241_v19 = vpop.f32.mrf.mxu1 }
 0x584   :  { %v6178_v53 = vpop.f32.mrf.mxu0  ;;  %v7242_v37 = vadd.f32 %v7241_v19, %v7240_v16 }
 0x585   :  { %8067 = vtanh.f32 %v6177_v28  ;;  %v6179_v4 = vadd.f32 %v6178_v53, %v6136_v55  ;;  %v7243_v34 = vpop.f32.mrf.mxu1 }
 0x586   :  { %v6180_v10 = vpop.f32.mrf.mxu0 }
 0x587   :  { %8069 = vtanh.f32 %v6179_v4  ;;  %v6181_v24 = vadd.f32 %v6180_v10, %v6138_v3  ;;  %v7244_v25 = vpop.f32.mrf.mxu1 }
 0x588   :  { %v7245_v46 = vadd.f32 %v7244_v25, %v7243_v34 }
 0x589   :  { %8071 = vtanh.f32 %v6181_v24 }
 0x590   :  { %v8066_v5 = vpop.eup %8065 }
 0x591   :  { %6365 = vst [vmem:[#allocation17 + $0x20] sm:$0xff] %v8066_v5 }
 0x592   :  { %v8068_v6 = vpop.eup %8067 }
 0x593   :  { %6366 = vst [vmem:[#allocation17 + $0x28] sm:$0xff] %v8068_v6 }
 0x594   :  { %v8070_v7 = vpop.eup %8069 }
 0x595   :  { %6372 = vst [vmem:[#allocation17 + $0x58] sm:$0xff] %v8070_v7 }
 0x596   :  { %v8072_v8 = vpop.eup %8071 }
 0x597   :  { %6373 = vst [vmem:[#allocation17 + $0x60] sm:$0xff] %v8072_v8 }
 0x5a0   :  { %v7218_v13 = vpop.f32.mrf.mxu0 }
 0x5a2   :  { %v7219_v15 = vpop.f32.mrf.mxu0 }
 0x5a3   :  { %v7220_v20 = vadd.f32 %v7219_v15, %v7218_v13 }
 0x5a4   :  { %v7221_v60 = vpop.f32.mrf.mxu0 }
 0x5a5   :  { %v6259_v35 = vadd.f32 %v7220_v20, %v6218_v23 }
 0x5a6   :  { %v7222_v22 = vpop.f32.mrf.mxu0 }
 0x5a7   :  { %v7223_v36 = vadd.f32 %v7222_v22, %v7221_v60  ;;  %v6300_v45 = vadd.f32 %v7242_v37, %v6259_v35 }
 0x5a9   :  { %v6262_v12 = vadd.f32 %v7223_v36, %v6221_v39 }
 0x5ab   :  { %v6303_v48 = vadd.f32 %v7245_v46, %v6262_v12 }
 0x5c0   :  { %v7262_v38 = vpop.f32.mrf.mxu0 }
 0x5c2   :  { %v7263_v40 = vpop.f32.mrf.mxu0 }
 0x5c3   :  { %v7264_v44 = vadd.f32 %v7263_v40, %v7262_v38 }
 0x5c4   :  { %v7265_v29 = vpop.f32.mrf.mxu0 }
 0x5c5   :  { %v6341_v47 = vadd.f32 %v7264_v44, %v6300_v45 }
 0x5c6   :  { %v7266_v17 = vpop.f32.mrf.mxu0 }
 0x5c7   :  { %8073 = vtanh.f32 %v6341_v47  ;;  %v7267_v49 = vadd.f32 %v7266_v17, %v7265_v29 }
 0x5c9   :  { %v6344_v50 = vadd.f32 %v7267_v49, %v6303_v48 }
 0x5cb   :  { %8075 = vtanh.f32 %v6344_v50 }
 0x5d4   :  { %v8074_v31 = vpop.eup %8073 }
 0x5d5   :  { %6367 = vst [vmem:[#allocation17 + $0x30] sm:$0xff] %v8074_v31 }
 0x5d8   :  { %v8076_v54 = vpop.eup %8075 }
 0x5d9   :  { %6374 = vst [vmem:[#allocation17 + $0x68] sm:$0xff] %v8076_v54 }
 0x5da   :  { %8268 = shalt.err (!%p8265_p7)
}
 0x5db   :  { %s8308_s13 = smov 896   ;;  %s8309_s16 = smov 56  }
 0x5dc   :  { %6386 = dma.vmem_to_hbm [thread:$0]  %s6381_s8, 1792, %s8575_s9, [#allocation4], %s8308_s13, %s8308_s13, %s8309_s16  }
 0x5dd   :  { %8287 = dma.done.wait [#allocation4], 1792  }
 0x5de   :  { %8288 = vsyncadd [#allocation4], 4294965504 }
 0x5df   :  { %6390 = vsyncpa [#allocation3], 1 }
 0x5e0   :  { %6391 = vsyncpa [#allocation6], 1 }
 0x5e1   :  { %6392 = vsyncpa [#allocation9], 1 }
 0x5e2   :  { %6393 = vsyncpa [#allocation12], 1 }
 0x5e3   :  { %6394 = vsyncpa [#allocation15], 1 }
 0x5e4   :  { %6395 = vsyncpa [#allocation4], 1 }

// kernel: tpu_custom_call.1
= control target key start
LH: loop header
LB: loop body
LE: loop exit
PB: predicated region body
PF: predicated region fallthrough
CT: control target
= control target key end

     0   :  { %14 = vsyncpa [#allocation3], 0  ;;  %s8566_s0 = inlined_call_operand.hbm [shape: f32[16,128], index: 0, kind: input, shape index: {}]   ;;  %s8567_s1 = inlined_call_operand.hbm [shape: bf16[128,256], index: 1, kind: input, shape index: {}]   ;;  %s8568_s2 = inlined_call_operand.hbm [shape: f32[1,256], index: 2, kind: input, shape index: {}]   ;;  %s8569_s3 = inlined_call_operand.hbm [shape: bf16[256,512], index: 3, kind: input, shape index: {}]   ;;  %s8570_s4 = inlined_call_operand.hbm [shape: f32[1,512], index: 4, kind: input, shape index: {}]   ;;  %s8571_s5 = inlined_call_operand.hbm [shape: bf16[512,1024], index: 5, kind: input, shape index: {}]   ;;  %s8572_s6 = inlined_call_operand.hbm [shape: f32[1,1024], index: 6, kind: input, shape index: {}]   ;;  %s8573_s7 = inlined_call_operand.hbm [shape: bf16[1024,896], index: 7, kind: input, shape index: {}]   ;;  %s8574_s8 = inlined_call_operand.hbm [shape: f32[1,896], index: 8, kind: input, shape index: {}]   ;;  %s8575_s9 = inlined_call_operand.hbm [shape: f32[16,896], index: 9, kind: output, shape index: {}]  }
   0x1   :  { %15 = vsyncpa [#allocation6], 0 }
   0x2   :  { %16 = vsyncpa [#allocation9], 0 }
   0x3   :  { %17 = vsyncpa [#allocation12], 0 }
   0x4   :  { %18 = vsyncpa [#allocation15], 0 }
   0x5   :  { %19 = vsyncpa [#allocation4], 0  ;;  %s8289_s30 = smov [#allocation5]   ;;  %s8290_s11 = smov [#allocation8]  }
   0x6   :  { %s37_s10 = sshll.u32 %s8289_s30, 4  ;;  %s59_s12 = sshll.u32 %s8290_s11, 4  ;;  %s38_s10 = int_to_ptr.vmem [resolvable:$true] %s37_s10  ;;  %s60_s12 = int_to_ptr.vmem [resolvable:$true] %s59_s12 }
   0x7   :  { %s8085_s13 = scalar_lea.vmem %s38_s10, 2048  ;;  %p8090_p1 = scmp.lt.s32.totalorder %s38_s10, %s38_s10 }
   0x8   :  { %p8086_p0 = scmp.ne.s32.totalorder %s38_s10, %s8085_s13  ;;  %p8091_p2 = scmp.lt.s32.totalorder %s8085_s13, %s8085_s13 }
   0xa   :  { %p8092_p3 = por %p8091_p2, %p8090_p1 }
   0xc   :  { %p8093_p4 = pnand %p8092_p3, %p8086_p0 }
   0xe   :  { %8096 = shalt.err (!%p8093_p4)
}
   0xf   :  { %s8291_s14 = smov 128   ;;  %s8292_s15 = smov 8  }
  0x10   :  { %43 = dma.hbm_to_vmem [thread:$0]  %s8567_s1, 2048, %s38_s10, [#allocation6], %s8291_s14, %s8291_s14, %s8292_s15  }
  0x11   :  { %s8105_s18 = scalar_lea.vmem %s60_s12, 8192  ;;  %p8110_p6 = scmp.lt.s32.totalorder %s60_s12, %s60_s12 }
  0x12   :  { %p8106_p5 = scmp.ne.s32.totalorder %s60_s12, %s8105_s18  ;;  %p8111_p7 = scmp.lt.s32.totalorder %s8105_s18, %s8105_s18 }
  0x14   :  { %p8112_p8 = por %p8111_p7, %p8110_p6 }
  0x16   :  { %p8113_p9 = pnand %p8112_p8, %p8106_p5 }
  0x18   :  { %8116 = shalt.err (!%p8113_p9)
}
  0x19   :  { %s8293_s19 = smov 256   ;;  %s8294_s20 = smov 16  }
  0x1a   :  { %65 = dma.hbm_to_vmem [thread:$0]  %s8569_s3, 8192, %s60_s12, [#allocation9], %s8293_s19, %s8293_s19, %s8294_s20  }
  0x1b   :  { %s8295_s23 = smov [#allocation11]  }
  0x1c   :  { %s81_s24 = sshll.u32 %s8295_s23, 4  ;;  %s82_s24 = int_to_ptr.vmem [resolvable:$true] %s81_s24 }
  0x1d   :  { %s8125_s25 = scalar_lea.vmem %s82_s24, 32768  ;;  %p8130_p11 = scmp.lt.s32.totalorder %s82_s24, %s82_s24 }
  0x1e   :  { %p8126_p10 = scmp.ne.s32.totalorder %s82_s24, %s8125_s25  ;;  %p8131_p12 = scmp.lt.s32.totalorder %s8125_s25, %s8125_s25 }
  0x20   :  { %p8132_p13 = por %p8131_p12, %p8130_p11 }
  0x22   :  { %p8133_p0 = pnand %p8132_p13, %p8126_p10 }
  0x24   :  { %8136 = shalt.err (!%p8133_p0)
}
  0x25   :  { %s8296_s1 = smov 512   ;;  %s8297_s26 = smov 32  }
  0x26   :  { %87 = dma.hbm_to_vmem [thread:$0]  %s8571_s5, 32768, %s82_s24, [#allocation12], %s8296_s1, %s8296_s1, %s8297_s26  }
  0x27   :  { %s8298_s29 = smov [#allocation14]  }
  0x28   :  { %s103_s30 = sshll.u32 %s8298_s29, 4  ;;  %s104_s30 = int_to_ptr.vmem [resolvable:$true] %s103_s30 }
  0x29   :  { %s8145_s3 = scalar_lea.vmem %s104_s30, 57344  ;;  %p8150_p2 = scmp.lt.s32.totalorder %s104_s30, %s104_s30 }
  0x2a   :  { %p8146_p1 = scmp.ne.s32.totalorder %s104_s30, %s8145_s3  ;;  %p8151_p3 = scmp.lt.s32.totalorder %s8145_s3, %s8145_s3 }
  0x2c   :  { %p8152_p4 = por %p8151_p3, %p8150_p2 }
  0x2e   :  { %p8153_p5 = pnand %p8152_p4, %p8146_p1 }
  0x30   :  { %8156 = shalt.err (!%p8153_p5)
}
  0x31   :  { %s8299_s10 = smov 448   ;;  %s8300_s11 = smov 28  }
  0x32   :  { %109 = dma.hbm_to_vmem [thread:$0]  %s8573_s7, 57344, %s104_s30, [#allocation15], %s8299_s10, %s8299_s10, %s8300_s11  }
  0x33   :  { %s8301_s16 = smov [#allocation2]   ;;  %s8302_s18 = smov [#allocation7]  }
  0x34   :  { %s25_s17 = sshll.u32 %s8301_s16, 4  ;;  %s50_s5 = sshll.u32 %s8302_s18, 4  ;;  %s26_s17 = int_to_ptr.vmem [resolvable:$true] %s25_s17  ;;  %s51_s5 = int_to_ptr.vmem [resolvable:$true] %s50_s5 }
  0x35   :  { %s8165_s19 = scalar_lea.vmem %s26_s17, 256  ;;  %p8170_p7 = scmp.lt.s32.totalorder %s26_s17, %s26_s17 }
  0x36   :  { %p8166_p6 = scmp.ne.s32.totalorder %s26_s17, %s8165_s19  ;;  %p8171_p8 = scmp.lt.s32.totalorder %s8165_s19, %s8165_s19 }
  0x38   :  { %p8172_p9 = por %p8171_p8, %p8170_p7 }
  0x3a   :  { %p8173_p10 = pnand %p8172_p9, %p8166_p6 }
  0x3c   :  { %8176 = shalt.err (!%p8173_p10)
}
  0x3d   :  { %31 = dma.hbm_to_vmem [thread:$0]  %s8566_s0, 256, %s26_s17, [#allocation3], %s8291_s14, %s8291_s14, %s8292_s15  }
  0x3e   :  { %s8185_s7 = scalar_lea.vmem %s51_s5, 32  ;;  %p8190_p12 = scmp.lt.s32.totalorder %s51_s5, %s51_s5 }
  0x3f   :  { %p8186_p11 = scmp.ne.s32.totalorder %s51_s5, %s8185_s7  ;;  %p8191_p13 = scmp.lt.s32.totalorder %s8185_s7, %s8185_s7 }
  0x41   :  { %p8192_p0 = por %p8191_p13, %p8190_p12 }
  0x43   :  { %p8193_p1 = pnand %p8192_p0, %p8186_p11 }
  0x45   :  { %8196 = shalt.err (!%p8193_p1)
}
  0x46   :  { %53 = dma.hbm_to_vmem [thread:$0]  %s8568_s2, 32, %s51_s5, [#allocation6]  }
  0x47   :  { %s8303_s24 = smov [#allocation10]   ;;  %s8304_s1 = smov [#allocation13]  }
  0x48   :  { %s72_s25 = sshll.u32 %s8303_s24, 4  ;;  %s94_s26 = sshll.u32 %s8304_s1, 4  ;;  %s73_s25 = int_to_ptr.vmem [resolvable:$true] %s72_s25  ;;  %s95_s26 = int_to_ptr.vmem [resolvable:$true] %s94_s26 }
  0x49   :  { %s8205_s27 = scalar_lea.vmem %s73_s25, 64  ;;  %p8210_p3 = scmp.lt.s32.totalorder %s73_s25, %s73_s25 }
  0x4a   :  { %p8206_p2 = scmp.ne.s32.totalorder %s73_s25, %s8205_s27  ;;  %p8211_p4 = scmp.lt.s32.totalorder %s8205_s27, %s8205_s27 }
  0x4c   :  { %p8212_p5 = por %p8211_p4, %p8210_p3 }
  0x4e   :  { %p8213_p6 = pnand %p8212_p5, %p8206_p2 }
  0x50   :  { %8216 = shalt.err (!%p8213_p6)
}
  0x51   :  { %75 = dma.hbm_to_vmem [thread:$0]  %s8570_s4, 64, %s73_s25, [#allocation9]  }
  0x52   :  { %s8225_s15 = scalar_lea.vmem %s95_s26, 128  ;;  %p8230_p8 = scmp.lt.s32.totalorder %s95_s26, %s95_s26 }
  0x53   :  { %p8226_p7 = scmp.ne.s32.totalorder %s95_s26, %s8225_s15  ;;  %p8231_p9 = scmp.lt.s32.totalorder %s8225_s15, %s8225_s15 }
  0x55   :  { %p8232_p10 = por %p8231_p9, %p8230_p8 }
  0x57   :  { %p8233_p11 = pnand %p8232_p10, %p8226_p7 }
  0x59   :  { %8236 = shalt.err (!%p8233_p11)
}
  0x5a   :  { %97 = dma.hbm_to_vmem [thread:$0]  %s8572_s6, 128, %s95_s26, [#allocation12]  }
  0x5b   :  { %s8305_s29 = smov [#allocation16]  }
  0x5c   :  { %s116_s30 = sshll.u32 %s8305_s29, 4  ;;  %s117_s30 = int_to_ptr.vmem [resolvable:$true] %s116_s30 }
  0x5d   :  { %s8245_s3 = scalar_lea.vmem %s117_s30, 112  ;;  %s8249_s10 = scalar_lea.vmem %s117_s30, 128 }
  0x5e   :  { %p8246_p12 = scmp.ne.s32.totalorder %s117_s30, %s8245_s3  ;;  %p8250_p13 = scmp.lt.s32.totalorder %s117_s30, %s117_s30 }
  0x5f   :  { %p8251_p0 = scmp.lt.s32.totalorder %s8249_s10, %s8245_s3 }
  0x61   :  { %p8252_p1 = por %p8251_p0, %p8250_p13 }
  0x63   :  { %p8253_p2 = pnand %p8252_p1, %p8246_p12 }
  0x65   :  { %8256 = shalt.err (!%p8253_p2)
}
  0x66   :  { %119 = dma.hbm_to_vmem [thread:$0]  %s8574_s8, 112, %s117_s30, [#allocation15]  }
  0x67   :  { %8277 = dma.done.wait [#allocation3], 256  }
  0x68   :  { %8278 = vsyncadd [#allocation3], 4294967040 }
  0x69   :  { %8279 = dma.done.wait [#allocation6], 2080  }
  0x6a   :  { %8280 = vsyncadd [#allocation6], 4294965216 }
  0x6b   :  { %8281 = dma.done.wait [#allocation9], 8256  }
  0x6c   :  { %8282 = vsyncadd [#allocation9], 4294959040 }
  0x6d   :  { %8283 = dma.done.wait [#allocation12], 32896  }
  0x6e   :  { %8284 = vsyncadd [#allocation12], 4294934400 }
  0x6f   :  { %8285 = dma.done.wait [#allocation15], 57456  }
  0x70   :  { %8286 = vsyncadd [#allocation15], 4294909840  ;;  %v8306_v0 = vmov 0   ;;  %v7289_v1 = vld [vmem:[#allocation5 + $0x74] ss:$8 sps:$4 sm:$0xff]   ;;  %s8307_s6 = smov [#allocation17]  }
  0x71   :  { %291 = vmatprep.mubr.bf16.mxu0 %v8306_v0  ;;  %v7291_v2 = vld [vmem:[#allocation5 + $0x70] ss:$8 sps:$4 sm:$0xff]   ;;  %259 = vmatprep.subr.bf16.mxu0 %v7289_v1  ;;  %v7292_v3 = vld [vmem:[#allocation5 + $0x64] ss:$8 sps:$4 sm:$0xff]   ;;  %v7294_v4 = vld [vmem:[#allocation5 + $0x60] ss:$8 sps:$4 sm:$0xff]  }
  0x72   :  { %260 = vmatpush1.bf16.msra.mxu0 %v7291_v2  ;;  %v7295_v5 = vld [vmem:[#allocation5 + $0x54] ss:$8 sps:$4 sm:$0xff]   ;;  %v7297_v6 = vld [vmem:[#allocation5 + $0x50] ss:$8 sps:$4 sm:$0xff]   ;;  %v7298_v7 = vld [vmem:[#allocation5 + $0x44] ss:$8 sps:$4 sm:$0xff]  }
  0x73   :  { %261 = vmatprep.subr.bf16.mxu0 %v7292_v3  ;;  %v7300_v8 = vld [vmem:[#allocation5 + $0x40] ss:$8 sps:$4 sm:$0xff]   ;;  %v7301_v9 = vld [vmem:[#allocation5 + $0x34] ss:$8 sps:$4 sm:$0xff]   ;;  %v7303_v13 = vld [vmem:[#allocation5 + $0x30] ss:$8 sps:$4 sm:$0xff]  }
  0x74   :  { %v7313_v10 = vld [vmem:[#allocation8 + $0xe4] ss:$16 sps:$4 sm:$0xff]   ;;  %v7318_v11 = vld [vmem:[#allocation8 + $0xe0] ss:$16 sps:$4 sm:$0xff]   ;;  %v7317_v28 = vld [vmem:[#allocation8 + $0xec] ss:$16 sps:$4 sm:$0xff]  }
  0x75   :  { %722 = vmatprep.subr.bf16.mxu1 %v7313_v10  ;;  %v7319_v12 = vld [vmem:[#allocation8 + $0xc4] ss:$16 sps:$4 sm:$0xff]   ;;  %v7324_v15 = vld [vmem:[#allocation8 + $0xc0] ss:$16 sps:$4 sm:$0xff]   ;;  %v7315_v32 = vld [vmem:[#allocation8 + $0xe8] ss:$16 sps:$4 sm:$0xff]  }
  0x76   :  { %262 = vmatpush1.bf16.msra.mxu0 %v7294_v4  ;;  %723 = vmatpush1.bf16.msra.mxu1 %v7318_v11  ;;  %v7304_v14 = vld [vmem:[#allocation5 + $0x24] ss:$8 sps:$4 sm:$0xff]   ;;  %v7306_v17 = vld [vmem:[#allocation5 + $0x20] ss:$8 sps:$4 sm:$0xff]   ;;  %v7307_v18 = vld [vmem:[#allocation5 + $0x14] ss:$8 sps:$4 sm:$0xff]  }
  0x77   :  { %263 = vmatprep.subr.bf16.mxu0 %v7295_v5  ;;  %724 = vmatprep.subr.bf16.mxu1 %v7319_v12  ;;  %v7325_v16 = vld [vmem:[#allocation8 + $0xa4] ss:$16 sps:$4 sm:$0xff]   ;;  %v7330_v19 = vld [vmem:[#allocation8 + $0xa0] ss:$16 sps:$4 sm:$0xff]   ;;  %v7323_v34 = vld [vmem:[#allocation8 + $0xcc] ss:$16 sps:$4 sm:$0xff]  }
  0x78   :  { %v7331_v20 = vld [vmem:[#allocation8 + $0x84] ss:$16 sps:$4 sm:$0xff]   ;;  %v7336_v22 = vld [vmem:[#allocation8 + $0x80] ss:$16 sps:$4 sm:$0xff]   ;;  %v7321_v36 = vld [vmem:[#allocation8 + $0xc8] ss:$16 sps:$4 sm:$0xff]  }
  0x79   :  { %v7309_v21 = vld [vmem:[#allocation5 + $0x10] ss:$8 sps:$4 sm:$0xff]   ;;  %v7310_v23 = vld [vmem:[#allocation5 + $0x4] ss:$8 sps:$4 sm:$0xff]   ;;  %v7312_v25 = vld [vmem:[#allocation5] ss:$8 sps:$4 sm:$0xff]  }
  0x7a   :  { %264 = vmatpush1.bf16.msra.mxu0 %v7297_v6  ;;  %725 = vmatpush1.bf16.msra.mxu1 %v7324_v15  ;;  %v7337_v24 = vld [vmem:[#allocation8 + $0x64] ss:$16 sps:$4 sm:$0xff]   ;;  %v7342_v29 = vld [vmem:[#allocation8 + $0x60] ss:$16 sps:$4 sm:$0xff]   ;;  %v7329_v37 = vld [vmem:[#allocation8 + $0xac] ss:$16 sps:$4 sm:$0xff]  }
  0x7b   :  { %265 = vmatprep.subr.bf16.mxu0 %v7298_v7  ;;  %726 = vmatprep.subr.bf16.mxu1 %v7325_v16  ;;  %v148_v26 = vld [vmem:[#allocation2] sm:$0xff]  ;;  %v149_v27 = vld [vmem:[#allocation2 + $0x8] sm:$0xff]  ;;  %s6380_s8 = sshll.u32 %s8307_s6, 4  ;;  %s6381_s8 = int_to_ptr.vmem [resolvable:$true] %s6380_s8 }
  0x7c   :  { %v7343_v30 = vld [vmem:[#allocation8 + $0x44] ss:$16 sps:$4 sm:$0xff]   ;;  %v150_v31 = vpack.c.bf16 %v149_v27, %v148_v26  ;;  %v7348_v33 = vld [vmem:[#allocation8 + $0x40] ss:$16 sps:$4 sm:$0xff]   ;;  %v7327_v40 = vld [vmem:[#allocation8 + $0xa8] ss:$16 sps:$4 sm:$0xff]   ;;  %p8262_p4 = scmp.lt.s32.totalorder %s6381_s8, %s6381_s8 }
  0x7d   :  { %v7349_v35 = vld [vmem:[#allocation8 + $0x24] ss:$16 sps:$4 sm:$0xff]   ;;  %v7354_v38 = vld [vmem:[#allocation8 + $0x20] ss:$16 sps:$4 sm:$0xff]   ;;  %v7335_v42 = vld [vmem:[#allocation8 + $0x8c] ss:$16 sps:$4 sm:$0xff]  }
  0x7e   :  { %266 = vmatpush1.bf16.msra.mxu0 %v7300_v8  ;;  %727 = vmatpush1.bf16.msra.mxu1 %v7330_v19  ;;  %v7355_v39 = vld [vmem:[#allocation8 + $0x4] ss:$16 sps:$4 sm:$0xff]   ;;  %v7360_v41 = vld [vmem:[#allocation8] ss:$16 sps:$4 sm:$0xff]   ;;  %v7333_v44 = vld [vmem:[#allocation8 + $0x88] ss:$16 sps:$4 sm:$0xff]  }
  0x7f   :  { %267 = vmatprep.subr.bf16.mxu0 %v7301_v9  ;;  %728 = vmatprep.subr.bf16.mxu1 %v7331_v20  ;;  %v7361_v43 = vld [vmem:[#allocation8 + $0x1e4] ss:$16 sps:$4 sm:$0xff]   ;;  %v7341_v45 = vld [vmem:[#allocation8 + $0x6c] ss:$16 sps:$4 sm:$0xff]   ;;  %v7366_v46 = vld [vmem:[#allocation8 + $0x1e0] ss:$16 sps:$4 sm:$0xff]  }
  0x80   :  { %v7367_v47 = vld [vmem:[#allocation8 + $0x1c4] ss:$16 sps:$4 sm:$0xff]   ;;  %v7339_v48 = vld [vmem:[#allocation8 + $0x68] ss:$16 sps:$4 sm:$0xff]   ;;  %v7372_v49 = vld [vmem:[#allocation8 + $0x1c0] ss:$16 sps:$4 sm:$0xff]  }
  0x81   :  { %v7347_v50 = vld [vmem:[#allocation8 + $0x4c] ss:$16 sps:$4 sm:$0xff]   ;;  %v7373_v51 = vld [vmem:[#allocation8 + $0x1a4] ss:$16 sps:$4 sm:$0xff]   ;;  %v7345_v52 = vld [vmem:[#allocation8 + $0x48] ss:$16 sps:$4 sm:$0xff]  }
  0x82   :  { %268 = vmatpush1.bf16.msra.mxu0 %v7303_v13  ;;  %729 = vmatpush1.bf16.msra.mxu1 %v7336_v22  ;;  %v7378_v53 = vld [vmem:[#allocation8 + $0x1a0] ss:$16 sps:$4 sm:$0xff]   ;;  %v7353_v54 = vld [vmem:[#allocation8 + $0x2c] ss:$16 sps:$4 sm:$0xff]   ;;  %v7379_v55 = vld [vmem:[#allocation8 + $0x184] ss:$16 sps:$4 sm:$0xff]  }
  0x83   :  { %269 = vmatprep.subr.bf16.mxu0 %v7304_v14  ;;  %730 = vmatprep.subr.bf16.mxu1 %v7337_v24  ;;  %v7351_v56 = vld [vmem:[#allocation8 + $0x28] ss:$16 sps:$4 sm:$0xff]   ;;  %v7384_v57 = vld [vmem:[#allocation8 + $0x180] ss:$16 sps:$4 sm:$0xff]   ;;  %v7359_v58 = vld [vmem:[#allocation8 + $0xc] ss:$16 sps:$4 sm:$0xff]  }
  0x84   :  { %v7385_v59 = vld [vmem:[#allocation8 + $0x164] ss:$16 sps:$4 sm:$0xff]   ;;  %v7357_v60 = vld [vmem:[#allocation8 + $0x8] ss:$16 sps:$4 sm:$0xff]   ;;  %v7365_v61 = vld [vmem:[#allocation8 + $0x1ec] ss:$16 sps:$4 sm:$0xff]  }
  0x85   :  { %v7363_v62 = vld [vmem:[#allocation8 + $0x1e8] ss:$16 sps:$4 sm:$0xff]   ;;  %v7371_v63 = vld [vmem:[#allocation8 + $0x1cc] ss:$16 sps:$4 sm:$0xff]   ;;  %v7390_v7 = vld [vmem:[#allocation8 + $0x160] ss:$16 sps:$4 sm:$0xff]  }
  0x86   :  { %270 = vmatpush1.bf16.msra.mxu0 %v7306_v17  ;;  %731 = vmatpush1.bf16.msra.mxu1 %v7342_v29  ;;  %v7369_v0 = vld [vmem:[#allocation8 + $0x1c8] ss:$16 sps:$4 sm:$0xff]   ;;  %v7377_v1 = vld [vmem:[#allocation8 + $0x1ac] ss:$16 sps:$4 sm:$0xff]   ;;  %v7391_v8 = vld [vmem:[#allocation8 + $0x144] ss:$16 sps:$4 sm:$0xff]  }
  0x87   :  { %271 = vmatprep.subr.bf16.mxu0 %v7307_v18  ;;  %732 = vmatprep.subr.bf16.mxu1 %v7343_v30  ;;  %v7375_v2 = vld [vmem:[#allocation8 + $0x1a8] ss:$16 sps:$4 sm:$0xff]   ;;  %v7383_v3 = vld [vmem:[#allocation8 + $0x18c] ss:$16 sps:$4 sm:$0xff]   ;;  %v7396_v11 = vld [vmem:[#allocation8 + $0x140] ss:$16 sps:$4 sm:$0xff]  }
  0x88   :  { %v7381_v4 = vld [vmem:[#allocation8 + $0x188] ss:$16 sps:$4 sm:$0xff]   ;;  %v7389_v5 = vld [vmem:[#allocation8 + $0x16c] ss:$16 sps:$4 sm:$0xff]   ;;  %v7397_v12 = vld [vmem:[#allocation8 + $0x124] ss:$16 sps:$4 sm:$0xff]  }
  0x89   :  { %v7387_v6 = vld [vmem:[#allocation8 + $0x168] ss:$16 sps:$4 sm:$0xff]   ;;  %v7395_v9 = vld [vmem:[#allocation8 + $0x14c] ss:$16 sps:$4 sm:$0xff]   ;;  %v7402_v15 = vld [vmem:[#allocation8 + $0x120] ss:$16 sps:$4 sm:$0xff]  }
  0x8a   :  { %272 = vmatpush1.bf16.msra.mxu0 %v7309_v21  ;;  %733 = vmatpush1.bf16.msra.mxu1 %v7348_v33  ;;  %v7393_v10 = vld [vmem:[#allocation8 + $0x148] ss:$16 sps:$4 sm:$0xff]   ;;  %v7401_v13 = vld [vmem:[#allocation8 + $0x12c] ss:$16 sps:$4 sm:$0xff]   ;;  %v7403_v16 = vld [vmem:[#allocation8 + $0x104] ss:$16 sps:$4 sm:$0xff]  }
  0x8b   :  { %273 = vmatprep.subr.bf16.mxu0 %v7310_v23  ;;  %734 = vmatprep.subr.bf16.mxu1 %v7349_v35  ;;  %v7399_v14 = vld [vmem:[#allocation8 + $0x128] ss:$16 sps:$4 sm:$0xff]   ;;  %v7407_v18 = vld [vmem:[#allocation8 + $0x10c] ss:$16 sps:$4 sm:$0xff]   ;;  %v7408_v19 = vld [vmem:[#allocation8 + $0x100] ss:$16 sps:$4 sm:$0xff]  }
  0x8c   :  { %v7405_v17 = vld [vmem:[#allocation8 + $0x108] ss:$16 sps:$4 sm:$0xff]   ;;  %v167_v30 = vld [vmem:[#allocation7] sm:$0x3]  ;;  %s8257_s12 = scalar_lea.vmem %s6381_s8, 1792 }
  0x8d   :  { %v892_v20 = vld [vmem:[#allocation11 + $0x1c0] sm:$0xff]  ;;  %p8258_p3 = scmp.ne.s32.totalorder %s6381_s8, %s8257_s12  ;;  %p8263_p5 = scmp.lt.s32.totalorder %s8257_s12, %s8257_s12 }
  0x8e   :  { %274 = vmatpush1.bf16.msra.mxu0 %v7312_v25  ;;  %735 = vmatpush1.bf16.msra.mxu1 %v7354_v38  ;;  %v896_v21 = vld [vmem:[#allocation11 + $0x1e0] sm:$0xff] }
  0x8f   :  { %765 = vmatprep.subr.bf16.mxu0 %v7317_v28  ;;  %736 = vmatprep.subr.bf16.mxu1 %v7355_v39  ;;  %v1020_v22 = vld [vmem:[#allocation11 + $0x5c0] sm:$0xff]  ;;  %v6532_v23 = vcombine.low %v892_v20, %v896_v21  ;;  %v6533_v24 = vcombine.high %v892_v20, %v896_v21  ;;  %v169_v28 = vlaneseq  ;;  %p8264_p6 = por %p8263_p5, %p8262_p4 }
  0x90   :  { %v1024_v25 = vld [vmem:[#allocation11 + $0x5e0] sm:$0xff] }
  0x91   :  { %292 = vmatmul.mubr.bf16.vlgmr.msra.gmra.mxu0 %v150_v31  ;;  %v6660_v26 = vcombine.low %v1020_v22, %v1024_v25  ;;  %v6661_v27 = vcombine.high %v1020_v22, %v1024_v25  ;;  %v8393_v29 = vshrl.u32 %v169_v28, 7  ;;  %v856_v20 = vld [vmem:[#allocation11 + $0xa0] sm:$0xff]  ;;  %p8265_p7 = pnand %p8264_p6, %p8258_p3 }
  0x92   :  { %766 = vmatpush1.bf16.msra.mxu0 %v7315_v32  ;;  %737 = vmatpush1.bf16.msra.mxu1 %v7360_v41  ;;  %v980_v21 = vld [vmem:[#allocation11 + $0x480] sm:$0xff] }
  0x93   :  { %767 = vmatprep.subr.bf16.mxu0 %v7323_v34  ;;  %738 = vmatprep.subr.bf16.mxu1 %v7361_v43  ;;  %v8396_v31 = vsub.s32 0, %v8393_v29  ;;  %v8399_v32 = vsub.s32 1, %v8393_v29  ;;  %v984_v22 = vld [vmem:[#allocation11 + $0x4a0] sm:$0xff] }
  0x94   :  { %v848_v28 = vld [vmem:[#allocation11 + $0x60] sm:$0xff] }
  0x95   :  { %v172_v33 = vrot.slane %v167_v30, %v8396_v31  ;;  %v176_v34 = vrot.slane %v167_v30, %v8399_v32  ;;  %v972_v30 = vld [vmem:[#allocation11 + $0x440] sm:$0xff] }
  0x96   :  { %768 = vmatpush1.bf16.msra.mxu0 %v7321_v36  ;;  %739 = vmatpush2.bf16.msra.mxu1 %v7366_v46  ;;  %v884_v46 = vld [vmem:[#allocation11 + $0x180] sm:$0xff] }
  0x97   :  { %769 = vmatprep.subr.bf16.mxu0 %v7329_v37  ;;  %740 = vmatprep.subr.bf16.mxu1 %v7367_v47  ;;  %v888_v47 = vld [vmem:[#allocation11 + $0x1a0] sm:$0xff] }
  0x9a   :  { %770 = vmatpush1.bf16.msra.mxu0 %v7327_v40  ;;  %741 = vmatpush2.bf16.msra.mxu1 %v7372_v49  ;;  %v1016_v49 = vld [vmem:[#allocation11 + $0x5a0] sm:$0xff] }
  0x9b   :  { %771 = vmatprep.subr.bf16.mxu0 %v7335_v42  ;;  %742 = vmatprep.subr.bf16.mxu1 %v7373_v51 }
  0x9e   :  { %772 = vmatpush1.bf16.msra.mxu0 %v7333_v44  ;;  %743 = vmatpush2.bf16.msra.mxu1 %v7378_v53 }
  0x9f   :  { %773 = vmatprep.subr.bf16.mxu0 %v7341_v45  ;;  %744 = vmatprep.subr.bf16.mxu1 %v7379_v55 }
  0xa2   :  { %774 = vmatpush1.bf16.msra.mxu0 %v7339_v48  ;;  %745 = vmatpush2.bf16.msra.mxu1 %v7384_v57  ;;  %v1012_v48 = vld [vmem:[#allocation11 + $0x580] sm:$0xff] }
  0xa3   :  { %775 = vmatprep.subr.bf16.mxu0 %v7347_v50  ;;  %746 = vmatprep.subr.bf16.mxu1 %v7385_v59  ;;  %v880_v57 = vld [vmem:[#allocation11 + $0x160] sm:$0xff] }
  0xa4   :  { %v1008_v59 = vld [vmem:[#allocation11 + $0x560] sm:$0xff] }
  0xa6   :  { %776 = vmatpush1.bf16.msra.mxu0 %v7345_v52  ;;  %747 = vmatpush2.bf16.msra.mxu1 %v7390_v7 }
  0xa7   :  { %777 = vmatprep.subr.bf16.mxu0 %v7353_v54  ;;  %748 = vmatprep.subr.bf16.mxu1 %v7391_v8 }
  0xaa   :  { %778 = vmatpush1.bf16.msra.mxu0 %v7351_v56  ;;  %749 = vmatpush2.bf16.msra.mxu1 %v7396_v11  ;;  %v876_v56 = vld [vmem:[#allocation11 + $0x140] sm:$0xff] }
  0xab   :  { %779 = vmatprep.subr.bf16.mxu0 %v7359_v58  ;;  %750 = vmatprep.subr.bf16.mxu1 %v7397_v12  ;;  %v1004_v58 = vld [vmem:[#allocation11 + $0x540] sm:$0xff]  ;;  %v6516_v7 = vcombine.low %v876_v56, %v880_v57 }
  0xac   :  { %v6644_v8 = vcombine.low %v1004_v58, %v1008_v59  ;;  %v860_v11 = vld [vmem:[#allocation11 + $0xc0] sm:$0xff] }
  0xad   :  { %v864_v12 = vld [vmem:[#allocation11 + $0xe0] sm:$0xff] }
  0xae   :  { %780 = vmatpush1.bf16.msra.mxu0 %v7357_v60  ;;  %751 = vmatpush2.bf16.msra.mxu1 %v7402_v15 }
  0xaf   :  { %781 = vmatprep.subr.bf16.mxu0 %v7365_v61  ;;  %752 = vmatprep.subr.bf16.mxu1 %v7403_v16  ;;  %v6525_v61 = vcombine.high %v884_v46, %v888_v47 }
  0xb2   :  { %782 = vmatpush2.bf16.msra.mxu0 %v7363_v62  ;;  %753 = vmatpush2.bf16.msra.mxu1 %v7408_v19  ;;  %v6653_v62 = vcombine.high %v1012_v48, %v1016_v49  ;;  %v852_v19 = vld [vmem:[#allocation11 + $0x80] sm:$0xff] }
  0xb3   :  { %783 = vmatprep.subr.bf16.mxu0 %v7371_v63  ;;  %2414 = vmatprep.subr.bf16.mxu1 %v6533_v24  ;;  %v6524_v63 = vcombine.low %v884_v46, %v888_v47  ;;  %v6493_v25 = vcombine.high %v852_v19, %v856_v20  ;;  %v956_v46 = vld [vmem:[#allocation11 + $0x3c0] sm:$0xff] }
  0xb4   :  { %v960_v47 = vld [vmem:[#allocation11 + $0x3e0] sm:$0xff] }
  0xb6   :  { %784 = vmatpush2.bf16.msra.mxu0 %v7369_v0  ;;  %v6652_v0 = vcombine.low %v1012_v48, %v1016_v49  ;;  %v1084_v48 = vld [vmem:[#allocation11 + $0x7c0] sm:$0xff] }
  0xb7   :  { %785 = vmatprep.subr.bf16.mxu0 %v7377_v1  ;;  %v868_v1 = vld [vmem:[#allocation11 + $0x100] sm:$0xff] }
  0xb8   :  { %v1088_v49 = vld [vmem:[#allocation11 + $0x7e0] sm:$0xff] }
  0xba   :  { %786 = vmatpush2.bf16.msra.mxu0 %v7375_v2  ;;  %v872_v2 = vld [vmem:[#allocation11 + $0x120] sm:$0xff] }
  0xbb   :  { %787 = vmatprep.subr.bf16.mxu0 %v7383_v3  ;;  %v996_v3 = vld [vmem:[#allocation11 + $0x500] sm:$0xff]  ;;  %v6508_v15 = vcombine.low %v868_v1, %v872_v2 }
  0xbe   :  { %788 = vmatpush2.bf16.msra.mxu0 %v7381_v4  ;;  %v1000_v4 = vld [vmem:[#allocation11 + $0x520] sm:$0xff] }
  0xbf   :  { %789 = vmatprep.subr.bf16.mxu0 %v7389_v5  ;;  %v6517_v5 = vcombine.high %v876_v56, %v880_v57  ;;  %v6636_v16 = vcombine.low %v996_v3, %v1000_v4  ;;  %v1076_v56 = vld [vmem:[#allocation11 + $0x780] sm:$0xff] }
  0xc0   :  { %v1080_v57 = vld [vmem:[#allocation11 + $0x7a0] sm:$0xff] }
  0xc2   :  { %790 = vmatpush2.bf16.msra.mxu0 %v7387_v6  ;;  %v6645_v6 = vcombine.high %v1004_v58, %v1008_v59  ;;  %v6596_v58 = vcombine.low %v956_v46, %v960_v47  ;;  %v6724_v59 = vcombine.low %v1084_v48, %v1088_v49 }
  0xc3   :  { %791 = vmatprep.subr.bf16.mxu0 %v7395_v9  ;;  %v6509_v9 = vcombine.high %v868_v1, %v872_v2  ;;  %v1072_v1 = vld [vmem:[#allocation11 + $0x760] sm:$0xff] }
  0xc6   :  { %792 = vmatpush2.bf16.msra.mxu0 %v7393_v10  ;;  %v6637_v10 = vcombine.high %v996_v3, %v1000_v4  ;;  %v6716_v3 = vcombine.low %v1076_v56, %v1080_v57 }
  0xc7   :  { %793 = vmatprep.subr.bf16.mxu0 %v7401_v13  ;;  %v988_v13 = vld [vmem:[#allocation11 + $0x4c0] sm:$0xff] }
  0xca   :  { %794 = vmatpush2.bf16.msra.mxu0 %v7399_v14  ;;  %v992_v14 = vld [vmem:[#allocation11 + $0x4e0] sm:$0xff] }
  0xcb   :  { %795 = vmatprep.subr.bf16.mxu0 %v7407_v18  ;;  %v6629_v18 = vcombine.high %v988_v13, %v992_v14  ;;  %v6628_v24 = vcombine.low %v988_v13, %v992_v14  ;;  %v924_v14 = vld [vmem:[#allocation11 + $0x2c0] sm:$0xff] }
  0xce   :  { %796 = vmatpush2.bf16.msra.mxu0 %v7405_v17  ;;  %v6501_v17 = vcombine.high %v860_v11, %v864_v12 }
  0xcf   :  { %2457 = vmatprep.subr.bf16.mxu0 %v6661_v27  ;;  %v844_v27 = vld [vmem:[#allocation11 + $0x40] sm:$0xff] }
 0x151   :  { %v293_v35 = vpop.f32.mrf.mxu0 }
 0x152   :  { %v294_v36 = vadd.f32 %v293_v35, %v172_v33  ;;  %v6620_v35 = vcombine.low %v980_v21, %v984_v22 }
 0x153   :  { %v295_v37 = vpop.f32.mrf.mxu0 }
 0x154   :  { %v296_v38 = vadd.f32 %v295_v37, %v176_v34  ;;  %v306_v40 = vmul.f32 0.2, %v294_v36  ;;  %vm302_vm2 = vcmp.ge.f32.partialorder %v294_v36, 0.0 }
 0x155   :  { %v297_v39 = vpop.f32.mrf.mxu0 }
 0x156   :  { %v307_v41 = vmul.f32 0.2, %v296_v38  ;;  %v298_v42 = vadd.f32 %v297_v39, %v172_v33  ;;  %vm303_vm1 = vcmp.ge.f32.partialorder %v296_v38, 0.0  ;;  %v310_v55 = vsel %vm302_vm2, %v294_v36, %v306_v40  ;;  %v976_v33 = vld [vmem:[#allocation11 + $0x460] sm:$0xff] }
 0x157   :  { %v299_v43 = vpop.f32.mrf.mxu0  ;;  %v6485_v36 = vcombine.high %v844_v27, %v848_v28  ;;  %v6613_v37 = vcombine.high %v972_v30, %v976_v33  ;;  %v840_v39 = vld [vmem:[#allocation11 + $0x20] sm:$0xff] }
 0x158   :  { %vm304_vm0 = vcmp.ge.f32.partialorder %v298_v42, 0.0  ;;  %v308_v44 = vmul.f32 0.2, %v298_v42  ;;  %v300_v45 = vadd.f32 %v299_v43, %v176_v34  ;;  %v311_v52 = vsel %vm303_vm1, %v296_v38, %v307_v41  ;;  %v836_v38 = vld [vmem:[#allocation11] sm:$0xff] }
 0x159   :  { %v6492_v34 = vcombine.low %v852_v19, %v856_v20  ;;  %v964_v40 = vld [vmem:[#allocation11 + $0x400] sm:$0xff]  ;;  %v6612_v43 = vcombine.low %v972_v30, %v976_v33 }
 0x15a   :  { %v309_v50 = vmul.f32 0.2, %v300_v45  ;;  %vm305_vm3 = vcmp.ge.f32.partialorder %v300_v45, 0.0  ;;  %v312_v51 = vsel %vm304_vm0, %v298_v42, %v308_v44  ;;  %v968_v41 = vld [vmem:[#allocation11 + $0x420] sm:$0xff]  ;;  %v6484_v42 = vcombine.low %v844_v27, %v848_v28 }
 0x15b   :  { %v314_v60 = vpack.c.bf16 %v312_v51, %v310_v55  ;;  %v6477_v44 = vcombine.high %v836_v38, %v840_v39  ;;  %v6604_v51 = vcombine.low %v964_v40, %v968_v41  ;;  %v952_v55 = vld [vmem:[#allocation11 + $0x3a0] sm:$0xff] }
 0x15c   :  { %v313_v53 = vsel %vm305_vm3, %v300_v45, %v309_v50  ;;  %v6605_v45 = vcombine.high %v964_v40, %v968_v41  ;;  %v6476_v50 = vcombine.low %v836_v38, %v840_v39  ;;  %v1048_v28 = vld [vmem:[#allocation11 + $0x6a0] sm:$0xff] }
 0x15d   :  { %v315_v54 = vpack.c.bf16 %v313_v53, %v311_v52  ;;  %v6597_v52 = vcombine.high %v956_v46, %v960_v47  ;;  %v6725_v53 = vcombine.high %v1084_v48, %v1088_v49  ;;  %v1040_v39 = vld [vmem:[#allocation11 + $0x660] sm:$0xff] }
 0x15e   :  { %v1032_v47 = vld [vmem:[#allocation11 + $0x620] sm:$0xff] }
 0x15f   :  { %754 = vmatprep.mubr.bf16.mxu1 %v315_v54  ;;  %797 = vmatprep.mubr.bf16.mxu0 %v315_v54  ;;  %v948_v54 = vld [vmem:[#allocation11 + $0x380] sm:$0xff] }
 0x160   :  { %755 = vmatmul.mubr.bf16.vlgmr.msra.gmra.mxu1 %v314_v60  ;;  %798 = vmatmul.mubr.bf16.vlgmr.msra.gmra.mxu0 %v314_v60  ;;  %v6589_v60 = vcombine.high %v948_v54, %v952_v55  ;;  %v6588_v2 = vcombine.low %v948_v54, %v952_v55  ;;  %v8411_v55 = vld [vmem:[#allocation11 + $0x5e8] sm:$0xff] }
 0x161   :  { %2415 = vmatpush1.bf16.msra.mxu1 %v6532_v23  ;;  %2458 = vmatpush1.bf16.msra.mxu0 %v6660_v26  ;;  %v6500_v23 = vcombine.low %v860_v11, %v864_v12  ;;  %v6621_v26 = vcombine.high %v980_v21, %v984_v22 }
 0x162   :  { %2416 = vmatprep.subr.bf16.mxu1 %v6525_v61  ;;  %2459 = vmatprep.subr.bf16.mxu0 %v6653_v62  ;;  %v6717_v61 = vcombine.high %v1076_v56, %v1080_v57  ;;  %v940_v62 = vld [vmem:[#allocation11 + $0x340] sm:$0xff] }
 0x165   :  { %2417 = vmatpush1.bf16.msra.mxu1 %v6524_v63  ;;  %2460 = vmatpush1.bf16.msra.mxu0 %v6652_v0  ;;  %v944_v63 = vld [vmem:[#allocation11 + $0x360] sm:$0xff] }
 0x166   :  { %2418 = vmatprep.subr.bf16.mxu1 %v6517_v5  ;;  %2461 = vmatprep.subr.bf16.mxu0 %v6645_v6  ;;  %v1068_v0 = vld [vmem:[#allocation11 + $0x740] sm:$0xff]  ;;  %v6581_v4 = vcombine.high %v940_v62, %v944_v63 }
 0x167   :  { %v6709_v5 = vcombine.high %v1068_v0, %v1072_v1  ;;  %v932_v6 = vld [vmem:[#allocation11 + $0x300] sm:$0xff]  ;;  %v6708_v11 = vcombine.low %v1068_v0, %v1072_v1 }
 0x169   :  { %2419 = vmatpush1.bf16.msra.mxu1 %v6516_v7  ;;  %2462 = vmatpush1.bf16.msra.mxu0 %v6644_v8  ;;  %v936_v7 = vld [vmem:[#allocation11 + $0x320] sm:$0xff] }
 0x16a   :  { %2420 = vmatprep.subr.bf16.mxu1 %v6509_v9  ;;  %2463 = vmatprep.subr.bf16.mxu0 %v6637_v10  ;;  %v1060_v8 = vld [vmem:[#allocation11 + $0x700] sm:$0xff]  ;;  %v6580_v10 = vcombine.low %v940_v62, %v944_v63  ;;  %v6573_v12 = vcombine.high %v932_v6, %v936_v7 }
 0x16b   :  { %v1064_v9 = vld [vmem:[#allocation11 + $0x720] sm:$0xff] }
 0x16c   :  { %v6701_v13 = vcombine.high %v1060_v8, %v1064_v9  ;;  %v6700_v19 = vcombine.low %v1060_v8, %v1064_v9 }
 0x16d   :  { %2421 = vmatpush1.bf16.msra.mxu1 %v6508_v15  ;;  %2464 = vmatpush1.bf16.msra.mxu0 %v6636_v16  ;;  %v928_v15 = vld [vmem:[#allocation11 + $0x2e0] sm:$0xff] }
 0x16e   :  { %2422 = vmatprep.subr.bf16.mxu1 %v6501_v17  ;;  %2465 = vmatprep.subr.bf16.mxu0 %v6629_v18  ;;  %v1052_v16 = vld [vmem:[#allocation11 + $0x6c0] sm:$0xff]  ;;  %v6572_v18 = vcombine.low %v932_v6, %v936_v7  ;;  %v6565_v20 = vcombine.high %v924_v14, %v928_v15  ;;  %v6564_v22 = vcombine.low %v924_v14, %v928_v15 }
 0x16f   :  { %v1056_v17 = vld [vmem:[#allocation11 + $0x6e0] sm:$0xff] }
 0x170   :  { %v6693_v21 = vcombine.high %v1052_v16, %v1056_v17 }
 0x171   :  { %2423 = vmatpush1.bf16.msra.mxu1 %v6500_v23  ;;  %2466 = vmatpush1.bf16.msra.mxu0 %v6628_v24  ;;  %v6692_v23 = vcombine.low %v1052_v16, %v1056_v17  ;;  %v916_v24 = vld [vmem:[#allocation11 + $0x280] sm:$0xff] }
 0x172   :  { %2424 = vmatprep.subr.bf16.mxu1 %v6493_v25  ;;  %2467 = vmatprep.subr.bf16.mxu0 %v6621_v26  ;;  %v920_v25 = vld [vmem:[#allocation11 + $0x2a0] sm:$0xff] }
 0x173   :  { %v1044_v26 = vld [vmem:[#allocation11 + $0x680] sm:$0xff]  ;;  %v6557_v27 = vcombine.high %v916_v24, %v920_v25  ;;  %v6556_v30 = vcombine.low %v916_v24, %v920_v25 }
 0x174   :  { %v6684_v33 = vcombine.low %v1044_v26, %v1048_v28 }
 0x175   :  { %2425 = vmatpush1.bf16.msra.mxu1 %v6492_v34  ;;  %2468 = vmatpush1.bf16.msra.mxu0 %v6620_v35  ;;  %v6685_v34 = vcombine.high %v1044_v26, %v1048_v28  ;;  %v908_v35 = vld [vmem:[#allocation11 + $0x240] sm:$0xff] }
 0x176   :  { %2426 = vmatprep.subr.bf16.mxu1 %v6485_v36  ;;  %2469 = vmatprep.subr.bf16.mxu0 %v6613_v37  ;;  %v912_v36 = vld [vmem:[#allocation11 + $0x260] sm:$0xff] }
 0x177   :  { %v1036_v37 = vld [vmem:[#allocation11 + $0x640] sm:$0xff]  ;;  %v6549_v38 = vcombine.high %v908_v35, %v912_v36  ;;  %v6548_v40 = vcombine.low %v908_v35, %v912_v36 }
 0x178   :  { %v6676_v41 = vcombine.low %v1036_v37, %v1040_v39 }
 0x179   :  { %2427 = vmatpush1.bf16.msra.mxu1 %v6484_v42  ;;  %2470 = vmatpush1.bf16.msra.mxu0 %v6612_v43  ;;  %v6677_v42 = vcombine.high %v1036_v37, %v1040_v39  ;;  %v900_v43 = vld [vmem:[#allocation11 + $0x200] sm:$0xff]  ;;  %v1013_v39 = vld [vmem:[#allocation11 + $0x588] sm:$0xff] }
 0x17a   :  { %2428 = vmatprep.subr.bf16.mxu1 %v6477_v44  ;;  %2471 = vmatprep.subr.bf16.mxu0 %v6605_v45  ;;  %v904_v44 = vld [vmem:[#allocation11 + $0x220] sm:$0xff] }
 0x17b   :  { %v1028_v45 = vld [vmem:[#allocation11 + $0x600] sm:$0xff]  ;;  %v6541_v46 = vcombine.high %v900_v43, %v904_v44  ;;  %v6540_v48 = vcombine.low %v900_v43, %v904_v44 }
 0x17c   :  { %v6668_v49 = vcombine.low %v1028_v45, %v1032_v47 }
 0x17d   :  { %2429 = vmatpush1.bf16.msra.mxu1 %v6476_v50  ;;  %2472 = vmatpush1.bf16.msra.mxu0 %v6604_v51  ;;  %v6669_v50 = vcombine.high %v1028_v45, %v1032_v47  ;;  %v8403_v51 = vld [vmem:[#allocation11 + $0x1c8] sm:$0xff] }
 0x17e   :  { %2430 = vmatprep.subr.bf16.mxu1 %v6597_v52  ;;  %2473 = vmatprep.subr.bf16.mxu0 %v6725_v53  ;;  %v8405_v52 = vld [vmem:[#allocation11 + $0x1e8] sm:$0xff] }
 0x17f   :  { %v8407_v53 = vld [vmem:[#allocation11 + $0x5c8] sm:$0xff]  ;;  %v6535_v54 = vcombine.high %v8403_v51, %v8405_v52  ;;  %v6534_v56 = vcombine.low %v8403_v51, %v8405_v52 }
 0x180   :  { %v6662_v57 = vcombine.low %v8407_v53, %v8411_v55  ;;  %v881_v47 = vld [vmem:[#allocation11 + $0x168] sm:$0xff] }
 0x181   :  { %2431 = vmatpush2.bf16.msra.mxu1 %v6596_v58  ;;  %2474 = vmatpush2.bf16.msra.mxu0 %v6724_v59  ;;  %v6663_v58 = vcombine.high %v8407_v53, %v8411_v55  ;;  %v380_v59 = vld [vmem:[#allocation10] sm:$0xf] }
 0x182   :  { %2432 = vmatprep.subr.bf16.mxu1 %v6589_v60  ;;  %2475 = vmatprep.subr.bf16.mxu0 %v6717_v61  ;;  %v8420_v60 = vsub.s32 3, %v8393_v29  ;;  %v8423_v61 = vsub.s32 2, %v8393_v29  ;;  %v385_v62 = vrot.slane %v380_v59, %v8396_v31  ;;  %v389_v1 = vrot.slane %v380_v59, %v8399_v32 }
 0x185   :  { %2433 = vmatpush2.bf16.msra.mxu1 %v6588_v2  ;;  %2476 = vmatpush2.bf16.msra.mxu0 %v6716_v3  ;;  %v397_v2 = vrot.slane %v380_v59, %v8420_v60  ;;  %v393_v3 = vrot.slane %v380_v59, %v8423_v61 }
 0x186   :  { %2434 = vmatprep.subr.bf16.mxu1 %v6581_v4  ;;  %2477 = vmatprep.subr.bf16.mxu0 %v6709_v5 }
 0x189   :  { %2435 = vmatpush2.bf16.msra.mxu1 %v6580_v10  ;;  %2478 = vmatpush2.bf16.msra.mxu0 %v6708_v11 }
 0x18a   :  { %2436 = vmatprep.subr.bf16.mxu1 %v6573_v12  ;;  %2479 = vmatprep.subr.bf16.mxu0 %v6701_v13 }
 0x18d   :  { %2437 = vmatpush2.bf16.msra.mxu1 %v6572_v18  ;;  %2480 = vmatpush2.bf16.msra.mxu0 %v6700_v19 }
 0x18e   :  { %2438 = vmatprep.subr.bf16.mxu1 %v6565_v20  ;;  %2481 = vmatprep.subr.bf16.mxu0 %v6693_v21 }
 0x191   :  { %2439 = vmatpush2.bf16.msra.mxu1 %v6564_v22  ;;  %2482 = vmatpush2.bf16.msra.mxu0 %v6692_v23 }
 0x192   :  { %2440 = vmatprep.subr.bf16.mxu1 %v6557_v27  ;;  %2483 = vmatprep.subr.bf16.mxu0 %v6685_v34  ;;  %v889_v34 = vld [vmem:[#allocation11 + $0x1a8] sm:$0xff] }
 0x195   :  { %2441 = vmatpush2.bf16.msra.mxu1 %v6556_v30  ;;  %2484 = vmatpush2.bf16.msra.mxu0 %v6684_v33  ;;  %v885_v33 = vld [vmem:[#allocation11 + $0x188] sm:$0xff] }
 0x196   :  { %2442 = vmatprep.subr.bf16.mxu1 %v6549_v38  ;;  %2485 = vmatprep.subr.bf16.mxu0 %v6677_v42  ;;  %v6527_v45 = vcombine.high %v885_v33, %v889_v34 }
 0x199   :  { %2443 = vmatpush2.bf16.msra.mxu1 %v6548_v40  ;;  %2486 = vmatpush2.bf16.msra.mxu0 %v6676_v41  ;;  %v1017_v40 = vld [vmem:[#allocation11 + $0x5a8] sm:$0xff] }
 0x19a   :  { %2444 = vmatprep.subr.bf16.mxu1 %v6541_v46  ;;  %2487 = vmatprep.subr.bf16.mxu0 %v6669_v50  ;;  %v877_v46 = vld [vmem:[#allocation11 + $0x148] sm:$0xff] }
 0x19b   :  { %v1009_v50 = vld [vmem:[#allocation11 + $0x568] sm:$0xff]  ;;  %v6519_v59 = vcombine.high %v877_v46, %v881_v47  ;;  %v6518_v51 = vcombine.low %v877_v46, %v881_v47 }
 0x19d   :  { %2445 = vmatpush2.bf16.msra.mxu1 %v6540_v48  ;;  %2488 = vmatpush2.bf16.msra.mxu0 %v6668_v49  ;;  %v6655_v48 = vcombine.high %v1013_v39, %v1017_v40  ;;  %v1005_v49 = vld [vmem:[#allocation11 + $0x548] sm:$0xff] }
 0x19e   :  { %2500 = vmatprep.subr.bf16.mxu1 %v6535_v54  ;;  %2543 = vmatprep.subr.bf16.mxu0 %v6663_v58  ;;  %v6526_v54 = vcombine.low %v885_v33, %v889_v34  ;;  %v6654_v58 = vcombine.low %v1013_v39, %v1017_v40  ;;  %v6646_v52 = vcombine.low %v1005_v49, %v1009_v50  ;;  %v1085_v39 = vld [vmem:[#allocation11 + $0x7c8] sm:$0xff] }
 0x19f   :  { %v1089_v40 = vld [vmem:[#allocation11 + $0x7e8] sm:$0xff] }
 0x1a0   :  { %v6727_v47 = vcombine.high %v1085_v39, %v1089_v40 }
 0x220   :  { %v756_v63 = vpop.f32.mrf.mxu1  ;;  %v799_v0 = vpop.f32.mrf.mxu0 }
 0x221   :  { %v757_v6 = vadd.f32 %v756_v63, %v385_v62  ;;  %v800_v13 = vadd.f32 %v799_v0, %v393_v3  ;;  %v869_v63 = vld [vmem:[#allocation11 + $0x108] sm:$0xff] }
 0x222   :  { %v758_v4 = vpop.f32.mrf.mxu1  ;;  %v801_v5 = vpop.f32.mrf.mxu0  ;;  %v873_v0 = vld [vmem:[#allocation11 + $0x128] sm:$0xff] }
 0x223   :  { %v759_v7 = vadd.f32 %v758_v4, %v389_v1  ;;  %v802_v10 = vadd.f32 %v801_v5, %v397_v2  ;;  %vm808_vm4 = vcmp.ge.f32.partialorder %v757_v6, 0.0  ;;  %v816_v21 = vmul.f32 0.2, %v757_v6  ;;  %v993_v4 = vld [vmem:[#allocation11 + $0x4e8] sm:$0xff] }
 0x224   :  { %v760_v8 = vpop.f32.mrf.mxu1  ;;  %v803_v9 = vpop.f32.mrf.mxu0  ;;  %v818_v23 = vmul.f32 0.2, %v800_v13  ;;  %vm810_vm10 = vcmp.ge.f32.partialorder %v800_v13, 0.0  ;;  %v6511_v53 = vcombine.high %v869_v63, %v873_v0  ;;  %v6510_v5 = vcombine.low %v869_v63, %v873_v0  ;;  %v941_v0 = vld [vmem:[#allocation11 + $0x348] sm:$0xff] }
 0x225   :  { %v761_v11 = vadd.f32 %v760_v8, %v385_v62  ;;  %v804_v12 = vadd.f32 %v803_v9, %v393_v3  ;;  %v817_v16 = vmul.f32 0.2, %v759_v7  ;;  %vm809_vm6 = vcmp.ge.f32.partialorder %v759_v7, 0.0  ;;  %v989_v3 = vld [vmem:[#allocation11 + $0x4c8] sm:$0xff] }
 0x226   :  { %v762_v14 = vpop.f32.mrf.mxu1  ;;  %v805_v15 = vpop.f32.mrf.mxu0  ;;  %v819_v22 = vmul.f32 0.2, %v802_v10  ;;  %vm811_vm8 = vcmp.ge.f32.partialorder %v802_v10, 0.0  ;;  %v824_v35 = vsel %vm808_vm4, %v757_v6, %v816_v21  ;;  %v826_v41 = vsel %vm810_vm10, %v800_v13, %v818_v23  ;;  %v853_v9 = vld [vmem:[#allocation11 + $0x88] sm:$0xff] }
 0x227   :  { %v820_v17 = vmul.f32 0.2, %v761_v11  ;;  %vm812_vm5 = vcmp.ge.f32.partialorder %v761_v11, 0.0  ;;  %v822_v18 = vmul.f32 0.2, %v804_v12  ;;  %v763_v19 = vadd.f32 %v762_v14, %v389_v1  ;;  %v997_v1 = vld [vmem:[#allocation11 + $0x508] sm:$0xff] }
 0x228   :  { %v806_v20 = vadd.f32 %v805_v15, %v397_v2  ;;  %vm814_vm7 = vcmp.ge.f32.partialorder %v804_v12, 0.0  ;;  %v825_v27 = vsel %vm809_vm6, %v759_v7, %v817_v16  ;;  %v827_v36 = vsel %vm811_vm8, %v802_v10, %v819_v22  ;;  %v1001_v2 = vld [vmem:[#allocation11 + $0x528] sm:$0xff] }
 0x229   :  { %vm813_vm9 = vcmp.ge.f32.partialorder %v763_v19, 0.0  ;;  %v821_v24 = vmul.f32 0.2, %v763_v19  ;;  %v828_v25 = vsel %vm812_vm5, %v761_v11, %v820_v17  ;;  %v830_v28 = vsel %vm814_vm7, %v804_v12, %v822_v18  ;;  %v857_v10 = vld [vmem:[#allocation11 + $0xa8] sm:$0xff] }
 0x22a   :  { %vm815_vm11 = vcmp.ge.f32.partialorder %v806_v20, 0.0  ;;  %v823_v26 = vmul.f32 0.2, %v806_v20  ;;  %v8432_v42 = vpack.c.bf16 %v828_v25, %v824_v35  ;;  %v8436_v44 = vpack.c.bf16 %v830_v28, %v826_v41  ;;  %v981_v11 = vld [vmem:[#allocation11 + $0x488] sm:$0xff] }
 0x22b   :  { %v829_v30 = vsel %vm813_vm9, %v763_v19, %v821_v24  ;;  %v6647_v62 = vcombine.high %v1005_v49, %v1009_v50  ;;  %v6639_v55 = vcombine.high %v997_v1, %v1001_v2  ;;  %v6638_v6 = vcombine.low %v997_v1, %v1001_v2  ;;  %v985_v12 = vld [vmem:[#allocation11 + $0x4a8] sm:$0xff] }
 0x22c   :  { %v8430_v37 = vpack.c.bf16 %v829_v30, %v825_v27  ;;  %v831_v38 = vsel %vm815_vm11, %v806_v20, %v823_v26  ;;  %v6631_v8 = vcombine.high %v989_v3, %v993_v4  ;;  %v6630_v14 = vcombine.low %v989_v3, %v993_v4  ;;  %v845_v17 = vld [vmem:[#allocation11 + $0x48] sm:$0xff] }
 0x22d   :  { %v8434_v43 = vpack.c.bf16 %v831_v38, %v827_v36  ;;  %v6495_v15 = vcombine.high %v853_v9, %v857_v10  ;;  %v6623_v16 = vcombine.high %v981_v11, %v985_v12  ;;  %v849_v18 = vld [vmem:[#allocation11 + $0x68] sm:$0xff]  ;;  %v6494_v21 = vcombine.low %v853_v9, %v857_v10 }
 0x22e   :  { %2446 = vmatprep.mubr.bf16.mxu1 %v8430_v37  ;;  %v973_v19 = vld [vmem:[#allocation11 + $0x448] sm:$0xff]  ;;  %v6622_v22 = vcombine.low %v981_v11, %v985_v12  ;;  %v6487_v23 = vcombine.high %v845_v17, %v849_v18  ;;  %v6486_v30 = vcombine.low %v845_v17, %v849_v18 }
 0x22f   :  { %2489 = vmatprep.mubr.bf16.mxu0 %v8434_v43  ;;  %2447 = vmatmul.mubr.bf16.vlgmr.msra.gmra.mxu1 %v8432_v42  ;;  %v977_v20 = vld [vmem:[#allocation11 + $0x468] sm:$0xff] }
 0x230   :  { %2490 = vmatmul.mubr.bf16.vlgmr.msra.gmra.mxu0 %v8436_v44  ;;  %2501 = vmatpush1.bf16.msra.mxu1 %v6534_v56  ;;  %v861_v56 = vld [vmem:[#allocation11 + $0xc8] sm:$0xff]  ;;  %v6615_v24 = vcombine.high %v973_v19, %v977_v20  ;;  %v6614_v33 = vcombine.low %v973_v19, %v977_v20 }
 0x231   :  { %2544 = vmatpush1.bf16.msra.mxu0 %v6662_v57  ;;  %2532 = vmatprep.mubr.bf16.mxu1 %v8430_v37  ;;  %v865_v57 = vld [vmem:[#allocation11 + $0xe8] sm:$0xff] }
 0x232   :  { %2575 = vmatprep.mubr.bf16.mxu0 %v8434_v43  ;;  %2502 = vmatprep.subr.bf16.mxu1 %v6527_v45  ;;  %v6503_v7 = vcombine.high %v861_v56, %v865_v57  ;;  %v6502_v13 = vcombine.low %v861_v56, %v865_v57  ;;  %v837_v25 = vld [vmem:[#allocation11 + $0x8] sm:$0xff] }
 0x233   :  { %2545 = vmatprep.subr.bf16.mxu0 %v6655_v48  ;;  %v841_v26 = vld [vmem:[#allocation11 + $0x28] sm:$0xff] }
 0x234   :  { %2503 = vmatpush1.bf16.msra.mxu1 %v6526_v54  ;;  %v965_v27 = vld [vmem:[#allocation11 + $0x408] sm:$0xff]  ;;  %v6479_v34 = vcombine.high %v837_v25, %v841_v26  ;;  %v6478_v41 = vcombine.low %v837_v25, %v841_v26 }
 0x235   :  { %2546 = vmatpush1.bf16.msra.mxu0 %v6654_v58  ;;  %2504 = vmatprep.subr.bf16.mxu1 %v6519_v59  ;;  %v969_v28 = vld [vmem:[#allocation11 + $0x428] sm:$0xff]  ;;  %v6726_v59 = vcombine.low %v1085_v39, %v1089_v40 }
 0x236   :  { %2547 = vmatprep.subr.bf16.mxu0 %v6647_v62  ;;  %v6607_v35 = vcombine.high %v965_v27, %v969_v28  ;;  %v957_v36 = vld [vmem:[#allocation11 + $0x3c8] sm:$0xff]  ;;  %v6606_v45 = vcombine.low %v965_v27, %v969_v28 }
 0x237   :  { %v961_v38 = vld [vmem:[#allocation11 + $0x3e8] sm:$0xff] }
 0x238   :  { %2505 = vmatpush1.bf16.msra.mxu1 %v6518_v51  ;;  %v6599_v46 = vcombine.high %v957_v36, %v961_v38  ;;  %v949_v48 = vld [vmem:[#allocation11 + $0x388] sm:$0xff]  ;;  %v6598_v58 = vcombine.low %v957_v36, %v961_v38 }
 0x239   :  { %2548 = vmatpush1.bf16.msra.mxu0 %v6646_v52  ;;  %2506 = vmatprep.subr.bf16.mxu1 %v6511_v53  ;;  %v953_v49 = vld [vmem:[#allocation11 + $0x3a8] sm:$0xff] }
 0x23a   :  { %2549 = vmatprep.subr.bf16.mxu0 %v6639_v55  ;;  %v1077_v50 = vld [vmem:[#allocation11 + $0x788] sm:$0xff]  ;;  %v6591_v62 = vcombine.high %v949_v48, %v953_v49  ;;  %v6590_v52 = vcombine.low %v949_v48, %v953_v49  ;;  %v894_v49 = vld [vmem:[#allocation11 + $0x1d0] sm:$0xff] }
 0x23b   :  { %v1081_v54 = vld [vmem:[#allocation11 + $0x7a8] sm:$0xff] }
 0x23c   :  { %2507 = vmatpush1.bf16.msra.mxu1 %v6510_v5  ;;  %v6719_v63 = vcombine.high %v1077_v50, %v1081_v54  ;;  %v945_v1 = vld [vmem:[#allocation11 + $0x368] sm:$0xff]  ;;  %v6718_v53 = vcombine.low %v1077_v50, %v1081_v54  ;;  %v898_v50 = vld [vmem:[#allocation11 + $0x1f0] sm:$0xff] }
 0x23d   :  { %2550 = vmatpush1.bf16.msra.mxu0 %v6638_v6  ;;  %2508 = vmatprep.subr.bf16.mxu1 %v6503_v7  ;;  %v1069_v2 = vld [vmem:[#allocation11 + $0x748] sm:$0xff]  ;;  %v6583_v55 = vcombine.high %v941_v0, %v945_v1  ;;  %v6582_v6 = vcombine.low %v941_v0, %v945_v1  ;;  %v1022_v54 = vld [vmem:[#allocation11 + $0x5d0] sm:$0xff] }
 0x23e   :  { %2551 = vmatprep.subr.bf16.mxu0 %v6631_v8  ;;  %v1073_v51 = vld [vmem:[#allocation11 + $0x768] sm:$0xff]  ;;  %v886_v1 = vld [vmem:[#allocation11 + $0x190] sm:$0xff] }
 0x23f   :  { %v6711_v56 = vcombine.high %v1069_v2, %v1073_v51  ;;  %v933_v57 = vld [vmem:[#allocation11 + $0x308] sm:$0xff]  ;;  %v6710_v7 = vcombine.low %v1069_v2, %v1073_v51  ;;  %v890_v2 = vld [vmem:[#allocation11 + $0x1b0] sm:$0xff]  ;;  %v6536_v51 = vcombine.low %v894_v49, %v898_v50 }
 0x240   :  { %2509 = vmatpush1.bf16.msra.mxu1 %v6502_v13  ;;  %v937_v3 = vld [vmem:[#allocation11 + $0x328] sm:$0xff] }
 0x241   :  { %2552 = vmatpush1.bf16.msra.mxu0 %v6630_v14  ;;  %2510 = vmatprep.subr.bf16.mxu1 %v6495_v15  ;;  %v1061_v4 = vld [vmem:[#allocation11 + $0x708] sm:$0xff]  ;;  %v6575_v8 = vcombine.high %v933_v57, %v937_v3  ;;  %v6574_v14 = vcombine.low %v933_v57, %v937_v3  ;;  %v878_v57 = vld [vmem:[#allocation11 + $0x150] sm:$0xff] }
 0x242   :  { %2553 = vmatprep.subr.bf16.mxu0 %v6623_v16  ;;  %v1065_v5 = vld [vmem:[#allocation11 + $0x728] sm:$0xff]  ;;  %v882_v3 = vld [vmem:[#allocation11 + $0x170] sm:$0xff] }
 0x243   :  { %v6703_v9 = vcombine.high %v1061_v4, %v1065_v5  ;;  %v925_v10 = vld [vmem:[#allocation11 + $0x2c8] sm:$0xff]  ;;  %v6702_v15 = vcombine.low %v1061_v4, %v1065_v5  ;;  %v1006_v5 = vld [vmem:[#allocation11 + $0x550] sm:$0xff] }
 0x244   :  { %2511 = vmatpush1.bf16.msra.mxu1 %v6494_v21  ;;  %v929_v11 = vld [vmem:[#allocation11 + $0x2e8] sm:$0xff] }
 0x245   :  { %2554 = vmatpush1.bf16.msra.mxu0 %v6622_v22  ;;  %2512 = vmatprep.subr.bf16.mxu1 %v6487_v23  ;;  %v1053_v12 = vld [vmem:[#allocation11 + $0x6c8] sm:$0xff]  ;;  %v6567_v16 = vcombine.high %v925_v10, %v929_v11  ;;  %v6566_v22 = vcombine.low %v925_v10, %v929_v11  ;;  %v870_v11 = vld [vmem:[#allocation11 + $0x110] sm:$0xff] }
 0x246   :  { %2555 = vmatprep.subr.bf16.mxu0 %v6615_v24  ;;  %v1057_v13 = vld [vmem:[#allocation11 + $0x6e8] sm:$0xff] }
 0x247   :  { %v6695_v17 = vcombine.high %v1053_v12, %v1057_v13  ;;  %v917_v18 = vld [vmem:[#allocation11 + $0x288] sm:$0xff]  ;;  %v6694_v23 = vcombine.low %v1053_v12, %v1057_v13  ;;  %v874_v12 = vld [vmem:[#allocation11 + $0x130] sm:$0xff] }
 0x248   :  { %2513 = vmatpush1.bf16.msra.mxu1 %v6486_v30  ;;  %v921_v19 = vld [vmem:[#allocation11 + $0x2a8] sm:$0xff]  ;;  %v998_v13 = vld [vmem:[#allocation11 + $0x510] sm:$0xff] }
 0x249   :  { %2556 = vmatpush1.bf16.msra.mxu0 %v6614_v33  ;;  %2514 = vmatprep.subr.bf16.mxu1 %v6479_v34  ;;  %v1045_v20 = vld [vmem:[#allocation11 + $0x688] sm:$0xff]  ;;  %v6559_v24 = vcombine.high %v917_v18, %v921_v19  ;;  %v6558_v33 = vcombine.low %v917_v18, %v921_v19  ;;  %v862_v19 = vld [vmem:[#allocation11 + $0xd0] sm:$0xff] }
 0x24a   :  { %2557 = vmatprep.subr.bf16.mxu0 %v6607_v35  ;;  %v1049_v21 = vld [vmem:[#allocation11 + $0x6a8] sm:$0xff] }
 0x24b   :  { %v6687_v25 = vcombine.high %v1045_v20, %v1049_v21  ;;  %v909_v26 = vld [vmem:[#allocation11 + $0x248] sm:$0xff]  ;;  %v6686_v34 = vcombine.low %v1045_v20, %v1049_v21  ;;  %v866_v20 = vld [vmem:[#allocation11 + $0xf0] sm:$0xff] }
 0x24c   :  { %2515 = vmatpush1.bf16.msra.mxu1 %v6478_v41  ;;  %v913_v27 = vld [vmem:[#allocation11 + $0x268] sm:$0xff]  ;;  %v990_v21 = vld [vmem:[#allocation11 + $0x4d0] sm:$0xff] }
 0x24d   :  { %2558 = vmatpush1.bf16.msra.mxu0 %v6606_v45  ;;  %2516 = vmatprep.subr.bf16.mxu1 %v6599_v46  ;;  %v1037_v28 = vld [vmem:[#allocation11 + $0x648] sm:$0xff]  ;;  %v6551_v35 = vcombine.high %v909_v26, %v913_v27  ;;  %v6550_v45 = vcombine.low %v909_v26, %v913_v27  ;;  %v854_v27 = vld [vmem:[#allocation11 + $0x90] sm:$0xff] }
 0x24e   :  { %2559 = vmatprep.subr.bf16.mxu0 %v6727_v47  ;;  %v1041_v30 = vld [vmem:[#allocation11 + $0x668] sm:$0xff] }
 0x24f   :  { %v6679_v36 = vcombine.high %v1037_v28, %v1041_v30  ;;  %v901_v38 = vld [vmem:[#allocation11 + $0x208] sm:$0xff]  ;;  %v6678_v46 = vcombine.low %v1037_v28, %v1041_v30  ;;  %v858_v28 = vld [vmem:[#allocation11 + $0xb0] sm:$0xff] }
 0x250   :  { %2517 = vmatpush2.bf16.msra.mxu1 %v6598_v58  ;;  %v905_v39 = vld [vmem:[#allocation11 + $0x228] sm:$0xff]  ;;  %v1026_v58 = vld [vmem:[#allocation11 + $0x5f0] sm:$0xff] }
 0x251   :  { %2560 = vmatpush2.bf16.msra.mxu0 %v6726_v59  ;;  %2518 = vmatprep.subr.bf16.mxu1 %v6591_v62  ;;  %v1029_v40 = vld [vmem:[#allocation11 + $0x608] sm:$0xff]  ;;  %v6543_v47 = vcombine.high %v901_v38, %v905_v39  ;;  %v6542_v59 = vcombine.low %v901_v38, %v905_v39  ;;  %v6665_v0 = vcombine.high %v1022_v54, %v1026_v58  ;;  %v982_v30 = vld [vmem:[#allocation11 + $0x490] sm:$0xff] }
 0x252   :  { %2561 = vmatprep.subr.bf16.mxu0 %v6719_v63  ;;  %v1033_v41 = vld [vmem:[#allocation11 + $0x628] sm:$0xff]  ;;  %v6537_v63 = vcombine.high %v894_v49, %v898_v50  ;;  %v846_v39 = vld [vmem:[#allocation11 + $0x50] sm:$0xff] }
 0x253   :  { %v6671_v48 = vcombine.high %v1029_v40, %v1033_v41  ;;  %v6670_v62 = vcombine.low %v1029_v40, %v1033_v41  ;;  %v850_v40 = vld [vmem:[#allocation11 + $0x70] sm:$0xff] }
 0x254   :  { %2519 = vmatpush2.bf16.msra.mxu1 %v6590_v52  ;;  %v1014_v52 = vld [vmem:[#allocation11 + $0x590] sm:$0xff] }
 0x255   :  { %2562 = vmatpush2.bf16.msra.mxu0 %v6718_v53  ;;  %2520 = vmatprep.subr.bf16.mxu1 %v6583_v55  ;;  %v1018_v53 = vld [vmem:[#allocation11 + $0x5b0] sm:$0xff]  ;;  %v6664_v55 = vcombine.low %v1022_v54, %v1026_v58 }
 0x256   :  { %2563 = vmatprep.subr.bf16.mxu0 %v6711_v56  ;;  %v6529_v56 = vcombine.high %v886_v1, %v890_v2  ;;  %v6657_v4 = vcombine.high %v1014_v52, %v1018_v53  ;;  %v974_v41 = vld [vmem:[#allocation11 + $0x450] sm:$0xff] }
 0x257   :  { %v838_v50 = vld [vmem:[#allocation11 + $0x10] sm:$0xff] }
 0x258   :  { %2521 = vmatpush2.bf16.msra.mxu1 %v6582_v6  ;;  %v1010_v6 = vld [vmem:[#allocation11 + $0x570] sm:$0xff] }
 0x259   :  { %2564 = vmatpush2.bf16.msra.mxu0 %v6710_v7  ;;  %2522 = vmatprep.subr.bf16.mxu1 %v6575_v8  ;;  %v6528_v7 = vcombine.low %v886_v1, %v890_v2  ;;  %v6656_v8 = vcombine.low %v1014_v52, %v1018_v53  ;;  %v6649_v10 = vcombine.high %v1006_v5, %v1010_v6  ;;  %v842_v54 = vld [vmem:[#allocation11 + $0x30] sm:$0xff] }
 0x25a   :  { %2565 = vmatprep.subr.bf16.mxu0 %v6703_v9  ;;  %v6521_v9 = vcombine.high %v878_v57, %v882_v3  ;;  %v966_v58 = vld [vmem:[#allocation11 + $0x410] sm:$0xff] }
 0x25b   :  { %v958_v2 = vld [vmem:[#allocation11 + $0x3d0] sm:$0xff] }
 0x25c   :  { %2523 = vmatpush2.bf16.msra.mxu1 %v6574_v14  ;;  %v1002_v14 = vld [vmem:[#allocation11 + $0x530] sm:$0xff] }
 0x25d   :  { %2566 = vmatpush2.bf16.msra.mxu0 %v6702_v15  ;;  %2524 = vmatprep.subr.bf16.mxu1 %v6567_v16  ;;  %v6520_v15 = vcombine.low %v878_v57, %v882_v3  ;;  %v6648_v16 = vcombine.low %v1006_v5, %v1010_v6  ;;  %v6641_v18 = vcombine.high %v998_v13, %v1002_v14  ;;  %v1086_v52 = vld [vmem:[#allocation11 + $0x7d0] sm:$0xff] }
 0x25e   :  { %2567 = vmatprep.subr.bf16.mxu0 %v6695_v17  ;;  %v6513_v17 = vcombine.high %v870_v11, %v874_v12  ;;  %v1090_v53 = vld [vmem:[#allocation11 + $0x7f0] sm:$0xff] }
 0x25f   :  { %v6729_v3 = vcombine.high %v1086_v52, %v1090_v53  ;;  %v954_v5 = vld [vmem:[#allocation11 + $0x3b0] sm:$0xff] }
 0x260   :  { %2525 = vmatpush2.bf16.msra.mxu1 %v6566_v22  ;;  %v994_v22 = vld [vmem:[#allocation11 + $0x4f0] sm:$0xff] }
 0x261   :  { %2568 = vmatpush2.bf16.msra.mxu0 %v6694_v23  ;;  %2526 = vmatprep.subr.bf16.mxu1 %v6559_v24  ;;  %v6512_v23 = vcombine.low %v870_v11, %v874_v12  ;;  %v6640_v24 = vcombine.low %v998_v13, %v1002_v14  ;;  %v6633_v26 = vcombine.high %v990_v21, %v994_v22  ;;  %v1078_v6 = vld [vmem:[#allocation11 + $0x790] sm:$0xff] }
 0x262   :  { %2569 = vmatprep.subr.bf16.mxu0 %v6687_v25  ;;  %v6505_v25 = vcombine.high %v862_v19, %v866_v20  ;;  %v942_v12 = vld [vmem:[#allocation11 + $0x350] sm:$0xff] }
 0x263   :  { %v946_v13 = vld [vmem:[#allocation11 + $0x370] sm:$0xff] }
 0x264   :  { %2527 = vmatpush2.bf16.msra.mxu1 %v6558_v33  ;;  %v986_v33 = vld [vmem:[#allocation11 + $0x4b0] sm:$0xff] }
 0x265   :  { %2570 = vmatpush2.bf16.msra.mxu0 %v6686_v34  ;;  %2528 = vmatprep.subr.bf16.mxu1 %v6551_v35  ;;  %v6504_v34 = vcombine.low %v862_v19, %v866_v20  ;;  %v6632_v35 = vcombine.low %v990_v21, %v994_v22  ;;  %v6625_v38 = vcombine.high %v982_v30, %v986_v33  ;;  %v1070_v14 = vld [vmem:[#allocation11 + $0x750] sm:$0xff] }
 0x266   :  { %2571 = vmatprep.subr.bf16.mxu0 %v6679_v36  ;;  %v6497_v36 = vcombine.high %v854_v27, %v858_v28  ;;  %v934_v20 = vld [vmem:[#allocation11 + $0x310] sm:$0xff] }
 0x267   :  { %v938_v21 = vld [vmem:[#allocation11 + $0x330] sm:$0xff] }
 0x268   :  { %2529 = vmatpush2.bf16.msra.mxu1 %v6550_v45  ;;  %v978_v45 = vld [vmem:[#allocation11 + $0x470] sm:$0xff] }
 0x269   :  { %2572 = vmatpush2.bf16.msra.mxu0 %v6678_v46  ;;  %2530 = vmatprep.subr.bf16.mxu1 %v6543_v47  ;;  %v6496_v46 = vcombine.low %v854_v27, %v858_v28  ;;  %v6624_v47 = vcombine.low %v982_v30, %v986_v33  ;;  %v6617_v49 = vcombine.high %v974_v41, %v978_v45  ;;  %v1062_v22 = vld [vmem:[#allocation11 + $0x710] sm:$0xff] }
 0x26a   :  { %2573 = vmatprep.subr.bf16.mxu0 %v6671_v48  ;;  %v6489_v48 = vcombine.high %v846_v39, %v850_v40  ;;  %v926_v28 = vld [vmem:[#allocation11 + $0x2d0] sm:$0xff] }
 0x26b   :  { %v930_v30 = vld [vmem:[#allocation11 + $0x2f0] sm:$0xff] }
 0x26c   :  { %2531 = vmatpush2.bf16.msra.mxu1 %v6542_v59  ;;  %v970_v59 = vld [vmem:[#allocation11 + $0x430] sm:$0xff] }
 0x26d   :  { %2574 = vmatpush2.bf16.msra.mxu0 %v6670_v62  ;;  %2586 = vmatprep.subr.bf16.mxu1 %v6537_v63  ;;  %v6488_v62 = vcombine.low %v846_v39, %v850_v40  ;;  %v6616_v63 = vcombine.low %v974_v41, %v978_v45  ;;  %v6609_v1 = vcombine.high %v966_v58, %v970_v59  ;;  %v1054_v33 = vld [vmem:[#allocation11 + $0x6d0] sm:$0xff] }
 0x26e   :  { %2629 = vmatprep.subr.bf16.mxu0 %v6665_v0  ;;  %v6481_v0 = vcombine.high %v838_v50, %v842_v54  ;;  %v918_v40 = vld [vmem:[#allocation11 + $0x290] sm:$0xff] }
 0x26f   :  { %2533 = vmatmul.mubr.bf16.vlgmr.msra.gmra.mxu1 %v8432_v42  ;;  %v922_v41 = vld [vmem:[#allocation11 + $0x2b0] sm:$0xff] }
 0x270   :  { %2576 = vmatmul.mubr.bf16.vlgmr.msra.gmra.mxu0 %v8436_v44  ;;  %2587 = vmatpush1.bf16.msra.mxu1 %v6536_v51  ;;  %v962_v51 = vld [vmem:[#allocation11 + $0x3f0] sm:$0xff] }
 0x271   :  { %2618 = vmatprep.mubr.bf16.mxu1 %v8430_v37  ;;  %2630 = vmatpush1.bf16.msra.mxu0 %v6664_v55  ;;  %v6480_v55 = vcombine.low %v838_v50, %v842_v54  ;;  %v6601_v57 = vcombine.high %v958_v2, %v962_v51  ;;  %v1046_v45 = vld [vmem:[#allocation11 + $0x690] sm:$0xff] }
 0x272   :  { %2661 = vmatprep.mubr.bf16.mxu0 %v8434_v43  ;;  %2588 = vmatprep.subr.bf16.mxu1 %v6529_v56  ;;  %v6608_v56 = vcombine.low %v966_v58, %v970_v59  ;;  %v910_v54 = vld [vmem:[#allocation11 + $0x250] sm:$0xff] }
 0x273   :  { %2631 = vmatprep.subr.bf16.mxu0 %v6657_v4  ;;  %v950_v4 = vld [vmem:[#allocation11 + $0x390] sm:$0xff] }
 0x274   :  { %2589 = vmatpush1.bf16.msra.mxu1 %v6528_v7  ;;  %v1082_v7 = vld [vmem:[#allocation11 + $0x7b0] sm:$0xff] }
 0x275   :  { %2632 = vmatpush1.bf16.msra.mxu0 %v6656_v8  ;;  %2590 = vmatprep.subr.bf16.mxu1 %v6521_v9  ;;  %v6600_v8 = vcombine.low %v958_v2, %v962_v51  ;;  %v6728_v9 = vcombine.low %v1086_v52, %v1090_v53  ;;  %v6721_v11 = vcombine.high %v1078_v6, %v1082_v7  ;;  %v914_v58 = vld [vmem:[#allocation11 + $0x270] sm:$0xff] }
 0x276   :  { %2633 = vmatprep.subr.bf16.mxu0 %v6649_v10  ;;  %v6593_v10 = vcombine.high %v950_v4, %v954_v5  ;;  %v1038_v59 = vld [vmem:[#allocation11 + $0x650] sm:$0xff] }
 0x277   :  { %v902_v51 = vld [vmem:[#allocation11 + $0x210] sm:$0xff] }
 0x278   :  { %2591 = vmatpush1.bf16.msra.mxu1 %v6520_v15  ;;  %v1074_v15 = vld [vmem:[#allocation11 + $0x770] sm:$0xff] }
 0x279   :  { %2634 = vmatpush1.bf16.msra.mxu0 %v6648_v16  ;;  %2592 = vmatprep.subr.bf16.mxu1 %v6513_v17  ;;  %v6592_v16 = vcombine.low %v950_v4, %v954_v5  ;;  %v6720_v17 = vcombine.low %v1078_v6, %v1082_v7  ;;  %v6713_v19 = vcombine.high %v1070_v14, %v1074_v15  ;;  %v906_v52 = vld [vmem:[#allocation11 + $0x230] sm:$0xff]  ;;  %v895_v5 = vld [vmem:[#allocation11 + $0x1d8] sm:$0xff] }
 0x27a   :  { %2635 = vmatprep.subr.bf16.mxu0 %v6641_v18  ;;  %v6585_v18 = vcombine.high %v942_v12, %v946_v13  ;;  %v1030_v53 = vld [vmem:[#allocation11 + $0x610] sm:$0xff]  ;;  %v899_v6 = vld [vmem:[#allocation11 + $0x1f8] sm:$0xff] }
 0x27b   :  { %v1023_v7 = vld [vmem:[#allocation11 + $0x5d8] sm:$0xff] }
 0x27c   :  { %2593 = vmatpush1.bf16.msra.mxu1 %v6512_v23  ;;  %v1066_v23 = vld [vmem:[#allocation11 + $0x730] sm:$0xff] }
 0x27d   :  { %2636 = vmatpush1.bf16.msra.mxu0 %v6640_v24  ;;  %2594 = vmatprep.subr.bf16.mxu1 %v6505_v25  ;;  %v6584_v24 = vcombine.low %v942_v12, %v946_v13  ;;  %v6712_v25 = vcombine.low %v1070_v14, %v1074_v15  ;;  %v6705_v27 = vcombine.high %v1062_v22, %v1066_v23  ;;  %v887_v13 = vld [vmem:[#allocation11 + $0x198] sm:$0xff] }
 0x27e   :  { %2637 = vmatprep.subr.bf16.mxu0 %v6633_v26  ;;  %v6577_v26 = vcombine.high %v934_v20, %v938_v21  ;;  %v891_v14 = vld [vmem:[#allocation11 + $0x1b8] sm:$0xff]  ;;  %v6538_v15 = vcombine.low %v895_v5, %v899_v6 }
 0x280   :  { %2595 = vmatpush1.bf16.msra.mxu1 %v6504_v34  ;;  %v1058_v34 = vld [vmem:[#allocation11 + $0x6f0] sm:$0xff] }
 0x281   :  { %2638 = vmatpush1.bf16.msra.mxu0 %v6632_v35  ;;  %2596 = vmatprep.subr.bf16.mxu1 %v6497_v36  ;;  %v6576_v35 = vcombine.low %v934_v20, %v938_v21  ;;  %v6704_v36 = vcombine.low %v1062_v22, %v1066_v23  ;;  %v6697_v39 = vcombine.high %v1054_v33, %v1058_v34  ;;  %v879_v20 = vld [vmem:[#allocation11 + $0x158] sm:$0xff] }
 0x282   :  { %2639 = vmatprep.subr.bf16.mxu0 %v6625_v38  ;;  %v6569_v38 = vcombine.high %v926_v28, %v930_v30  ;;  %v883_v21 = vld [vmem:[#allocation11 + $0x178] sm:$0xff] }
 0x283   :  { %v1007_v23 = vld [vmem:[#allocation11 + $0x558] sm:$0xff] }
 0x284   :  { %2597 = vmatpush1.bf16.msra.mxu1 %v6496_v46  ;;  %v1050_v46 = vld [vmem:[#allocation11 + $0x6b0] sm:$0xff] }
 0x285   :  { %2640 = vmatpush1.bf16.msra.mxu0 %v6624_v47  ;;  %2598 = vmatprep.subr.bf16.mxu1 %v6489_v48  ;;  %v6568_v47 = vcombine.low %v926_v28, %v930_v30  ;;  %v6696_v48 = vcombine.low %v1054_v33, %v1058_v34  ;;  %v6689_v50 = vcombine.high %v1046_v45, %v1050_v46  ;;  %v871_v30 = vld [vmem:[#allocation11 + $0x118] sm:$0xff] }
 0x286   :  { %2641 = vmatprep.subr.bf16.mxu0 %v6617_v49  ;;  %v6561_v49 = vcombine.high %v918_v40, %v922_v41  ;;  %v875_v33 = vld [vmem:[#allocation11 + $0x138] sm:$0xff] }
 0x287   :  { %v999_v34 = vld [vmem:[#allocation11 + $0x518] sm:$0xff] }
 0x288   :  { %2599 = vmatpush1.bf16.msra.mxu1 %v6488_v62  ;;  %v1042_v62 = vld [vmem:[#allocation11 + $0x670] sm:$0xff] }
 0x289   :  { %2642 = vmatpush1.bf16.msra.mxu0 %v6616_v63  ;;  %2600 = vmatprep.subr.bf16.mxu1 %v6481_v0  ;;  %v6560_v63 = vcombine.low %v918_v40, %v922_v41  ;;  %v6688_v0 = vcombine.low %v1046_v45, %v1050_v46  ;;  %v6681_v2 = vcombine.high %v1038_v59, %v1042_v62  ;;  %v863_v40 = vld [vmem:[#allocation11 + $0xd8] sm:$0xff] }
 0x28a   :  { %2643 = vmatprep.subr.bf16.mxu0 %v6609_v1  ;;  %v6553_v1 = vcombine.high %v910_v54, %v914_v58  ;;  %v867_v41 = vld [vmem:[#allocation11 + $0xf8] sm:$0xff] }
 0x28b   :  { %v991_v45 = vld [vmem:[#allocation11 + $0x4d8] sm:$0xff] }
 0x28c   :  { %2601 = vmatpush1.bf16.msra.mxu1 %v6480_v55  ;;  %v1034_v55 = vld [vmem:[#allocation11 + $0x630] sm:$0xff]  ;;  %v995_v46 = vld [vmem:[#allocation11 + $0x4f8] sm:$0xff] }
 0x28d   :  { %2644 = vmatpush1.bf16.msra.mxu0 %v6608_v56  ;;  %2602 = vmatprep.subr.bf16.mxu1 %v6601_v57  ;;  %v6552_v56 = vcombine.low %v910_v54, %v914_v58  ;;  %v6680_v57 = vcombine.low %v1038_v59, %v1042_v62  ;;  %v6673_v4 = vcombine.high %v1030_v53, %v1034_v55  ;;  %v859_v54 = vld [vmem:[#allocation11 + $0xb8] sm:$0xff] }
 0x28e   :  { %2645 = vmatprep.subr.bf16.mxu0 %v6729_v3  ;;  %v6545_v3 = vcombine.high %v902_v51, %v906_v52  ;;  %v983_v58 = vld [vmem:[#allocation11 + $0x498] sm:$0xff]  ;;  %v6506_v62 = vcombine.low %v863_v40, %v867_v41 }
 0x28f   :  { %v987_v59 = vld [vmem:[#allocation11 + $0x4b8] sm:$0xff] }
 0x290   :  { %2603 = vmatpush2.bf16.msra.mxu1 %v6600_v8  ;;  %v1027_v8 = vld [vmem:[#allocation11 + $0x5f8] sm:$0xff] }
 0x291   :  { %2646 = vmatpush2.bf16.msra.mxu0 %v6728_v9  ;;  %2604 = vmatprep.subr.bf16.mxu1 %v6593_v10  ;;  %v6544_v9 = vcombine.low %v902_v51, %v906_v52  ;;  %v6672_v10 = vcombine.low %v1030_v53, %v1034_v55  ;;  %v6667_v12 = vcombine.high %v1023_v7, %v1027_v8  ;;  %v851_v51 = vld [vmem:[#allocation11 + $0x78] sm:$0xff] }
 0x292   :  { %2647 = vmatprep.subr.bf16.mxu0 %v6721_v11  ;;  %v6539_v11 = vcombine.high %v895_v5, %v899_v6  ;;  %v975_v52 = vld [vmem:[#allocation11 + $0x458] sm:$0xff] }
 0x293   :  { %v979_v53 = vld [vmem:[#allocation11 + $0x478] sm:$0xff] }
 0x294   :  { %2605 = vmatpush2.bf16.msra.mxu1 %v6592_v16  ;;  %v1015_v16 = vld [vmem:[#allocation11 + $0x598] sm:$0xff] }
 0x295   :  { %2648 = vmatpush2.bf16.msra.mxu0 %v6720_v17  ;;  %2606 = vmatprep.subr.bf16.mxu1 %v6585_v18  ;;  %v1019_v17 = vld [vmem:[#allocation11 + $0x5b8] sm:$0xff]  ;;  %v6666_v18 = vcombine.low %v1023_v7, %v1027_v8 }
 0x296   :  { %2649 = vmatprep.subr.bf16.mxu0 %v6713_v19  ;;  %v6531_v19 = vcombine.high %v887_v13, %v891_v14  ;;  %v6659_v22 = vcombine.high %v1015_v16, %v1019_v17  ;;  %v843_v5 = vld [vmem:[#allocation11 + $0x38] sm:$0xff] }
 0x297   :  { %v967_v6 = vld [vmem:[#allocation11 + $0x418] sm:$0xff] }
 0x298   :  { %2607 = vmatpush2.bf16.msra.mxu1 %v6584_v24  ;;  %v1011_v24 = vld [vmem:[#allocation11 + $0x578] sm:$0xff] }
 0x299   :  { %2650 = vmatpush2.bf16.msra.mxu0 %v6712_v25  ;;  %2608 = vmatprep.subr.bf16.mxu1 %v6577_v26  ;;  %v6530_v25 = vcombine.low %v887_v13, %v891_v14  ;;  %v6658_v26 = vcombine.low %v1015_v16, %v1019_v17  ;;  %v6651_v28 = vcombine.high %v1007_v23, %v1011_v24  ;;  %v971_v7 = vld [vmem:[#allocation11 + $0x438] sm:$0xff] }
 0x29a   :  { %2651 = vmatprep.subr.bf16.mxu0 %v6705_v27  ;;  %v6523_v27 = vcombine.high %v879_v20, %v883_v21  ;;  %v963_v13 = vld [vmem:[#allocation11 + $0x3f8] sm:$0xff]  ;;  %v6610_v17 = vcombine.low %v967_v6, %v971_v7 }
 0x29b   :  { %v1087_v14 = vld [vmem:[#allocation11 + $0x7d8] sm:$0xff] }
 0x29c   :  { %2609 = vmatpush2.bf16.msra.mxu1 %v6576_v35  ;;  %v1003_v35 = vld [vmem:[#allocation11 + $0x538] sm:$0xff] }
 0x29d   :  { %2652 = vmatpush2.bf16.msra.mxu0 %v6704_v36  ;;  %2610 = vmatprep.subr.bf16.mxu1 %v6569_v38  ;;  %v6522_v36 = vcombine.low %v879_v20, %v883_v21  ;;  %v6650_v38 = vcombine.low %v1007_v23, %v1011_v24  ;;  %v951_v20 = vld [vmem:[#allocation11 + $0x398] sm:$0xff] }
 0x29e   :  { %2653 = vmatprep.subr.bf16.mxu0 %v6697_v39  ;;  %v6515_v39 = vcombine.high %v871_v30, %v875_v33  ;;  %v955_v21 = vld [vmem:[#allocation11 + $0x3b8] sm:$0xff] }
 0x29f   :  { %v1083_v23 = vld [vmem:[#allocation11 + $0x7b8] sm:$0xff] }
 0x2a0   :  { %2611 = vmatpush2.bf16.msra.mxu1 %v6568_v47  ;;  %v6642_v47 = vcombine.low %v999_v34, %v1003_v35 }
 0x2a1   :  { %2654 = vmatpush2.bf16.msra.mxu0 %v6696_v48  ;;  %2612 = vmatprep.subr.bf16.mxu1 %v6561_v49  ;;  %v6507_v48 = vcombine.high %v863_v40, %v867_v41  ;;  %v6635_v49 = vcombine.high %v991_v45, %v995_v46  ;;  %v939_v40 = vld [vmem:[#allocation11 + $0x338] sm:$0xff] }
 0x2a2   :  { %2655 = vmatprep.subr.bf16.mxu0 %v6689_v50  ;;  %v855_v50 = vld [vmem:[#allocation11 + $0x98] sm:$0xff] }
 0x2a3   :  { %v6498_v55 = vcombine.low %v855_v50, %v859_v54  ;;  %v1063_v41 = vld [vmem:[#allocation11 + $0x718] sm:$0xff] }
 0x2a4   :  { %2613 = vmatpush2.bf16.msra.mxu1 %v6560_v63  ;;  %v6634_v63 = vcombine.low %v991_v45, %v995_v46  ;;  %v1067_v45 = vld [vmem:[#allocation11 + $0x738] sm:$0xff] }
 0x2a5   :  { %2656 = vmatpush2.bf16.msra.mxu0 %v6688_v0  ;;  %2614 = vmatprep.subr.bf16.mxu1 %v6553_v1  ;;  %v6499_v0 = vcombine.high %v855_v50, %v859_v54  ;;  %v6627_v1 = vcombine.high %v983_v58, %v987_v59  ;;  %v931_v50 = vld [vmem:[#allocation11 + $0x2f8] sm:$0xff] }
 0x2a6   :  { %2657 = vmatprep.subr.bf16.mxu0 %v6681_v2  ;;  %v847_v2 = vld [vmem:[#allocation11 + $0x58] sm:$0xff] }
 0x2a7   :  { %v6490_v8 = vcombine.low %v847_v2, %v851_v51  ;;  %v1055_v54 = vld [vmem:[#allocation11 + $0x6d8] sm:$0xff] }
 0x2a8   :  { %2615 = vmatpush2.bf16.msra.mxu1 %v6552_v56  ;;  %v6626_v56 = vcombine.low %v983_v58, %v987_v59  ;;  %v1059_v58 = vld [vmem:[#allocation11 + $0x6f8] sm:$0xff] }
 0x2a9   :  { %2658 = vmatpush2.bf16.msra.mxu0 %v6680_v57  ;;  %2616 = vmatprep.subr.bf16.mxu1 %v6545_v3  ;;  %v6491_v57 = vcombine.high %v847_v2, %v851_v51  ;;  %v6619_v3 = vcombine.high %v975_v52, %v979_v53  ;;  %v923_v2 = vld [vmem:[#allocation11 + $0x2b8] sm:$0xff] }
 0x2aa   :  { %2659 = vmatprep.subr.bf16.mxu0 %v6673_v4  ;;  %v839_v4 = vld [vmem:[#allocation11 + $0x18] sm:$0xff] }
 0x2ab   :  { %v6482_v16 = vcombine.low %v839_v4, %v843_v5  ;;  %v1047_v51 = vld [vmem:[#allocation11 + $0x698] sm:$0xff] }
 0x2ac   :  { %2617 = vmatpush2.bf16.msra.mxu1 %v6544_v9  ;;  %v6618_v9 = vcombine.low %v975_v52, %v979_v53  ;;  %v1051_v52 = vld [vmem:[#allocation11 + $0x6b8] sm:$0xff] }
 0x2ad   :  { %2660 = vmatpush2.bf16.msra.mxu0 %v6672_v10  ;;  %2672 = vmatprep.subr.bf16.mxu1 %v6539_v11  ;;  %v6483_v10 = vcombine.high %v839_v4, %v843_v5  ;;  %v6611_v11 = vcombine.high %v967_v6, %v971_v7  ;;  %v915_v4 = vld [vmem:[#allocation11 + $0x278] sm:$0xff] }
 0x2ae   :  { %2715 = vmatprep.subr.bf16.mxu0 %v6667_v12  ;;  %v959_v12 = vld [vmem:[#allocation11 + $0x3d8] sm:$0xff] }
 0x2af   :  { %2619 = vmatmul.mubr.bf16.vlgmr.msra.gmra.mxu1 %v8432_v42  ;;  %v6602_v24 = vcombine.low %v959_v12, %v963_v13  ;;  %v1039_v5 = vld [vmem:[#allocation11 + $0x658] sm:$0xff] }
 0x2b0   :  { %2662 = vmatmul.mubr.bf16.vlgmr.msra.gmra.mxu0 %v8436_v44  ;;  %2673 = vmatpush1.bf16.msra.mxu1 %v6538_v15  ;;  %v1091_v15 = vld [vmem:[#allocation11 + $0x7f8] sm:$0xff] }
 0x2b1   :  { %2704 = vmatprep.mubr.bf16.mxu1 %v8430_v37  ;;  %2716 = vmatpush1.bf16.msra.mxu0 %v6666_v18  ;;  %v6643_v37 = vcombine.high %v999_v34, %v1003_v35  ;;  %v6603_v18 = vcombine.high %v959_v12, %v963_v13  ;;  %v1075_v34 = vld [vmem:[#allocation11 + $0x778] sm:$0xff]  ;;  %v6594_v35 = vcombine.low %v951_v20, %v955_v21 }
 0x2b2   :  { %2747 = vmatprep.mubr.bf16.mxu0 %v8434_v43  ;;  %2674 = vmatprep.subr.bf16.mxu1 %v6531_v19  ;;  %v6514_v43 = vcombine.low %v871_v30, %v875_v33  ;;  %v6731_v19 = vcombine.high %v1087_v14, %v1091_v15  ;;  %v947_v30 = vld [vmem:[#allocation11 + $0x378] sm:$0xff] }
 0x2b3   :  { %2717 = vmatprep.subr.bf16.mxu0 %v6659_v22  ;;  %v1079_v22 = vld [vmem:[#allocation11 + $0x798] sm:$0xff] }
 0x2b4   :  { %2675 = vmatpush1.bf16.msra.mxu1 %v6530_v25  ;;  %v6730_v25 = vcombine.low %v1087_v14, %v1091_v15  ;;  %v1071_v33 = vld [vmem:[#allocation11 + $0x758] sm:$0xff] }
 0x2b5   :  { %2718 = vmatpush1.bf16.msra.mxu0 %v6658_v26  ;;  %2676 = vmatprep.subr.bf16.mxu1 %v6523_v27  ;;  %v6595_v26 = vcombine.high %v951_v20, %v955_v21  ;;  %v6723_v27 = vcombine.high %v1079_v22, %v1083_v23  ;;  %v1043_v6 = vld [vmem:[#allocation11 + $0x678] sm:$0xff]  ;;  %v7411_v21 = vld [vmem:[#allocation14 + $0x18c] ss:$28 sps:$4 sm:$0xff]  }
 0x2b6   :  { %2719 = vmatprep.subr.bf16.mxu0 %v6651_v28  ;;  %v943_v28 = vld [vmem:[#allocation11 + $0x358] sm:$0xff] }
 0x2b7   :  { %v6586_v46 = vcombine.low %v943_v28, %v947_v30  ;;  %v907_v12 = vld [vmem:[#allocation11 + $0x238] sm:$0xff] }
 0x2b8   :  { %2677 = vmatpush1.bf16.msra.mxu1 %v6522_v36  ;;  %v6722_v36 = vcombine.low %v1079_v22, %v1083_v23  ;;  %v1031_v13 = vld [vmem:[#allocation11 + $0x618] sm:$0xff]  ;;  %v7426_v22 = vld [vmem:[#allocation14 + $0x50c] ss:$28 sps:$4 sm:$0xff]  }
 0x2b9   :  { %2720 = vmatpush1.bf16.msra.mxu0 %v6650_v38  ;;  %2678 = vmatprep.subr.bf16.mxu1 %v6515_v39  ;;  %v6587_v38 = vcombine.high %v943_v28, %v947_v30  ;;  %v6715_v39 = vcombine.high %v1071_v33, %v1075_v34  ;;  %v1035_v14 = vld [vmem:[#allocation11 + $0x638] sm:$0xff]  ;;  %v7409_v23 = vld [vmem:[#allocation14 + $0x188] ss:$28 sps:$4 sm:$0xff]  }
 0x2ba   :  { %2721 = vmatprep.subr.bf16.mxu0 %v6643_v37  ;;  %v935_v37 = vld [vmem:[#allocation11 + $0x318] sm:$0xff]  ;;  %v6674_v20 = vcombine.low %v1031_v13, %v1035_v14 }
 0x2bb   :  { %v6578_v59 = vcombine.low %v935_v37, %v939_v40  ;;  %v7432_v28 = vld [vmem:[#allocation14 + $0x4d4] ss:$28 sps:$4 sm:$0xff]  }
 0x2bc   :  { %2679 = vmatpush1.bf16.msra.mxu1 %v6514_v43  ;;  %v6714_v43 = vcombine.low %v1071_v33, %v1075_v34  ;;  %v7412_v34 = vld [vmem:[#allocation14 + $0x150] ss:$28 sps:$4 sm:$0xff]  }
 0x2bd   :  { %2722 = vmatpush1.bf16.msra.mxu0 %v6642_v47  ;;  %2680 = vmatprep.subr.bf16.mxu1 %v6507_v48  ;;  %v6579_v47 = vcombine.high %v935_v37, %v939_v40  ;;  %v6707_v48 = vcombine.high %v1063_v41, %v1067_v45  ;;  %v7438_v40 = vld [vmem:[#allocation14 + $0x49c] ss:$28 sps:$4 sm:$0xff]  }
 0x2be   :  { %2723 = vmatprep.subr.bf16.mxu0 %v6635_v49  ;;  %v927_v49 = vld [vmem:[#allocation11 + $0x2d8] sm:$0xff] }
 0x2bf   :  { %v6570_v53 = vcombine.low %v927_v49, %v931_v50 }
 0x2c0   :  { %2681 = vmatpush1.bf16.msra.mxu1 %v6506_v62  ;;  %v6706_v62 = vcombine.low %v1063_v41, %v1067_v45  ;;  %v7415_v45 = vld [vmem:[#allocation14 + $0x118] ss:$28 sps:$4 sm:$0xff]  }
 0x2c1   :  { %2724 = vmatpush1.bf16.msra.mxu0 %v6634_v63  ;;  %2682 = vmatprep.subr.bf16.mxu1 %v6499_v0  ;;  %v6571_v63 = vcombine.high %v927_v49, %v931_v50  ;;  %v6699_v0 = vcombine.high %v1055_v54, %v1059_v58 }
 0x2c2   :  { %2725 = vmatprep.subr.bf16.mxu0 %v6627_v1  ;;  %v919_v1 = vld [vmem:[#allocation11 + $0x298] sm:$0xff] }
 0x2c3   :  { %v6562_v7 = vcombine.low %v919_v1, %v923_v2 }
 0x2c4   :  { %2683 = vmatpush1.bf16.msra.mxu1 %v6498_v55  ;;  %v6698_v55 = vcombine.low %v1055_v54, %v1059_v58  ;;  %v7418_v54 = vld [vmem:[#allocation14 + $0xe0] ss:$28 sps:$4 sm:$0xff]  }
 0x2c5   :  { %2726 = vmatpush1.bf16.msra.mxu0 %v6626_v56  ;;  %2684 = vmatprep.subr.bf16.mxu1 %v6491_v57  ;;  %v6563_v56 = vcombine.high %v919_v1, %v923_v2  ;;  %v6691_v57 = vcombine.high %v1047_v51, %v1051_v52  ;;  %v7421_v2 = vld [vmem:[#allocation14 + $0xa8] ss:$28 sps:$4 sm:$0xff]  }
 0x2c6   :  { %2727 = vmatprep.subr.bf16.mxu0 %v6619_v3  ;;  %v911_v3 = vld [vmem:[#allocation11 + $0x258] sm:$0xff] }
 0x2c7   :  { %v6554_v15 = vcombine.low %v911_v3, %v915_v4 }
 0x2c8   :  { %2685 = vmatpush1.bf16.msra.mxu1 %v6490_v8  ;;  %v6690_v8 = vcombine.low %v1047_v51, %v1051_v52 }
 0x2c9   :  { %2728 = vmatpush1.bf16.msra.mxu0 %v6618_v9  ;;  %2686 = vmatprep.subr.bf16.mxu1 %v6483_v10  ;;  %v6555_v9 = vcombine.high %v911_v3, %v915_v4  ;;  %v6683_v10 = vcombine.high %v1039_v5, %v1043_v6  ;;  %v7427_v3 = vld [vmem:[#allocation14 + $0x70] ss:$28 sps:$4 sm:$0xff]   ;;  %v7435_v4 = vld [vmem:[#allocation14 + $0x3c] ss:$28 sps:$4 sm:$0xff]  }
 0x2ca   :  { %2729 = vmatprep.subr.bf16.mxu0 %v6611_v11  ;;  %v903_v11 = vld [vmem:[#allocation11 + $0x218] sm:$0xff] }
 0x2cc   :  { %2687 = vmatpush1.bf16.msra.mxu1 %v6482_v16  ;;  %v6682_v16 = vcombine.low %v1039_v5, %v1043_v6  ;;  %v7454_v5 = vld [vmem:[#allocation14 + $0x3f0] ss:$28 sps:$4 sm:$0xff]   ;;  %v7462_v6 = vld [vmem:[#allocation14 + $0x3bc] ss:$28 sps:$4 sm:$0xff]  }
 0x2cd   :  { %2730 = vmatpush1.bf16.msra.mxu0 %v6610_v17  ;;  %2688 = vmatprep.subr.bf16.mxu1 %v6603_v18  ;;  %v6547_v17 = vcombine.high %v903_v11, %v907_v12  ;;  %v6675_v18 = vcombine.high %v1031_v13, %v1035_v14  ;;  %v7466_v13 = vld [vmem:[#allocation14 + $0x380] ss:$28 sps:$4 sm:$0xff]   ;;  %v7474_v14 = vld [vmem:[#allocation14 + $0x6cc] ss:$28 sps:$4 sm:$0xff]  }
 0x2ce   :  { %2731 = vmatprep.subr.bf16.mxu0 %v6731_v19  ;;  %v6546_v19 = vcombine.low %v903_v11, %v907_v12  ;;  %v7439_v11 = vld [vmem:[#allocation14] ss:$28 sps:$4 sm:$0xff]   ;;  %v7447_v12 = vld [vmem:[#allocation14 + $0x34c] ss:$28 sps:$4 sm:$0xff]  }
 0x2d0   :  { %2689 = vmatpush2.bf16.msra.mxu1 %v6602_v24  ;;  %v8458_v24 = vld [vmem:[#allocation13] sm:$0xff] }
 0x2d1   :  { %2732 = vmatpush2.bf16.msra.mxu0 %v6730_v25  ;;  %2690 = vmatprep.subr.bf16.mxu1 %v6595_v26  ;;  %v7414_v25 = vld [vmem:[#allocation14 + $0x154] ss:$28 sps:$4 sm:$0xff]   ;;  %v7424_v26 = vld [vmem:[#allocation14 + $0x508] ss:$28 sps:$4 sm:$0xff]  }
 0x2d2   :  { %2733 = vmatprep.subr.bf16.mxu0 %v6723_v27  ;;  %v1101_v27 = vrot.slane %v8458_v24, %v8399_v32 }
 0x2d4   :  { %2691 = vmatpush2.bf16.msra.mxu1 %v6594_v35 }
 0x2d5   :  { %2734 = vmatpush2.bf16.msra.mxu0 %v6722_v36  ;;  %2692 = vmatprep.subr.bf16.mxu1 %v6587_v38  ;;  %v7417_v36 = vld [vmem:[#allocation14 + $0x11c] ss:$28 sps:$4 sm:$0xff]   ;;  %v7430_v38 = vld [vmem:[#allocation14 + $0x4d0] ss:$28 sps:$4 sm:$0xff]  }
 0x2d6   :  { %2735 = vmatprep.subr.bf16.mxu0 %v6715_v39 }
 0x2d8   :  { %2693 = vmatpush2.bf16.msra.mxu1 %v6586_v46 }
 0x2d9   :  { %2736 = vmatpush2.bf16.msra.mxu0 %v6714_v43  ;;  %2694 = vmatprep.subr.bf16.mxu1 %v6579_v47  ;;  %v7420_v43 = vld [vmem:[#allocation14 + $0xe4] ss:$28 sps:$4 sm:$0xff]   ;;  %v7436_v47 = vld [vmem:[#allocation14 + $0x498] ss:$28 sps:$4 sm:$0xff]  }
 0x2da   :  { %2737 = vmatprep.subr.bf16.mxu0 %v6707_v48  ;;  %v7444_v48 = vld [vmem:[#allocation14 + $0x464] ss:$28 sps:$4 sm:$0xff]  }
 0x2dc   :  { %2695 = vmatpush2.bf16.msra.mxu1 %v6578_v59 }
 0x2dd   :  { %2738 = vmatpush2.bf16.msra.mxu0 %v6706_v62  ;;  %2696 = vmatprep.subr.bf16.mxu1 %v6571_v63  ;;  %v7423_v62 = vld [vmem:[#allocation14 + $0xac] ss:$28 sps:$4 sm:$0xff]   ;;  %v7442_v63 = vld [vmem:[#allocation14 + $0x460] ss:$28 sps:$4 sm:$0xff]  }
 0x2de   :  { %2739 = vmatprep.subr.bf16.mxu0 %v6699_v0  ;;  %v7450_v0 = vld [vmem:[#allocation14 + $0x42c] ss:$28 sps:$4 sm:$0xff]  }
 0x2e0   :  { %2697 = vmatpush2.bf16.msra.mxu1 %v6570_v53  ;;  %v7429_v53 = vld [vmem:[#allocation14 + $0x74] ss:$28 sps:$4 sm:$0xff]  }
 0x2e1   :  { %2740 = vmatpush2.bf16.msra.mxu0 %v6698_v55  ;;  %2698 = vmatprep.subr.bf16.mxu1 %v6563_v56  ;;  %v7448_v55 = vld [vmem:[#allocation14 + $0x428] ss:$28 sps:$4 sm:$0xff]  }
 0x2e2   :  { %2741 = vmatprep.subr.bf16.mxu0 %v6691_v57  ;;  %v7456_v57 = vld [vmem:[#allocation14 + $0x3f4] ss:$28 sps:$4 sm:$0xff]  }
 0x2e4   :  { %2699 = vmatpush2.bf16.msra.mxu1 %v6562_v7  ;;  %v7433_v7 = vld [vmem:[#allocation14 + $0x38] ss:$28 sps:$4 sm:$0xff]  }
 0x2e5   :  { %2742 = vmatpush2.bf16.msra.mxu0 %v6690_v8  ;;  %2700 = vmatprep.subr.bf16.mxu1 %v6555_v9  ;;  %v7441_v8 = vld [vmem:[#allocation14 + $0x4] ss:$28 sps:$4 sm:$0xff]   ;;  %v7460_v9 = vld [vmem:[#allocation14 + $0x3b8] ss:$28 sps:$4 sm:$0xff]  }
 0x2e6   :  { %2743 = vmatprep.subr.bf16.mxu0 %v6683_v10  ;;  %v7468_v10 = vld [vmem:[#allocation14 + $0x384] ss:$28 sps:$4 sm:$0xff]  }
 0x2e8   :  { %2701 = vmatpush2.bf16.msra.mxu1 %v6554_v15  ;;  %v7445_v15 = vld [vmem:[#allocation14 + $0x348] ss:$28 sps:$4 sm:$0xff]  }
 0x2e9   :  { %2744 = vmatpush2.bf16.msra.mxu0 %v6682_v16  ;;  %2702 = vmatprep.subr.bf16.mxu1 %v6547_v17  ;;  %v7453_v16 = vld [vmem:[#allocation14 + $0x314] ss:$28 sps:$4 sm:$0xff]   ;;  %v7472_v17 = vld [vmem:[#allocation14 + $0x6c8] ss:$28 sps:$4 sm:$0xff]  }
 0x2ea   :  { %2745 = vmatprep.subr.bf16.mxu0 %v6675_v18  ;;  %v7480_v18 = vld [vmem:[#allocation14 + $0x694] ss:$28 sps:$4 sm:$0xff]  }
 0x2ec   :  { %2703 = vmatpush2.bf16.msra.mxu1 %v6546_v19  ;;  %v7451_v19 = vld [vmem:[#allocation14 + $0x310] ss:$28 sps:$4 sm:$0xff]  }
 0x2ed   :  { %2746 = vmatpush2.bf16.msra.mxu0 %v6674_v20  ;;  %5667 = vmatprep.subr.bf16.mxu1 %v7411_v21  ;;  %v7459_v20 = vld [vmem:[#allocation14 + $0x2dc] ss:$28 sps:$4 sm:$0xff]   ;;  %v7478_v21 = vld [vmem:[#allocation14 + $0x690] ss:$28 sps:$4 sm:$0xff]  }
 0x2ee   :  { %5710 = vmatprep.subr.bf16.mxu0 %v7426_v22  ;;  %v7486_v22 = vld [vmem:[#allocation14 + $0x65c] ss:$28 sps:$4 sm:$0xff]  }
 0x2ef   :  { %2705 = vmatmul.mubr.bf16.vlgmr.msra.gmra.mxu1 %v8432_v42  ;;  %v8463_v30 = vpop.f32.mrf.mxu1 }
 0x2f0   :  { %2748 = vmatmul.mubr.bf16.vlgmr.msra.gmra.mxu0 %v8436_v44  ;;  %v8466_v33 = vpop.f32.mrf.mxu0  ;;  %5668 = vmatpush1.bf16.msra.mxu1 %v7409_v23  ;;  %v7457_v23 = vld [vmem:[#allocation14 + $0x2d8] ss:$28 sps:$4 sm:$0xff]  }
 0x2f1   :  { %v2450_v35 = vpop.f32.mrf.mxu1  ;;  %5669 = vmatprep.subr.bf16.mxu1 %v7414_v25  ;;  %5711 = vmatpush1.bf16.msra.mxu0 %v7424_v26  ;;  %v7465_v25 = vld [vmem:[#allocation14 + $0x2a4] ss:$28 sps:$4 sm:$0xff]   ;;  %v7484_v26 = vld [vmem:[#allocation14 + $0x658] ss:$28 sps:$4 sm:$0xff]  }
 0x2f2   :  { %v2451_v39 = vadd.f32 %v2450_v35, %v1101_v27  ;;  %v2493_v37 = vpop.f32.mrf.mxu0  ;;  %5712 = vmatprep.subr.bf16.mxu0 %v7432_v28  ;;  %v7463_v28 = vld [vmem:[#allocation14 + $0x2a0] ss:$28 sps:$4 sm:$0xff]  }
 0x2f3   :  { %v8468_v41 = vpop.f32.mrf.mxu1  ;;  %v7490_v35 = vld [vmem:[#allocation14 + $0x620] ss:$28 sps:$4 sm:$0xff]  }
 0x2f4   :  { %v8470_v42 = vpop.f32.mrf.mxu0  ;;  %5670 = vmatpush1.bf16.msra.mxu1 %v7412_v34  ;;  %v2494_v44 = vadd.f32 %v2493_v37, %v2451_v39  ;;  %v7471_v34 = vld [vmem:[#allocation14 + $0x26c] ss:$28 sps:$4 sm:$0xff]   ;;  %v7477_v37 = vld [vmem:[#allocation14 + $0x234] ss:$28 sps:$4 sm:$0xff]  }
 0x2f5   :  { %v2454_v46 = vpop.f32.mrf.mxu1  ;;  %5671 = vmatprep.subr.bf16.mxu1 %v7417_v36  ;;  %5713 = vmatpush1.bf16.msra.mxu0 %v7430_v38  ;;  %v7495_v36 = vld [vmem:[#allocation14 + $0x5ec] ss:$28 sps:$4 sm:$0xff]   ;;  %v1097_v38 = vrot.slane %v8458_v24, %v8396_v31 }
 0x2f6   :  { %5714 = vmatprep.subr.bf16.mxu0 %v7438_v40  ;;  %v2455_v49 = vadd.f32 %v2454_v46, %v1101_v27  ;;  %v2497_v50 = vpop.f32.mrf.mxu0  ;;  %v2775_v58 = vmul.f32 0.2, %v2494_v44  ;;  %vm2759_vm12 = vcmp.ge.f32.partialorder %v2494_v44, 0.0  ;;  %v7492_v27 = vld [vmem:[#allocation14 + $0x624] ss:$28 sps:$4 sm:$0xff]  }
 0x2f7   :  { %v7469_v39 = vld [vmem:[#allocation14 + $0x268] ss:$28 sps:$4 sm:$0xff]   ;;  %v2449_v46 = vadd.f32 %v8463_v30, %v1097_v38 }
 0x2f8   :  { %5672 = vmatpush1.bf16.msra.mxu1 %v7415_v45  ;;  %v2498_v59 = vadd.f32 %v2497_v50, %v2455_v49  ;;  %v2791_v51 = vsel %vm2759_vm12, %v2494_v44, %v2775_v58  ;;  %v7493_v40 = vld [vmem:[#allocation14 + $0x5e8] ss:$28 sps:$4 sm:$0xff]   ;;  %v2453_v45 = vadd.f32 %v8468_v41, %v1097_v38  ;;  %v7498_v44 = vld [vmem:[#allocation14 + $0x5b4] ss:$28 sps:$4 sm:$0xff]   ;;  %v7501_v50 = vld [vmem:[#allocation14 + $0x57c] ss:$28 sps:$4 sm:$0xff]  }
 0x2f9   :  { %5673 = vmatprep.subr.bf16.mxu1 %v7420_v43  ;;  %5715 = vmatpush1.bf16.msra.mxu0 %v7436_v47  ;;  %v7475_v43 = vld [vmem:[#allocation14 + $0x230] ss:$28 sps:$4 sm:$0xff]   ;;  %v7483_v47 = vld [vmem:[#allocation14 + $0x1fc] ss:$28 sps:$4 sm:$0xff]   ;;  %v7489_v41 = vld [vmem:[#allocation14 + $0x1c4] ss:$28 sps:$4 sm:$0xff]  }
 0x2fa   :  { %5716 = vmatprep.subr.bf16.mxu0 %v7444_v48  ;;  %vm2767_vm13 = vcmp.ge.f32.partialorder %v2498_v59, 0.0  ;;  %v2783_v1 = vmul.f32 0.2, %v2498_v59  ;;  %v7496_v48 = vld [vmem:[#allocation14 + $0x5b0] ss:$28 sps:$4 sm:$0xff]   ;;  %v2496_v49 = vadd.f32 %v8470_v42, %v2453_v45 }
 0x2fb   :  { %v7481_v58 = vld [vmem:[#allocation14 + $0x1f8] ss:$28 sps:$4 sm:$0xff]   ;;  %v7504_v30 = vld [vmem:[#allocation14 + $0x544] ss:$28 sps:$4 sm:$0xff]  }
 0x2fc   :  { %5674 = vmatpush1.bf16.msra.mxu1 %v7418_v54  ;;  %v2799_v52 = vsel %vm2767_vm13, %v2498_v59, %v2783_v1  ;;  %v2492_v54 = vadd.f32 %v8466_v33, %v2449_v46  ;;  %v7499_v59 = vld [vmem:[#allocation14 + $0x578] ss:$28 sps:$4 sm:$0xff]   ;;  %vm2766_vm14 = vcmp.ge.f32.partialorder %v2496_v49, 0.0  ;;  %v7502_v42 = vld [vmem:[#allocation14 + $0x540] ss:$28 sps:$4 sm:$0xff]  }
 0x2fd   :  { %5675 = vmatprep.subr.bf16.mxu1 %v7423_v62  ;;  %5717 = vmatpush1.bf16.msra.mxu0 %v7442_v63  ;;  %v8472_v56 = vpack.c.bf16 %v2799_v52, %v2791_v51  ;;  %v2782_v62 = vmul.f32 0.2, %v2496_v49  ;;  %v7507_v1 = vld [vmem:[#allocation14 + $0x88c] ss:$28 sps:$4 sm:$0xff]  }
 0x2fe   :  { %5718 = vmatprep.subr.bf16.mxu0 %v7450_v0  ;;  %v2774_v63 = vmul.f32 0.2, %v2492_v54  ;;  %v7487_v0 = vld [vmem:[#allocation14 + $0x1c0] ss:$28 sps:$4 sm:$0xff]   ;;  %vm2758_vm15 = vcmp.ge.f32.partialorder %v2492_v54, 0.0 }
 0x2ff   :  { %5699 = vmatprep.mubr.bf16.mxu1 %v8472_v56  ;;  %v7555_v33 = vld [vmem:[#allocation14 + $0xc0c] ss:$28 sps:$4 sm:$0xff]  }
 0x300   :  { %5676 = vmatpush1.bf16.msra.mxu1 %v7421_v2  ;;  %v2798_v2 = vsel %vm2766_vm14, %v2496_v49, %v2782_v62  ;;  %v2790_v51 = vsel %vm2758_vm15, %v2492_v54, %v2774_v63  ;;  %v7505_v52 = vld [vmem:[#allocation14 + $0x888] ss:$28 sps:$4 sm:$0xff]   ;;  %v7525_v49 = vld [vmem:[#allocation14 + $0x73c] ss:$28 sps:$4 sm:$0xff]  }
 0x301   :  { %5677 = vmatprep.subr.bf16.mxu1 %v7429_v53  ;;  %5719 = vmatpush1.bf16.msra.mxu0 %v7448_v55  ;;  %v8481_v53 = vpack.c.bf16 %v2798_v2, %v2790_v51  ;;  %v7510_v55 = vld [vmem:[#allocation14 + $0x854] ss:$28 sps:$4 sm:$0xff]   ;;  %v7517_v38 = vld [vmem:[#allocation14 + $0x7a8] ss:$28 sps:$4 sm:$0xff]   ;;  %v7567_v54 = vld [vmem:[#allocation14 + $0xb9c] ss:$28 sps:$4 sm:$0xff]  }
 0x302   :  { %5720 = vmatprep.subr.bf16.mxu0 %v7456_v57  ;;  %v1105_v57 = vrot.slane %v8458_v24, %v8423_v61  ;;  %v7553_v46 = vld [vmem:[#allocation14 + $0xc08] ss:$28 sps:$4 sm:$0xff]   ;;  %v7534_v2 = vld [vmem:[#allocation14 + $0xa14] ss:$28 sps:$4 sm:$0xff]  }
 0x303   :  { %v7573_v62 = vld [vmem:[#allocation14 + $0xb64] ss:$28 sps:$4 sm:$0xff]   ;;  %v7531_v63 = vld [vmem:[#allocation14 + $0xa4c] ss:$28 sps:$4 sm:$0xff]   ;;  %v7585_v51 = vld [vmem:[#allocation14 + $0xaf4] ss:$28 sps:$4 sm:$0xff]  }
 0x304   :  { %5678 = vmatpush1.bf16.msra.mxu1 %v7427_v3  ;;  %v1109_v3 = vrot.slane %v8458_v24, %v8420_v60 }
 0x305   :  { %5679 = vmatprep.subr.bf16.mxu1 %v7435_v4  ;;  %5721 = vmatpush1.bf16.msra.mxu0 %v7454_v5 }
 0x306   :  { %5722 = vmatprep.subr.bf16.mxu0 %v7462_v6  ;;  %v7508_v6 = vld [vmem:[#allocation14 + $0x850] ss:$28 sps:$4 sm:$0xff]  }
 0x308   :  { %5680 = vmatpush1.bf16.msra.mxu1 %v7433_v7 }
 0x309   :  { %5681 = vmatprep.subr.bf16.mxu1 %v7441_v8  ;;  %5723 = vmatpush1.bf16.msra.mxu0 %v7460_v9  ;;  %v7513_v8 = vld [vmem:[#allocation14 + $0x81c] ss:$28 sps:$4 sm:$0xff]  }
 0x30a   :  { %5724 = vmatprep.subr.bf16.mxu0 %v7468_v10 }
 0x30c   :  { %5682 = vmatpush1.bf16.msra.mxu1 %v7439_v11 }
 0x30d   :  { %5683 = vmatprep.subr.bf16.mxu1 %v7447_v12  ;;  %5725 = vmatpush1.bf16.msra.mxu0 %v7466_v13 }
 0x30e   :  { %5726 = vmatprep.subr.bf16.mxu0 %v7474_v14 }
 0x310   :  { %5684 = vmatpush2.bf16.msra.mxu1 %v7445_v15  ;;  %v7511_v15 = vld [vmem:[#allocation14 + $0x818] ss:$28 sps:$4 sm:$0xff]  }
 0x311   :  { %5685 = vmatprep.subr.bf16.mxu1 %v7453_v16  ;;  %5727 = vmatpush2.bf16.msra.mxu0 %v7472_v17 }
 0x312   :  { %5728 = vmatprep.subr.bf16.mxu0 %v7480_v18  ;;  %v7516_v18 = vld [vmem:[#allocation14 + $0x7e4] ss:$28 sps:$4 sm:$0xff]  }
 0x314   :  { %5686 = vmatpush2.bf16.msra.mxu1 %v7451_v19 }
 0x315   :  { %5687 = vmatprep.subr.bf16.mxu1 %v7459_v20  ;;  %5729 = vmatpush2.bf16.msra.mxu0 %v7478_v21 }
 0x316   :  { %5730 = vmatprep.subr.bf16.mxu0 %v7486_v22 }
 0x318   :  { %5688 = vmatpush2.bf16.msra.mxu1 %v7457_v23 }
 0x319   :  { %5689 = vmatprep.subr.bf16.mxu1 %v7465_v25  ;;  %5731 = vmatpush2.bf16.msra.mxu0 %v7484_v26  ;;  %v7514_v25 = vld [vmem:[#allocation14 + $0x7e0] ss:$28 sps:$4 sm:$0xff]  }
 0x31a   :  { %5732 = vmatprep.subr.bf16.mxu0 %v7492_v27 }
 0x31c   :  { %5690 = vmatpush2.bf16.msra.mxu1 %v7463_v28  ;;  %v7519_v28 = vld [vmem:[#allocation14 + $0x7ac] ss:$28 sps:$4 sm:$0xff]  }
 0x31d   :  { %5691 = vmatprep.subr.bf16.mxu1 %v7471_v34  ;;  %5733 = vmatpush2.bf16.msra.mxu0 %v7490_v35 }
 0x31e   :  { %5734 = vmatprep.subr.bf16.mxu0 %v7495_v36 }
 0x320   :  { %5692 = vmatpush2.bf16.msra.mxu1 %v7469_v39 }
 0x321   :  { %5693 = vmatprep.subr.bf16.mxu1 %v7477_v37  ;;  %5735 = vmatpush2.bf16.msra.mxu0 %v7493_v40  ;;  %v7522_v40 = vld [vmem:[#allocation14 + $0x774] ss:$28 sps:$4 sm:$0xff]  }
 0x322   :  { %5736 = vmatprep.subr.bf16.mxu0 %v7498_v44 }
 0x324   :  { %5694 = vmatpush2.bf16.msra.mxu1 %v7475_v43 }
 0x325   :  { %5695 = vmatprep.subr.bf16.mxu1 %v7483_v47  ;;  %5737 = vmatpush2.bf16.msra.mxu0 %v7496_v48  ;;  %v7561_v47 = vld [vmem:[#allocation14 + $0xbd4] ss:$28 sps:$4 sm:$0xff]  }
 0x326   :  { %5738 = vmatprep.subr.bf16.mxu0 %v7501_v50  ;;  %v7520_v48 = vld [vmem:[#allocation14 + $0x770] ss:$28 sps:$4 sm:$0xff]  }
 0x327   :  { %v7559_v50 = vld [vmem:[#allocation14 + $0xbd0] ss:$28 sps:$4 sm:$0xff]  }
 0x328   :  { %5696 = vmatpush2.bf16.msra.mxu1 %v7481_v58  ;;  %v7523_v58 = vld [vmem:[#allocation14 + $0x738] ss:$28 sps:$4 sm:$0xff]  }
 0x329   :  { %5697 = vmatprep.subr.bf16.mxu1 %v7489_v41  ;;  %5739 = vmatpush2.bf16.msra.mxu0 %v7499_v59  ;;  %v7528_v41 = vld [vmem:[#allocation14 + $0x704] ss:$28 sps:$4 sm:$0xff]   ;;  %v7565_v59 = vld [vmem:[#allocation14 + $0xb98] ss:$28 sps:$4 sm:$0xff]  }
 0x32a   :  { %5740 = vmatprep.subr.bf16.mxu0 %v7504_v30  ;;  %v7526_v30 = vld [vmem:[#allocation14 + $0x700] ss:$28 sps:$4 sm:$0xff]  }
 0x32c   :  { %5698 = vmatpush2.bf16.msra.mxu1 %v7487_v0  ;;  %v7571_v0 = vld [vmem:[#allocation14 + $0xb60] ss:$28 sps:$4 sm:$0xff]  }
 0x32d   :  { %5741 = vmatpush2.bf16.msra.mxu0 %v7502_v42  ;;  %5753 = vmatprep.subr.bf16.mxu1 %v7507_v1  ;;  %v7579_v42 = vld [vmem:[#allocation14 + $0xb2c] ss:$28 sps:$4 sm:$0xff]  }
 0x32e   :  { %5796 = vmatprep.subr.bf16.mxu0 %v7555_v33  ;;  %v7529_v1 = vld [vmem:[#allocation14 + $0xa48] ss:$28 sps:$4 sm:$0xff]  }
 0x32f   :  { %v2534_v4 = vpop.f32.mrf.mxu1  ;;  %5700 = vmatmul.mubr.bf16.vlgmr.msra.gmra.mxu1 %v8481_v53  ;;  %v7577_v33 = vld [vmem:[#allocation14 + $0xb28] ss:$28 sps:$4 sm:$0xff]  }
 0x330   :  { %v2577_v5 = vpop.f32.mrf.mxu0  ;;  %5754 = vmatpush1.bf16.msra.mxu1 %v7505_v52  ;;  %v2535_v9 = vadd.f32 %v2534_v4, %v1105_v57  ;;  %v7532_v52 = vld [vmem:[#allocation14 + $0xa10] ss:$28 sps:$4 sm:$0xff]   ;;  %v7535_v4 = vld [vmem:[#allocation14 + $0x9d8] ss:$28 sps:$4 sm:$0xff]  }
 0x331   :  { %v2536_v7 = vpop.f32.mrf.mxu1  ;;  %5755 = vmatprep.subr.bf16.mxu1 %v7510_v55  ;;  %v7537_v55 = vld [vmem:[#allocation14 + $0x9dc] ss:$28 sps:$4 sm:$0xff]  }
 0x332   :  { %v2537_v10 = vadd.f32 %v2536_v7, %v1109_v3  ;;  %v2579_v11 = vpop.f32.mrf.mxu0  ;;  %v2578_v19 = vadd.f32 %v2577_v5, %v2535_v9  ;;  %v7540_v5 = vld [vmem:[#allocation14 + $0x9a4] ss:$28 sps:$4 sm:$0xff]   ;;  %v7543_v9 = vld [vmem:[#allocation14 + $0x96c] ss:$28 sps:$4 sm:$0xff]  }
 0x333   :  { %v2538_v12 = vpop.f32.mrf.mxu1  ;;  %v7597_v7 = vld [vmem:[#allocation14 + $0xa84] ss:$28 sps:$4 sm:$0xff]  }
 0x334   :  { %v2539_v13 = vadd.f32 %v2538_v12, %v1105_v57  ;;  %v2581_v14 = vpop.f32.mrf.mxu0  ;;  %5756 = vmatpush1.bf16.msra.mxu1 %v7508_v6  ;;  %v2580_v16 = vadd.f32 %v2579_v11, %v2537_v10  ;;  %v2776_v34 = vmul.f32 0.2, %v2578_v19  ;;  %vm2760_vm2 = vcmp.ge.f32.partialorder %v2578_v19, 0.0  ;;  %v7583_v57 = vld [vmem:[#allocation14 + $0xaf0] ss:$28 sps:$4 sm:$0xff]  }
 0x335   :  { %v2540_v17 = vpop.f32.mrf.mxu1  ;;  %5757 = vmatprep.subr.bf16.mxu1 %v7513_v8  ;;  %v7589_v6 = vld [vmem:[#allocation14 + $0xab8] ss:$28 sps:$4 sm:$0xff]   ;;  %v7538_v8 = vld [vmem:[#allocation14 + $0x9a0] ss:$28 sps:$4 sm:$0xff]   ;;  %v7603_v11 = vld [vmem:[#allocation14 + $0xdcc] ss:$28 sps:$4 sm:$0xff]  }
 0x336   :  { %v2582_v20 = vadd.f32 %v2581_v14, %v2539_v13  ;;  %v2541_v21 = vadd.f32 %v2540_v17, %v1109_v3  ;;  %v2583_v23 = vpop.f32.mrf.mxu0  ;;  %v2777_v26 = vmul.f32 0.2, %v2580_v16  ;;  %vm2761_vm1 = vcmp.ge.f32.partialorder %v2580_v16, 0.0  ;;  %v7591_v3 = vld [vmem:[#allocation14 + $0xabc] ss:$28 sps:$4 sm:$0xff]  }
 0x337   :  { %v2792_v45 = vsel %vm2760_vm2, %v2578_v19, %v2776_v34  ;;  %v7595_v10 = vld [vmem:[#allocation14 + $0xa80] ss:$28 sps:$4 sm:$0xff]   ;;  %v7541_v12 = vld [vmem:[#allocation14 + $0x968] ss:$28 sps:$4 sm:$0xff]   ;;  %v7546_v13 = vld [vmem:[#allocation14 + $0x934] ss:$28 sps:$4 sm:$0xff]  }
 0x338   :  { %v2784_v22 = vmul.f32 0.2, %v2582_v20  ;;  %5758 = vmatpush1.bf16.msra.mxu1 %v7511_v15  ;;  %vm2768_vm0 = vcmp.ge.f32.partialorder %v2582_v20, 0.0  ;;  %v2584_v27 = vadd.f32 %v2583_v23, %v2541_v21  ;;  %v2793_v39 = vsel %vm2761_vm1, %v2580_v16, %v2777_v26  ;;  %v7601_v14 = vld [vmem:[#allocation14 + $0xdc8] ss:$28 sps:$4 sm:$0xff]  }
 0x339   :  { %5759 = vmatprep.subr.bf16.mxu1 %v7516_v18  ;;  %v7609_v15 = vld [vmem:[#allocation14 + $0xd94] ss:$28 sps:$4 sm:$0xff]   ;;  %v7549_v17 = vld [vmem:[#allocation14 + $0x8fc] ss:$28 sps:$4 sm:$0xff]   ;;  %v7552_v21 = vld [vmem:[#allocation14 + $0x8c4] ss:$28 sps:$4 sm:$0xff]  }
 0x33a   :  { %vm2769_vm3 = vcmp.ge.f32.partialorder %v2584_v27, 0.0  ;;  %v2785_v35 = vmul.f32 0.2, %v2584_v27  ;;  %v2800_v36 = vsel %vm2768_vm0, %v2582_v20, %v2784_v22  ;;  %v7544_v16 = vld [vmem:[#allocation14 + $0x930] ss:$28 sps:$4 sm:$0xff]  }
 0x33b   :  { %v8490_v43 = vpack.c.bf16 %v2800_v36, %v2792_v45  ;;  %v7607_v18 = vld [vmem:[#allocation14 + $0xd90] ss:$28 sps:$4 sm:$0xff]   ;;  %v7615_v19 = vld [vmem:[#allocation14 + $0xd5c] ss:$28 sps:$4 sm:$0xff]   ;;  %v7621_v23 = vld [vmem:[#allocation14 + $0xd24] ss:$28 sps:$4 sm:$0xff]  }
 0x33c   :  { %5760 = vmatpush1.bf16.msra.mxu1 %v7514_v25  ;;  %v2801_v37 = vsel %vm2769_vm3, %v2584_v27, %v2785_v35  ;;  %v7547_v20 = vld [vmem:[#allocation14 + $0x8f8] ss:$28 sps:$4 sm:$0xff]   ;;  %v7550_v25 = vld [vmem:[#allocation14 + $0x8c0] ss:$28 sps:$4 sm:$0xff]   ;;  %v1112_v27 = vsub.s32 4, %v8393_v29 }
 0x33d   :  { %5761 = vmatprep.subr.bf16.mxu1 %v7519_v28  ;;  %v8488_v44 = vpack.c.bf16 %v2801_v37, %v2793_v39  ;;  %v7613_v22 = vld [vmem:[#allocation14 + $0xd58] ss:$28 sps:$4 sm:$0xff]   ;;  %v1116_v28 = vsub.s32 5, %v8393_v29  ;;  %v7619_v34 = vld [vmem:[#allocation14 + $0xd20] ss:$28 sps:$4 sm:$0xff]  }
 0x33e   :  { %v7558_v26 = vld [vmem:[#allocation14 + $0x194] ss:$28 sps:$4 sm:$0xff]   ;;  %v7627_v35 = vld [vmem:[#allocation14 + $0xcec] ss:$28 sps:$4 sm:$0xff]   ;;  %v1113_v36 = vrot.slane %v8458_v24, %v1112_v27 }
 0x33f   :  { %5742 = vmatprep.mubr.bf16.mxu0 %v8488_v44  ;;  %v7625_v39 = vld [vmem:[#allocation14 + $0xce8] ss:$28 sps:$4 sm:$0xff]  }
 0x340   :  { %5762 = vmatpush1.bf16.msra.mxu1 %v7517_v38  ;;  %5743 = vmatmul.mubr.bf16.vlgmr.msra.gmra.mxu0 %v8490_v43  ;;  %v1117_v38 = vrot.slane %v8458_v24, %v1116_v28 }
 0x341   :  { %5763 = vmatprep.subr.bf16.mxu1 %v7522_v40  ;;  %5797 = vmatpush1.bf16.msra.mxu0 %v7553_v46  ;;  %v7633_v40 = vld [vmem:[#allocation14 + $0xcb4] ss:$28 sps:$4 sm:$0xff]  }
 0x342   :  { %5798 = vmatprep.subr.bf16.mxu0 %v7561_v47 }
 0x344   :  { %5764 = vmatpush1.bf16.msra.mxu1 %v7520_v48 }
 0x345   :  { %5765 = vmatprep.subr.bf16.mxu1 %v7525_v49  ;;  %5799 = vmatpush1.bf16.msra.mxu0 %v7559_v50  ;;  %v7631_v50 = vld [vmem:[#allocation14 + $0xcb0] ss:$28 sps:$4 sm:$0xff]  }
 0x346   :  { %5800 = vmatprep.subr.bf16.mxu0 %v7567_v54 }
 0x348   :  { %5766 = vmatpush1.bf16.msra.mxu1 %v7523_v58  ;;  %v7639_v58 = vld [vmem:[#allocation14 + $0xc7c] ss:$28 sps:$4 sm:$0xff]  }
 0x349   :  { %5767 = vmatprep.subr.bf16.mxu1 %v7528_v41  ;;  %5801 = vmatpush1.bf16.msra.mxu0 %v7565_v59 }
 0x34a   :  { %5802 = vmatprep.subr.bf16.mxu0 %v7573_v62 }
 0x34c   :  { %5768 = vmatpush1.bf16.msra.mxu1 %v7526_v30 }
 0x34d   :  { %5769 = vmatprep.subr.bf16.mxu1 %v7531_v63  ;;  %5803 = vmatpush1.bf16.msra.mxu0 %v7571_v0 }
 0x34e   :  { %5804 = vmatprep.subr.bf16.mxu0 %v7579_v42  ;;  %v7637_v42 = vld [vmem:[#allocation14 + $0xc78] ss:$28 sps:$4 sm:$0xff]  }
 0x350   :  { %5770 = vmatpush2.bf16.msra.mxu1 %v7529_v1 }
 0x351   :  { %5771 = vmatprep.subr.bf16.mxu1 %v7534_v2  ;;  %5805 = vmatpush1.bf16.msra.mxu0 %v7577_v33  ;;  %v7645_v2 = vld [vmem:[#allocation14 + $0xc44] ss:$28 sps:$4 sm:$0xff]  }
 0x352   :  { %5806 = vmatprep.subr.bf16.mxu0 %v7585_v51 }
 0x354   :  { %5772 = vmatpush2.bf16.msra.mxu1 %v7532_v52 }
 0x355   :  { %5773 = vmatprep.subr.bf16.mxu1 %v7537_v55  ;;  %5807 = vmatpush1.bf16.msra.mxu0 %v7583_v57 }
 0x356   :  { %5808 = vmatprep.subr.bf16.mxu0 %v7591_v3  ;;  %v7643_v3 = vld [vmem:[#allocation14 + $0xc40] ss:$28 sps:$4 sm:$0xff]  }
 0x358   :  { %5774 = vmatpush2.bf16.msra.mxu1 %v7535_v4 }
 0x359   :  { %5775 = vmatprep.subr.bf16.mxu1 %v7540_v5  ;;  %5809 = vmatpush1.bf16.msra.mxu0 %v7589_v6  ;;  %v7651_v5 = vld [vmem:[#allocation14 + $0x514] ss:$28 sps:$4 sm:$0xff]  }
 0x35a   :  { %5810 = vmatprep.subr.bf16.mxu0 %v7597_v7 }
 0x35c   :  { %5776 = vmatpush2.bf16.msra.mxu1 %v7538_v8 }
 0x35d   :  { %5777 = vmatprep.subr.bf16.mxu1 %v7543_v9  ;;  %5811 = vmatpush1.bf16.msra.mxu0 %v7595_v10 }
 0x35e   :  { %5812 = vmatprep.subr.bf16.mxu0 %v7603_v11  ;;  %v7556_v11 = vld [vmem:[#allocation14 + $0x190] ss:$28 sps:$4 sm:$0xff]  }
 0x360   :  { %5778 = vmatpush2.bf16.msra.mxu1 %v7541_v12 }
 0x361   :  { %5779 = vmatprep.subr.bf16.mxu1 %v7546_v13  ;;  %5813 = vmatpush2.bf16.msra.mxu0 %v7601_v14  ;;  %v7564_v13 = vld [vmem:[#allocation14 + $0x15c] ss:$28 sps:$4 sm:$0xff]  }
 0x362   :  { %5814 = vmatprep.subr.bf16.mxu0 %v7609_v15  ;;  %v7562_v14 = vld [vmem:[#allocation14 + $0x158] ss:$28 sps:$4 sm:$0xff]   ;;  %v7570_v15 = vld [vmem:[#allocation14 + $0x124] ss:$28 sps:$4 sm:$0xff]  }
 0x364   :  { %5780 = vmatpush2.bf16.msra.mxu1 %v7544_v16  ;;  %v7568_v16 = vld [vmem:[#allocation14 + $0x120] ss:$28 sps:$4 sm:$0xff]  }
 0x365   :  { %5781 = vmatprep.subr.bf16.mxu1 %v7549_v17  ;;  %5815 = vmatpush2.bf16.msra.mxu0 %v7607_v18  ;;  %v7576_v17 = vld [vmem:[#allocation14 + $0xec] ss:$28 sps:$4 sm:$0xff]  }
 0x366   :  { %5816 = vmatprep.subr.bf16.mxu0 %v7615_v19  ;;  %v7574_v18 = vld [vmem:[#allocation14 + $0xe8] ss:$28 sps:$4 sm:$0xff]   ;;  %v7582_v19 = vld [vmem:[#allocation14 + $0xb4] ss:$28 sps:$4 sm:$0xff]  }
 0x368   :  { %5782 = vmatpush2.bf16.msra.mxu1 %v7547_v20  ;;  %v7580_v20 = vld [vmem:[#allocation14 + $0xb0] ss:$28 sps:$4 sm:$0xff]  }
 0x369   :  { %5783 = vmatprep.subr.bf16.mxu1 %v7552_v21  ;;  %5817 = vmatpush2.bf16.msra.mxu0 %v7613_v22  ;;  %v7588_v21 = vld [vmem:[#allocation14 + $0x7c] ss:$28 sps:$4 sm:$0xff]  }
 0x36a   :  { %5818 = vmatprep.subr.bf16.mxu0 %v7621_v23  ;;  %v7586_v22 = vld [vmem:[#allocation14 + $0x78] ss:$28 sps:$4 sm:$0xff]   ;;  %v7594_v23 = vld [vmem:[#allocation14 + $0x44] ss:$28 sps:$4 sm:$0xff]  }
 0x36c   :  { %5784 = vmatpush2.bf16.msra.mxu1 %v7550_v25  ;;  %v7592_v25 = vld [vmem:[#allocation14 + $0x40] ss:$28 sps:$4 sm:$0xff]  }
 0x36d   :  { %5839 = vmatprep.subr.bf16.mxu1 %v7558_v26  ;;  %5819 = vmatpush2.bf16.msra.mxu0 %v7619_v34  ;;  %v7600_v26 = vld [vmem:[#allocation14 + $0xc] ss:$28 sps:$4 sm:$0xff]  }
 0x36e   :  { %5820 = vmatprep.subr.bf16.mxu0 %v7627_v35  ;;  %v7598_v34 = vld [vmem:[#allocation14 + $0x8] ss:$28 sps:$4 sm:$0xff]   ;;  %v7606_v35 = vld [vmem:[#allocation14 + $0x354] ss:$28 sps:$4 sm:$0xff]  }
 0x36f   :  { %v2620_v37 = vpop.f32.mrf.mxu1 }
 0x370   :  { %v2663_v45 = vpop.f32.mrf.mxu0  ;;  %v2621_v47 = vadd.f32 %v2620_v37, %v1113_v36  ;;  %v7618_v37 = vld [vmem:[#allocation14 + $0x2e4] ss:$28 sps:$4 sm:$0xff]  }
 0x371   :  { %v2622_v46 = vpop.f32.mrf.mxu1  ;;  %5821 = vmatpush2.bf16.msra.mxu0 %v7625_v39  ;;  %v7610_v39 = vld [vmem:[#allocation14 + $0x318] ss:$28 sps:$4 sm:$0xff]  }
 0x372   :  { %v2623_v48 = vadd.f32 %v2622_v46, %v1117_v38  ;;  %v2665_v49 = vpop.f32.mrf.mxu0  ;;  %5822 = vmatprep.subr.bf16.mxu0 %v7633_v40  ;;  %v2664_v63 = vadd.f32 %v2663_v45, %v2621_v47  ;;  %v7616_v40 = vld [vmem:[#allocation14 + $0x2e0] ss:$28 sps:$4 sm:$0xff]   ;;  %v7624_v45 = vld [vmem:[#allocation14 + $0x2ac] ss:$28 sps:$4 sm:$0xff]   ;;  %v1120_v47 = vsub.s32 6, %v8393_v29 }
 0x373   :  { %v2624_v54 = vpop.f32.mrf.mxu1  ;;  %v7622_v46 = vld [vmem:[#allocation14 + $0x2a8] ss:$28 sps:$4 sm:$0xff]  }
 0x374   :  { %v2625_v41 = vadd.f32 %v2624_v54, %v1113_v36  ;;  %v2667_v59 = vpop.f32.mrf.mxu0  ;;  %v2666_v62 = vadd.f32 %v2665_v49, %v2623_v48  ;;  %v2778_v57 = vmul.f32 0.2, %v2664_v63  ;;  %vm2762_vm6 = vcmp.ge.f32.partialorder %v2664_v63, 0.0  ;;  %v7604_v36 = vld [vmem:[#allocation14 + $0x350] ss:$28 sps:$4 sm:$0xff]  }
 0x375   :  { %v2626_v30 = vpop.f32.mrf.mxu1  ;;  %5823 = vmatpush2.bf16.msra.mxu0 %v7631_v50  ;;  %v1124_v48 = vsub.s32 7, %v8393_v29  ;;  %v7630_v49 = vld [vmem:[#allocation14 + $0x274] ss:$28 sps:$4 sm:$0xff]   ;;  %v1121_v50 = vrot.slane %v8458_v24, %v1120_v47 }
 0x376   :  { %v2668_v0 = vadd.f32 %v2667_v59, %v2625_v41  ;;  %v2627_v1 = vadd.f32 %v2626_v30, %v1117_v38  ;;  %5824 = vmatprep.subr.bf16.mxu0 %v7639_v58  ;;  %v2669_v51 = vpop.f32.mrf.mxu0  ;;  %v2779_v52 = vmul.f32 0.2, %v2666_v62  ;;  %vm2763_vm5 = vcmp.ge.f32.partialorder %v2666_v62, 0.0  ;;  %v7612_v38 = vld [vmem:[#allocation14 + $0x31c] ss:$28 sps:$4 sm:$0xff]  }
 0x377   :  { %v2794_v9 = vsel %vm2762_vm6, %v2664_v63, %v2778_v57  ;;  %v7628_v54 = vld [vmem:[#allocation14 + $0x270] ss:$28 sps:$4 sm:$0xff]   ;;  %v1125_v58 = vrot.slane %v8458_v24, %v1124_v48  ;;  %v7636_v59 = vld [vmem:[#allocation14 + $0x23c] ss:$28 sps:$4 sm:$0xff]   ;;  %v7667_v48 = vld [vmem:[#allocation14 + $0x468] ss:$28 sps:$4 sm:$0xff]  }
 0x378   :  { %v2786_v33 = vmul.f32 0.2, %v2668_v0  ;;  %vm2770_vm4 = vcmp.ge.f32.partialorder %v2668_v0, 0.0  ;;  %v2670_v55 = vadd.f32 %v2669_v51, %v2627_v1  ;;  %v2795_v7 = vsel %vm2763_vm5, %v2666_v62, %v2779_v52  ;;  %v7634_v1 = vld [vmem:[#allocation14 + $0x238] ss:$28 sps:$4 sm:$0xff]  }
 0x379   :  { %5825 = vmatpush2.bf16.msra.mxu0 %v7637_v42  ;;  %v7640_v24 = vld [vmem:[#allocation14 + $0x200] ss:$28 sps:$4 sm:$0xff]  }
 0x37a   :  { %vm2771_vm7 = vcmp.ge.f32.partialorder %v2670_v55, 0.0  ;;  %v2787_v4 = vmul.f32 0.2, %v2670_v55  ;;  %5826 = vmatprep.subr.bf16.mxu0 %v7645_v2  ;;  %v2802_v6 = vsel %vm2770_vm4, %v2668_v0, %v2786_v33  ;;  %v7642_v33 = vld [vmem:[#allocation14 + $0x204] ss:$28 sps:$4 sm:$0xff]  }
 0x37b   :  { %v8504_v12 = vpack.c.bf16 %v2802_v6, %v2794_v9  ;;  %v7648_v6 = vld [vmem:[#allocation14 + $0x1cc] ss:$28 sps:$4 sm:$0xff]  }
 0x37c   :  { %v2803_v8 = vsel %vm2771_vm7, %v2670_v55, %v2787_v4 }
 0x37d   :  { %v8502_v10 = vpack.c.bf16 %v2803_v8, %v2795_v7  ;;  %5827 = vmatpush2.bf16.msra.mxu0 %v7643_v3 }
 0x37e   :  { %5882 = vmatprep.subr.bf16.mxu0 %v7651_v5 }
 0x37f   :  { %5785 = vmatprep.mubr.bf16.mxu1 %v8502_v10 }
 0x380   :  { %5786 = vmatmul.mubr.bf16.vlgmr.msra.gmra.mxu1 %v8504_v12 }
 0x381   :  { %5840 = vmatpush1.bf16.msra.mxu1 %v7556_v11  ;;  %5871 = vmatprep.mubr.bf16.mxu1 %v8472_v56 }
 0x382   :  { %5841 = vmatprep.subr.bf16.mxu1 %v7564_v13 }
 0x385   :  { %5842 = vmatpush1.bf16.msra.mxu1 %v7562_v14  ;;  %v7646_v14 = vld [vmem:[#allocation14 + $0x1c8] ss:$28 sps:$4 sm:$0xff]  }
 0x386   :  { %5843 = vmatprep.subr.bf16.mxu1 %v7570_v15 }
 0x389   :  { %5844 = vmatpush1.bf16.msra.mxu1 %v7568_v16  ;;  %v7654_v16 = vld [vmem:[#allocation14 + $0x894] ss:$28 sps:$4 sm:$0xff]  }
 0x38a   :  { %5845 = vmatprep.subr.bf16.mxu1 %v7576_v17 }
 0x38d   :  { %5846 = vmatpush1.bf16.msra.mxu1 %v7574_v18 }
 0x38e   :  { %5847 = vmatprep.subr.bf16.mxu1 %v7582_v19 }
 0x391   :  { %5848 = vmatpush1.bf16.msra.mxu1 %v7580_v20 }
 0x392   :  { %5849 = vmatprep.subr.bf16.mxu1 %v7588_v21 }
 0x395   :  { %5850 = vmatpush1.bf16.msra.mxu1 %v7586_v22  ;;  %v7649_v22 = vld [vmem:[#allocation14 + $0x510] ss:$28 sps:$4 sm:$0xff]  }
 0x396   :  { %5851 = vmatprep.subr.bf16.mxu1 %v7594_v23  ;;  %v7652_v23 = vld [vmem:[#allocation14 + $0x890] ss:$28 sps:$4 sm:$0xff]  }
 0x399   :  { %5852 = vmatpush1.bf16.msra.mxu1 %v7592_v25 }
 0x39a   :  { %5853 = vmatprep.subr.bf16.mxu1 %v7600_v26  ;;  %v7657_v26 = vld [vmem:[#allocation14 + $0x4dc] ss:$28 sps:$4 sm:$0xff]  }
 0x39d   :  { %5854 = vmatpush1.bf16.msra.mxu1 %v7598_v34  ;;  %v7660_v34 = vld [vmem:[#allocation14 + $0x85c] ss:$28 sps:$4 sm:$0xff]  }
 0x39e   :  { %5855 = vmatprep.subr.bf16.mxu1 %v7606_v35  ;;  %v7655_v35 = vld [vmem:[#allocation14 + $0x4d8] ss:$28 sps:$4 sm:$0xff]  }
 0x3a1   :  { %5856 = vmatpush2.bf16.msra.mxu1 %v7604_v36  ;;  %v7658_v36 = vld [vmem:[#allocation14 + $0x858] ss:$28 sps:$4 sm:$0xff]  }
 0x3a2   :  { %5857 = vmatprep.subr.bf16.mxu1 %v7612_v38  ;;  %v7663_v38 = vld [vmem:[#allocation14 + $0x4a4] ss:$28 sps:$4 sm:$0xff]  }
 0x3a5   :  { %5858 = vmatpush2.bf16.msra.mxu1 %v7610_v39  ;;  %v7666_v39 = vld [vmem:[#allocation14 + $0x824] ss:$28 sps:$4 sm:$0xff]  }
 0x3a6   :  { %5859 = vmatprep.subr.bf16.mxu1 %v7618_v37  ;;  %v7661_v37 = vld [vmem:[#allocation14 + $0x4a0] ss:$28 sps:$4 sm:$0xff]  }
 0x3a9   :  { %5860 = vmatpush2.bf16.msra.mxu1 %v7616_v40  ;;  %v7664_v40 = vld [vmem:[#allocation14 + $0x820] ss:$28 sps:$4 sm:$0xff]  }
 0x3aa   :  { %5861 = vmatprep.subr.bf16.mxu1 %v7624_v45  ;;  %v7669_v45 = vld [vmem:[#allocation14 + $0x46c] ss:$28 sps:$4 sm:$0xff]  }
 0x3ad   :  { %5862 = vmatpush2.bf16.msra.mxu1 %v7622_v46  ;;  %v7672_v46 = vld [vmem:[#allocation14 + $0x7ec] ss:$28 sps:$4 sm:$0xff]  }
 0x3ae   :  { %5863 = vmatprep.subr.bf16.mxu1 %v7630_v49  ;;  %v7670_v49 = vld [vmem:[#allocation14 + $0x7e8] ss:$28 sps:$4 sm:$0xff]  }
 0x3af   :  { %v2706_v41 = vpop.f32.mrf.mxu1 }
 0x3b0   :  { %v2749_v62 = vpop.f32.mrf.mxu0  ;;  %v2707_v63 = vadd.f32 %v2706_v41, %v1121_v50  ;;  %v7676_v41 = vld [vmem:[#allocation14 + $0x7b0] ss:$28 sps:$4 sm:$0xff]  }
 0x3b1   :  { %v2708_v30 = vpop.f32.mrf.mxu1  ;;  %5864 = vmatpush2.bf16.msra.mxu1 %v7628_v54  ;;  %v7678_v54 = vld [vmem:[#allocation14 + $0x7b4] ss:$28 sps:$4 sm:$0xff]  }
 0x3b2   :  { %v2709_v0 = vadd.f32 %v2708_v30, %v1125_v58  ;;  %v2751_v42 = vpop.f32.mrf.mxu0  ;;  %5865 = vmatprep.subr.bf16.mxu1 %v7636_v59  ;;  %v2750_v3 = vadd.f32 %v2749_v62, %v2707_v63  ;;  %v7681_v59 = vld [vmem:[#allocation14 + $0x3fc] ss:$28 sps:$4 sm:$0xff]  }
 0x3b3   :  { %v2710_v2 = vpop.f32.mrf.mxu1  ;;  %v7684_v62 = vld [vmem:[#allocation14 + $0x77c] ss:$28 sps:$4 sm:$0xff]  }
 0x3b4   :  { %v2711_v51 = vadd.f32 %v2710_v2, %v1121_v50  ;;  %v2753_v52 = vpop.f32.mrf.mxu0  ;;  %v2752_v55 = vadd.f32 %v2751_v42, %v2709_v0  ;;  %v2780_v13 = vmul.f32 0.2, %v2750_v3  ;;  %vm2764_vm10 = vcmp.ge.f32.partialorder %v2750_v3, 0.0  ;;  %v7675_v50 = vld [vmem:[#allocation14 + $0x434] ss:$28 sps:$4 sm:$0xff]  }
 0x3b5   :  { %v2712_v57 = vpop.f32.mrf.mxu1  ;;  %5866 = vmatpush2.bf16.msra.mxu1 %v7634_v1  ;;  %v7679_v30 = vld [vmem:[#allocation14 + $0x3f8] ss:$28 sps:$4 sm:$0xff]   ;;  %v7687_v0 = vld [vmem:[#allocation14 + $0x3c4] ss:$28 sps:$4 sm:$0xff]  }
 0x3b6   :  { %v2754_v4 = vadd.f32 %v2753_v52, %v2711_v51  ;;  %v2713_v5 = vadd.f32 %v2712_v57, %v1125_v58  ;;  %5867 = vmatprep.subr.bf16.mxu1 %v7642_v33  ;;  %v2755_v8 = vpop.f32.mrf.mxu0  ;;  %v2781_v9 = vmul.f32 0.2, %v2752_v55  ;;  %vm2765_vm9 = vcmp.ge.f32.partialorder %v2752_v55, 0.0  ;;  %v7673_v58 = vld [vmem:[#allocation14 + $0x430] ss:$28 sps:$4 sm:$0xff]  }
 0x3b7   :  { %v2796_v20 = vsel %vm2764_vm10, %v2750_v3, %v2780_v13  ;;  %v7682_v63 = vld [vmem:[#allocation14 + $0x778] ss:$28 sps:$4 sm:$0xff]   ;;  %v7690_v42 = vld [vmem:[#allocation14 + $0x744] ss:$28 sps:$4 sm:$0xff]   ;;  %v7693_v33 = vld [vmem:[#allocation14 + $0x38c] ss:$28 sps:$4 sm:$0xff]  }
 0x3b8   :  { %v2788_v7 = vmul.f32 0.2, %v2754_v4  ;;  %vm2772_vm8 = vcmp.ge.f32.partialorder %v2754_v4, 0.0  ;;  %v2756_v11 = vadd.f32 %v2755_v8, %v2713_v5  ;;  %v2797_v18 = vsel %vm2765_vm9, %v2752_v55, %v2781_v9  ;;  %v7685_v1 = vld [vmem:[#allocation14 + $0x3c0] ss:$28 sps:$4 sm:$0xff]  }
 0x3b9   :  { %5868 = vmatpush2.bf16.msra.mxu1 %v7640_v24  ;;  %v7688_v2 = vld [vmem:[#allocation14 + $0x740] ss:$28 sps:$4 sm:$0xff]   ;;  %v7696_v51 = vld [vmem:[#allocation14 + $0x70c] ss:$28 sps:$4 sm:$0xff]   ;;  %v7699_v57 = vld [vmem:[#allocation14 + $0x6d4] ss:$28 sps:$4 sm:$0xff]  }
 0x3ba   :  { %vm2773_vm11 = vcmp.ge.f32.partialorder %v2756_v11, 0.0  ;;  %v2789_v15 = vmul.f32 0.2, %v2756_v11  ;;  %5869 = vmatprep.subr.bf16.mxu1 %v7648_v6  ;;  %v2804_v17 = vsel %vm2772_vm8, %v2754_v4, %v2788_v7  ;;  %v7691_v52 = vld [vmem:[#allocation14 + $0x388] ss:$28 sps:$4 sm:$0xff]  }
 0x3bb   :  { %v8517_v25 = vpack.c.bf16 %v2804_v17, %v2796_v20  ;;  %v7694_v55 = vld [vmem:[#allocation14 + $0x708] ss:$28 sps:$4 sm:$0xff]   ;;  %v7702_v3 = vld [vmem:[#allocation14 + $0xa54] ss:$28 sps:$4 sm:$0xff]   ;;  %v7705_v5 = vld [vmem:[#allocation14 + $0x69c] ss:$28 sps:$4 sm:$0xff]  }
 0x3bc   :  { %v2805_v19 = vsel %vm2773_vm11, %v2756_v11, %v2789_v15  ;;  %v7697_v4 = vld [vmem:[#allocation14 + $0x6d0] ss:$28 sps:$4 sm:$0xff]   ;;  %v7708_v6 = vld [vmem:[#allocation14 + $0xa1c] ss:$28 sps:$4 sm:$0xff]   ;;  %v7711_v9 = vld [vmem:[#allocation14 + $0x664] ss:$28 sps:$4 sm:$0xff]  }
 0x3bd   :  { %v8515_v21 = vpack.c.bf16 %v2805_v19, %v2797_v18  ;;  %5870 = vmatpush2.bf16.msra.mxu1 %v7646_v14  ;;  %v7700_v24 = vld [vmem:[#allocation14 + $0xa50] ss:$28 sps:$4 sm:$0xff]   ;;  %v7703_v7 = vld [vmem:[#allocation14 + $0x698] ss:$28 sps:$4 sm:$0xff]   ;;  %v7714_v11 = vld [vmem:[#allocation14 + $0x9e4] ss:$28 sps:$4 sm:$0xff]  }
 0x3be   :  { %5925 = vmatprep.subr.bf16.mxu1 %v7654_v16  ;;  %v7706_v8 = vld [vmem:[#allocation14 + $0xa18] ss:$28 sps:$4 sm:$0xff]   ;;  %v7709_v13 = vld [vmem:[#allocation14 + $0x660] ss:$28 sps:$4 sm:$0xff]   ;;  %v7717_v15 = vld [vmem:[#allocation14 + $0x62c] ss:$28 sps:$4 sm:$0xff]  }
 0x3bf   :  { %5828 = vmatprep.mubr.bf16.mxu0 %v8515_v21  ;;  %v7712_v14 = vld [vmem:[#allocation14 + $0x9e0] ss:$28 sps:$4 sm:$0xff]   ;;  %v7720_v16 = vld [vmem:[#allocation14 + $0x9ac] ss:$28 sps:$4 sm:$0xff]   ;;  %v7723_v19 = vld [vmem:[#allocation14 + $0x5f4] ss:$28 sps:$4 sm:$0xff]  }
 0x3c0   :  { %5872 = vmatmul.mubr.bf16.vlgmr.msra.gmra.mxu1 %v8481_v53  ;;  %5829 = vmatmul.mubr.bf16.vlgmr.msra.gmra.mxu0 %v8517_v25  ;;  %v7715_v17 = vld [vmem:[#allocation14 + $0x628] ss:$28 sps:$4 sm:$0xff]   ;;  %v7726_v20 = vld [vmem:[#allocation14 + $0x974] ss:$28 sps:$4 sm:$0xff]  }
 0x3c1   :  { %5883 = vmatpush1.bf16.msra.mxu0 %v7649_v22  ;;  %5926 = vmatpush1.bf16.msra.mxu1 %v7652_v23  ;;  %v7718_v18 = vld [vmem:[#allocation14 + $0x9a8] ss:$28 sps:$4 sm:$0xff]   ;;  %v7721_v22 = vld [vmem:[#allocation14 + $0x5f0] ss:$28 sps:$4 sm:$0xff]  }
 0x3c2   :  { %5957 = vmatprep.mubr.bf16.mxu1 %v8502_v10  ;;  %5914 = vmatprep.mubr.bf16.mxu0 %v8488_v44  ;;  %v7724_v23 = vld [vmem:[#allocation14 + $0x970] ss:$28 sps:$4 sm:$0xff]  }
 0x3c3   :  { %5884 = vmatprep.subr.bf16.mxu0 %v7657_v26  ;;  %5927 = vmatprep.subr.bf16.mxu1 %v7660_v34  ;;  %v7729_v26 = vld [vmem:[#allocation14 + $0x5bc] ss:$28 sps:$4 sm:$0xff]  }
 0x3c4   :  { %v7732_v34 = vld [vmem:[#allocation14 + $0x93c] ss:$28 sps:$4 sm:$0xff]  }
 0x3c5   :  { %5885 = vmatpush1.bf16.msra.mxu0 %v7655_v35  ;;  %5928 = vmatpush1.bf16.msra.mxu1 %v7658_v36  ;;  %v7727_v35 = vld [vmem:[#allocation14 + $0x5b8] ss:$28 sps:$4 sm:$0xff]  }
 0x3c6   :  { %5886 = vmatprep.subr.bf16.mxu0 %v7663_v38  ;;  %5929 = vmatprep.subr.bf16.mxu1 %v7666_v39  ;;  %v7730_v36 = vld [vmem:[#allocation14 + $0x938] ss:$28 sps:$4 sm:$0xff]   ;;  %v7735_v38 = vld [vmem:[#allocation14 + $0x584] ss:$28 sps:$4 sm:$0xff]  }
 0x3c7   :  { %v7738_v39 = vld [vmem:[#allocation14 + $0x904] ss:$28 sps:$4 sm:$0xff]  }
 0x3c9   :  { %5887 = vmatpush1.bf16.msra.mxu0 %v7661_v37  ;;  %5930 = vmatpush1.bf16.msra.mxu1 %v7664_v40  ;;  %v7733_v37 = vld [vmem:[#allocation14 + $0x580] ss:$28 sps:$4 sm:$0xff]  }
 0x3ca   :  { %5888 = vmatprep.subr.bf16.mxu0 %v7669_v45  ;;  %5931 = vmatprep.subr.bf16.mxu1 %v7672_v46  ;;  %v7736_v40 = vld [vmem:[#allocation14 + $0x900] ss:$28 sps:$4 sm:$0xff]   ;;  %v7741_v45 = vld [vmem:[#allocation14 + $0x54c] ss:$28 sps:$4 sm:$0xff]  }
 0x3cb   :  { %v7744_v46 = vld [vmem:[#allocation14 + $0x8cc] ss:$28 sps:$4 sm:$0xff]  }
 0x3cd   :  { %5889 = vmatpush1.bf16.msra.mxu0 %v7667_v48  ;;  %5932 = vmatpush1.bf16.msra.mxu1 %v7670_v49  ;;  %v7739_v48 = vld [vmem:[#allocation14 + $0x548] ss:$28 sps:$4 sm:$0xff]  }
 0x3ce   :  { %5890 = vmatprep.subr.bf16.mxu0 %v7675_v50  ;;  %5933 = vmatprep.subr.bf16.mxu1 %v7678_v54  ;;  %v7742_v49 = vld [vmem:[#allocation14 + $0x8c8] ss:$28 sps:$4 sm:$0xff]   ;;  %v7747_v50 = vld [vmem:[#allocation14 + $0xc14] ss:$28 sps:$4 sm:$0xff]   ;;  %v7750_v54 = vld [vmem:[#allocation14 + $0x19c] ss:$28 sps:$4 sm:$0xff]  }
 0x3d1   :  { %5891 = vmatpush1.bf16.msra.mxu0 %v7673_v58  ;;  %5934 = vmatpush1.bf16.msra.mxu1 %v7676_v41  ;;  %v7745_v58 = vld [vmem:[#allocation14 + $0xc10] ss:$28 sps:$4 sm:$0xff]   ;;  %v7748_v41 = vld [vmem:[#allocation14 + $0x198] ss:$28 sps:$4 sm:$0xff]  }
 0x3d2   :  { %5892 = vmatprep.subr.bf16.mxu0 %v7681_v59  ;;  %5935 = vmatprep.subr.bf16.mxu1 %v7684_v62  ;;  %v7753_v59 = vld [vmem:[#allocation14 + $0xbdc] ss:$28 sps:$4 sm:$0xff]   ;;  %v7756_v62 = vld [vmem:[#allocation14 + $0x164] ss:$28 sps:$4 sm:$0xff]  }
 0x3d5   :  { %5893 = vmatpush1.bf16.msra.mxu0 %v7679_v30  ;;  %5936 = vmatpush1.bf16.msra.mxu1 %v7682_v63  ;;  %v7751_v30 = vld [vmem:[#allocation14 + $0xbd8] ss:$28 sps:$4 sm:$0xff]   ;;  %v7754_v63 = vld [vmem:[#allocation14 + $0x160] ss:$28 sps:$4 sm:$0xff]  }
 0x3d6   :  { %5894 = vmatprep.subr.bf16.mxu0 %v7687_v0  ;;  %5937 = vmatprep.subr.bf16.mxu1 %v7690_v42  ;;  %v7759_v0 = vld [vmem:[#allocation14 + $0xba4] ss:$28 sps:$4 sm:$0xff]   ;;  %v7762_v42 = vld [vmem:[#allocation14 + $0x12c] ss:$28 sps:$4 sm:$0xff]  }
 0x3d9   :  { %5895 = vmatpush1.bf16.msra.mxu0 %v7685_v1  ;;  %5938 = vmatpush1.bf16.msra.mxu1 %v7688_v2  ;;  %v7757_v1 = vld [vmem:[#allocation14 + $0xba0] ss:$28 sps:$4 sm:$0xff]   ;;  %v7760_v2 = vld [vmem:[#allocation14 + $0x128] ss:$28 sps:$4 sm:$0xff]  }
 0x3da   :  { %5896 = vmatprep.subr.bf16.mxu0 %v7693_v33  ;;  %5939 = vmatprep.subr.bf16.mxu1 %v7696_v51  ;;  %v7765_v33 = vld [vmem:[#allocation14 + $0xb6c] ss:$28 sps:$4 sm:$0xff]   ;;  %v7768_v51 = vld [vmem:[#allocation14 + $0xf4] ss:$28 sps:$4 sm:$0xff]  }
 0x3dd   :  { %5897 = vmatpush1.bf16.msra.mxu0 %v7691_v52  ;;  %5940 = vmatpush1.bf16.msra.mxu1 %v7694_v55  ;;  %v7763_v52 = vld [vmem:[#allocation14 + $0xb68] ss:$28 sps:$4 sm:$0xff]   ;;  %v7766_v55 = vld [vmem:[#allocation14 + $0xf0] ss:$28 sps:$4 sm:$0xff]  }
 0x3de   :  { %5898 = vmatprep.subr.bf16.mxu0 %v7699_v57  ;;  %5941 = vmatprep.subr.bf16.mxu1 %v7702_v3  ;;  %v7771_v57 = vld [vmem:[#allocation14 + $0xb34] ss:$28 sps:$4 sm:$0xff]   ;;  %v7774_v3 = vld [vmem:[#allocation14 + $0xbc] ss:$28 sps:$4 sm:$0xff]  }
 0x3e1   :  { %5899 = vmatpush2.bf16.msra.mxu0 %v7697_v4  ;;  %5942 = vmatpush2.bf16.msra.mxu1 %v7700_v24  ;;  %v7769_v4 = vld [vmem:[#allocation14 + $0xb30] ss:$28 sps:$4 sm:$0xff]   ;;  %v7772_v24 = vld [vmem:[#allocation14 + $0xb8] ss:$28 sps:$4 sm:$0xff]  }
 0x3e2   :  { %5900 = vmatprep.subr.bf16.mxu0 %v7705_v5  ;;  %5943 = vmatprep.subr.bf16.mxu1 %v7708_v6  ;;  %v7777_v5 = vld [vmem:[#allocation14 + $0xafc] ss:$28 sps:$4 sm:$0xff]   ;;  %v7780_v6 = vld [vmem:[#allocation14 + $0x84] ss:$28 sps:$4 sm:$0xff]  }
 0x3e5   :  { %5901 = vmatpush2.bf16.msra.mxu0 %v7703_v7  ;;  %5944 = vmatpush2.bf16.msra.mxu1 %v7706_v8  ;;  %v7775_v7 = vld [vmem:[#allocation14 + $0xaf8] ss:$28 sps:$4 sm:$0xff]   ;;  %v7778_v8 = vld [vmem:[#allocation14 + $0x80] ss:$28 sps:$4 sm:$0xff]  }
 0x3e6   :  { %5902 = vmatprep.subr.bf16.mxu0 %v7711_v9  ;;  %5945 = vmatprep.subr.bf16.mxu1 %v7714_v11  ;;  %v7783_v9 = vld [vmem:[#allocation14 + $0xac4] ss:$28 sps:$4 sm:$0xff]   ;;  %v7786_v11 = vld [vmem:[#allocation14 + $0x4c] ss:$28 sps:$4 sm:$0xff]  }
 0x3e9   :  { %5903 = vmatpush2.bf16.msra.mxu0 %v7709_v13  ;;  %5946 = vmatpush2.bf16.msra.mxu1 %v7712_v14  ;;  %v7781_v13 = vld [vmem:[#allocation14 + $0xac0] ss:$28 sps:$4 sm:$0xff]   ;;  %v7784_v14 = vld [vmem:[#allocation14 + $0x48] ss:$28 sps:$4 sm:$0xff]  }
 0x3ea   :  { %5904 = vmatprep.subr.bf16.mxu0 %v7717_v15  ;;  %5947 = vmatprep.subr.bf16.mxu1 %v7720_v16  ;;  %v7789_v15 = vld [vmem:[#allocation14 + $0xa8c] ss:$28 sps:$4 sm:$0xff]   ;;  %v7792_v16 = vld [vmem:[#allocation14 + $0x14] ss:$28 sps:$4 sm:$0xff]  }
 0x3ed   :  { %5905 = vmatpush2.bf16.msra.mxu0 %v7715_v17  ;;  %5948 = vmatpush2.bf16.msra.mxu1 %v7718_v18  ;;  %v7787_v17 = vld [vmem:[#allocation14 + $0xa88] ss:$28 sps:$4 sm:$0xff]   ;;  %v7790_v18 = vld [vmem:[#allocation14 + $0x10] ss:$28 sps:$4 sm:$0xff]  }
 0x3ee   :  { %5906 = vmatprep.subr.bf16.mxu0 %v7723_v19  ;;  %5949 = vmatprep.subr.bf16.mxu1 %v7726_v20  ;;  %v7795_v19 = vld [vmem:[#allocation14 + $0xdd4] ss:$28 sps:$4 sm:$0xff]   ;;  %v7798_v20 = vld [vmem:[#allocation14 + $0x35c] ss:$28 sps:$4 sm:$0xff]  }
 0x3f1   :  { %5907 = vmatpush2.bf16.msra.mxu0 %v7721_v22  ;;  %5950 = vmatpush2.bf16.msra.mxu1 %v7724_v23  ;;  %v7793_v22 = vld [vmem:[#allocation14 + $0xdd0] ss:$28 sps:$4 sm:$0xff]   ;;  %v7796_v23 = vld [vmem:[#allocation14 + $0x358] ss:$28 sps:$4 sm:$0xff]  }
 0x3f2   :  { %5908 = vmatprep.subr.bf16.mxu0 %v7729_v26  ;;  %5951 = vmatprep.subr.bf16.mxu1 %v7732_v34  ;;  %v7801_v26 = vld [vmem:[#allocation14 + $0xd9c] ss:$28 sps:$4 sm:$0xff]   ;;  %v7804_v34 = vld [vmem:[#allocation14 + $0x324] ss:$28 sps:$4 sm:$0xff]  }
 0x3f5   :  { %5909 = vmatpush2.bf16.msra.mxu0 %v7727_v35  ;;  %5952 = vmatpush2.bf16.msra.mxu1 %v7730_v36  ;;  %v7799_v35 = vld [vmem:[#allocation14 + $0xd98] ss:$28 sps:$4 sm:$0xff]   ;;  %v7802_v36 = vld [vmem:[#allocation14 + $0x320] ss:$28 sps:$4 sm:$0xff]  }
 0x3f6   :  { %5910 = vmatprep.subr.bf16.mxu0 %v7735_v38  ;;  %5953 = vmatprep.subr.bf16.mxu1 %v7738_v39  ;;  %v7807_v38 = vld [vmem:[#allocation14 + $0xd64] ss:$28 sps:$4 sm:$0xff]   ;;  %v7810_v39 = vld [vmem:[#allocation14 + $0x2ec] ss:$28 sps:$4 sm:$0xff]  }
 0x3f9   :  { %5911 = vmatpush2.bf16.msra.mxu0 %v7733_v37  ;;  %5954 = vmatpush2.bf16.msra.mxu1 %v7736_v40  ;;  %v7805_v37 = vld [vmem:[#allocation14 + $0xd60] ss:$28 sps:$4 sm:$0xff]   ;;  %v7808_v40 = vld [vmem:[#allocation14 + $0x2e8] ss:$28 sps:$4 sm:$0xff]  }
 0x3fa   :  { %5912 = vmatprep.subr.bf16.mxu0 %v7741_v45  ;;  %5955 = vmatprep.subr.bf16.mxu1 %v7744_v46  ;;  %v7813_v45 = vld [vmem:[#allocation14 + $0xd2c] ss:$28 sps:$4 sm:$0xff]   ;;  %v7816_v46 = vld [vmem:[#allocation14 + $0x2b4] ss:$28 sps:$4 sm:$0xff]  }
 0x3fd   :  { %5913 = vmatpush2.bf16.msra.mxu0 %v7739_v48  ;;  %5956 = vmatpush2.bf16.msra.mxu1 %v7742_v49  ;;  %v7811_v48 = vld [vmem:[#allocation14 + $0xd28] ss:$28 sps:$4 sm:$0xff]   ;;  %v7814_v49 = vld [vmem:[#allocation14 + $0x2b0] ss:$28 sps:$4 sm:$0xff]  }
 0x3fe   :  { %5968 = vmatprep.subr.bf16.mxu0 %v7747_v50  ;;  %6011 = vmatprep.subr.bf16.mxu1 %v7750_v54  ;;  %v7819_v50 = vld [vmem:[#allocation14 + $0xcf4] ss:$28 sps:$4 sm:$0xff]   ;;  %v7822_v54 = vld [vmem:[#allocation14 + $0x27c] ss:$28 sps:$4 sm:$0xff]  }
 0x400   :  { %5915 = vmatmul.mubr.bf16.vlgmr.msra.gmra.mxu0 %v8490_v43  ;;  %5958 = vmatmul.mubr.bf16.vlgmr.msra.gmra.mxu1 %v8504_v12 }
 0x401   :  { %5969 = vmatpush1.bf16.msra.mxu0 %v7745_v58  ;;  %6000 = vmatprep.mubr.bf16.mxu0 %v8515_v21  ;;  %v7817_v58 = vld [vmem:[#allocation14 + $0xcf0] ss:$28 sps:$4 sm:$0xff]  }
 0x402   :  { %6012 = vmatpush1.bf16.msra.mxu1 %v7748_v41  ;;  %6043 = vmatprep.mubr.bf16.mxu1 %v8472_v56  ;;  %v7820_v41 = vld [vmem:[#allocation14 + $0x278] ss:$28 sps:$4 sm:$0xff]  }
 0x403   :  { %5970 = vmatprep.subr.bf16.mxu0 %v7753_v59  ;;  %6013 = vmatprep.subr.bf16.mxu1 %v7756_v62  ;;  %v7825_v59 = vld [vmem:[#allocation14 + $0xcbc] ss:$28 sps:$4 sm:$0xff]   ;;  %v7828_v62 = vld [vmem:[#allocation14 + $0x244] ss:$28 sps:$4 sm:$0xff]  }
 0x405   :  { %5971 = vmatpush1.bf16.msra.mxu0 %v7751_v30  ;;  %v7823_v30 = vld [vmem:[#allocation14 + $0xcb8] ss:$28 sps:$4 sm:$0xff]  }
 0x406   :  { %6014 = vmatpush1.bf16.msra.mxu1 %v7754_v63  ;;  %5972 = vmatprep.subr.bf16.mxu0 %v7759_v0  ;;  %v7826_v63 = vld [vmem:[#allocation14 + $0x240] ss:$28 sps:$4 sm:$0xff]  }
 0x407   :  { %6015 = vmatprep.subr.bf16.mxu1 %v7762_v42  ;;  %v7831_v0 = vld [vmem:[#allocation14 + $0xc84] ss:$28 sps:$4 sm:$0xff]   ;;  %v7834_v42 = vld [vmem:[#allocation14 + $0x20c] ss:$28 sps:$4 sm:$0xff]  }
 0x409   :  { %5973 = vmatpush1.bf16.msra.mxu0 %v7757_v1  ;;  %v7829_v1 = vld [vmem:[#allocation14 + $0xc80] ss:$28 sps:$4 sm:$0xff]  }
 0x40a   :  { %6016 = vmatpush1.bf16.msra.mxu1 %v7760_v2  ;;  %5974 = vmatprep.subr.bf16.mxu0 %v7765_v33  ;;  %v7832_v2 = vld [vmem:[#allocation14 + $0x208] ss:$28 sps:$4 sm:$0xff]  }
 0x40b   :  { %6017 = vmatprep.subr.bf16.mxu1 %v7768_v51  ;;  %v7837_v33 = vld [vmem:[#allocation14 + $0xc4c] ss:$28 sps:$4 sm:$0xff]   ;;  %v7840_v51 = vld [vmem:[#allocation14 + $0x1d4] ss:$28 sps:$4 sm:$0xff]  }
 0x40d   :  { %5975 = vmatpush1.bf16.msra.mxu0 %v7763_v52  ;;  %v7835_v52 = vld [vmem:[#allocation14 + $0xc48] ss:$28 sps:$4 sm:$0xff]  }
 0x40e   :  { %6018 = vmatpush1.bf16.msra.mxu1 %v7766_v55  ;;  %5976 = vmatprep.subr.bf16.mxu0 %v7771_v57  ;;  %v7838_v55 = vld [vmem:[#allocation14 + $0x1d0] ss:$28 sps:$4 sm:$0xff]   ;;  %v7843_v57 = vld [vmem:[#allocation14 + $0x51c] ss:$28 sps:$4 sm:$0xff]  }
 0x40f   :  { %6019 = vmatprep.subr.bf16.mxu1 %v7774_v3  ;;  %v7846_v3 = vld [vmem:[#allocation14 + $0x89c] ss:$28 sps:$4 sm:$0xff]  }
 0x411   :  { %5977 = vmatpush1.bf16.msra.mxu0 %v7769_v4  ;;  %v7841_v4 = vld [vmem:[#allocation14 + $0x518] ss:$28 sps:$4 sm:$0xff]  }
 0x412   :  { %6020 = vmatpush1.bf16.msra.mxu1 %v7772_v24  ;;  %5978 = vmatprep.subr.bf16.mxu0 %v7777_v5  ;;  %v7844_v24 = vld [vmem:[#allocation14 + $0x898] ss:$28 sps:$4 sm:$0xff]   ;;  %v7849_v5 = vld [vmem:[#allocation14 + $0x4e4] ss:$28 sps:$4 sm:$0xff]  }
 0x413   :  { %6021 = vmatprep.subr.bf16.mxu1 %v7780_v6  ;;  %v7852_v6 = vld [vmem:[#allocation14 + $0x864] ss:$28 sps:$4 sm:$0xff]  }
 0x415   :  { %5979 = vmatpush1.bf16.msra.mxu0 %v7775_v7  ;;  %v7847_v7 = vld [vmem:[#allocation14 + $0x4e0] ss:$28 sps:$4 sm:$0xff]  }
 0x416   :  { %6022 = vmatpush1.bf16.msra.mxu1 %v7778_v8  ;;  %5980 = vmatprep.subr.bf16.mxu0 %v7783_v9  ;;  %v7850_v8 = vld [vmem:[#allocation14 + $0x860] ss:$28 sps:$4 sm:$0xff]   ;;  %v7855_v9 = vld [vmem:[#allocation14 + $0x4ac] ss:$28 sps:$4 sm:$0xff]  }
 0x417   :  { %6023 = vmatprep.subr.bf16.mxu1 %v7786_v11  ;;  %v7858_v11 = vld [vmem:[#allocation14 + $0x82c] ss:$28 sps:$4 sm:$0xff]  }
 0x419   :  { %5981 = vmatpush1.bf16.msra.mxu0 %v7781_v13  ;;  %v7853_v13 = vld [vmem:[#allocation14 + $0x4a8] ss:$28 sps:$4 sm:$0xff]  }
 0x41a   :  { %6024 = vmatpush1.bf16.msra.mxu1 %v7784_v14  ;;  %5982 = vmatprep.subr.bf16.mxu0 %v7789_v15  ;;  %v7856_v14 = vld [vmem:[#allocation14 + $0x828] ss:$28 sps:$4 sm:$0xff]   ;;  %v7861_v15 = vld [vmem:[#allocation14 + $0x474] ss:$28 sps:$4 sm:$0xff]  }
 0x41b   :  { %6025 = vmatprep.subr.bf16.mxu1 %v7792_v16  ;;  %v7864_v16 = vld [vmem:[#allocation14 + $0x7f4] ss:$28 sps:$4 sm:$0xff]  }
 0x41d   :  { %5983 = vmatpush1.bf16.msra.mxu0 %v7787_v17  ;;  %v7859_v17 = vld [vmem:[#allocation14 + $0x470] ss:$28 sps:$4 sm:$0xff]  }
 0x41e   :  { %6026 = vmatpush1.bf16.msra.mxu1 %v7790_v18  ;;  %5984 = vmatprep.subr.bf16.mxu0 %v7795_v19  ;;  %v7862_v18 = vld [vmem:[#allocation14 + $0x7f0] ss:$28 sps:$4 sm:$0xff]   ;;  %v7867_v19 = vld [vmem:[#allocation14 + $0x43c] ss:$28 sps:$4 sm:$0xff]  }
 0x41f   :  { %6027 = vmatprep.subr.bf16.mxu1 %v7798_v20  ;;  %v7870_v20 = vld [vmem:[#allocation14 + $0x7bc] ss:$28 sps:$4 sm:$0xff]  }
 0x421   :  { %5985 = vmatpush2.bf16.msra.mxu0 %v7793_v22  ;;  %v7865_v22 = vld [vmem:[#allocation14 + $0x438] ss:$28 sps:$4 sm:$0xff]  }
 0x422   :  { %6028 = vmatpush2.bf16.msra.mxu1 %v7796_v23  ;;  %5986 = vmatprep.subr.bf16.mxu0 %v7801_v26  ;;  %v7868_v23 = vld [vmem:[#allocation14 + $0x7b8] ss:$28 sps:$4 sm:$0xff]   ;;  %v7873_v26 = vld [vmem:[#allocation14 + $0x404] ss:$28 sps:$4 sm:$0xff]  }
 0x423   :  { %6029 = vmatprep.subr.bf16.mxu1 %v7804_v34  ;;  %v7876_v34 = vld [vmem:[#allocation14 + $0x784] ss:$28 sps:$4 sm:$0xff]  }
 0x425   :  { %5987 = vmatpush2.bf16.msra.mxu0 %v7799_v35  ;;  %v7871_v35 = vld [vmem:[#allocation14 + $0x400] ss:$28 sps:$4 sm:$0xff]  }
 0x426   :  { %6030 = vmatpush2.bf16.msra.mxu1 %v7802_v36  ;;  %5988 = vmatprep.subr.bf16.mxu0 %v7807_v38  ;;  %v7874_v36 = vld [vmem:[#allocation14 + $0x780] ss:$28 sps:$4 sm:$0xff]   ;;  %v7879_v38 = vld [vmem:[#allocation14 + $0x3cc] ss:$28 sps:$4 sm:$0xff]  }
 0x427   :  { %6031 = vmatprep.subr.bf16.mxu1 %v7810_v39  ;;  %v7882_v39 = vld [vmem:[#allocation14 + $0x74c] ss:$28 sps:$4 sm:$0xff]  }
 0x429   :  { %5989 = vmatpush2.bf16.msra.mxu0 %v7805_v37  ;;  %v7877_v37 = vld [vmem:[#allocation14 + $0x3c8] ss:$28 sps:$4 sm:$0xff]  }
 0x42a   :  { %6032 = vmatpush2.bf16.msra.mxu1 %v7808_v40  ;;  %5990 = vmatprep.subr.bf16.mxu0 %v7813_v45  ;;  %v7880_v40 = vld [vmem:[#allocation14 + $0x748] ss:$28 sps:$4 sm:$0xff]   ;;  %v7885_v45 = vld [vmem:[#allocation14 + $0x394] ss:$28 sps:$4 sm:$0xff]  }
 0x42b   :  { %6033 = vmatprep.subr.bf16.mxu1 %v7816_v46  ;;  %v7888_v46 = vld [vmem:[#allocation14 + $0x714] ss:$28 sps:$4 sm:$0xff]  }
 0x42d   :  { %5991 = vmatpush2.bf16.msra.mxu0 %v7811_v48  ;;  %v7883_v48 = vld [vmem:[#allocation14 + $0x390] ss:$28 sps:$4 sm:$0xff]  }
 0x42e   :  { %6034 = vmatpush2.bf16.msra.mxu1 %v7814_v49  ;;  %5992 = vmatprep.subr.bf16.mxu0 %v7819_v50  ;;  %v7886_v49 = vld [vmem:[#allocation14 + $0x710] ss:$28 sps:$4 sm:$0xff]   ;;  %v7891_v50 = vld [vmem:[#allocation14 + $0x6dc] ss:$28 sps:$4 sm:$0xff]  }
 0x42f   :  { %6035 = vmatprep.subr.bf16.mxu1 %v7822_v54  ;;  %v7894_v54 = vld [vmem:[#allocation14 + $0xa5c] ss:$28 sps:$4 sm:$0xff]  }
 0x431   :  { %5993 = vmatpush2.bf16.msra.mxu0 %v7817_v58  ;;  %v7889_v58 = vld [vmem:[#allocation14 + $0x6d8] ss:$28 sps:$4 sm:$0xff]  }
 0x432   :  { %6036 = vmatpush2.bf16.msra.mxu1 %v7820_v41  ;;  %5994 = vmatprep.subr.bf16.mxu0 %v7825_v59  ;;  %v7892_v41 = vld [vmem:[#allocation14 + $0xa58] ss:$28 sps:$4 sm:$0xff]   ;;  %v7897_v59 = vld [vmem:[#allocation14 + $0x6a4] ss:$28 sps:$4 sm:$0xff]  }
 0x433   :  { %6037 = vmatprep.subr.bf16.mxu1 %v7828_v62  ;;  %v7900_v62 = vld [vmem:[#allocation14 + $0xa24] ss:$28 sps:$4 sm:$0xff]  }
 0x435   :  { %5995 = vmatpush2.bf16.msra.mxu0 %v7823_v30  ;;  %v7895_v30 = vld [vmem:[#allocation14 + $0x6a0] ss:$28 sps:$4 sm:$0xff]  }
 0x436   :  { %6038 = vmatpush2.bf16.msra.mxu1 %v7826_v63  ;;  %5996 = vmatprep.subr.bf16.mxu0 %v7831_v0  ;;  %v7898_v63 = vld [vmem:[#allocation14 + $0xa20] ss:$28 sps:$4 sm:$0xff]   ;;  %v7903_v0 = vld [vmem:[#allocation14 + $0x66c] ss:$28 sps:$4 sm:$0xff]  }
 0x437   :  { %6039 = vmatprep.subr.bf16.mxu1 %v7834_v42  ;;  %v7906_v42 = vld [vmem:[#allocation14 + $0x9ec] ss:$28 sps:$4 sm:$0xff]  }
 0x439   :  { %5997 = vmatpush2.bf16.msra.mxu0 %v7829_v1  ;;  %v7901_v1 = vld [vmem:[#allocation14 + $0x668] ss:$28 sps:$4 sm:$0xff]  }
 0x43a   :  { %6040 = vmatpush2.bf16.msra.mxu1 %v7832_v2  ;;  %5998 = vmatprep.subr.bf16.mxu0 %v7837_v33  ;;  %v7904_v2 = vld [vmem:[#allocation14 + $0x9e8] ss:$28 sps:$4 sm:$0xff]   ;;  %v7909_v33 = vld [vmem:[#allocation14 + $0x634] ss:$28 sps:$4 sm:$0xff]  }
 0x43b   :  { %6041 = vmatprep.subr.bf16.mxu1 %v7840_v51  ;;  %v7912_v51 = vld [vmem:[#allocation14 + $0x9b4] ss:$28 sps:$4 sm:$0xff]  }
 0x43d   :  { %5999 = vmatpush2.bf16.msra.mxu0 %v7835_v52  ;;  %v5701_v52 = vpop.f32.mrf.mxu1 }
 0x43e   :  { %6042 = vmatpush2.bf16.msra.mxu1 %v7838_v55  ;;  %6054 = vmatprep.subr.bf16.mxu0 %v7843_v57  ;;  %v7907_v55 = vld [vmem:[#allocation14 + $0x630] ss:$28 sps:$4 sm:$0xff]  }
 0x43f   :  { %6097 = vmatprep.subr.bf16.mxu1 %v7846_v3  ;;  %v7910_v57 = vld [vmem:[#allocation14 + $0x9b0] ss:$28 sps:$4 sm:$0xff]   ;;  %v7915_v3 = vld [vmem:[#allocation14 + $0x5fc] ss:$28 sps:$4 sm:$0xff]  }
 0x440   :  { %6001 = vmatmul.mubr.bf16.vlgmr.msra.gmra.mxu0 %v8517_v25 }
 0x441   :  { %6044 = vmatmul.mubr.bf16.vlgmr.msra.gmra.mxu1 %v8481_v53  ;;  %6055 = vmatpush1.bf16.msra.mxu0 %v7841_v4  ;;  %v7918_v4 = vld [vmem:[#allocation14 + $0x97c] ss:$28 sps:$4 sm:$0xff]  }
 0x442   :  { %6086 = vmatprep.mubr.bf16.mxu0 %v8488_v44  ;;  %6098 = vmatpush1.bf16.msra.mxu1 %v7844_v24  ;;  %v5703_v24 = vpop.f32.mrf.mxu1 }
 0x443   :  { %6129 = vmatprep.mubr.bf16.mxu1 %v8502_v10  ;;  %6056 = vmatprep.subr.bf16.mxu0 %v7849_v5  ;;  %v7913_v5 = vld [vmem:[#allocation14 + $0x5f8] ss:$28 sps:$4 sm:$0xff]  }
 0x444   :  { %6099 = vmatprep.subr.bf16.mxu1 %v7852_v6  ;;  %v7916_v6 = vld [vmem:[#allocation14 + $0x978] ss:$28 sps:$4 sm:$0xff]  }
 0x445   :  { %6057 = vmatpush1.bf16.msra.mxu0 %v7847_v7  ;;  %v7921_v7 = vld [vmem:[#allocation14 + $0x5c4] ss:$28 sps:$4 sm:$0xff]  }
 0x446   :  { %6100 = vmatpush1.bf16.msra.mxu1 %v7850_v8  ;;  %6058 = vmatprep.subr.bf16.mxu0 %v7855_v9  ;;  %v7924_v8 = vld [vmem:[#allocation14 + $0x944] ss:$28 sps:$4 sm:$0xff]   ;;  %v5705_v9 = vpop.f32.mrf.mxu1 }
 0x447   :  { %6101 = vmatprep.subr.bf16.mxu1 %v7858_v11  ;;  %v7919_v11 = vld [vmem:[#allocation14 + $0x5c0] ss:$28 sps:$4 sm:$0xff]  }
 0x449   :  { %6059 = vmatpush1.bf16.msra.mxu0 %v7853_v13  ;;  %v5744_v13 = vpop.f32.mrf.mxu0 }
 0x44a   :  { %6102 = vmatpush1.bf16.msra.mxu1 %v7856_v14  ;;  %6060 = vmatprep.subr.bf16.mxu0 %v7861_v15  ;;  %v7922_v14 = vld [vmem:[#allocation14 + $0x940] ss:$28 sps:$4 sm:$0xff]   ;;  %v7927_v15 = vld [vmem:[#allocation14 + $0x58c] ss:$28 sps:$4 sm:$0xff]  }
 0x44b   :  { %6103 = vmatprep.subr.bf16.mxu1 %v7864_v16  ;;  %v7930_v16 = vld [vmem:[#allocation14 + $0x90c] ss:$28 sps:$4 sm:$0xff]  }
 0x44d   :  { %6061 = vmatpush1.bf16.msra.mxu0 %v7859_v17  ;;  %v8532_v17 = vld [vmem:[#allocation16] sm:$0xff] }
 0x44e   :  { %6104 = vmatpush1.bf16.msra.mxu1 %v7862_v18  ;;  %6062 = vmatprep.subr.bf16.mxu0 %v7867_v19  ;;  %v5707_v18 = vpop.f32.mrf.mxu1  ;;  %v7925_v19 = vld [vmem:[#allocation14 + $0x588] ss:$28 sps:$4 sm:$0xff]  }
 0x44f   :  { %6105 = vmatprep.subr.bf16.mxu1 %v7870_v20  ;;  %v5746_v20 = vpop.f32.mrf.mxu0 }
 0x451   :  { %6063 = vmatpush1.bf16.msra.mxu0 %v7865_v22  ;;  %v5787_v22 = vpop.f32.mrf.mxu1 }
 0x452   :  { %6106 = vmatpush1.bf16.msra.mxu1 %v7868_v23  ;;  %6064 = vmatprep.subr.bf16.mxu0 %v7873_v26  ;;  %v7928_v23 = vld [vmem:[#allocation14 + $0x908] ss:$28 sps:$4 sm:$0xff]   ;;  %v7933_v26 = vld [vmem:[#allocation14 + $0x554] ss:$28 sps:$4 sm:$0xff]  }
 0x453   :  { %6107 = vmatprep.subr.bf16.mxu1 %v7876_v34  ;;  %v3331_v34 = vrot.slane %v8532_v17, %v8396_v31  ;;  %v7937_v31 = vld [vmem:[#allocation14 + $0xc18] ss:$28 sps:$4 sm:$0xff]  }
 0x455   :  { %6065 = vmatpush1.bf16.msra.mxu0 %v7871_v35  ;;  %v7936_v35 = vld [vmem:[#allocation14 + $0x8d4] ss:$28 sps:$4 sm:$0xff]  }
 0x456   :  { %6108 = vmatpush1.bf16.msra.mxu1 %v7874_v36  ;;  %6066 = vmatprep.subr.bf16.mxu0 %v7879_v38  ;;  %v3335_v36 = vrot.slane %v8532_v17, %v8399_v32  ;;  %v7931_v38 = vld [vmem:[#allocation14 + $0x550] ss:$28 sps:$4 sm:$0xff]   ;;  %v7941_v32 = vld [vmem:[#allocation14 + $0x1a0] ss:$28 sps:$4 sm:$0xff]  }
 0x457   :  { %6109 = vmatprep.subr.bf16.mxu1 %v7882_v39  ;;  %v5748_v39 = vpop.f32.mrf.mxu0 }
 0x459   :  { %6067 = vmatpush1.bf16.msra.mxu0 %v7877_v37  ;;  %v5789_v37 = vpop.f32.mrf.mxu1 }
 0x45a   :  { %6110 = vmatpush1.bf16.msra.mxu1 %v7880_v40  ;;  %6068 = vmatprep.subr.bf16.mxu0 %v7885_v45  ;;  %v7934_v40 = vld [vmem:[#allocation14 + $0x8d0] ss:$28 sps:$4 sm:$0xff]   ;;  %v7939_v45 = vld [vmem:[#allocation14 + $0xc1c] ss:$28 sps:$4 sm:$0xff]  }
 0x45b   :  { %6111 = vmatprep.subr.bf16.mxu1 %v7888_v46  ;;  %v5702_v46 = vadd.f32 %v5701_v52, %v3331_v34 }
 0x45d   :  { %6069 = vmatpush1.bf16.msra.mxu0 %v7883_v48  ;;  %v7940_v48 = vld [vmem:[#allocation14 + $0x360] ss:$28 sps:$4 sm:$0xff]  }
 0x45e   :  { %6112 = vmatpush1.bf16.msra.mxu1 %v7886_v49  ;;  %6070 = vmatprep.subr.bf16.mxu0 %v7891_v50  ;;  %v5704_v49 = vadd.f32 %v5703_v24, %v3335_v36  ;;  %v5745_v50 = vadd.f32 %v5744_v13, %v5702_v46 }
 0x45f   :  { %6113 = vmatprep.subr.bf16.mxu1 %v7894_v54  ;;  %v5750_v54 = vpop.f32.mrf.mxu0 }
 0x461   :  { %6071 = vmatpush2.bf16.msra.mxu0 %v7889_v58  ;;  %v5791_v58 = vpop.f32.mrf.mxu1 }
 0x462   :  { %6114 = vmatpush2.bf16.msra.mxu1 %v7892_v41  ;;  %6072 = vmatprep.subr.bf16.mxu0 %v7897_v59  ;;  %v5706_v41 = vadd.f32 %v5705_v9, %v3331_v34  ;;  %v5747_v59 = vadd.f32 %v5746_v20, %v5704_v49  ;;  %v7959_v20 = vld [vmem:[#allocation14 + $0xb3c] ss:$28 sps:$4 sm:$0xff]   ;;  %v7964_v34 = vld [vmem:[#allocation14 + $0xb04] ss:$28 sps:$4 sm:$0xff]  }
 0x463   :  { %6115 = vmatprep.subr.bf16.mxu1 %v7900_v62  ;;  %v5788_v62 = vadd.f32 %v5787_v22, %v5745_v50  ;;  %v5793_v52 = vpop.f32.mrf.mxu1  ;;  %v7960_v22 = vld [vmem:[#allocation14 + $0x280] ss:$28 sps:$4 sm:$0xff]   ;;  %v7971_v50 = vld [vmem:[#allocation14 + $0x50] ss:$28 sps:$4 sm:$0xff]  }
 0x465   :  { %6073 = vmatpush2.bf16.msra.mxu0 %v7895_v30  ;;  %v7944_v30 = vld [vmem:[#allocation14 + $0xbe4] ss:$28 sps:$4 sm:$0xff]  }
 0x466   :  { %6116 = vmatpush2.bf16.msra.mxu1 %v7898_v63  ;;  %6074 = vmatprep.subr.bf16.mxu0 %v7903_v0  ;;  %v5708_v63 = vadd.f32 %v5707_v18, %v3335_v36  ;;  %v7955_v18 = vld [vmem:[#allocation14 + $0x2b8] ss:$28 sps:$4 sm:$0xff]  }
 0x467   :  { %6117 = vmatprep.subr.bf16.mxu1 %v7906_v42  ;;  %v7945_v42 = vld [vmem:[#allocation14 + $0x328] ss:$28 sps:$4 sm:$0xff]  }
 0x469   :  { %6075 = vmatpush2.bf16.msra.mxu0 %v7901_v1  ;;  %v5749_v1 = vadd.f32 %v5748_v39, %v5706_v41  ;;  %v7979_v41 = vld [vmem:[#allocation14 + $0xddc] ss:$28 sps:$4 sm:$0xff]  }
 0x46a   :  { %6118 = vmatpush2.bf16.msra.mxu1 %v7904_v2  ;;  %6076 = vmatprep.subr.bf16.mxu0 %v7909_v33  ;;  %v5790_v2 = vadd.f32 %v5789_v37, %v5747_v59  ;;  %v7966_v37 = vld [vmem:[#allocation14 + $0x88] ss:$28 sps:$4 sm:$0xff]   ;;  %v7980_v59 = vld [vmem:[#allocation14 + $0xa60] ss:$28 sps:$4 sm:$0xff]  }
 0x46b   :  { %6119 = vmatprep.subr.bf16.mxu1 %v7912_v51  ;;  %v7942_v51 = vld [vmem:[#allocation14 + $0xbe0] ss:$28 sps:$4 sm:$0xff]   ;;  %v5792_v24 = vadd.f32 %v5791_v58, %v5749_v1  ;;  %v7972_v58 = vld [vmem:[#allocation14 + $0xa90] ss:$28 sps:$4 sm:$0xff]   ;;  %v7986_v1 = vld [vmem:[#allocation14 + $0x868] ss:$28 sps:$4 sm:$0xff]  }
 0x46d   :  { %6077 = vmatpush2.bf16.msra.mxu0 %v7907_v55 }
 0x46e   :  { %6120 = vmatpush2.bf16.msra.mxu1 %v7910_v57  ;;  %6078 = vmatprep.subr.bf16.mxu0 %v7915_v3  ;;  %v7946_v57 = vld [vmem:[#allocation14 + $0x168] ss:$28 sps:$4 sm:$0xff]  }
 0x46f   :  { %6121 = vmatprep.subr.bf16.mxu1 %v7918_v4  ;;  %v7949_v3 = vld [vmem:[#allocation14 + $0xbac] ss:$28 sps:$4 sm:$0xff]   ;;  %v5751_v4 = vadd.f32 %v5750_v54, %v5708_v63  ;;  %v7975_v54 = vld [vmem:[#allocation14 + $0x1d8] ss:$28 sps:$4 sm:$0xff]   ;;  %v7984_v63 = vld [vmem:[#allocation14 + $0xda4] ss:$28 sps:$4 sm:$0xff]  }
 0x471   :  { %6079 = vmatpush2.bf16.msra.mxu0 %v7913_v5 }
 0x472   :  { %6122 = vmatpush2.bf16.msra.mxu1 %v7916_v6  ;;  %6080 = vmatprep.subr.bf16.mxu0 %v7921_v7  ;;  %v7950_v6 = vld [vmem:[#allocation14 + $0x2f0] ss:$28 sps:$4 sm:$0xff]  }
 0x473   :  { %6123 = vmatprep.subr.bf16.mxu1 %v7924_v8  ;;  %v5794_v8 = vadd.f32 %v5793_v52, %v5751_v4  ;;  %v7991_v52 = vld [vmem:[#allocation14 + $0x830] ss:$28 sps:$4 sm:$0xff]   ;;  %v7999_v4 = vld [vmem:[#allocation14 + $0xcfc] ss:$28 sps:$4 sm:$0xff]  }
 0x475   :  { %6081 = vmatpush2.bf16.msra.mxu0 %v7919_v11  ;;  %v7947_v11 = vld [vmem:[#allocation14 + $0xba8] ss:$28 sps:$4 sm:$0xff]  }
 0x476   :  { %6124 = vmatpush2.bf16.msra.mxu1 %v7922_v14  ;;  %6082 = vmatprep.subr.bf16.mxu0 %v7927_v15  ;;  %v7951_v14 = vld [vmem:[#allocation14 + $0x130] ss:$28 sps:$4 sm:$0xff]  }
 0x477   :  { %6125 = vmatprep.subr.bf16.mxu1 %v7930_v16  ;;  %v7954_v15 = vld [vmem:[#allocation14 + $0xb74] ss:$28 sps:$4 sm:$0xff]  }
 0x479   :  { %6083 = vmatpush2.bf16.msra.mxu0 %v7925_v19  ;;  %v7956_v19 = vld [vmem:[#allocation14 + $0xf8] ss:$28 sps:$4 sm:$0xff]  }
 0x47a   :  { %6126 = vmatpush2.bf16.msra.mxu1 %v7928_v23  ;;  %6084 = vmatprep.subr.bf16.mxu0 %v7933_v26  ;;  %v7957_v23 = vld [vmem:[#allocation14 + $0xb38] ss:$28 sps:$4 sm:$0xff]   ;;  %v7961_v26 = vld [vmem:[#allocation14 + $0xc0] ss:$28 sps:$4 sm:$0xff]  }
 0x47b   :  { %6127 = vmatprep.subr.bf16.mxu1 %v7936_v35  ;;  %v7965_v35 = vld [vmem:[#allocation14 + $0x248] ss:$28 sps:$4 sm:$0xff]  }
 0x47d   :  { %6085 = vmatpush2.bf16.msra.mxu0 %v7931_v38  ;;  %v7962_v38 = vld [vmem:[#allocation14 + $0xb00] ss:$28 sps:$4 sm:$0xff]  }
 0x47e   :  { %6128 = vmatpush2.bf16.msra.mxu1 %v7934_v40  ;;  %6140 = vmatprep.subr.bf16.mxu0 %v7939_v45  ;;  %v7969_v40 = vld [vmem:[#allocation14 + $0xacc] ss:$28 sps:$4 sm:$0xff]  }
 0x47f   :  { %7180 = vmatprep.subr.bf16.mxu1 %v7940_v48  ;;  %v7970_v45 = vld [vmem:[#allocation14 + $0x210] ss:$28 sps:$4 sm:$0xff]   ;;  %v7967_v48 = vld [vmem:[#allocation14 + $0xac8] ss:$28 sps:$4 sm:$0xff]  }
 0x480   :  { %6087 = vmatmul.mubr.bf16.vlgmr.msra.gmra.mxu0 %v8490_v43  ;;  %v5830_v0 = vpop.f32.mrf.mxu0 }
 0x481   :  { %6130 = vmatmul.mubr.bf16.vlgmr.msra.gmra.mxu1 %v8504_v12  ;;  %v5831_v33 = vadd.f32 %v5830_v0, %v5788_v62  ;;  %6141 = vmatpush1.bf16.msra.mxu0 %v7937_v31  ;;  %v7974_v31 = vld [vmem:[#allocation14 + $0xa94] ss:$28 sps:$4 sm:$0xff]   ;;  %v7985_v0 = vld [vmem:[#allocation14 + $0xa28] ss:$28 sps:$4 sm:$0xff]  }
 0x482   :  { %6172 = vmatprep.mubr.bf16.mxu0 %v8515_v21  ;;  %7181 = vmatpush3.bf16.msra.mxu1 %v7941_v32  ;;  %v5832_v55 = vpop.f32.mrf.mxu0  ;;  %v7976_v32 = vld [vmem:[#allocation14 + $0x18] ss:$28 sps:$4 sm:$0xff]  }
 0x483   :  { %8049 = vtanh.f32 %v5831_v33  ;;  %6215 = vmatprep.mubr.bf16.mxu1 %v8472_v56  ;;  %v5833_v5 = vadd.f32 %v5832_v55, %v5790_v2  ;;  %6142 = vmatprep.subr.bf16.mxu0 %v7944_v30  ;;  %v7952_v56 = vld [vmem:[#allocation14 + $0xb70] ss:$28 sps:$4 sm:$0xff]   ;;  %v7977_v62 = vld [vmem:[#allocation14 + $0xdd8] ss:$28 sps:$4 sm:$0xff]   ;;  %v7981_v30 = vld [vmem:[#allocation14 + $0x8a0] ss:$28 sps:$4 sm:$0xff]  }
 0x484   :  { %7182 = vmatprep.subr.bf16.mxu1 %v7945_v42  ;;  %v5834_v7 = vpop.f32.mrf.mxu0  ;;  %v7982_v42 = vld [vmem:[#allocation14 + $0xda0] ss:$28 sps:$4 sm:$0xff]   ;;  %v7989_v2 = vld [vmem:[#allocation14 + $0xd6c] ss:$28 sps:$4 sm:$0xff]   ;;  %v7994_v55 = vld [vmem:[#allocation14 + $0xd34] ss:$28 sps:$4 sm:$0xff]  }
 0x485   :  { %8051 = vtanh.f32 %v5833_v5  ;;  %v5835_v9 = vadd.f32 %v5834_v7, %v5792_v24  ;;  %6143 = vmatpush1.bf16.msra.mxu0 %v7942_v51  ;;  %v7990_v33 = vld [vmem:[#allocation14 + $0x9f0] ss:$28 sps:$4 sm:$0xff]   ;;  %v7987_v51 = vld [vmem:[#allocation14 + $0xd68] ss:$28 sps:$4 sm:$0xff]   ;;  %v7997_v24 = vld [vmem:[#allocation14 + $0xcf8] ss:$28 sps:$4 sm:$0xff]  }
 0x486   :  { %7183 = vmatpush3.bf16.msra.mxu1 %v7946_v57  ;;  %v5836_v13 = vpop.f32.mrf.mxu0  ;;  %6144 = vmatprep.subr.bf16.mxu0 %v7949_v3  ;;  %v7995_v57 = vld [vmem:[#allocation14 + $0x9b8] ss:$28 sps:$4 sm:$0xff]   ;;  %v8001_v5 = vld [vmem:[#allocation14 + $0x7c0] ss:$28 sps:$4 sm:$0xff]   ;;  %v8005_v7 = vld [vmem:[#allocation14 + $0x948] ss:$28 sps:$4 sm:$0xff]  }
 0x487   :  { %8053 = vtanh.f32 %v5835_v9  ;;  %v5837_v16 = vadd.f32 %v5836_v13, %v5794_v8  ;;  %7184 = vmatprep.subr.bf16.mxu1 %v7950_v6  ;;  %v7996_v3 = vld [vmem:[#allocation14 + $0x7f8] ss:$28 sps:$4 sm:$0xff]   ;;  %v8004_v6 = vld [vmem:[#allocation14 + $0xcc4] ss:$28 sps:$4 sm:$0xff]   ;;  %v8010_v13 = vld [vmem:[#allocation14 + $0x910] ss:$28 sps:$4 sm:$0xff]  }
 0x488   :  { %v8002_v8 = vld [vmem:[#allocation14 + $0xcc0] ss:$28 sps:$4 sm:$0xff]   ;;  %v8006_v9 = vld [vmem:[#allocation14 + $0x788] ss:$28 sps:$4 sm:$0xff]  }
 0x489   :  { %8055 = vtanh.f32 %v5837_v16  ;;  %6145 = vmatpush1.bf16.msra.mxu0 %v7947_v11  ;;  %v8009_v11 = vld [vmem:[#allocation14 + $0xc8c] ss:$28 sps:$4 sm:$0xff]   ;;  %v8014_v16 = vld [vmem:[#allocation14 + $0xc54] ss:$28 sps:$4 sm:$0xff]  }
 0x48a   :  { %7185 = vmatpush3.bf16.msra.mxu1 %v7951_v14  ;;  %6146 = vmatprep.subr.bf16.mxu0 %v7954_v15  ;;  %v8007_v14 = vld [vmem:[#allocation14 + $0xc88] ss:$28 sps:$4 sm:$0xff]   ;;  %v8011_v15 = vld [vmem:[#allocation14 + $0x750] ss:$28 sps:$4 sm:$0xff]  }
 0x48b   :  { %7186 = vmatprep.subr.bf16.mxu1 %v7955_v18  ;;  %v8015_v18 = vld [vmem:[#allocation14 + $0x8d8] ss:$28 sps:$4 sm:$0xff]  }
 0x48d   :  { %6147 = vmatpush1.bf16.msra.mxu0 %v7952_v56  ;;  %v8012_v56 = vld [vmem:[#allocation14 + $0xc50] ss:$28 sps:$4 sm:$0xff]  }
 0x48e   :  { %7187 = vmatpush3.bf16.msra.mxu1 %v7956_v19  ;;  %6148 = vmatprep.subr.bf16.mxu0 %v7959_v20  ;;  %v8016_v19 = vld [vmem:[#allocation14 + $0x718] ss:$28 sps:$4 sm:$0xff]   ;;  %v8017_v20 = vld [vmem:[#allocation14 + $0x6e0] ss:$28 sps:$4 sm:$0xff]  }
 0x48f   :  { %7188 = vmatprep.subr.bf16.mxu1 %v7960_v22  ;;  %v8018_v22 = vld [vmem:[#allocation14 + $0x520] ss:$28 sps:$4 sm:$0xff]  }
 0x490   :  { %v8050_v36 = vpop.eup %8049 }
 0x491   :  { %6361 = vst [vmem:[#allocation17] sm:$0xff] %v8050_v36  ;;  %6149 = vmatpush1.bf16.msra.mxu0 %v7957_v23  ;;  %v8019_v23 = vld [vmem:[#allocation14 + $0x6a8] ss:$28 sps:$4 sm:$0xff]   ;;  %v8023_v36 = vld [vmem:[#allocation14 + $0x638] ss:$28 sps:$4 sm:$0xff]  }
 0x492   :  { %v8052_v39 = vpop.eup %8051  ;;  %7189 = vmatpush3.bf16.msra.mxu1 %v7961_v26  ;;  %6150 = vmatprep.subr.bf16.mxu0 %v7964_v34  ;;  %v8020_v26 = vld [vmem:[#allocation14 + $0x4e8] ss:$28 sps:$4 sm:$0xff]   ;;  %v8021_v34 = vld [vmem:[#allocation14 + $0x670] ss:$28 sps:$4 sm:$0xff]  }
 0x493   :  { %6362 = vst [vmem:[#allocation17 + $0x8] sm:$0xff] %v8052_v39  ;;  %7190 = vmatprep.subr.bf16.mxu1 %v7965_v35  ;;  %v8022_v35 = vld [vmem:[#allocation14 + $0x4b0] ss:$28 sps:$4 sm:$0xff]   ;;  %v8025_v39 = vld [vmem:[#allocation14 + $0x600] ss:$28 sps:$4 sm:$0xff]  }
 0x494   :  { %v8054_v46 = vpop.eup %8053 }
 0x495   :  { %6368 = vst [vmem:[#allocation17 + $0x38] sm:$0xff] %v8054_v46  ;;  %6151 = vmatpush1.bf16.msra.mxu0 %v7962_v38  ;;  %v8024_v38 = vld [vmem:[#allocation14 + $0x478] ss:$28 sps:$4 sm:$0xff]  }
 0x496   :  { %v8056_v49 = vpop.eup %8055  ;;  %7191 = vmatpush3.bf16.msra.mxu1 %v7966_v37  ;;  %6152 = vmatprep.subr.bf16.mxu0 %v7969_v40  ;;  %v8026_v37 = vld [vmem:[#allocation14 + $0x440] ss:$28 sps:$4 sm:$0xff]   ;;  %v8027_v40 = vld [vmem:[#allocation14 + $0x5c8] ss:$28 sps:$4 sm:$0xff]   ;;  %v8031_v46 = vld [vmem:[#allocation14 + $0x558] ss:$28 sps:$4 sm:$0xff]  }
 0x497   :  { %6369 = vst [vmem:[#allocation17 + $0x40] sm:$0xff] %v8056_v49  ;;  %7192 = vmatprep.subr.bf16.mxu1 %v7970_v45  ;;  %v8029_v45 = vld [vmem:[#allocation14 + $0x590] ss:$28 sps:$4 sm:$0xff]   ;;  %v8033_v49 = vld [vmem:[#allocation14 + $0xde0] ss:$28 sps:$4 sm:$0xff]  }
 0x499   :  { %6153 = vmatpush1.bf16.msra.mxu0 %v7967_v48  ;;  %v8032_v48 = vld [vmem:[#allocation14 + $0x398] ss:$28 sps:$4 sm:$0xff]  }
 0x49a   :  { %7193 = vmatpush3.bf16.msra.mxu1 %v7971_v50  ;;  %6154 = vmatprep.subr.bf16.mxu0 %v7974_v31  ;;  %v8034_v50 = vld [vmem:[#allocation14 + $0xc20] ss:$28 sps:$4 sm:$0xff]   ;;  %v8035_v31 = vld [vmem:[#allocation14 + $0xda8] ss:$28 sps:$4 sm:$0xff]  }
 0x49b   :  { %7194 = vmatprep.subr.bf16.mxu1 %v7975_v54  ;;  %v8036_v54 = vld [vmem:[#allocation14 + $0xbe8] ss:$28 sps:$4 sm:$0xff]  }
 0x49d   :  { %6155 = vmatpush1.bf16.msra.mxu0 %v7972_v58  ;;  %v8037_v58 = vld [vmem:[#allocation14 + $0xd70] ss:$28 sps:$4 sm:$0xff]  }
 0x49e   :  { %7195 = vmatpush3.bf16.msra.mxu1 %v7976_v32  ;;  %6156 = vmatprep.subr.bf16.mxu0 %v7979_v41  ;;  %v8038_v32 = vld [vmem:[#allocation14 + $0xbb0] ss:$28 sps:$4 sm:$0xff]   ;;  %v8039_v41 = vld [vmem:[#allocation14 + $0xd38] ss:$28 sps:$4 sm:$0xff]  }
 0x49f   :  { %7224 = vmatprep.subr.bf16.mxu1 %v7980_v59  ;;  %v8040_v59 = vld [vmem:[#allocation14 + $0xb78] ss:$28 sps:$4 sm:$0xff]  }
 0x4a1   :  { %6216 = vmatmul.mubr.bf16.vlgmr.msra.gmra.mxu1 %v8481_v53  ;;  %6157 = vmatpush2.bf16.msra.mxu0 %v7977_v62  ;;  %v7992_v53 = vld [vmem:[#allocation14 + $0xd30] ss:$28 sps:$4 sm:$0xff]   ;;  %v5873_v62 = vpop.f32.mrf.mxu1 }
 0x4a2   :  { %7225 = vmatpush3.bf16.msra.mxu1 %v7981_v30  ;;  %6297 = vmatprep.mubr.bf16.mxu1 %v8502_v10  ;;  %v8000_v10 = vld [vmem:[#allocation14 + $0x980] ss:$28 sps:$4 sm:$0xff]  }
 0x4a3   :  { %6158 = vmatprep.subr.bf16.mxu0 %v7984_v63  ;;  %7226 = vmatprep.subr.bf16.mxu1 %v7985_v0  ;;  %v8041_v30 = vld [vmem:[#allocation14 + $0xd00] ss:$28 sps:$4 sm:$0xff]   ;;  %v5875_v0 = vpop.f32.mrf.mxu1 }
 0x4a4   :  { %v8042_v63 = vld [vmem:[#allocation14 + $0xb40] ss:$28 sps:$4 sm:$0xff]  }
 0x4a5   :  { %6159 = vmatpush2.bf16.msra.mxu0 %v7982_v42  ;;  %v8044_v42 = vld [vmem:[#allocation14 + $0xb08] ss:$28 sps:$4 sm:$0xff]  }
 0x4a6   :  { %7227 = vmatpush3.bf16.msra.mxu1 %v7986_v1  ;;  %6160 = vmatprep.subr.bf16.mxu0 %v7989_v2  ;;  %v8045_v2 = vld [vmem:[#allocation14 + $0xc90] ss:$28 sps:$4 sm:$0xff]  }
 0x4a7   :  { %7228 = vmatprep.subr.bf16.mxu1 %v7990_v33  ;;  %v3339_v33 = vrot.slane %v8532_v17, %v8423_v61 }
 0x4a9   :  { %6161 = vmatpush2.bf16.msra.mxu0 %v7987_v51  ;;  %v8046_v51 = vld [vmem:[#allocation14 + $0xad0] ss:$28 sps:$4 sm:$0xff]  }
 0x4aa   :  { %7229 = vmatpush3.bf16.msra.mxu1 %v7991_v52  ;;  %6162 = vmatprep.subr.bf16.mxu0 %v7994_v55 }
 0x4ab   :  { %7230 = vmatprep.subr.bf16.mxu1 %v7995_v57  ;;  %v8047_v57 = vld [vmem:[#allocation14 + $0xc58] ss:$28 sps:$4 sm:$0xff]  }
 0x4ad   :  { %6163 = vmatpush2.bf16.msra.mxu0 %v7992_v53  ;;  %v3343_v53 = vrot.slane %v8532_v17, %v8420_v60 }
 0x4ae   :  { %7231 = vmatpush3.bf16.msra.mxu1 %v7996_v3  ;;  %6164 = vmatprep.subr.bf16.mxu0 %v7999_v4  ;;  %v5874_v4 = vadd.f32 %v5873_v62, %v3339_v33 }
 0x4af   :  { %7232 = vmatprep.subr.bf16.mxu1 %v8000_v10  ;;  %v8048_v10 = vld [vmem:[#allocation14 + $0xa98] ss:$28 sps:$4 sm:$0xff]  }
 0x4b1   :  { %6165 = vmatpush2.bf16.msra.mxu0 %v7997_v24 }
 0x4b2   :  { %7233 = vmatpush3.bf16.msra.mxu1 %v8001_v5  ;;  %6166 = vmatprep.subr.bf16.mxu0 %v8004_v6  ;;  %v5876_v5 = vadd.f32 %v5875_v0, %v3343_v53 }
 0x4b3   :  { %7234 = vmatprep.subr.bf16.mxu1 %v8005_v7 }
 0x4b5   :  { %6167 = vmatpush2.bf16.msra.mxu0 %v8002_v8 }
 0x4b6   :  { %7235 = vmatpush3.bf16.msra.mxu1 %v8006_v9  ;;  %6168 = vmatprep.subr.bf16.mxu0 %v8009_v11 }
 0x4b7   :  { %7236 = vmatprep.subr.bf16.mxu1 %v8010_v13 }
 0x4b9   :  { %6169 = vmatpush2.bf16.msra.mxu0 %v8007_v14 }
 0x4ba   :  { %7237 = vmatpush3.bf16.msra.mxu1 %v8011_v15  ;;  %6170 = vmatprep.subr.bf16.mxu0 %v8014_v16 }
 0x4bb   :  { %7238 = vmatprep.subr.bf16.mxu1 %v8015_v18 }
 0x4bd   :  { %6171 = vmatpush2.bf16.msra.mxu0 %v8012_v56 }
 0x4be   :  { %7239 = vmatpush3.bf16.msra.mxu1 %v8016_v19  ;;  %7202 = vmatprep.subr.bf16.mxu0 %v8017_v20 }
 0x4c0   :  { %6173 = vmatmul.mubr.bf16.vlgmr.msra.gmra.mxu0 %v8517_v25  ;;  %v5916_v1 = vpop.f32.mrf.mxu0 }
 0x4c1   :  { %6298 = vmatmul.mubr.bf16.vlgmr.msra.gmra.mxu1 %v8504_v12  ;;  %7203 = vmatpush3.bf16.msra.mxu0 %v8018_v22  ;;  %v8028_v12 = vld [vmem:[#allocation14 + $0x408] ss:$28 sps:$4 sm:$0xff]   ;;  %v5917_v6 = vadd.f32 %v5916_v1, %v5874_v4 }
 0x4c2   :  { %6256 = vmatprep.mubr.bf16.mxu0 %v8488_v44  ;;  %7204 = vmatprep.subr.bf16.mxu0 %v8019_v23  ;;  %v8030_v44 = vld [vmem:[#allocation14 + $0x3d0] ss:$28 sps:$4 sm:$0xff]   ;;  %v5918_v55 = vpop.f32.mrf.mxu0 }
 0x4c3   :  { %v5919_v61 = vadd.f32 %v5918_v55, %v5876_v5 }
 0x4c4   :  { %v5920_v24 = vpop.f32.mrf.mxu0 }
 0x4c5   :  { %7205 = vmatpush3.bf16.msra.mxu0 %v8020_v26 }
 0x4c6   :  { %7206 = vmatprep.subr.bf16.mxu0 %v8021_v34  ;;  %v5922_v9 = vpop.f32.mrf.mxu0 }
 0x4c9   :  { %7207 = vmatpush3.bf16.msra.mxu0 %v8022_v35 }
 0x4ca   :  { %7208 = vmatprep.subr.bf16.mxu0 %v8023_v36 }
 0x4cd   :  { %7209 = vmatpush3.bf16.msra.mxu0 %v8024_v38 }
 0x4ce   :  { %7210 = vmatprep.subr.bf16.mxu0 %v8025_v39 }
 0x4d1   :  { %7211 = vmatpush3.bf16.msra.mxu0 %v8026_v37 }
 0x4d2   :  { %7212 = vmatprep.subr.bf16.mxu0 %v8027_v40 }
 0x4d5   :  { %7213 = vmatpush3.bf16.msra.mxu0 %v8028_v12 }
 0x4d6   :  { %7214 = vmatprep.subr.bf16.mxu0 %v8029_v45 }
 0x4d9   :  { %7215 = vmatpush3.bf16.msra.mxu0 %v8030_v44 }
 0x4da   :  { %7216 = vmatprep.subr.bf16.mxu0 %v8031_v46 }
 0x4dd   :  { %7217 = vmatpush3.bf16.msra.mxu0 %v8032_v48  ;;  %v3347_v48 = vrot.slane %v8532_v17, %v1112_v27 }
 0x4de   :  { %7246 = vmatprep.subr.bf16.mxu0 %v8033_v49 }
 0x4e0   :  { %6257 = vmatmul.mubr.bf16.vlgmr.msra.gmra.mxu0 %v8490_v43  ;;  %v8043_v43 = vld [vmem:[#allocation14 + $0xcc8] ss:$28 sps:$4 sm:$0xff]  }
 0x4e1   :  { %7247 = vmatpush3.bf16.msra.mxu0 %v8034_v50  ;;  %6338 = vmatprep.mubr.bf16.mxu0 %v8515_v21  ;;  %v5877_v21 = vpop.f32.mrf.mxu1 }
 0x4e2   :  { %7248 = vmatprep.subr.bf16.mxu0 %v8035_v31  ;;  %v5878_v8 = vadd.f32 %v5877_v21, %v3339_v33  ;;  %v3351_v31 = vrot.slane %v8532_v17, %v1116_v28 }
 0x4e3   :  { %v5879_v52 = vpop.f32.mrf.mxu1 }
 0x4e4   :  { %v5880_v11 = vadd.f32 %v5879_v52, %v3343_v53  ;;  %v5921_v14 = vadd.f32 %v5920_v24, %v5878_v8 }
 0x4e5   :  { %7249 = vmatpush3.bf16.msra.mxu0 %v8036_v54  ;;  %v5959_v3 = vpop.f32.mrf.mxu1 }
 0x4e6   :  { %7250 = vmatprep.subr.bf16.mxu0 %v8037_v58  ;;  %v5960_v13 = vadd.f32 %v5959_v3, %v5917_v6  ;;  %v5923_v18 = vadd.f32 %v5922_v9, %v5880_v11 }
 0x4e7   :  { %v5961_v7 = vpop.f32.mrf.mxu1 }
 0x4e8   :  { %v5962_v60 = vadd.f32 %v5961_v7, %v5919_v61 }
 0x4e9   :  { %7251 = vmatpush3.bf16.msra.mxu0 %v8038_v32  ;;  %v5963_v15 = vpop.f32.mrf.mxu1 }
 0x4ea   :  { %7252 = vmatprep.subr.bf16.mxu0 %v8039_v41  ;;  %v5964_v20 = vadd.f32 %v5963_v15, %v5921_v14 }
 0x4eb   :  { %v5965_v23 = vpop.f32.mrf.mxu1 }
 0x4ec   :  { %v5966_v34 = vadd.f32 %v5965_v23, %v5923_v18  ;;  %v3355_v18 = vrot.slane %v8532_v17, %v1120_v47 }
 0x4ed   :  { %7253 = vmatpush3.bf16.msra.mxu0 %v8040_v59 }
 0x4ee   :  { %7254 = vmatprep.subr.bf16.mxu0 %v8041_v30 }
 0x4f1   :  { %7255 = vmatpush3.bf16.msra.mxu0 %v8042_v63 }
 0x4f2   :  { %7256 = vmatprep.subr.bf16.mxu0 %v8043_v43 }
 0x4f5   :  { %7257 = vmatpush3.bf16.msra.mxu0 %v8044_v42 }
 0x4f6   :  { %7258 = vmatprep.subr.bf16.mxu0 %v8045_v2 }
 0x4f9   :  { %7259 = vmatpush3.bf16.msra.mxu0 %v8046_v51 }
 0x4fa   :  { %7260 = vmatprep.subr.bf16.mxu0 %v8047_v57 }
 0x4fd   :  { %7261 = vmatpush3.bf16.msra.mxu0 %v8048_v10 }
 0x500   :  { %v6002_v16 = vpop.f32.mrf.mxu0  ;;  %6339 = vmatmul.mubr.bf16.vlgmr.msra.gmra.mxu0 %v8517_v25 }
 0x501   :  { %v6003_v56 = vadd.f32 %v6002_v16, %v5960_v13  ;;  %v6045_v12 = vpop.f32.mrf.mxu1 }
 0x502   :  { %v6004_v19 = vpop.f32.mrf.mxu0  ;;  %v6046_v58 = vadd.f32 %v6045_v12, %v3347_v48 }
 0x503   :  { %8057 = vtanh.f32 %v6003_v56  ;;  %v6005_v22 = vadd.f32 %v6004_v19, %v5962_v60  ;;  %v6047_v45 = vpop.f32.mrf.mxu1 }
 0x504   :  { %v6006_v26 = vpop.f32.mrf.mxu0  ;;  %v6048_v41 = vadd.f32 %v6047_v45, %v3351_v31 }
 0x505   :  { %8059 = vtanh.f32 %v6005_v22  ;;  %v6007_v35 = vadd.f32 %v6006_v26, %v5964_v20  ;;  %v6049_v44 = vpop.f32.mrf.mxu1 }
 0x506   :  { %v6008_v36 = vpop.f32.mrf.mxu0  ;;  %v6050_v30 = vadd.f32 %v6049_v44, %v3347_v48 }
 0x507   :  { %8061 = vtanh.f32 %v6007_v35  ;;  %v6009_v38 = vadd.f32 %v6008_v36, %v5966_v34  ;;  %v6051_v49 = vpop.f32.mrf.mxu1 }
 0x508   :  { %v6052_v43 = vadd.f32 %v6051_v49, %v3351_v31 }
 0x509   :  { %8063 = vtanh.f32 %v6009_v38 }
 0x510   :  { %v8058_v39 = vpop.eup %8057 }
 0x511   :  { %6363 = vst [vmem:[#allocation17 + $0x10] sm:$0xff] %v8058_v39 }
 0x512   :  { %v8060_v37 = vpop.eup %8059 }
 0x513   :  { %6364 = vst [vmem:[#allocation17 + $0x18] sm:$0xff] %v8060_v37 }
 0x514   :  { %v8062_v25 = vpop.eup %8061 }
 0x515   :  { %6370 = vst [vmem:[#allocation17 + $0x48] sm:$0xff] %v8062_v25 }
 0x516   :  { %v8064_v40 = vpop.eup %8063 }
 0x517   :  { %6371 = vst [vmem:[#allocation17 + $0x50] sm:$0xff] %v8064_v40 }
 0x540   :  { %v6088_v46 = vpop.f32.mrf.mxu0 }
 0x541   :  { %v6131_v54 = vpop.f32.mrf.mxu1  ;;  %v6089_v59 = vadd.f32 %v6088_v46, %v6046_v58 }
 0x542   :  { %v6090_v50 = vpop.f32.mrf.mxu0 }
 0x543   :  { %v6133_v62 = vpop.f32.mrf.mxu1  ;;  %v6091_v63 = vadd.f32 %v6090_v50, %v6048_v41  ;;  %v6132_v42 = vadd.f32 %v6131_v54, %v6089_v59 }
 0x544   :  { %v6092_v32 = vpop.f32.mrf.mxu0 }
 0x545   :  { %v6093_v21 = vadd.f32 %v6092_v32, %v6050_v30  ;;  %v6135_v1 = vpop.f32.mrf.mxu1  ;;  %v6134_v2 = vadd.f32 %v6133_v62, %v6091_v63 }
 0x546   :  { %v6094_v0 = vpop.f32.mrf.mxu0 }
 0x547   :  { %v6095_v33 = vadd.f32 %v6094_v0, %v6052_v43  ;;  %v6136_v55 = vadd.f32 %v6135_v1, %v6093_v21  ;;  %v6137_v57 = vpop.f32.mrf.mxu1 }
 0x549   :  { %v6138_v3 = vadd.f32 %v6137_v57, %v6095_v33 }
 0x561   :  { %v7196_v61 = vpop.f32.mrf.mxu1 }
 0x563   :  { %v7197_v9 = vpop.f32.mrf.mxu1 }
 0x564   :  { %v7198_v56 = vadd.f32 %v7197_v9, %v7196_v61 }
 0x565   :  { %v7199_v11 = vpop.f32.mrf.mxu1 }
 0x566   :  { %v6218_v23 = vadd.f32 %v7198_v56, %v3355_v18 }
 0x567   :  { %v7200_v14 = vpop.f32.mrf.mxu1 }
 0x568   :  { %v7201_v26 = vadd.f32 %v7200_v14, %v7199_v11 }
 0x56a   :  { %v6221_v39 = vadd.f32 %v7201_v26, %v3355_v18 }
 0x580   :  { %v6174_v27 = vpop.f32.mrf.mxu0 }
 0x581   :  { %v6175_v51 = vadd.f32 %v6174_v27, %v6132_v42  ;;  %v7240_v16 = vpop.f32.mrf.mxu1 }
 0x582   :  { %v6176_v52 = vpop.f32.mrf.mxu0 }
 0x583   :  { %8065 = vtanh.f32 %v6175_v51  ;;  %v6177_v28 = vadd.f32 %v6176_v52, %v6134_v2  ;;  %v7241_v19 = vpop.f32.mrf.mxu1 }
 0x584   :  { %v6178_v53 = vpop.f32.mrf.mxu0  ;;  %v7242_v37 = vadd.f32 %v7241_v19, %v7240_v16 }
 0x585   :  { %8067 = vtanh.f32 %v6177_v28  ;;  %v6179_v4 = vadd.f32 %v6178_v53, %v6136_v55  ;;  %v7243_v34 = vpop.f32.mrf.mxu1 }
 0x586   :  { %v6180_v10 = vpop.f32.mrf.mxu0 }
 0x587   :  { %8069 = vtanh.f32 %v6179_v4  ;;  %v6181_v24 = vadd.f32 %v6180_v10, %v6138_v3  ;;  %v7244_v25 = vpop.f32.mrf.mxu1 }
 0x588   :  { %v7245_v46 = vadd.f32 %v7244_v25, %v7243_v34 }
 0x589   :  { %8071 = vtanh.f32 %v6181_v24 }
 0x590   :  { %v8066_v5 = vpop.eup %8065 }
 0x591   :  { %6365 = vst [vmem:[#allocation17 + $0x20] sm:$0xff] %v8066_v5 }
 0x592   :  { %v8068_v6 = vpop.eup %8067 }
 0x593   :  { %6366 = vst [vmem:[#allocation17 + $0x28] sm:$0xff] %v8068_v6 }
 0x594   :  { %v8070_v7 = vpop.eup %8069 }
 0x595   :  { %6372 = vst [vmem:[#allocation17 + $0x58] sm:$0xff] %v8070_v7 }
 0x596   :  { %v8072_v8 = vpop.eup %8071 }
 0x597   :  { %6373 = vst [vmem:[#allocation17 + $0x60] sm:$0xff] %v8072_v8 }
 0x5a0   :  { %v7218_v13 = vpop.f32.mrf.mxu0 }
 0x5a2   :  { %v7219_v15 = vpop.f32.mrf.mxu0 }
 0x5a3   :  { %v7220_v20 = vadd.f32 %v7219_v15, %v7218_v13 }
 0x5a4   :  { %v7221_v60 = vpop.f32.mrf.mxu0 }
 0x5a5   :  { %v6259_v35 = vadd.f32 %v7220_v20, %v6218_v23 }
 0x5a6   :  { %v7222_v22 = vpop.f32.mrf.mxu0 }
 0x5a7   :  { %v7223_v36 = vadd.f32 %v7222_v22, %v7221_v60  ;;  %v6300_v45 = vadd.f32 %v7242_v37, %v6259_v35 }
 0x5a9   :  { %v6262_v12 = vadd.f32 %v7223_v36, %v6221_v39 }
 0x5ab   :  { %v6303_v48 = vadd.f32 %v7245_v46, %v6262_v12 }
 0x5c0   :  { %v7262_v38 = vpop.f32.mrf.mxu0 }
 0x5c2   :  { %v7263_v40 = vpop.f32.mrf.mxu0 }
 0x5c3   :  { %v7264_v44 = vadd.f32 %v7263_v40, %v7262_v38 }
 0x5c4   :  { %v7265_v29 = vpop.f32.mrf.mxu0 }
 0x5c5   :  { %v6341_v47 = vadd.f32 %v7264_v44, %v6300_v45 }
 0x5c6   :  { %v7266_v17 = vpop.f32.mrf.mxu0 }
 0x5c7   :  { %8073 = vtanh.f32 %v6341_v47  ;;  %v7267_v49 = vadd.f32 %v7266_v17, %v7265_v29 }
 0x5c9   :  { %v6344_v50 = vadd.f32 %v7267_v49, %v6303_v48 }
 0x5cb   :  { %8075 = vtanh.f32 %v6344_v50 }
 0x5d4   :  { %v8074_v31 = vpop.eup %8073 }
 0x5d5   :  { %6367 = vst [vmem:[#allocation17 + $0x30] sm:$0xff] %v8074_v31 }
 0x5d8   :  { %v8076_v54 = vpop.eup %8075 }
 0x5d9   :  { %6374 = vst [vmem:[#allocation17 + $0x68] sm:$0xff] %v8076_v54 }
 0x5da   :  { %8268 = shalt.err (!%p8265_p7)
}
 0x5db   :  { %s8308_s13 = smov 896   ;;  %s8309_s16 = smov 56  }
 0x5dc   :  { %6386 = dma.vmem_to_hbm [thread:$0]  %s6381_s8, 1792, %s8575_s9, [#allocation4], %s8308_s13, %s8308_s13, %s8309_s16  }
 0x5dd   :  { %8287 = dma.done.wait [#allocation4], 1792  }
 0x5de   :  { %8288 = vsyncadd [#allocation4], 4294965504 }
 0x5df   :  { %6390 = vsyncpa [#allocation3], 1 }
 0x5e0   :  { %6391 = vsyncpa [#allocation6], 1 }
 0x5e1   :  { %6392 = vsyncpa [#allocation9], 1 }
 0x5e2   :  { %6393 = vsyncpa [#allocation12], 1 }
 0x5e3   :  { %6394 = vsyncpa [#allocation15], 1 }
 0x5e4   :  { %6395 = vsyncpa [#allocation4], 1 }

</bundles_post_ra>
